<compile_context>
chip_gen: v7x
topology: tpu7x:2x2x1
jax: 0.10.0
libtpu: 0.0.40
codegen_flags: <defaults>
</compile_context>

<pallas_src>
import functools

import jax
import jax.numpy as jnp
from jax.experimental import pallas as pl
from jax.experimental.pallas import tpu as pltpu

# --- fixed dims implied by the module ('small' size arg) ---
C_IN = 384        # path_input_dim
D = 192           # hidden dim (size_dict_path['small'][1])
T = 256           # 16x16 tokens produced by unfold(1, 16, 16)
N_HEADS = 3
HEAD_DIM = D // N_HEADS
N_LAYERS = 2
N_CLASSES = 4
LN_EPS = 1e-5

# --- packed square-weight stack indices: (N_SQ, D, D) ---
SQ_PHI = 0
SQ_L0 = 1                 # per layer: +0 q, +1 k, +2 v, +3 out, +4 ffn1, +5 ffn2
SQ_STRIDE = 6
SQ_A = SQ_L0 + N_LAYERS * SQ_STRIDE     # 13 (attention_a weight)
SQ_B = SQ_A + 1                         # 14 (attention_b weight)
SQ_RHO = SQ_B + 1                       # 15 (global_rho weight)
N_SQ = SQ_RHO + 1                       # 16

# --- packed vector stack indices: (N_VEC, 1, D) ---
V_PHI_B = 0
V_A_B = 1
V_B_B = 2
V_RHO_B = 3
V_MISC = 4        # [0,0] = attention_c bias, [0,1:1+N_CLASSES] = classifier bias
V_L0 = 5          # per layer: qb, kb, vb, ob, ln1_g, ln1_b, f1b, f2b, ln2_g, ln2_b
V_STRIDE = 10
N_VEC = V_L0 + N_LAYERS * V_STRIDE      # 25


# ---------------------------------------------------------------------------
# Phase 1: per-region token reduction + patch embedding (memory-bound, gridded)
# ---------------------------------------------------------------------------
def embed_kernel(tokens_ref, emb_w_ref, emb_b_ref, h_ref):
    # TODO(synk): vit4k_xs (HIPT local ViT-4K) source is not provided; stand-in is a
    # per-token 384->192 linear patch embedding followed by mean pooling. The mean is
    # folded through the linear (valid for this stand-in only).
    toks = tokens_ref[...]                                     # (BLK_M, T, C_IN) bf16
    pooled = jnp.sum(toks, axis=1, dtype=jnp.float32) * (1.0 / T)   # (BLK_M, C_IN) f32
    h_ref[...] = (
        jnp.dot(pooled, emb_w_ref[...], preferred_element_type=jnp.float32)
        + emb_b_ref[...]
    )


# ---------------------------------------------------------------------------
# Phase 2: global_phi -> transformer x2 -> gated pool -> rho -> classifier
# ---------------------------------------------------------------------------
def global_kernel(h_ref, sqw_ref, vec_ref, headw_ref, logits_ref, probs_ref,
                  *, n_valid):
    f32 = jnp.float32
    h = h_ref[...]                       # (Mp, D) f32
    mp = h.shape[0]
    masked = n_valid < mp                # static python bool (shapes are static)

    def vrow(i):                         # (1, D) packed bias / LN row
        return vec_ref[i]

    def layer_norm(x, g, b):
        mu = jnp.mean(x, axis=-1, keepdims=True)
        var = jnp.mean((x - mu) ** 2, axis=-1, keepdims=True)
        return (x - mu) * jax.lax.rsqrt(var + LN_EPS) * g + b

    if masked:
        key_valid = jax.lax.broadcasted_iota(jnp.int32, (1, mp), 1) < n_valid

    # --- global_phi: Linear(192,192) + ReLU (Dropout = identity in eval) ---
    h = jnp.maximum(
        jnp.dot(h, sqw_ref[SQ_PHI], preferred_element_type=f32) + vrow(V_PHI_B), 0.0)

    # --- global_transformer: 2 post-norm encoder layers (d=192, nhead=3, ff=192) ---
    scale = 1.0 / (HEAD_DIM ** 0.5)
    for l in range(N_LAYERS):
        sq0 = SQ_L0 + l * SQ_STRIDE
        vl0 = V_L0 + l * V_STRIDE
        x = h
        q = jnp.dot(x, sqw_ref[sq0 + 0], preferred_element_type=f32) + vrow(vl0 + 0)
        k = jnp.dot(x, sqw_ref[sq0 + 1], preferred_element_type=f32) + vrow(vl0 + 1)
        v = jnp.dot(x, sqw_ref[sq0 + 2], preferred_element_type=f32) + vrow(vl0 + 2)
        wo = sqw_ref[sq0 + 3]            # (D, D) output projection

        # Head loop is fully unrolled (HEAD_DIM=64 < 128 lanes, so a true batched-head
        # relayout would itself cost lane shuffles). The concatenate is eliminated by
        # accumulating each head straight through its slice of the output projection.
        head_sum = None
        for hh in range(N_HEADS):
            lo, hi = hh * HEAD_DIM, (hh + 1) * HEAD_DIM
            qh = q[:, lo:hi] * scale
            kh = k[:, lo:hi]
            vh = v[:, lo:hi]
            s = jnp.dot(qh, kh.T, preferred_element_type=f32)      # (Mp, Mp)
            if masked:
                s = jnp.where(key_valid, s, -1e30)                 # mask padded keys
            s = s - jnp.max(s, axis=-1, keepdims=True)
            p = jnp.exp(s)
            p = p * pl.reciprocal(jnp.sum(p, axis=-1, keepdims=True), approx=True)
            ctx = jnp.dot(p, vh, preferred_element_type=f32)       # (Mp, HEAD_DIM)
            contrib = jnp.dot(ctx, wo[lo:hi, :], preferred_element_type=f32)
            head_sum = contrib if head_sum is None else head_sum + contrib
        attn_out = head_sum + vrow(vl0 + 3)

        x = layer_norm(x + attn_out, vrow(vl0 + 4), vrow(vl0 + 5))
        ff = jnp.maximum(
            jnp.dot(x, sqw_ref[sq0 + 4], preferred_element_type=f32) + vrow(vl0 + 6),
            0.0)
        ff = jnp.dot(ff, sqw_ref[sq0 + 5], preferred_element_type=f32) + vrow(vl0 + 7)
        h = layer_norm(x + ff, vrow(vl0 + 8), vrow(vl0 + 9))

    # --- Attn_Net_Gated pooling (softmax over the M regions) ---
    # TODO(synk): for very large M (> ~1500) the (Mp, Mp) scores above should switch
    # to a flash-style blocked softmax to bound VMEM; not needed at WSI bag sizes here.
    a = jnp.tanh(jnp.dot(h, sqw_ref[SQ_A], preferred_element_type=f32) + vrow(V_A_B))
    b = jax.nn.sigmoid(
        jnp.dot(h, sqw_ref[SQ_B], preferred_element_type=f32) + vrow(V_B_B))
    misc = vrow(V_MISC)                                            # (1, D)
    proj = jnp.dot(a * b, headw_ref[...], preferred_element_type=f32)   # (Mp, 8)
    A = proj[:, 0:1] + misc[:, 0:1]                                # (Mp, 1)
    if masked:
        row_valid = jax.lax.broadcasted_iota(jnp.int32, (mp, 1), 0) < n_valid
        A = jnp.where(row_valid, A, -1e30)                         # mask padded rows
    A = A - jnp.max(A, axis=0, keepdims=True)
    eA = jnp.exp(A)
    wA = eA * pl.reciprocal(jnp.sum(eA, axis=0, keepdims=True), approx=True)
    h_path = jnp.sum(wA * h, axis=0, keepdims=True)                # (1, D) == A.T @ h

    # --- global_rho: Linear + ReLU ---
    h_wsi = jnp.maximum(
        jnp.dot(h_path, sqw_ref[SQ_RHO], preferred_element_type=f32) + vrow(V_RHO_B),
        0.0)

    # --- classifier + softmax over classes ---
    out8 = jnp.dot(h_wsi, headw_ref[...], preferred_element_type=f32)    # (1, 8)
    logits = out8[:, 1:1 + N_CLASSES] + misc[:, 1:1 + N_CLASSES]
    logits_ref[...] = logits
    z = logits - jnp.max(logits, axis=-1, keepdims=True)
    e = jnp.exp(z)
    probs_ref[...] = e / jnp.sum(e, axis=-1, keepdims=True)        # exact for accuracy


# ---------------------------------------------------------------------------
# Parameters
# ---------------------------------------------------------------------------
def init_params(key):
    """Deterministic synthetic parameters. Weights stored as (in, out): y = x @ W + b."""
    ks = iter(jax.random.split(key, 64))
    nrm = lambda shape, s=0.02: (s * jax.random.normal(next(ks), shape)).astype(jnp.float32)
    return {
        "emb_w": nrm((C_IN, D)), "emb_b": nrm((1, D)),
        "phi_w": nrm((D, D)), "phi_b": nrm((1, D)),
        "qw": nrm((N_LAYERS, D, D)), "qb": nrm((N_LAYERS, 1, D)),
        "kw": nrm((N_LAYERS, D, D)), "kb": nrm((N_LAYERS, 1, D)),
        "vw": nrm((N_LAYERS, D, D)), "vb": nrm((N_LAYERS, 1, D)),
        "ow": nrm((N_LAYERS, D, D)), "ob": nrm((N_LAYERS, 1, D)),
        "ln1_g": jnp.ones((N_LAYERS, 1, D), jnp.float32),
        "ln1_b": jnp.zeros((N_LAYERS, 1, D), jnp.float32),
        "f1w": nrm((N_LAYERS, D, D)), "f1b": nrm((N_LAYERS, 1, D)),
        "f2w": nrm((N_LAYERS, D, D)), "f2b": nrm((N_LAYERS, 1, D)),
        "ln2_g": jnp.ones((N_LAYERS, 1, D), jnp.float32),
        "ln2_b": jnp.zeros((N_LAYERS, 1, D), jnp.float32),
        "aw": nrm((D, D)), "ab": nrm((1, D)),
        "bw": nrm((D, D)), "bb": nrm((1, D)),
        "cw": nrm((D, 1)), "cb": nrm((1, 1)),
        "rho_w": nrm((D, D)), "rho_b": nrm((1, D)),
        "cls_w": nrm((D, N_CLASSES)), "cls_b": nrm((1, N_CLASSES)),
    }


def pack_params(p):
    """Pack the many tiny parameters into a few arrays (one-time, outside jit)."""
    sq = [p["phi_w"]]
    for l in range(N_LAYERS):
        for name in ("qw", "kw", "vw", "ow", "f1w", "f2w"):
            sq.append(p[name][l])
    sq += [p["aw"], p["bw"], p["rho_w"]]
    sq_w = jnp.stack(sq, axis=0)                                   # (N_SQ, D, D)

    misc = jnp.zeros((1, D), jnp.float32)
    misc = misc.at[0, 0].set(p["cb"][0, 0])
    misc = misc.at[0, 1:1 + N_CLASSES].set(p["cls_b"][0])
    rows = [p["phi_b"], p["ab"], p["bb"], p["rho_b"], misc]
    for l in range(N_LAYERS):
        for name in ("qb", "kb", "vb", "ob", "ln1_g", "ln1_b",
                     "f1b", "f2b", "ln2_g", "ln2_b"):
            rows.append(p[name][l])
    vec = jnp.stack(rows, axis=0)                                  # (N_VEC, 1, D)

    head_w = jnp.zeros((D, 8), jnp.float32)
    head_w = head_w.at[:, 0:1].set(p["cw"])
    head_w = head_w.at[:, 1:1 + N_CLASSES].set(p["cls_w"])

    return {"emb_w": p["emb_w"], "emb_b": p["emb_b"],
            "sq_w": sq_w, "vec": vec, "head_w": head_w}


# ---------------------------------------------------------------------------
# Forward wrapper
# ---------------------------------------------------------------------------
@jax.jit
def hipt_lgp_fc_forward(x_256, packed):
    """x_256: [M, T=256, C=384] (token layout equivalent of the PyTorch input)."""
    M = x_256.shape[0]
    tokens = x_256 if x_256.dtype == jnp.bfloat16 else x_256.astype(jnp.bfloat16)

    blk_m = 8 if M <= 8 else 16
    m_pad = ((M + blk_m - 1) // blk_m) * blk_m
    if m_pad != M:
        tokens = jnp.pad(tokens, ((0, m_pad - M), (0, 0), (0, 0)))

    # Phase 1: gridded over regions; weights stay resident (constant index_map);
    # token blocks are double-buffered by the Pallas pipeline.
    h = pl.pallas_call(
        embed_kernel,
        out_shape=jax.ShapeDtypeStruct((m_pad, D), jnp.float32),
        grid=(m_pad // blk_m,),
        in_specs=[
            pl.BlockSpec((blk_m, T, C_IN), lambda i: (i, 0, 0)),
            pl.BlockSpec((C_IN, D), lambda i: (0, 0)),
            pl.BlockSpec((1, D), lambda i: (0, 0)),
        ],
        out_specs=pl.BlockSpec((blk_m, D), lambda i: (i, 0)),
        compiler_params=pltpu.CompilerParams(
            dimension_semantics=("parallel",),
            vmem_limit_bytes=32 << 20,
        ),
    )(tokens, packed["emb_w"], packed["emb_b"])

    # Phase 2: tiny global aggregation network, single block, packed params.
    vmem = pl.BlockSpec(memory_space=pltpu.MemorySpace.VMEM)
    logits, probs = pl.pallas_call(
        functools.partial(global_kernel, n_valid=M),
        out_shape=(
            jax.ShapeDtypeStruct((1, N_CLASSES), jnp.float32),
            jax.ShapeDtypeStruct((1, N_CLASSES), jnp.float32),
        ),
        in_specs=[vmem, vmem, vmem, vmem],
        out_specs=(vmem, vmem),
    )(h, packed["sq_w"], packed["vec"], packed["head_w"])

    # torch.topk(logits, 1, dim=1)[1] -> argmax indices, shape (1, 1)  (glue in JAX)
    y_hat = jnp.argmax(logits, axis=1)[:, None]
    return logits, probs, y_hat, None, None


if __name__ == "__main__":
    key = jax.random.PRNGKey(0)
    k_x, k_p = jax.random.split(key)

    M = 8  # number of 4K regions in the bag (small)
    x_256 = jax.random.normal(k_x, (M, T, C_IN), dtype=jnp.float32).astype(jnp.bfloat16)
    params = init_params(k_p)
    packed = pack_params(params)

    logits, probs, y_hat, _, _ = hipt_lgp_fc_forward(x_256, packed)
    jax.block_until_ready((logits, probs, y_hat))

    assert logits.shape == (1, N_CLASSES)
    assert probs.shape == (1, N_CLASSES)
    assert y_hat.shape == (1, 1)
    assert bool(jnp.isfinite(logits).all())
    assert abs(float(jnp.sum(probs)) - 1.0) < 1e-4

    print("KERNEL_OK")
</pallas_src>

<mosaic_0001>
module attributes {stable_mosaic.version = 11 : i64} {
  func.func @embed_kernel(%arg0: i32, %arg1: memref<8x256x384xbf16, #tpu.memory_space<vmem>>, %arg2: memref<384x192xf32, #tpu.memory_space<vmem>>, %arg3: memref<1x192xf32, #tpu.memory_space<vmem>>, %arg4: memref<8x192xf32, #tpu.memory_space<vmem>>) attributes {dimension_semantics = [#tpu.dimension_semantics<parallel>], iteration_bounds = array<i64: 1>, scalar_prefetch = 0 : i64, scratch_operands = 0 : i64, tpu.core_type = #tpu.core_type<tc>, window_params = [{transform_indices = @transform_0, window_bounds = array<i64: 8, 256, 384>}, {pipeline_mode = #tpu.pipeline_mode<synchronous>, transform_indices = @transform_1, window_bounds = array<i64: 384, 192>}, {pipeline_mode = #tpu.pipeline_mode<synchronous>, transform_indices = @transform_2, window_bounds = array<i64: 1, 192>}, {transform_indices = @transform_3, window_bounds = array<i64: 8, 192>}]} {
    %c0 = arith.constant 0 : index
    %c0_0 = arith.constant 0 : index
    %c0_1 = arith.constant 0 : index
    %0 = vector.load %arg1[%c0, %c0_0, %c0_1] : memref<8x256x384xbf16, #tpu.memory_space<vmem>>, vector<8x256x384xbf16>
    %1 = arith.extf %0 : vector<8x256x384xbf16> to vector<8x256x384xf32>
    %cst = arith.constant dense<0.000000e+00> : vector<8x384xf32>
    %2 = vector.multi_reduction <add>, %1, %cst [1] : vector<8x256x384xf32> to vector<8x384xf32>
    %cst_2 = arith.constant 3.906250e-03 : f32
    %3 = vector.broadcast %cst_2 : f32 to vector<8x384xf32>
    %4 = arith.mulf %2, %3 : vector<8x384xf32>
    %c0_3 = arith.constant 0 : index
    %c0_4 = arith.constant 0 : index
    %5 = vector.load %arg2[%c0_3, %c0_4] : memref<384x192xf32, #tpu.memory_space<vmem>>, vector<384x192xf32>
    %cst_5 = arith.constant dense<0.000000e+00> : vector<8x192xf32>
    %6 = tpu.matmul %4, %5, %cst_5 {dimension_numbers = #tpu.dot_dimension_numbers<[1], [0], [0], [1], [0, 0, 1, 1], [], []>} : vector<8x384xf32>, vector<384x192xf32>, vector<8x192xf32> -> vector<8x192xf32>
    %c0_6 = arith.constant 0 : index
    %c0_7 = arith.constant 0 : index
    %7 = vector.load %arg3[%c0_6, %c0_7] : memref<1x192xf32, #tpu.memory_space<vmem>>, vector<1x192xf32>
    %8 = vector.broadcast %7 : vector<1x192xf32> to vector<8x192xf32>
    %9 = arith.addf %6, %8 : vector<8x192xf32>
    %c0_8 = arith.constant 0 : index
    %c0_9 = arith.constant 0 : index
    %10 = vector.load %arg4[%c0_8, %c0_9] : memref<8x192xf32, #tpu.memory_space<vmem>>, vector<8x192xf32>
    tpu.vector_store %arg4[%c0_8, %c0_9], %9 {strides = array<i32>} : memref<8x192xf32, #tpu.memory_space<vmem>>, vector<8x192xf32>,
    return
  }
  func.func @transform_0(%arg0: i32) -> (i32, i32, i32) {
    %c0_i32 = arith.constant 0 : i32
    %c0_i32_0 = arith.constant 0 : i32
    %c0_i32_1 = arith.constant 0 : i32
    return %arg0, %c0_i32, %c0_i32_0 : i32, i32, i32
  }
  func.func @transform_1(%arg0: i32) -> (i32, i32) {
    %c0_i32 = arith.constant 0 : i32
    %c0_i32_0 = arith.constant 0 : i32
    %c0_i32_1 = arith.constant 0 : i32
    return %c0_i32, %c0_i32_0 : i32, i32
  }
  func.func @transform_2(%arg0: i32) -> (i32, i32) {
    %c0_i32 = arith.constant 0 : i32
    %c0_i32_0 = arith.constant 0 : i32
    %c0_i32_1 = arith.constant 0 : i32
    return %c0_i32, %c0_i32_0 : i32, i32
  }
  func.func @transform_3(%arg0: i32) -> (i32, i32) {
    %c0_i32 = arith.constant 0 : i32
    %c0_i32_0 = arith.constant 0 : i32
    return %arg0, %c0_i32 : i32, i32
  }
}

module attributes {stable_mosaic.version = 11 : i64} {
  func.func @global_kernel(%arg0: memref<8x192xf32, #tpu.memory_space<vmem>>, %arg1: memref<16x192x192xf32, #tpu.memory_space<vmem>>, %arg2: memref<25x1x192xf32, #tpu.memory_space<vmem>>, %arg3: memref<192x8xf32, #tpu.memory_space<vmem>>, %arg4: memref<1x4xf32, #tpu.memory_space<vmem>>, %arg5: memref<1x4xf32, #tpu.memory_space<vmem>>) attributes {dimension_semantics = [], scalar_prefetch = 0 : i64, scratch_operands = 0 : i64, tpu.core_type = #tpu.core_type<tc>} {
    %c0 = arith.constant 0 : index
    %c0_0 = arith.constant 0 : index
    %0 = vector.load %arg0[%c0, %c0_0] : memref<8x192xf32, #tpu.memory_space<vmem>>, vector<8x192xf32>
    %c0_1 = arith.constant 0 : index
    %c0_2 = arith.constant 0 : index
    %c0_3 = arith.constant 0 : index
    %1 = vector.load %arg1[%c0_1, %c0_2, %c0_3] : memref<16x192x192xf32, #tpu.memory_space<vmem>>, vector<1x192x192xf32>
    %2 = vector.shape_cast %1 : vector<1x192x192xf32> to vector<192x192xf32>
    %cst = arith.constant dense<0.000000e+00> : vector<8x192xf32>
    %3 = tpu.matmul %0, %2, %cst {dimension_numbers = #tpu.dot_dimension_numbers<[1], [0], [0], [1], [0, 0, 1, 1], [], []>} : vector<8x192xf32>, vector<192x192xf32>, vector<8x192xf32> -> vector<8x192xf32>
    %c0_4 = arith.constant 0 : index
    %c0_5 = arith.constant 0 : index
    %c0_6 = arith.constant 0 : index
    %4 = vector.load %arg2[%c0_4, %c0_5, %c0_6] : memref<25x1x192xf32, #tpu.memory_space<vmem>>, vector<1x1x192xf32>
    %5 = vector.shape_cast %4 : vector<1x1x192xf32> to vector<1x192xf32>
    %6 = vector.broadcast %5 : vector<1x192xf32> to vector<8x192xf32>
    %7 = arith.addf %3, %6 : vector<8x192xf32>
    %cst_7 = arith.constant 0.000000e+00 : f32
    %8 = vector.broadcast %cst_7 : f32 to vector<8x192xf32>
    %9 = arith.maximumf %7, %8 : vector<8x192xf32>
    %c1 = arith.constant 1 : index
    %c0_8 = arith.constant 0 : index
    %c0_9 = arith.constant 0 : index
    %10 = vector.load %arg1[%c1, %c0_8, %c0_9] : memref<16x192x192xf32, #tpu.memory_space<vmem>>, vector<1x192x192xf32>
    %11 = vector.shape_cast %10 : vector<1x192x192xf32> to vector<192x192xf32>
    %cst_10 = arith.constant dense<0.000000e+00> : vector<8x192xf32>
    %12 = tpu.matmul %9, %11, %cst_10 {dimension_numbers = #tpu.dot_dimension_numbers<[1], [0], [0], [1], [0, 0, 1, 1], [], []>} : vector<8x192xf32>, vector<192x192xf32>, vector<8x192xf32> -> vector<8x192xf32>
    %c5 = arith.constant 5 : index
    %c0_11 = arith.constant 0 : index
    %c0_12 = arith.constant 0 : index
    %13 = vector.load %arg2[%c5, %c0_11, %c0_12] : memref<25x1x192xf32, #tpu.memory_space<vmem>>, vector<1x1x192xf32>
    %14 = vector.shape_cast %13 : vector<1x1x192xf32> to vector<1x192xf32>
    %15 = vector.broadcast %14 : vector<1x192xf32> to vector<8x192xf32>
    %16 = arith.addf %12, %15 : vector<8x192xf32>
    %c2 = arith.constant 2 : index
    %c0_13 = arith.constant 0 : index
    %c0_14 = arith.constant 0 : index
    %17 = vector.load %arg1[%c2, %c0_13, %c0_14] : memref<16x192x192xf32, #tpu.memory_space<vmem>>, vector<1x192x192xf32>
    %18 = vector.shape_cast %17 : vector<1x192x192xf32> to vector<192x192xf32>
    %cst_15 = arith.constant dense<0.000000e+00> : vector<8x192xf32>
    %19 = tpu.matmul %9, %18, %cst_15 {dimension_numbers = #tpu.dot_dimension_numbers<[1], [0], [0], [1], [0, 0, 1, 1], [], []>} : vector<8x192xf32>, vector<192x192xf32>, vector<8x192xf32> -> vector<8x192xf32>
    %c6 = arith.constant 6 : index
    %c0_16 = arith.constant 0 : index
    %c0_17 = arith.constant 0 : index
    %20 = vector.load %arg2[%c6, %c0_16, %c0_17] : memref<25x1x192xf32, #tpu.memory_space<vmem>>, vector<1x1x192xf32>
    %21 = vector.shape_cast %20 : vector<1x1x192xf32> to vector<1x192xf32>
    %22 = vector.broadcast %21 : vector<1x192xf32> to vector<8x192xf32>
    %23 = arith.addf %19, %22 : vector<8x192xf32>
    %c3 = arith.constant 3 : index
    %c0_18 = arith.constant 0 : index
    %c0_19 = arith.constant 0 : index
    %24 = vector.load %arg1[%c3, %c0_18, %c0_19] : memref<16x192x192xf32, #tpu.memory_space<vmem>>, vector<1x192x192xf32>
    %25 = vector.shape_cast %24 : vector<1x192x192xf32> to vector<192x192xf32>
    %cst_20 = arith.constant dense<0.000000e+00> : vector<8x192xf32>
    %26 = tpu.matmul %9, %25, %cst_20 {dimension_numbers = #tpu.dot_dimension_numbers<[1], [0], [0], [1], [0, 0, 1, 1], [], []>} : vector<8x192xf32>, vector<192x192xf32>, vector<8x192xf32> -> vector<8x192xf32>
    %c7 = arith.constant 7 : index
    %c0_21 = arith.constant 0 : index
    %c0_22 = arith.constant 0 : index
    %27 = vector.load %arg2[%c7, %c0_21, %c0_22] : memref<25x1x192xf32, #tpu.memory_space<vmem>>, vector<1x1x192xf32>
    %28 = vector.shape_cast %27 : vector<1x1x192xf32> to vector<1x192xf32>
    %29 = vector.broadcast %28 : vector<1x192xf32> to vector<8x192xf32>
    %30 = arith.addf %26, %29 : vector<8x192xf32>
    %c4 = arith.constant 4 : index
    %c0_23 = arith.constant 0 : index
    %c0_24 = arith.constant 0 : index
    %31 = vector.load %arg1[%c4, %c0_23, %c0_24] : memref<16x192x192xf32, #tpu.memory_space<vmem>>, vector<1x192x192xf32>
    %32 = vector.shape_cast %31 : vector<1x192x192xf32> to vector<192x192xf32>
    %33 = vector.extract_strided_slice %16 {offsets = [0, 0], sizes = [8, 64], strides = [1, 1]} : vector<8x192xf32> to vector<8x64xf32>
    %cst_25 = arith.constant 1.250000e-01 : f32
    %34 = vector.broadcast %cst_25 : f32 to vector<8x64xf32>
    %35 = arith.mulf %33, %34 : vector<8x64xf32>
    %36 = vector.extract_strided_slice %23 {offsets = [0, 0], sizes = [8, 64], strides = [1, 1]} : vector<8x192xf32> to vector<8x64xf32>
    %37 = vector.extract_strided_slice %30 {offsets = [0, 0], sizes = [8, 64], strides = [1, 1]} : vector<8x192xf32> to vector<8x64xf32>
    %38 = tpu.transpose %36, [1, 0] : vector<8x64xf32> -> vector<64x8xf32>
    %cst_26 = arith.constant dense<0.000000e+00> : vector<8x8xf32>
    %39 = tpu.matmul %35, %38, %cst_26 {dimension_numbers = #tpu.dot_dimension_numbers<[1], [0], [0], [1], [0, 0, 1, 1], [], []>} : vector<8x64xf32>, vector<64x8xf32>, vector<8x8xf32> -> vector<8x8xf32>
    %cst_27 = arith.constant dense<0xFF800000> : vector<8xf32>
    %40 = vector.multi_reduction <maximumf>, %39, %cst_27 [1] : vector<8x8xf32> to vector<8xf32>
    %41 = vector.shape_cast %40 : vector<8xf32> to vector<8x1xf32>
    %42 = vector.broadcast %41 : vector<8x1xf32> to vector<8x8xf32>
    %43 = arith.subf %39, %42 : vector<8x8xf32>
    %44 = math.exp %43 : vector<8x8xf32>
    %cst_28 = arith.constant dense<0.000000e+00> : vector<8xf32>
    %45 = vector.multi_reduction <add>, %44, %cst_28 [1] : vector<8x8xf32> to vector<8xf32>
    %46 = vector.shape_cast %45 : vector<8xf32> to vector<8x1xf32>
    %47 = tpu.reciprocal %46 {approx = true} : vector<8x1xf32> -> vector<8x1xf32>
    %48 = vector.broadcast %47 : vector<8x1xf32> to vector<8x8xf32>
    %49 = arith.mulf %44, %48 : vector<8x8xf32>
    %cst_29 = arith.constant dense<0.000000e+00> : vector<8x64xf32>
    %50 = tpu.matmul %49, %37, %cst_29 {dimension_numbers = #tpu.dot_dimension_numbers<[1], [0], [0], [1], [0, 0, 1, 1], [], []>} : vector<8x8xf32>, vector<8x64xf32>, vector<8x64xf32> -> vector<8x64xf32>
    %51 = vector.extract_strided_slice %32 {offsets = [0, 0], sizes = [64, 192], strides = [1, 1]} : vector<192x192xf32> to vector<64x192xf32>
    %cst_30 = arith.constant dense<0.000000e+00> : vector<8x192xf32>
    %52 = tpu.matmul %50, %51, %cst_30 {dimension_numbers = #tpu.dot_dimension_numbers<[1], [0], [0], [1], [0, 0, 1, 1], [], []>} : vector<8x64xf32>, vector<64x192xf32>, vector<8x192xf32> -> vector<8x192xf32>
    %53 = vector.extract_strided_slice %16 {offsets = [0, 64], sizes = [8, 64], strides = [1, 1]} : vector<8x192xf32> to vector<8x64xf32>
    %cst_31 = arith.constant 1.250000e-01 : f32
    %54 = vector.broadcast %cst_31 : f32 to vector<8x64xf32>
    %55 = arith.mulf %53, %54 : vector<8x64xf32>
    %56 = vector.extract_strided_slice %23 {offsets = [0, 64], sizes = [8, 64], strides = [1, 1]} : vector<8x192xf32> to vector<8x64xf32>
    %57 = vector.extract_strided_slice %30 {offsets = [0, 64], sizes = [8, 64], strides = [1, 1]} : vector<8x192xf32> to vector<8x64xf32>
    %58 = tpu.transpose %56, [1, 0] : vector<8x64xf32> -> vector<64x8xf32>
    %cst_32 = arith.constant dense<0.000000e+00> : vector<8x8xf32>
    %59 = tpu.matmul %55, %58, %cst_32 {dimension_numbers = #tpu.dot_dimension_numbers<[1], [0], [0], [1], [0, 0, 1, 1], [], []>} : vector<8x64xf32>, vector<64x8xf32>, vector<8x8xf32> -> vector<8x8xf32>
    %cst_33 = arith.constant dense<0xFF800000> : vector<8xf32>
    %60 = vector.multi_reduction <maximumf>, %59, %cst_33 [1] : vector<8x8xf32> to vector<8xf32>
    %61 = vector.shape_cast %60 : vector<8xf32> to vector<8x1xf32>
    %62 = vector.broadcast %61 : vector<8x1xf32> to vector<8x8xf32>
    %63 = arith.subf %59, %62 : vector<8x8xf32>
    %64 = math.exp %63 : vector<8x8xf32>
    %cst_34 = arith.constant dense<0.000000e+00> : vector<8xf32>
    %65 = vector.multi_reduction <add>, %64, %cst_34 [1] : vector<8x8xf32> to vector<8xf32>
    %66 = vector.shape_cast %65 : vector<8xf32> to vector<8x1xf32>
    %67 = tpu.reciprocal %66 {approx = true} : vector<8x1xf32> -> vector<8x1xf32>
    %68 = vector.broadcast %67 : vector<8x1xf32> to vector<8x8xf32>
    %69 = arith.mulf %64, %68 : vector<8x8xf32>
    %cst_35 = arith.constant dense<0.000000e+00> : vector<8x64xf32>
    %70 = tpu.matmul %69, %57, %cst_35 {dimension_numbers = #tpu.dot_dimension_numbers<[1], [0], [0], [1], [0, 0, 1, 1], [], []>} : vector<8x8xf32>, vector<8x64xf32>, vector<8x64xf32> -> vector<8x64xf32>
    %71 = vector.extract_strided_slice %32 {offsets = [64, 0], sizes = [64, 192], strides = [1, 1]} : vector<192x192xf32> to vector<64x192xf32>
    %cst_36 = arith.constant dense<0.000000e+00> : vector<8x192xf32>
    %72 = tpu.matmul %70, %71, %cst_36 {dimension_numbers = #tpu.dot_dimension_numbers<[1], [0], [0], [1], [0, 0, 1, 1], [], []>} : vector<8x64xf32>, vector<64x192xf32>, vector<8x192xf32> -> vector<8x192xf32>
    %73 = arith.addf %52, %72 : vector<8x192xf32>
    %74 = vector.extract_strided_slice %16 {offsets = [0, 128], sizes = [8, 64], strides = [1, 1]} : vector<8x192xf32> to vector<8x64xf32>
    %cst_37 = arith.constant 1.250000e-01 : f32
    %75 = vector.broadcast %cst_37 : f32 to vector<8x64xf32>
    %76 = arith.mulf %74, %75 : vector<8x64xf32>
    %77 = vector.extract_strided_slice %23 {offsets = [0, 128], sizes = [8, 64], strides = [1, 1]} : vector<8x192xf32> to vector<8x64xf32>
    %78 = vector.extract_strided_slice %30 {offsets = [0, 128], sizes = [8, 64], strides = [1, 1]} : vector<8x192xf32> to vector<8x64xf32>
    %79 = tpu.transpose %77, [1, 0] : vector<8x64xf32> -> vector<64x8xf32>
    %cst_38 = arith.constant dense<0.000000e+00> : vector<8x8xf32>
    %80 = tpu.matmul %76, %79, %cst_38 {dimension_numbers = #tpu.dot_dimension_numbers<[1], [0], [0], [1], [0, 0, 1, 1], [], []>} : vector<8x64xf32>, vector<64x8xf32>, vector<8x8xf32> -> vector<8x8xf32>
    %cst_39 = arith.constant dense<0xFF800000> : vector<8xf32>
    %81 = vector.multi_reduction <maximumf>, %80, %cst_39 [1] : vector<8x8xf32> to vector<8xf32>
    %82 = vector.shape_cast %81 : vector<8xf32> to vector<8x1xf32>
    %83 = vector.broadcast %82 : vector<8x1xf32> to vector<8x8xf32>
    %84 = arith.subf %80, %83 : vector<8x8xf32>
    %85 = math.exp %84 : vector<8x8xf32>
    %cst_40 = arith.constant dense<0.000000e+00> : vector<8xf32>
    %86 = vector.multi_reduction <add>, %85, %cst_40 [1] : vector<8x8xf32> to vector<8xf32>
    %87 = vector.shape_cast %86 : vector<8xf32> to vector<8x1xf32>
    %88 = tpu.reciprocal %87 {approx = true} : vector<8x1xf32> -> vector<8x1xf32>
    %89 = vector.broadcast %88 : vector<8x1xf32> to vector<8x8xf32>
    %90 = arith.mulf %85, %89 : vector<8x8xf32>
    %cst_41 = arith.constant dense<0.000000e+00> : vector<8x64xf32>
    %91 = tpu.matmul %90, %78, %cst_41 {dimension_numbers = #tpu.dot_dimension_numbers<[1], [0], [0], [1], [0, 0, 1, 1], [], []>} : vector<8x8xf32>, vector<8x64xf32>, vector<8x64xf32> -> vector<8x64xf32>
    %92 = vector.extract_strided_slice %32 {offsets = [128, 0], sizes = [64, 192], strides = [1, 1]} : vector<192x192xf32> to vector<64x192xf32>
    %cst_42 = arith.constant dense<0.000000e+00> : vector<8x192xf32>
    %93 = tpu.matmul %91, %92, %cst_42 {dimension_numbers = #tpu.dot_dimension_numbers<[1], [0], [0], [1], [0, 0, 1, 1], [], []>} : vector<8x64xf32>, vector<64x192xf32>, vector<8x192xf32> -> vector<8x192xf32>
    %94 = arith.addf %73, %93 : vector<8x192xf32>
    %c8 = arith.constant 8 : index
    %c0_43 = arith.constant 0 : index
    %c0_44 = arith.constant 0 : index
    %95 = vector.load %arg2[%c8, %c0_43, %c0_44] : memref<25x1x192xf32, #tpu.memory_space<vmem>>, vector<1x1x192xf32>
    %96 = vector.shape_cast %95 : vector<1x1x192xf32> to vector<1x192xf32>
    %97 = vector.broadcast %96 : vector<1x192xf32> to vector<8x192xf32>
    %98 = arith.addf %94, %97 : vector<8x192xf32>
    %99 = arith.addf %9, %98 : vector<8x192xf32>
    %c9 = arith.constant 9 : index
    %c0_45 = arith.constant 0 : index
    %c0_46 = arith.constant 0 : index
    %100 = vector.load %arg2[%c9, %c0_45, %c0_46] : memref<25x1x192xf32, #tpu.memory_space<vmem>>, vector<1x1x192xf32>
    %101 = vector.shape_cast %100 : vector<1x1x192xf32> to vector<1x192xf32>
    %c10 = arith.constant 10 : index
    %c0_47 = arith.constant 0 : index
    %c0_48 = arith.constant 0 : index
    %102 = vector.load %arg2[%c10, %c0_47, %c0_48] : memref<25x1x192xf32, #tpu.memory_space<vmem>>, vector<1x1x192xf32>
    %103 = vector.shape_cast %102 : vector<1x1x192xf32> to vector<1x192xf32>
    %cst_49 = arith.constant dense<0.000000e+00> : vector<8xf32>
    %104 = vector.multi_reduction <add>, %99, %cst_49 [1] : vector<8x192xf32> to vector<8xf32>
    %105 = vector.shape_cast %104 : vector<8xf32> to vector<8x1xf32>
    %cst_50 = arith.constant 1.920000e+02 : f32
    %106 = vector.broadcast %cst_50 : f32 to vector<8x1xf32>
    %107 = arith.divf %105, %106 : vector<8x1xf32>
    %108 = vector.broadcast %107 : vector<8x1xf32> to vector<8x192xf32>
    %109 = arith.subf %99, %108 : vector<8x192xf32>
    %110 = arith.mulf %109, %109 : vector<8x192xf32>
    %cst_51 = arith.constant dense<0.000000e+00> : vector<8xf32>
    %111 = vector.multi_reduction <add>, %110, %cst_51 [1] : vector<8x192xf32> to vector<8xf32>
    %112 = vector.shape_cast %111 : vector<8xf32> to vector<8x1xf32>
    %cst_52 = arith.constant 1.920000e+02 : f32
    %113 = vector.broadcast %cst_52 : f32 to vector<8x1xf32>
    %114 = arith.divf %112, %113 : vector<8x1xf32>
    %115 = vector.broadcast %107 : vector<8x1xf32> to vector<8x192xf32>
    %116 = arith.subf %99, %115 : vector<8x192xf32>
    %cst_53 = arith.constant 9.99999974E-6 : f32
    %117 = vector.broadcast %cst_53 : f32 to vector<8x1xf32>
    %118 = arith.addf %114, %117 : vector<8x1xf32>
    %119 = math.rsqrt %118 : vector<8x1xf32>
    %120 = vector.broadcast %119 : vector<8x1xf32> to vector<8x192xf32>
    %121 = arith.mulf %116, %120 : vector<8x192xf32>
    %122 = vector.broadcast %101 : vector<1x192xf32> to vector<8x192xf32>
    %123 = arith.mulf %121, %122 : vector<8x192xf32>
    %124 = vector.broadcast %103 : vector<1x192xf32> to vector<8x192xf32>
    %125 = arith.addf %123, %124 : vector<8x192xf32>
    %c5_54 = arith.constant 5 : index
    %c0_55 = arith.constant 0 : index
    %c0_56 = arith.constant 0 : index
    %126 = vector.load %arg1[%c5_54, %c0_55, %c0_56] : memref<16x192x192xf32, #tpu.memory_space<vmem>>, vector<1x192x192xf32>
    %127 = vector.shape_cast %126 : vector<1x192x192xf32> to vector<192x192xf32>
    %cst_57 = arith.constant dense<0.000000e+00> : vector<8x192xf32>
    %128 = tpu.matmul %125, %127, %cst_57 {dimension_numbers = #tpu.dot_dimension_numbers<[1], [0], [0], [1], [0, 0, 1, 1], [], []>} : vector<8x192xf32>, vector<192x192xf32>, vector<8x192xf32> -> vector<8x192xf32>
    %c11 = arith.constant 11 : index
    %c0_58 = arith.constant 0 : index
    %c0_59 = arith.constant 0 : index
    %129 = vector.load %arg2[%c11, %c0_58, %c0_59] : memref<25x1x192xf32, #tpu.memory_space<vmem>>, vector<1x1x192xf32>
    %130 = vector.shape_cast %129 : vector<1x1x192xf32> to vector<1x192xf32>
    %131 = vector.broadcast %130 : vector<1x192xf32> to vector<8x192xf32>
    %132 = arith.addf %128, %131 : vector<8x192xf32>
    %cst_60 = arith.constant 0.000000e+00 : f32
    %133 = vector.broadcast %cst_60 : f32 to vector<8x192xf32>
    %134 = arith.maximumf %132, %133 : vector<8x192xf32>
    %c6_61 = arith.constant 6 : index
    %c0_62 = arith.constant 0 : index
    %c0_63 = arith.constant 0 : index
    %135 = vector.load %arg1[%c6_61, %c0_62, %c0_63] : memref<16x192x192xf32, #tpu.memory_space<vmem>>, vector<1x192x192xf32>
    %136 = vector.shape_cast %135 : vector<1x192x192xf32> to vector<192x192xf32>
    %cst_64 = arith.constant dense<0.000000e+00> : vector<8x192xf32>
    %137 = tpu.matmul %134, %136, %cst_64 {dimension_numbers = #tpu.dot_dimension_numbers<[1], [0], [0], [1], [0, 0, 1, 1], [], []>} : vector<8x192xf32>, vector<192x192xf32>, vector<8x192xf32> -> vector<8x192xf32>
    %c12 = arith.constant 12 : index
    %c0_65 = arith.constant 0 : index
    %c0_66 = arith.constant 0 : index
    %138 = vector.load %arg2[%c12, %c0_65, %c0_66] : memref<25x1x192xf32, #tpu.memory_space<vmem>>, vector<1x1x192xf32>
    %139 = vector.shape_cast %138 : vector<1x1x192xf32> to vector<1x192xf32>
    %140 = vector.broadcast %139 : vector<1x192xf32> to vector<8x192xf32>
    %141 = arith.addf %137, %140 : vector<8x192xf32>
    %142 = arith.addf %125, %141 : vector<8x192xf32>
    %c13 = arith.constant 13 : index
    %c0_67 = arith.constant 0 : index
    %c0_68 = arith.constant 0 : index
    %143 = vector.load %arg2[%c13, %c0_67, %c0_68] : memref<25x1x192xf32, #tpu.memory_space<vmem>>, vector<1x1x192xf32>
    %144 = vector.shape_cast %143 : vector<1x1x192xf32> to vector<1x192xf32>
    %c14 = arith.constant 14 : index
    %c0_69 = arith.constant 0 : index
    %c0_70 = arith.constant 0 : index
    %145 = vector.load %arg2[%c14, %c0_69, %c0_70] : memref<25x1x192xf32, #tpu.memory_space<vmem>>, vector<1x1x192xf32>
    %146 = vector.shape_cast %145 : vector<1x1x192xf32> to vector<1x192xf32>
    %cst_71 = arith.constant dense<0.000000e+00> : vector<8xf32>
    %147 = vector.multi_reduction <add>, %142, %cst_71 [1] : vector<8x192xf32> to vector<8xf32>
    %148 = vector.shape_cast %147 : vector<8xf32> to vector<8x1xf32>
    %cst_72 = arith.constant 1.920000e+02 : f32
    %149 = vector.broadcast %cst_72 : f32 to vector<8x1xf32>
    %150 = arith.divf %148, %149 : vector<8x1xf32>
    %151 = vector.broadcast %150 : vector<8x1xf32> to vector<8x192xf32>
    %152 = arith.subf %142, %151 : vector<8x192xf32>
    %153 = arith.mulf %152, %152 : vector<8x192xf32>
    %cst_73 = arith.constant dense<0.000000e+00> : vector<8xf32>
    %154 = vector.multi_reduction <add>, %153, %cst_73 [1] : vector<8x192xf32> to vector<8xf32>
    %155 = vector.shape_cast %154 : vector<8xf32> to vector<8x1xf32>
    %cst_74 = arith.constant 1.920000e+02 : f32
    %156 = vector.broadcast %cst_74 : f32 to vector<8x1xf32>
    %157 = arith.divf %155, %156 : vector<8x1xf32>
    %158 = vector.broadcast %150 : vector<8x1xf32> to vector<8x192xf32>
    %159 = arith.subf %142, %158 : vector<8x192xf32>
    %cst_75 = arith.constant 9.99999974E-6 : f32
    %160 = vector.broadcast %cst_75 : f32 to vector<8x1xf32>
    %161 = arith.addf %157, %160 : vector<8x1xf32>
    %162 = math.rsqrt %161 : vector<8x1xf32>
    %163 = vector.broadcast %162 : vector<8x1xf32> to vector<8x192xf32>
    %164 = arith.mulf %159, %163 : vector<8x192xf32>
    %165 = vector.broadcast %144 : vector<1x192xf32> to vector<8x192xf32>
    %166 = arith.mulf %164, %165 : vector<8x192xf32>
    %167 = vector.broadcast %146 : vector<1x192xf32> to vector<8x192xf32>
    %168 = arith.addf %166, %167 : vector<8x192xf32>
    %c7_76 = arith.constant 7 : index
    %c0_77 = arith.constant 0 : index
    %c0_78 = arith.constant 0 : index
    %169 = vector.load %arg1[%c7_76, %c0_77, %c0_78] : memref<16x192x192xf32, #tpu.memory_space<vmem>>, vector<1x192x192xf32>
    %170 = vector.shape_cast %169 : vector<1x192x192xf32> to vector<192x192xf32>
    %cst_79 = arith.constant dense<0.000000e+00> : vector<8x192xf32>
    %171 = tpu.matmul %168, %170, %cst_79 {dimension_numbers = #tpu.dot_dimension_numbers<[1], [0], [0], [1], [0, 0, 1, 1], [], []>} : vector<8x192xf32>, vector<192x192xf32>, vector<8x192xf32> -> vector<8x192xf32>
    %c15 = arith.constant 15 : index
    %c0_80 = arith.constant 0 : index
    %c0_81 = arith.constant 0 : index
    %172 = vector.load %arg2[%c15, %c0_80, %c0_81] : memref<25x1x192xf32, #tpu.memory_space<vmem>>, vector<1x1x192xf32>
    %173 = vector.shape_cast %172 : vector<1x1x192xf32> to vector<1x192xf32>
    %174 = vector.broadcast %173 : vector<1x192xf32> to vector<8x192xf32>
    %175 = arith.addf %171, %174 : vector<8x192xf32>
    %c8_82 = arith.constant 8 : index
    %c0_83 = arith.constant 0 : index
    %c0_84 = arith.constant 0 : index
    %176 = vector.load %arg1[%c8_82, %c0_83, %c0_84] : memref<16x192x192xf32, #tpu.memory_space<vmem>>, vector<1x192x192xf32>
    %177 = vector.shape_cast %176 : vector<1x192x192xf32> to vector<192x192xf32>
    %cst_85 = arith.constant dense<0.000000e+00> : vector<8x192xf32>
    %178 = tpu.matmul %168, %177, %cst_85 {dimension_numbers = #tpu.dot_dimension_numbers<[1], [0], [0], [1], [0, 0, 1, 1], [], []>} : vector<8x192xf32>, vector<192x192xf32>, vector<8x192xf32> -> vector<8x192xf32>
    %c16 = arith.constant 16 : index
    %c0_86 = arith.constant 0 : index
    %c0_87 = arith.constant 0 : index
    %179 = vector.load %arg2[%c16, %c0_86, %c0_87] : memref<25x1x192xf32, #tpu.memory_space<vmem>>, vector<1x1x192xf32>
    %180 = vector.shape_cast %179 : vector<1x1x192xf32> to vector<1x192xf32>
    %181 = vector.broadcast %180 : vector<1x192xf32> to vector<8x192xf32>
    %182 = arith.addf %178, %181 : vector<8x192xf32>
    %c9_88 = arith.constant 9 : index
    %c0_89 = arith.constant 0 : index
    %c0_90 = arith.constant 0 : index
    %183 = vector.load %arg1[%c9_88, %c0_89, %c0_90] : memref<16x192x192xf32, #tpu.memory_space<vmem>>, vector<1x192x192xf32>
    %184 = vector.shape_cast %183 : vector<1x192x192xf32> to vector<192x192xf32>
    %cst_91 = arith.constant dense<0.000000e+00> : vector<8x192xf32>
    %185 = tpu.matmul %168, %184, %cst_91 {dimension_numbers = #tpu.dot_dimension_numbers<[1], [0], [0], [1], [0, 0, 1, 1], [], []>} : vector<8x192xf32>, vector<192x192xf32>, vector<8x192xf32> -> vector<8x192xf32>
    %c17 = arith.constant 17 : index
    %c0_92 = arith.constant 0 : index
    %c0_93 = arith.constant 0 : index
    %186 = vector.load %arg2[%c17, %c0_92, %c0_93] : memref<25x1x192xf32, #tpu.memory_space<vmem>>, vector<1x1x192xf32>
    %187 = vector.shape_cast %186 : vector<1x1x192xf32> to vector<1x192xf32>
    %188 = vector.broadcast %187 : vector<1x192xf32> to vector<8x192xf32>
    %189 = arith.addf %185, %188 : vector<8x192xf32>
    %c10_94 = arith.constant 10 : index
    %c0_95 = arith.constant 0 : index
    %c0_96 = arith.constant 0 : index
    %190 = vector.load %arg1[%c10_94, %c0_95, %c0_96] : memref<16x192x192xf32, #tpu.memory_space<vmem>>, vector<1x192x192xf32>
    %191 = vector.shape_cast %190 : vector<1x192x192xf32> to vector<192x192xf32>
    %192 = vector.extract_strided_slice %175 {offsets = [0, 0], sizes = [8, 64], strides = [1, 1]} : vector<8x192xf32> to vector<8x64xf32>
    %cst_97 = arith.constant 1.250000e-01 : f32
    %193 = vector.broadcast %cst_97 : f32 to vector<8x64xf32>
    %194 = arith.mulf %192, %193 : vector<8x64xf32>
    %195 = vector.extract_strided_slice %182 {offsets = [0, 0], sizes = [8, 64], strides = [1, 1]} : vector<8x192xf32> to vector<8x64xf32>
    %196 = vector.extract_strided_slice %189 {offsets = [0, 0], sizes = [8, 64], strides = [1, 1]} : vector<8x192xf32> to vector<8x64xf32>
    %197 = tpu.transpose %195, [1, 0] : vector<8x64xf32> -> vector<64x8xf32>
    %cst_98 = arith.constant dense<0.000000e+00> : vector<8x8xf32>
    %198 = tpu.matmul %194, %197, %cst_98 {dimension_numbers = #tpu.dot_dimension_numbers<[1], [0], [0], [1], [0, 0, 1, 1], [], []>} : vector<8x64xf32>, vector<64x8xf32>, vector<8x8xf32> -> vector<8x8xf32>
    %cst_99 = arith.constant dense<0xFF800000> : vector<8xf32>
    %199 = vector.multi_reduction <maximumf>, %198, %cst_99 [1] : vector<8x8xf32> to vector<8xf32>
    %200 = vector.shape_cast %199 : vector<8xf32> to vector<8x1xf32>
    %201 = vector.broadcast %200 : vector<8x1xf32> to vector<8x8xf32>
    %202 = arith.subf %198, %201 : vector<8x8xf32>
    %203 = math.exp %202 : vector<8x8xf32>
    %cst_100 = arith.constant dense<0.000000e+00> : vector<8xf32>
    %204 = vector.multi_reduction <add>, %203, %cst_100 [1] : vector<8x8xf32> to vector<8xf32>
    %205 = vector.shape_cast %204 : vector<8xf32> to vector<8x1xf32>
    %206 = tpu.reciprocal %205 {approx = true} : vector<8x1xf32> -> vector<8x1xf32>
    %207 = vector.broadcast %206 : vector<8x1xf32> to vector<8x8xf32>
    %208 = arith.mulf %203, %207 : vector<8x8xf32>
    %cst_101 = arith.constant dense<0.000000e+00> : vector<8x64xf32>
    %209 = tpu.matmul %208, %196, %cst_101 {dimension_numbers = #tpu.dot_dimension_numbers<[1], [0], [0], [1], [0, 0, 1, 1], [], []>} : vector<8x8xf32>, vector<8x64xf32>, vector<8x64xf32> -> vector<8x64xf32>
    %210 = vector.extract_strided_slice %191 {offsets = [0, 0], sizes = [64, 192], strides = [1, 1]} : vector<192x192xf32> to vector<64x192xf32>
    %cst_102 = arith.constant dense<0.000000e+00> : vector<8x192xf32>
    %211 = tpu.matmul %209, %210, %cst_102 {dimension_numbers = #tpu.dot_dimension_numbers<[1], [0], [0], [1], [0, 0, 1, 1], [], []>} : vector<8x64xf32>, vector<64x192xf32>, vector<8x192xf32> -> vector<8x192xf32>
    %212 = vector.extract_strided_slice %175 {offsets = [0, 64], sizes = [8, 64], strides = [1, 1]} : vector<8x192xf32> to vector<8x64xf32>
    %cst_103 = arith.constant 1.250000e-01 : f32
    %213 = vector.broadcast %cst_103 : f32 to vector<8x64xf32>
    %214 = arith.mulf %212, %213 : vector<8x64xf32>
    %215 = vector.extract_strided_slice %182 {offsets = [0, 64], sizes = [8, 64], strides = [1, 1]} : vector<8x192xf32> to vector<8x64xf32>
    %216 = vector.extract_strided_slice %189 {offsets = [0, 64], sizes = [8, 64], strides = [1, 1]} : vector<8x192xf32> to vector<8x64xf32>
    %217 = tpu.transpose %215, [1, 0] : vector<8x64xf32> -> vector<64x8xf32>
    %cst_104 = arith.constant dense<0.000000e+00> : vector<8x8xf32>
    %218 = tpu.matmul %214, %217, %cst_104 {dimension_numbers = #tpu.dot_dimension_numbers<[1], [0], [0], [1], [0, 0, 1, 1], [], []>} : vector<8x64xf32>, vector<64x8xf32>, vector<8x8xf32> -> vector<8x8xf32>
    %cst_105 = arith.constant dense<0xFF800000> : vector<8xf32>
    %219 = vector.multi_reduction <maximumf>, %218, %cst_105 [1] : vector<8x8xf32> to vector<8xf32>
    %220 = vector.shape_cast %219 : vector<8xf32> to vector<8x1xf32>
    %221 = vector.broadcast %220 : vector<8x1xf32> to vector<8x8xf32>
    %222 = arith.subf %218, %221 : vector<8x8xf32>
    %223 = math.exp %222 : vector<8x8xf32>
    %cst_106 = arith.constant dense<0.000000e+00> : vector<8xf32>
    %224 = vector.multi_reduction <add>, %223, %cst_106 [1] : vector<8x8xf32> to vector<8xf32>
    %225 = vector.shape_cast %224 : vector<8xf32> to vector<8x1xf32>
    %226 = tpu.reciprocal %225 {approx = true} : vector<8x1xf32> -> vector<8x1xf32>
    %227 = vector.broadcast %226 : vector<8x1xf32> to vector<8x8xf32>
    %228 = arith.mulf %223, %227 : vector<8x8xf32>
    %cst_107 = arith.constant dense<0.000000e+00> : vector<8x64xf32>
    %229 = tpu.matmul %228, %216, %cst_107 {dimension_numbers = #tpu.dot_dimension_numbers<[1], [0], [0], [1], [0, 0, 1, 1], [], []>} : vector<8x8xf32>, vector<8x64xf32>, vector<8x64xf32> -> vector<8x64xf32>
    %230 = vector.extract_strided_slice %191 {offsets = [64, 0], sizes = [64, 192], strides = [1, 1]} : vector<192x192xf32> to vector<64x192xf32>
    %cst_108 = arith.constant dense<0.000000e+00> : vector<8x192xf32>
    %231 = tpu.matmul %229, %230, %cst_108 {dimension_numbers = #tpu.dot_dimension_numbers<[1], [0], [0], [1], [0, 0, 1, 1], [], []>} : vector<8x64xf32>, vector<64x192xf32>, vector<8x192xf32> -> vector<8x192xf32>
    %232 = arith.addf %211, %231 : vector<8x192xf32>
    %233 = vector.extract_strided_slice %175 {offsets = [0, 128], sizes = [8, 64], strides = [1, 1]} : vector<8x192xf32> to vector<8x64xf32>
    %cst_109 = arith.constant 1.250000e-01 : f32
    %234 = vector.broadcast %cst_109 : f32 to vector<8x64xf32>
    %235 = arith.mulf %233, %234 : vector<8x64xf32>
    %236 = vector.extract_strided_slice %182 {offsets = [0, 128], sizes = [8, 64], strides = [1, 1]} : vector<8x192xf32> to vector<8x64xf32>
    %237 = vector.extract_strided_slice %189 {offsets = [0, 128], sizes = [8, 64], strides = [1, 1]} : vector<8x192xf32> to vector<8x64xf32>
    %238 = tpu.transpose %236, [1, 0] : vector<8x64xf32> -> vector<64x8xf32>
    %cst_110 = arith.constant dense<0.000000e+00> : vector<8x8xf32>
    %239 = tpu.matmul %235, %238, %cst_110 {dimension_numbers = #tpu.dot_dimension_numbers<[1], [0], [0], [1], [0, 0, 1, 1], [], []>} : vector<8x64xf32>, vector<64x8xf32>, vector<8x8xf32> -> vector<8x8xf32>
    %cst_111 = arith.constant dense<0xFF800000> : vector<8xf32>
    %240 = vector.multi_reduction <maximumf>, %239, %cst_111 [1] : vector<8x8xf32> to vector<8xf32>
    %241 = vector.shape_cast %240 : vector<8xf32> to vector<8x1xf32>
    %242 = vector.broadcast %241 : vector<8x1xf32> to vector<8x8xf32>
    %243 = arith.subf %239, %242 : vector<8x8xf32>
    %244 = math.exp %243 : vector<8x8xf32>
    %cst_112 = arith.constant dense<0.000000e+00> : vector<8xf32>
    %245 = vector.multi_reduction <add>, %244, %cst_112 [1] : vector<8x8xf32> to vector<8xf32>
    %246 = vector.shape_cast %245 : vector<8xf32> to vector<8x1xf32>
    %247 = tpu.reciprocal %246 {approx = true} : vector<8x1xf32> -> vector<8x1xf32>
    %248 = vector.broadcast %247 : vector<8x1xf32> to vector<8x8xf32>
    %249 = arith.mulf %244, %248 : vector<8x8xf32>
    %cst_113 = arith.constant dense<0.000000e+00> : vector<8x64xf32>
    %250 = tpu.matmul %249, %237, %cst_113 {dimension_numbers = #tpu.dot_dimension_numbers<[1], [0], [0], [1], [0, 0, 1, 1], [], []>} : vector<8x8xf32>, vector<8x64xf32>, vector<8x64xf32> -> vector<8x64xf32>
    %251 = vector.extract_strided_slice %191 {offsets = [128, 0], sizes = [64, 192], strides = [1, 1]} : vector<192x192xf32> to vector<64x192xf32>
    %cst_114 = arith.constant dense<0.000000e+00> : vector<8x192xf32>
    %252 = tpu.matmul %250, %251, %cst_114 {dimension_numbers = #tpu.dot_dimension_numbers<[1], [0], [0], [1], [0, 0, 1, 1], [], []>} : vector<8x64xf32>, vector<64x192xf32>, vector<8x192xf32> -> vector<8x192xf32>
    %253 = arith.addf %232, %252 : vector<8x192xf32>
    %c18 = arith.constant 18 : index
    %c0_115 = arith.constant 0 : index
    %c0_116 = arith.constant 0 : index
    %254 = vector.load %arg2[%c18, %c0_115, %c0_116] : memref<25x1x192xf32, #tpu.memory_space<vmem>>, vector<1x1x192xf32>
    %255 = vector.shape_cast %254 : vector<1x1x192xf32> to vector<1x192xf32>
    %256 = vector.broadcast %255 : vector<1x192xf32> to vector<8x192xf32>
    %257 = arith.addf %253, %256 : vector<8x192xf32>
    %258 = arith.addf %168, %257 : vector<8x192xf32>
    %c19 = arith.constant 19 : index
    %c0_117 = arith.constant 0 : index
    %c0_118 = arith.constant 0 : index
    %259 = vector.load %arg2[%c19, %c0_117, %c0_118] : memref<25x1x192xf32, #tpu.memory_space<vmem>>, vector<1x1x192xf32>
    %260 = vector.shape_cast %259 : vector<1x1x192xf32> to vector<1x192xf32>
    %c20 = arith.constant 20 : index
    %c0_119 = arith.constant 0 : index
    %c0_120 = arith.constant 0 : index
    %261 = vector.load %arg2[%c20, %c0_119, %c0_120] : memref<25x1x192xf32, #tpu.memory_space<vmem>>, vector<1x1x192xf32>
    %262 = vector.shape_cast %261 : vector<1x1x192xf32> to vector<1x192xf32>
    %cst_121 = arith.constant dense<0.000000e+00> : vector<8xf32>
    %263 = vector.multi_reduction <add>, %258, %cst_121 [1] : vector<8x192xf32> to vector<8xf32>
    %264 = vector.shape_cast %263 : vector<8xf32> to vector<8x1xf32>
    %cst_122 = arith.constant 1.920000e+02 : f32
    %265 = vector.broadcast %cst_122 : f32 to vector<8x1xf32>
    %266 = arith.divf %264, %265 : vector<8x1xf32>
    %267 = vector.broadcast %266 : vector<8x1xf32> to vector<8x192xf32>
    %268 = arith.subf %258, %267 : vector<8x192xf32>
    %269 = arith.mulf %268, %268 : vector<8x192xf32>
    %cst_123 = arith.constant dense<0.000000e+00> : vector<8xf32>
    %270 = vector.multi_reduction <add>, %269, %cst_123 [1] : vector<8x192xf32> to vector<8xf32>
    %271 = vector.shape_cast %270 : vector<8xf32> to vector<8x1xf32>
    %cst_124 = arith.constant 1.920000e+02 : f32
    %272 = vector.broadcast %cst_124 : f32 to vector<8x1xf32>
    %273 = arith.divf %271, %272 : vector<8x1xf32>
    %274 = vector.broadcast %266 : vector<8x1xf32> to vector<8x192xf32>
    %275 = arith.subf %258, %274 : vector<8x192xf32>
    %cst_125 = arith.constant 9.99999974E-6 : f32
    %276 = vector.broadcast %cst_125 : f32 to vector<8x1xf32>
    %277 = arith.addf %273, %276 : vector<8x1xf32>
    %278 = math.rsqrt %277 : vector<8x1xf32>
    %279 = vector.broadcast %278 : vector<8x1xf32> to vector<8x192xf32>
    %280 = arith.mulf %275, %279 : vector<8x192xf32>
    %281 = vector.broadcast %260 : vector<1x192xf32> to vector<8x192xf32>
    %282 = arith.mulf %280, %281 : vector<8x192xf32>
    %283 = vector.broadcast %262 : vector<1x192xf32> to vector<8x192xf32>
    %284 = arith.addf %282, %283 : vector<8x192xf32>
    %c11_126 = arith.constant 11 : index
    %c0_127 = arith.constant 0 : index
    %c0_128 = arith.constant 0 : index
    %285 = vector.load %arg1[%c11_126, %c0_127, %c0_128] : memref<16x192x192xf32, #tpu.memory_space<vmem>>, vector<1x192x192xf32>
    %286 = vector.shape_cast %285 : vector<1x192x192xf32> to vector<192x192xf32>
    %cst_129 = arith.constant dense<0.000000e+00> : vector<8x192xf32>
    %287 = tpu.matmul %284, %286, %cst_129 {dimension_numbers = #tpu.dot_dimension_numbers<[1], [0], [0], [1], [0, 0, 1, 1], [], []>} : vector<8x192xf32>, vector<192x192xf32>, vector<8x192xf32> -> vector<8x192xf32>
    %c21 = arith.constant 21 : index
    %c0_130 = arith.constant 0 : index
    %c0_131 = arith.constant 0 : index
    %288 = vector.load %arg2[%c21, %c0_130, %c0_131] : memref<25x1x192xf32, #tpu.memory_space<vmem>>, vector<1x1x192xf32>
    %289 = vector.shape_cast %288 : vector<1x1x192xf32> to vector<1x192xf32>
    %290 = vector.broadcast %289 : vector<1x192xf32> to vector<8x192xf32>
    %291 = arith.addf %287, %290 : vector<8x192xf32>
    %cst_132 = arith.constant 0.000000e+00 : f32
    %292 = vector.broadcast %cst_132 : f32 to vector<8x192xf32>
    %293 = arith.maximumf %291, %292 : vector<8x192xf32>
    %c12_133 = arith.constant 12 : index
    %c0_134 = arith.constant 0 : index
    %c0_135 = arith.constant 0 : index
    %294 = vector.load %arg1[%c12_133, %c0_134, %c0_135] : memref<16x192x192xf32, #tpu.memory_space<vmem>>, vector<1x192x192xf32>
    %295 = vector.shape_cast %294 : vector<1x192x192xf32> to vector<192x192xf32>
    %cst_136 = arith.constant dense<0.000000e+00> : vector<8x192xf32>
    %296 = tpu.matmul %293, %295, %cst_136 {dimension_numbers = #tpu.dot_dimension_numbers<[1], [0], [0], [1], [0, 0, 1, 1], [], []>} : vector<8x192xf32>, vector<192x192xf32>, vector<8x192xf32> -> vector<8x192xf32>
    %c22 = arith.constant 22 : index
    %c0_137 = arith.constant 0 : index
    %c0_138 = arith.constant 0 : index
    %297 = vector.load %arg2[%c22, %c0_137, %c0_138] : memref<25x1x192xf32, #tpu.memory_space<vmem>>, vector<1x1x192xf32>
    %298 = vector.shape_cast %297 : vector<1x1x192xf32> to vector<1x192xf32>
    %299 = vector.broadcast %298 : vector<1x192xf32> to vector<8x192xf32>
    %300 = arith.addf %296, %299 : vector<8x192xf32>
    %301 = arith.addf %284, %300 : vector<8x192xf32>
    %c23 = arith.constant 23 : index
    %c0_139 = arith.constant 0 : index
    %c0_140 = arith.constant 0 : index
    %302 = vector.load %arg2[%c23, %c0_139, %c0_140] : memref<25x1x192xf32, #tpu.memory_space<vmem>>, vector<1x1x192xf32>
    %303 = vector.shape_cast %302 : vector<1x1x192xf32> to vector<1x192xf32>
    %c24 = arith.constant 24 : index
    %c0_141 = arith.constant 0 : index
    %c0_142 = arith.constant 0 : index
    %304 = vector.load %arg2[%c24, %c0_141, %c0_142] : memref<25x1x192xf32, #tpu.memory_space<vmem>>, vector<1x1x192xf32>
    %305 = vector.shape_cast %304 : vector<1x1x192xf32> to vector<1x192xf32>
    %cst_143 = arith.constant dense<0.000000e+00> : vector<8xf32>
    %306 = vector.multi_reduction <add>, %301, %cst_143 [1] : vector<8x192xf32> to vector<8xf32>
    %307 = vector.shape_cast %306 : vector<8xf32> to vector<8x1xf32>
    %cst_144 = arith.constant 1.920000e+02 : f32
    %308 = vector.broadcast %cst_144 : f32 to vector<8x1xf32>
    %309 = arith.divf %307, %308 : vector<8x1xf32>
    %310 = vector.broadcast %309 : vector<8x1xf32> to vector<8x192xf32>
    %311 = arith.subf %301, %310 : vector<8x192xf32>
    %312 = arith.mulf %311, %311 : vector<8x192xf32>
    %cst_145 = arith.constant dense<0.000000e+00> : vector<8xf32>
    %313 = vector.multi_reduction <add>, %312, %cst_145 [1] : vector<8x192xf32> to vector<8xf32>
    %314 = vector.shape_cast %313 : vector<8xf32> to vector<8x1xf32>
    %cst_146 = arith.constant 1.920000e+02 : f32
    %315 = vector.broadcast %cst_146 : f32 to vector<8x1xf32>
    %316 = arith.divf %314, %315 : vector<8x1xf32>
    %317 = vector.broadcast %309 : vector<8x1xf32> to vector<8x192xf32>
    %318 = arith.subf %301, %317 : vector<8x192xf32>
    %cst_147 = arith.constant 9.99999974E-6 : f32
    %319 = vector.broadcast %cst_147 : f32 to vector<8x1xf32>
    %320 = arith.addf %316, %319 : vector<8x1xf32>
    %321 = math.rsqrt %320 : vector<8x1xf32>
    %322 = vector.broadcast %321 : vector<8x1xf32> to vector<8x192xf32>
    %323 = arith.mulf %318, %322 : vector<8x192xf32>
    %324 = vector.broadcast %303 : vector<1x192xf32> to vector<8x192xf32>
    %325 = arith.mulf %323, %324 : vector<8x192xf32>
    %326 = vector.broadcast %305 : vector<1x192xf32> to vector<8x192xf32>
    %327 = arith.addf %325, %326 : vector<8x192xf32>
    %c13_148 = arith.constant 13 : index
    %c0_149 = arith.constant 0 : index
    %c0_150 = arith.constant 0 : index
    %328 = vector.load %arg1[%c13_148, %c0_149, %c0_150] : memref<16x192x192xf32, #tpu.memory_space<vmem>>, vector<1x192x192xf32>
    %329 = vector.shape_cast %328 : vector<1x192x192xf32> to vector<192x192xf32>
    %cst_151 = arith.constant dense<0.000000e+00> : vector<8x192xf32>
    %330 = tpu.matmul %327, %329, %cst_151 {dimension_numbers = #tpu.dot_dimension_numbers<[1], [0], [0], [1], [0, 0, 1, 1], [], []>} : vector<8x192xf32>, vector<192x192xf32>, vector<8x192xf32> -> vector<8x192xf32>
    %c1_152 = arith.constant 1 : index
    %c0_153 = arith.constant 0 : index
    %c0_154 = arith.constant 0 : index
    %331 = vector.load %arg2[%c1_152, %c0_153, %c0_154] : memref<25x1x192xf32, #tpu.memory_space<vmem>>, vector<1x1x192xf32>
    %332 = vector.shape_cast %331 : vector<1x1x192xf32> to vector<1x192xf32>
    %333 = vector.broadcast %332 : vector<1x192xf32> to vector<8x192xf32>
    %334 = arith.addf %330, %333 : vector<8x192xf32>
    %335 = math.tanh %334 : vector<8x192xf32>
    %c14_155 = arith.constant 14 : index
    %c0_156 = arith.constant 0 : index
    %c0_157 = arith.constant 0 : index
    %336 = vector.load %arg1[%c14_155, %c0_156, %c0_157] : memref<16x192x192xf32, #tpu.memory_space<vmem>>, vector<1x192x192xf32>
    %337 = vector.shape_cast %336 : vector<1x192x192xf32> to vector<192x192xf32>
    %cst_158 = arith.constant dense<0.000000e+00> : vector<8x192xf32>
    %338 = tpu.matmul %327, %337, %cst_158 {dimension_numbers = #tpu.dot_dimension_numbers<[1], [0], [0], [1], [0, 0, 1, 1], [], []>} : vector<8x192xf32>, vector<192x192xf32>, vector<8x192xf32> -> vector<8x192xf32>
    %c2_159 = arith.constant 2 : index
    %c0_160 = arith.constant 0 : index
    %c0_161 = arith.constant 0 : index
    %339 = vector.load %arg2[%c2_159, %c0_160, %c0_161] : memref<25x1x192xf32, #tpu.memory_space<vmem>>, vector<1x1x192xf32>
    %340 = vector.shape_cast %339 : vector<1x1x192xf32> to vector<1x192xf32>
    %341 = vector.broadcast %340 : vector<1x192xf32> to vector<8x192xf32>
    %342 = arith.addf %338, %341 : vector<8x192xf32>
    %343 = arith.negf %342 : vector<8x192xf32>
    %344 = math.exp %343 : vector<8x192xf32>
    %cst_162 = arith.constant 1.000000e+00 : f32
    %345 = vector.broadcast %cst_162 : f32 to vector<8x192xf32>
    %346 = arith.addf %345, %344 : vector<8x192xf32>
    %347 = arith.divf %345, %346 : vector<8x192xf32>
    %c4_163 = arith.constant 4 : index
    %c0_164 = arith.constant 0 : index
    %c0_165 = arith.constant 0 : index
    %348 = vector.load %arg2[%c4_163, %c0_164, %c0_165] : memref<25x1x192xf32, #tpu.memory_space<vmem>>, vector<1x1x192xf32>
    %349 = vector.shape_cast %348 : vector<1x1x192xf32> to vector<1x192xf32>
    %350 = arith.mulf %335, %347 : vector<8x192xf32>
    %c0_166 = arith.constant 0 : index
    %c0_167 = arith.constant 0 : index
    %351 = vector.load %arg3[%c0_166, %c0_167] : memref<192x8xf32, #tpu.memory_space<vmem>>, vector<192x8xf32>
    %cst_168 = arith.constant dense<0.000000e+00> : vector<8x8xf32>
    %352 = tpu.matmul %350, %351, %cst_168 {dimension_numbers = #tpu.dot_dimension_numbers<[1], [0], [0], [1], [0, 0, 1, 1], [], []>} : vector<8x192xf32>, vector<192x8xf32>, vector<8x8xf32> -> vector<8x8xf32>
    %353 = vector.extract_strided_slice %352 {offsets = [0, 0], sizes = [8, 1], strides = [1, 1]} : vector<8x8xf32> to vector<8x1xf32>
    %354 = vector.extract_strided_slice %349 {offsets = [0, 0], sizes = [1, 1], strides = [1, 1]} : vector<1x192xf32> to vector<1x1xf32>
    %355 = vector.broadcast %354 : vector<1x1xf32> to vector<8x1xf32>
    %356 = arith.addf %353, %355 : vector<8x1xf32>
    %cst_169 = arith.constant dense<0xFF800000> : vector<1xf32>
    %357 = vector.multi_reduction <maximumf>, %356, %cst_169 [0] : vector<8x1xf32> to vector<1xf32>
    %358 = vector.shape_cast %357 : vector<1xf32> to vector<1x1xf32>
    %359 = vector.broadcast %358 : vector<1x1xf32> to vector<8x1xf32>
    %360 = arith.subf %356, %359 : vector<8x1xf32>
    %361 = math.exp %360 : vector<8x1xf32>
    %cst_170 = arith.constant dense<0.000000e+00> : vector<1xf32>
    %362 = vector.multi_reduction <add>, %361, %cst_170 [0] : vector<8x1xf32> to vector<1xf32>
    %363 = vector.shape_cast %362 : vector<1xf32> to vector<1x1xf32>
    %364 = tpu.reciprocal %363 {approx = true} : vector<1x1xf32> -> vector<1x1xf32>
    %365 = vector.broadcast %364 : vector<1x1xf32> to vector<8x1xf32>
    %366 = arith.mulf %361, %365 : vector<8x1xf32>
    %367 = vector.broadcast %366 : vector<8x1xf32> to vector<8x192xf32>
    %368 = arith.mulf %367, %327 : vector<8x192xf32>
    %cst_171 = arith.constant dense<0.000000e+00> : vector<192xf32>
    %369 = vector.multi_reduction <add>, %368, %cst_171 [0] : vector<8x192xf32> to vector<192xf32>
    %370 = vector.shape_cast %369 : vector<192xf32> to vector<1x192xf32>
    %c15_172 = arith.constant 15 : index
    %c0_173 = arith.constant 0 : index
    %c0_174 = arith.constant 0 : index
    %371 = vector.load %arg1[%c15_172, %c0_173, %c0_174] : memref<16x192x192xf32, #tpu.memory_space<vmem>>, vector<1x192x192xf32>
    %372 = vector.shape_cast %371 : vector<1x192x192xf32> to vector<192x192xf32>
    %cst_175 = arith.constant dense<0.000000e+00> : vector<1x192xf32>
    %373 = tpu.matmul %370, %372, %cst_175 {dimension_numbers = #tpu.dot_dimension_numbers<[1], [0], [0], [1], [0, 0, 1, 1], [], []>} : vector<1x192xf32>, vector<192x192xf32>, vector<1x192xf32> -> vector<1x192xf32>
    %c3_176 = arith.constant 3 : index
    %c0_177 = arith.constant 0 : index
    %c0_178 = arith.constant 0 : index
    %374 = vector.load %arg2[%c3_176, %c0_177, %c0_178] : memref<25x1x192xf32, #tpu.memory_space<vmem>>, vector<1x1x192xf32>
    %375 = vector.shape_cast %374 : vector<1x1x192xf32> to vector<1x192xf32>
    %376 = arith.addf %373, %375 : vector<1x192xf32>
    %cst_179 = arith.constant 0.000000e+00 : f32
    %377 = vector.broadcast %cst_179 : f32 to vector<1x192xf32>
    %378 = arith.maximumf %376, %377 : vector<1x192xf32>
    %c0_180 = arith.constant 0 : index
    %c0_181 = arith.constant 0 : index
    %379 = vector.load %arg3[%c0_180, %c0_181] : memref<192x8xf32, #tpu.memory_space<vmem>>, vector<192x8xf32>
    %cst_182 = arith.constant dense<0.000000e+00> : vector<1x8xf32>
    %380 = tpu.matmul %378, %379, %cst_182 {dimension_numbers = #tpu.dot_dimension_numbers<[1], [0], [0], [1], [0, 0, 1, 1], [], []>} : vector<1x192xf32>, vector<192x8xf32>, vector<1x8xf32> -> vector<1x8xf32>
    %381 = vector.extract_strided_slice %380 {offsets = [0, 1], sizes = [1, 4], strides = [1, 1]} : vector<1x8xf32> to vector<1x4xf32>
    %382 = vector.extract_strided_slice %349 {offsets = [0, 1], sizes = [1, 4], strides = [1, 1]} : vector<1x192xf32> to vector<1x4xf32>
    %383 = arith.addf %381, %382 : vector<1x4xf32>
    %c0_183 = arith.constant 0 : index
    %c0_184 = arith.constant 0 : index
    %384 = vector.load %arg4[%c0_183, %c0_184] : memref<1x4xf32, #tpu.memory_space<vmem>>, vector<1x4xf32>
    tpu.vector_store %arg4[%c0_183, %c0_184], %383 {strides = array<i32>} : memref<1x4xf32, #tpu.memory_space<vmem>>, vector<1x4xf32>,
    %cst_185 = arith.constant dense<0xFF800000> : vector<1xf32>
    %385 = vector.multi_reduction <maximumf>, %383, %cst_185 [1] : vector<1x4xf32> to vector<1xf32>
    %386 = vector.shape_cast %385 : vector<1xf32> to vector<1x1xf32>
    %387 = vector.broadcast %386 : vector<1x1xf32> to vector<1x4xf32>
    %388 = arith.subf %383, %387 : vector<1x4xf32>
    %389 = math.exp %388 : vector<1x4xf32>
    %cst_186 = arith.constant dense<0.000000e+00> : vector<1xf32>
    %390 = vector.multi_reduction <add>, %389, %cst_186 [1] : vector<1x4xf32> to vector<1xf32>
    %391 = vector.shape_cast %390 : vector<1xf32> to vector<1x1xf32>
    %392 = vector.broadcast %391 : vector<1x1xf32> to vector<1x4xf32>
    %393 = arith.divf %389, %392 : vector<1x4xf32>
    %c0_187 = arith.constant 0 : index
    %c0_188 = arith.constant 0 : index
    %394 = vector.load %arg5[%c0_187, %c0_188] : memref<1x4xf32, #tpu.memory_space<vmem>>, vector<1x4xf32>
    tpu.vector_store %arg5[%c0_187, %c0_188], %393 {strides = array<i32>} : memref<1x4xf32, #tpu.memory_space<vmem>>, vector<1x4xf32>,
    return
  }
}

</mosaic_0001>

<bundles_post_ra>
// kernel: hipt_lgp_fc_forward.2
= control target key start
LH: loop header
LB: loop body
LE: loop exit
PB: predicated region body
PF: predicated region fallthrough
CT: control target
= control target key end

     0   :  { %8 = vsyncpa [#allocation3], 0  ;;  %s6994_s0 = inlined_call_operand.hbm [shape: bf16[8,256,384], index: 0, kind: input, shape index: {}]   ;;  %s6995_s1 = inlined_call_operand.vmem [shape: f32[384,192], index: 1, kind: input, shape index: {}]   ;;  %s6996_s2 = inlined_call_operand.hbm [shape: f32[1,192], index: 2, kind: input, shape index: {}]   ;;  %s6997_s3 = inlined_call_operand.vmem [shape: f32[8,192], index: 3, kind: output, shape index: {}]  }
   0x1   :  { %9 = vsyncpa [#allocation5], 0  ;;  %s2941_s12 = smov [#allocation2]   ;;  %s2893_s16 = scalar_lea.hbm %s6994_s0, 49152 }
   0x2   :  { %s15_s13 = sshll.u32 %s2941_s12, 4  ;;  %p2894_p0 = scmp.ne.s32.totalorder %s6994_s0, %s2893_s16  ;;  %s16_s13 = int_to_ptr.vmem [resolvable:$true] %s15_s13 }
   0x3   :  { %p2897_p1 = scmp.lt.u32.totalorder %s2893_s16, %s6994_s0 }
   0x5   :  { %p2899_p2 = pnand %p2897_p1, %p2894_p0 }
   0x7   :  { %2902 = shalt.err (!%p2899_p2)
}
   0x8   :  { %s2903_s21 = scalar_lea.vmem %s16_s13, 49152  ;;  %p2908_p4 = scmp.lt.s32.totalorder %s16_s13, %s16_s13 }
   0x9   :  { %p2904_p3 = scmp.ne.s32.totalorder %s16_s13, %s2903_s21  ;;  %p2909_p5 = scmp.lt.s32.totalorder %s2903_s21, %s2903_s21 }
   0xb   :  { %p2910_p6 = por %p2909_p5, %p2908_p4 }
   0xd   :  { %p2911_p7 = pnand %p2910_p6, %p2904_p3 }
   0xf   :  { %2914 = shalt.err (!%p2911_p7)
}
  0x10   :  { %s2942_s22 = smov 192   ;;  %s2943_s23 = smov 12  }
  0x11   :  { %21 = dma.hbm_to_vmem [thread:$0]  %s6994_s0, 49152, %s16_s13, [#allocation3], %s2942_s22, %s2942_s22, %s2943_s23  }
  0x12   :  { %s2944_s26 = smov [#allocation4]   ;;  %s2915_s30 = scalar_lea.hbm %s6996_s2, 32 }
  0x13   :  { %s30_s27 = sshll.u32 %s2944_s26, 4  ;;  %p2916_p8 = scmp.ne.s32.totalorder %s6996_s2, %s2915_s30  ;;  %s31_s27 = int_to_ptr.vmem [resolvable:$true] %s30_s27 }
  0x14   :  { %p2919_p9 = scmp.lt.u32.totalorder %s2915_s30, %s6996_s2 }
  0x16   :  { %p2921_p10 = pnand %p2919_p9, %p2916_p8 }
  0x18   :  { %2924 = shalt.err (!%p2921_p10)
}
  0x19   :  { %s2925_s8 = scalar_lea.vmem %s31_s27, 32  ;;  %p2930_p12 = scmp.lt.s32.totalorder %s31_s27, %s31_s27 }
  0x1a   :  { %p2926_p11 = scmp.ne.s32.totalorder %s31_s27, %s2925_s8  ;;  %p2931_p13 = scmp.lt.s32.totalorder %s2925_s8, %s2925_s8 }
  0x1c   :  { %p2932_p0 = por %p2931_p13, %p2930_p12 }
  0x1e   :  { %p2933_p1 = pnand %p2932_p0, %p2926_p11 }
  0x20   :  { %2936 = shalt.err (!%p2933_p1)
}
  0x21   :  { %33 = dma.hbm_to_vmem [thread:$0]  %s6996_s2, 32, %s31_s27, [#allocation5]  }
  0x22   :  { %2937 = dma.done.wait [#allocation3], 49152  }
  0x23   :  { %2938 = vsyncadd [#allocation3], 4294918144 }
  0x24   :  { %2939 = dma.done.wait [#allocation5], 32  }
  0x25   :  { %2940 = vsyncadd [#allocation5], 4294967264  ;;  %v2233_v0 = vld [vmem:[%s6995_s1 + $0x8] sm:$0xff]  ;;  %v2235_v1 = vld [vmem:[%s6995_s1 + $0x18] sm:$0xff]  ;;  %vm2364_vm0 = vcmask 1041409   ;;  %vm2366_vm1 = vcmask 1042434  }
  0x26   :  { %v2232_v2 = vld [vmem:[%s6995_s1] sm:$0xff]  ;;  %v2546_v3 = vpack.c.bf16 %v2235_v1, %v2233_v0  ;;  %v2234_v4 = vld [vmem:[%s6995_s1 + $0x10] sm:$0xff]  ;;  %v2237_v5 = vld [vmem:[%s6995_s1 + $0x28] sm:$0xff]  ;;  %vm2368_vm2 = vcmask 1043459   ;;  %vm2370_vm3 = vcmask 1044484   ;;  %vm2372_vm4 = vcmask 1045509  }
  0x27   :  { %v2239_v6 = vld [vmem:[%s6995_s1 + $0x38] sm:$0xff]  ;;  %v2548_v7 = vpack.c.bf16 %v2234_v4, %v2232_v2  ;;  %v2236_v9 = vld [vmem:[%s6995_s1 + $0x20] sm:$0xff]  ;;  %v2238_v10 = vld [vmem:[%s6995_s1 + $0x30] sm:$0xff]  ;;  %vm2374_vm5 = vcmask 1046534   ;;  %vm2376_vm6 = vcmask 1047559   ;;  %vm2538_vm7 = vcmask 523264  }
  0x28   :  { %v2550_v8 = vpack.c.bf16 %v2239_v6, %v2237_v5  ;;  %v2241_v11 = vld [vmem:[%s6995_s1 + $0x48] sm:$0xff]  ;;  %2547 = vmatprep.subr.bf16.mxu1 %v2546_v3  ;;  %v2243_v12 = vld [vmem:[%s6995_s1 + $0x58] sm:$0xff]  ;;  %v2552_v13 = vpack.c.bf16 %v2238_v10, %v2236_v9  ;;  %v2240_v15 = vld [vmem:[%s6995_s1 + $0x40] sm:$0xff] }
  0x29   :  { %2549 = vmatpush1.bf16.msra.mxu1 %v2548_v7  ;;  %v2554_v14 = vpack.c.bf16 %v2243_v12, %v2241_v11  ;;  %v2242_v16 = vld [vmem:[%s6995_s1 + $0x50] sm:$0xff]  ;;  %v2245_v17 = vld [vmem:[%s6995_s1 + $0x68] sm:$0xff]  ;;  %v2247_v18 = vld [vmem:[%s6995_s1 + $0x78] sm:$0xff] }
  0x2a   :  { %2551 = vmatprep.subr.bf16.mxu1 %v2550_v8  ;;  %v2556_v19 = vpack.c.bf16 %v2242_v16, %v2240_v15  ;;  %v2558_v20 = vpack.c.bf16 %v2247_v18, %v2245_v17  ;;  %v2244_v21 = vld [vmem:[%s6995_s1 + $0x60] sm:$0xff]  ;;  %v2246_v22 = vld [vmem:[%s6995_s1 + $0x70] sm:$0xff]  ;;  %v2249_v23 = vld [vmem:[%s6995_s1 + $0x88] sm:$0xff] }
  0x2b   :  { %v2251_v24 = vld [vmem:[%s6995_s1 + $0x98] sm:$0xff]  ;;  %v2560_v25 = vpack.c.bf16 %v2246_v22, %v2244_v21  ;;  %v2297_v26 = vld [vmem:[%s6995_s1 + $0x208] sm:$0xff]  ;;  %v2296_v28 = vld [vmem:[%s6995_s1 + $0x200] sm:$0xff] }
  0x2c   :  { %v2299_v27 = vld [vmem:[%s6995_s1 + $0x218] sm:$0xff]  ;;  %v2562_v29 = vpack.c.bf16 %v2251_v24, %v2249_v23  ;;  %v2248_v30 = vld [vmem:[%s6995_s1 + $0x80] sm:$0xff]  ;;  %v2250_v31 = vld [vmem:[%s6995_s1 + $0x90] sm:$0xff] }
  0x2d   :  { %2553 = vmatpush1.bf16.msra.mxu1 %v2552_v13  ;;  %v2610_v32 = vpack.c.bf16 %v2299_v27, %v2297_v26  ;;  %v2298_v33 = vld [vmem:[%s6995_s1 + $0x210] sm:$0xff]  ;;  %v2253_v34 = vld [vmem:[%s6995_s1 + $0xa8] sm:$0xff]  ;;  %v2255_v35 = vld [vmem:[%s6995_s1 + $0xb8] sm:$0xff]  ;;  %v2564_v41 = vpack.c.bf16 %v2250_v31, %v2248_v30 }
  0x2e   :  { %2555 = vmatprep.subr.bf16.mxu1 %v2554_v14  ;;  %v2612_v36 = vpack.c.bf16 %v2298_v33, %v2296_v28  ;;  %v2301_v37 = vld [vmem:[%s6995_s1 + $0x228] sm:$0xff]  ;;  %v2303_v38 = vld [vmem:[%s6995_s1 + $0x238] sm:$0xff]  ;;  %v2300_v39 = vld [vmem:[%s6995_s1 + $0x220] sm:$0xff]  ;;  %v2566_v46 = vpack.c.bf16 %v2255_v35, %v2253_v34 }
  0x2f   :  { %2611 = vmatprep.subr.bf16.mxu0 %v2610_v32  ;;  %v2302_v40 = vld [vmem:[%s6995_s1 + $0x230] sm:$0xff]  ;;  %v2252_v42 = vld [vmem:[%s6995_s1 + $0xa0] sm:$0xff]  ;;  %v2614_v44 = vpack.c.bf16 %v2303_v38, %v2301_v37  ;;  %v2257_v47 = vld [vmem:[%s6995_s1 + $0xc8] sm:$0xff] }
  0x30   :  { %v2254_v43 = vld [vmem:[%s6995_s1 + $0xb0] sm:$0xff]  ;;  %2613 = vmatpush1.bf16.msra.mxu0 %v2612_v36  ;;  %v2616_v45 = vpack.c.bf16 %v2302_v40, %v2300_v39  ;;  %v2305_v48 = vld [vmem:[%s6995_s1 + $0x248] sm:$0xff]  ;;  %v2307_v49 = vld [vmem:[%s6995_s1 + $0x258] sm:$0xff] }
  0x31   :  { %2557 = vmatpush1.bf16.msra.mxu1 %v2556_v19  ;;  %v2259_v50 = vld [vmem:[%s6995_s1 + $0xd8] sm:$0xff]  ;;  %2615 = vmatprep.subr.bf16.mxu0 %v2614_v44  ;;  %v2618_v51 = vpack.c.bf16 %v2307_v49, %v2305_v48  ;;  %v2304_v52 = vld [vmem:[%s6995_s1 + $0x240] sm:$0xff]  ;;  %v2306_v53 = vld [vmem:[%s6995_s1 + $0x250] sm:$0xff]  ;;  %v2568_v56 = vpack.c.bf16 %v2254_v43, %v2252_v42 }
  0x32   :  { %2559 = vmatprep.subr.bf16.mxu1 %v2558_v20  ;;  %v2256_v54 = vld [vmem:[%s6995_s1 + $0xc0] sm:$0xff]  ;;  %v2258_v55 = vld [vmem:[%s6995_s1 + $0xd0] sm:$0xff]  ;;  %v3113_v57 = vld [vmem:[%s6995_s1 + $0xe8] sm:$0xff]  ;;  %v2620_v58 = vpack.c.bf16 %v2306_v53, %v2304_v52  ;;  %v2570_v61 = vpack.c.bf16 %v2259_v50, %v2257_v47 }
  0x33   :  { %v2309_v59 = vld [vmem:[%s6995_s1 + $0x268] sm:$0xff]  ;;  %v2311_v60 = vld [vmem:[%s6995_s1 + $0x278] sm:$0xff]  ;;  %v2308_v0 = vld [vmem:[%s6995_s1 + $0x260] sm:$0xff]  ;;  %v2572_v10 = vpack.c.bf16 %v2258_v55, %v2256_v54 }
  0x34   :  { %2617 = vmatpush1.bf16.msra.mxu0 %v2616_v45  ;;  %v2263_v62 = vld [vmem:[%s6995_s1 + $0xf8] sm:$0xff]  ;;  %v2622_v63 = vpack.c.bf16 %v2311_v60, %v2309_v59  ;;  %v2310_v1 = vld [vmem:[%s6995_s1 + $0x270] sm:$0xff]  ;;  %v3133_v2 = vld [vmem:[%s6995_s1 + $0xe0] sm:$0xff] }
  0x35   :  { %2561 = vmatpush1.bf16.msra.mxu1 %v2560_v25  ;;  %2619 = vmatprep.subr.bf16.mxu0 %v2618_v51  ;;  %v3138_v3 = vld [vmem:[%s6995_s1 + $0xf0] sm:$0xff]  ;;  %v2313_v4 = vld [vmem:[%s6995_s1 + $0x288] sm:$0xff]  ;;  %v3151_v6 = vld [vmem:[%s6995_s1 + $0x118] sm:$0xff]  ;;  %v2624_v15 = vpack.c.bf16 %v2310_v1, %v2308_v0  ;;  %v2574_v16 = vpack.c.bf16 %v2263_v62, %v3113_v57 }
  0x36   :  { %2563 = vmatprep.subr.bf16.mxu1 %v2562_v29  ;;  %v3146_v5 = vld [vmem:[%s6995_s1 + $0x108] sm:$0xff]  ;;  %v3156_v7 = vld [vmem:[%s6995_s1 + $0x100] sm:$0xff]  ;;  %v3161_v8 = vld [vmem:[%s6995_s1 + $0x110] sm:$0xff]  ;;  %v2576_v38 = vpack.c.bf16 %v3138_v3, %v3133_v2 }
  0x37   :  { %v2315_v9 = vld [vmem:[%s6995_s1 + $0x298] sm:$0xff]  ;;  %v3169_v11 = vld [vmem:[%s6995_s1 + $0x128] sm:$0xff]  ;;  %v3179_v13 = vld [vmem:[%s6995_s1 + $0x120] sm:$0xff]  ;;  %v2578_v44 = vpack.c.bf16 %v3151_v6, %v3146_v5  ;;  %v2580_v45 = vpack.c.bf16 %v3161_v8, %v3156_v7 }
  0x38   :  { %v3174_v12 = vld [vmem:[%s6995_s1 + $0x138] sm:$0xff]  ;;  %v3184_v14 = vld [vmem:[%s6995_s1 + $0x130] sm:$0xff]  ;;  %2621 = vmatpush1.bf16.msra.mxu0 %v2620_v58  ;;  %v3190_v17 = vld [vmem:[%s6995_s1 + $0x148] sm:$0xff]  ;;  %v2626_v25 = vpack.c.bf16 %v2315_v9, %v2313_v4 }
  0x39   :  { %2565 = vmatpush1.bf16.msra.mxu1 %v2564_v41  ;;  %v3195_v18 = vld [vmem:[%s6995_s1 + $0x158] sm:$0xff]  ;;  %v3200_v19 = vld [vmem:[%s6995_s1 + $0x140] sm:$0xff]  ;;  %v3205_v20 = vld [vmem:[%s6995_s1 + $0x150] sm:$0xff]  ;;  %2623 = vmatprep.subr.bf16.mxu0 %v2622_v63  ;;  %v2582_v50 = vpack.c.bf16 %v3174_v12, %v3169_v11 }
  0x3a   :  { %2567 = vmatprep.subr.bf16.mxu1 %v2566_v46  ;;  %v3210_v21 = vld [vmem:[%s6995_s1 + $0x168] sm:$0xff]  ;;  %v3215_v22 = vld [vmem:[%s6995_s1 + $0x178] sm:$0xff]  ;;  %v3220_v23 = vld [vmem:[%s6995_s1 + $0x160] sm:$0xff] }
  0x3b   :  { %v3225_v24 = vld [vmem:[%s6995_s1 + $0x170] sm:$0xff]  ;;  %v2312_v26 = vld [vmem:[%s6995_s1 + $0x280] sm:$0xff]  ;;  %v3236_v28 = vld [vmem:[%s6995_s1 + $0x188] sm:$0xff] }
  0x3c   :  { %v2314_v27 = vld [vmem:[%s6995_s1 + $0x290] sm:$0xff]  ;;  %v3241_v29 = vld [vmem:[%s6995_s1 + $0x198] sm:$0xff]  ;;  %v3246_v30 = vld [vmem:[%s6995_s1 + $0x180] sm:$0xff]  ;;  %2625 = vmatpush1.bf16.msra.mxu0 %v2624_v15 }
  0x3d   :  { %2569 = vmatpush1.bf16.msra.mxu1 %v2568_v56  ;;  %v3251_v31 = vld [vmem:[%s6995_s1 + $0x190] sm:$0xff]  ;;  %v3256_v32 = vld [vmem:[%s6995_s1 + $0x1a8] sm:$0xff]  ;;  %v3261_v33 = vld [vmem:[%s6995_s1 + $0x1b8] sm:$0xff]  ;;  %v2628_v46 = vpack.c.bf16 %v2314_v27, %v2312_v26  ;;  %2627 = vmatprep.subr.bf16.mxu0 %v2626_v25 }
  0x3e   :  { %2571 = vmatprep.subr.bf16.mxu1 %v2570_v61  ;;  %v3266_v34 = vld [vmem:[%s6995_s1 + $0x1a0] sm:$0xff]  ;;  %v3271_v35 = vld [vmem:[%s6995_s1 + $0x1b0] sm:$0xff]  ;;  %v2317_v36 = vld [vmem:[%s6995_s1 + $0x2a8] sm:$0xff] }
  0x3f   :  { %v2319_v37 = vld [vmem:[%s6995_s1 + $0x2b8] sm:$0xff]  ;;  %v3284_v39 = vld [vmem:[%s6995_s1 + $0x2a0] sm:$0xff]  ;;  %v3289_v40 = vld [vmem:[%s6995_s1 + $0x2b0] sm:$0xff] }
  0x40   :  { %v3294_v41 = vld [vmem:[%s6995_s1 + $0x1c8] sm:$0xff]  ;;  %v3299_v42 = vld [vmem:[%s6995_s1 + $0x1d8] sm:$0xff]  ;;  %v3304_v43 = vld [vmem:[%s6995_s1 + $0x1c0] sm:$0xff]  ;;  %v2630_v52 = vpack.c.bf16 %v2319_v37, %v2317_v36  ;;  %2629 = vmatpush1.bf16.msra.mxu0 %v2628_v46  ;;  %v2632_v7 = vpack.c.bf16 %v3289_v40, %v3284_v39 }
  0x41   :  { %2573 = vmatpush1.bf16.msra.mxu1 %v2572_v10  ;;  %v3313_v47 = vld [vmem:[%s6995_s1 + $0x1d0] sm:$0xff]  ;;  %v3318_v48 = vld [vmem:[%s6995_s1 + $0x2c8] sm:$0xff]  ;;  %v3323_v49 = vld [vmem:[%s6995_s1 + $0x2d8] sm:$0xff] }
  0x42   :  { %2575 = vmatprep.subr.bf16.mxu1 %v2574_v16  ;;  %v3332_v53 = vld [vmem:[%s6995_s1 + $0x2c0] sm:$0xff]  ;;  %v3337_v54 = vld [vmem:[%s6995_s1 + $0x2d0] sm:$0xff]  ;;  %v3342_v55 = vld [vmem:[%s6995_s1 + $0x1e8] sm:$0xff]  ;;  %2631 = vmatprep.subr.bf16.mxu0 %v2630_v52  ;;  %v2634_v15 = vpack.c.bf16 %v3323_v49, %v3318_v48 }
  0x43   :  { %v3347_v56 = vld [vmem:[%s6995_s1 + $0x1f8] sm:$0xff]  ;;  %v3360_v61 = vld [vmem:[%s6995_s1 + $0x1e0] sm:$0xff]  ;;  %v3365_v62 = vld [vmem:[%s6995_s1 + $0x1f0] sm:$0xff] }
  0x44   :  { %v3370_v63 = vld [vmem:[%s6995_s1 + $0x2e8] sm:$0xff]  ;;  %v3383_v4 = vld [vmem:[%s6995_s1 + $0x2f8] sm:$0xff]  ;;  %v3388_v5 = vld [vmem:[%s6995_s1 + $0x2e0] sm:$0xff]  ;;  %2633 = vmatpush1.bf16.msra.mxu0 %v2632_v7 }
  0x45   :  { %v3393_v6 = vld [vmem:[%s6995_s1 + $0x2f0] sm:$0xff]  ;;  %2577 = vmatpush1.bf16.msra.mxu1 %v2576_v38  ;;  %v3401_v10 = vld [vmem:[#allocation2] sm:$0xff]  ;;  %v3405_v12 = vld [vmem:[#allocation2 + $0x18] sm:$0xff]  ;;  %v2636_v38 = vpack.c.bf16 %v3337_v54, %v3332_v53  ;;  %2635 = vmatprep.subr.bf16.mxu0 %v2634_v15  ;;  %v7527_v15 = vpack.c.bf16 %v3184_v14, %v3179_v13 }
  0x46   :  { %7517 = vst [vmem:[#allocation8_spill] sm:$0xff] %v3401_v10  ;;  %v3403_v11 = vld [vmem:[#allocation2 + $0xc] sm:$0xff]  ;;  %7519 = vst [vmem:[#allocation10_spill] sm:$0xff] %v3405_v12  ;;  %2579 = vmatprep.subr.bf16.mxu1 %v2578_v44  ;;  %v3409_v16 = vld [vmem:[#allocation2 + $0x24] sm:$0xff]  ;;  %v553_v27 = vunpack.c.h.bf16 %v3401_v10  ;;  %v559_v37 = vunpack.c.h.bf16 %v3405_v12  ;;  %v2638_v44 = vpack.c.bf16 %v3383_v4, %v3370_v63 }
  0x47   :  { %7518 = vst [vmem:[#allocation9_spill] sm:$0xff] %v3403_v11  ;;  %7520 = vst [vmem:[#allocation11_spill] sm:$0xff] %v3409_v16  ;;  %v3411_v25 = vld [vmem:[#allocation2 + $0x30] sm:$0xff]  ;;  %v3413_v26 = vld [vmem:[#allocation2 + $0x3c] sm:$0xff]  ;;  %v556_v36 = vunpack.c.h.bf16 %v3403_v11  ;;  %v562_v40 = vunpack.c.h.bf16 %v3409_v16 }
  0x48   :  { %7521 = vst [vmem:[#allocation12_spill] sm:$0xff] %v3411_v25  ;;  %7522 = vst [vmem:[#allocation13_spill] sm:$0xff] %v3413_v26  ;;  %v3426_v46 = vld [vmem:[#allocation2 + $0x48] sm:$0xff]  ;;  %v3428_v48 = vld [vmem:[#allocation2 + $0x54] sm:$0xff]  ;;  %v565_v2 = vunpack.c.h.bf16 %v3411_v25  ;;  %v568_v1 = vunpack.c.h.bf16 %v3413_v26  ;;  %2637 = vmatpush1.bf16.msra.mxu0 %v2636_v38 }
  0x49   :  { %7523 = vst [vmem:[#allocation14_spill] sm:$0xff] %v3426_v46  ;;  %v3430_v49 = vld [vmem:[#allocation2 + $0x60] sm:$0xff]  ;;  %v3434_v9 = vld [vmem:[#allocation2 + $0x6c] sm:$0xff]  ;;  %v3436_v53 = vld [vmem:[#allocation2 + $0x78] sm:$0xff]  ;;  %v1357_v39 = vadd.f32 %v556_v36, %v553_v27  ;;  %2581 = vmatpush1.bf16.msra.mxu1 %v2580_v45  ;;  %2639 = vmatprep.subr.bf16.mxu0 %v2638_v44  ;;  %v7536_v44 = vpack.c.bf16 %v3393_v6, %v3388_v5  ;;  %v7539_v26 = vunpack.c.h.bf16 %v3428_v48 }
  0x4a   :  { %v3438_v54 = vld [vmem:[#allocation2 + $0x84] sm:$0xff]  ;;  %v3442_v4 = vld [vmem:[#allocation2 + $0x90] sm:$0xff]  ;;  %v3444_v8 = vld [vmem:[#allocation2 + $0x9c] sm:$0xff]  ;;  %2583 = vmatprep.subr.bf16.mxu1 %v2582_v50 }
  0x4b   :  { %v3446_v3 = vld [vmem:[#allocation2 + $0xa8] sm:$0xff]  ;;  %v3452_v27 = vld [vmem:[#allocation2 + $0xb4] sm:$0xff]  ;;  %v3454_v45 = vld [vmem:[#allocation2 + $0xc0] sm:$0xff]  ;;  %v1358_v52 = vadd.f32 %v1357_v39, %v559_v37 }
  0x4c   :  { %v3456_v7 = vld [vmem:[#allocation2 + $0xcc] sm:$0xff]  ;;  %v3461_v58 = vld [vmem:[#allocation2 + $0xd8] sm:$0xff]  ;;  %v3463_v0 = vld [vmem:[#allocation2 + $0xe4] sm:$0xff]  ;;  %2641 = vmatpush1.bf16.msra.mxu0 %v7536_v44  ;;  %v7538_v44 = vunpack.c.h.bf16 %v3426_v46 }
  0x4d   :  { %7524 = vst [vmem:[#allocation15_spill] sm:$0xff] %v3461_v58  ;;  %7525 = vst [vmem:[#allocation16_spill] sm:$0xff] %v3463_v0  ;;  %v3465_v60 = vld [vmem:[#allocation2 + $0xf0] sm:$0xff]  ;;  %v3471_v36 = vld [vmem:[#allocation2 + $0xfc] sm:$0xff]  ;;  %v1359_v10 = vadd.f32 %v1358_v52, %v562_v40  ;;  %2585 = vmatpush1.bf16.msra.mxu1 %v7527_v15  ;;  %v7529_v40 = vpack.c.bf16 %v3195_v18, %v3190_v17 }
  0x4e   :  { %7526 = vst [vmem:[#allocation17_spill] sm:$0xff] %v3471_v36  ;;  %v3473_v63 = vld [vmem:[#allocation2 + $0x108] sm:$0xff]  ;;  %v3475_v59 = vld [vmem:[#allocation2 + $0x114] sm:$0xff]  ;;  %v3483_v57 = vld [vmem:[#allocation2 + $0x120] sm:$0xff]  ;;  %v7535_v36 = vpack.c.bf16 %v3205_v20, %v3200_v19  ;;  %v7537_v19 = vpack.c.bf16 %v3215_v22, %v3210_v21 }
  0x4f   :  { %v3485_v51 = vld [vmem:[#allocation2 + $0x12c] sm:$0xff]  ;;  %v3487_v50 = vld [vmem:[#allocation2 + $0x138] sm:$0xff]  ;;  %2587 = vmatprep.subr.bf16.mxu1 %v7529_v40  ;;  %v3496_v13 = vld [vmem:[#allocation2 + $0x144] sm:$0xff]  ;;  %v1360_v39 = vadd.f32 %v1359_v10, %v565_v2 }
  0x50   :  { %7528 = vst [vmem:[#allocation18_spill] sm:$0xff] %v3487_v50  ;;  %7530 = vst [vmem:[#allocation19_spill] sm:$0xff] %v3496_v13  ;;  %v3498_v14 = vld [vmem:[#allocation2 + $0x150] sm:$0xff]  ;;  %v3500_v38 = vld [vmem:[#allocation2 + $0x15c] sm:$0xff]  ;;  %v7547_v13 = vunpack.c.h.bf16 %v3434_v9  ;;  %v7549_v9 = vpack.c.bf16 %v3261_v33, %v3256_v32 }
  0x51   :  { %7531 = vst [vmem:[#allocation20_spill] sm:$0xff] %v3498_v14  ;;  %7532 = vst [vmem:[#allocation21_spill] sm:$0xff] %v3500_v38  ;;  %v3505_v12 = vld [vmem:[#allocation2 + $0x168] sm:$0xff]  ;;  %v3507_v11 = vld [vmem:[#allocation2 + $0x174] sm:$0xff]  ;;  %v1361_v37 = vadd.f32 %v1360_v39, %v568_v1  ;;  %2589 = vmatpush1.bf16.msra.mxu1 %v7535_v36 }
  0x52   :  { %7533 = vst [vmem:[#allocation22_spill] sm:$0xff] %v3505_v12  ;;  %7534 = vst [vmem:[#allocation23_spill] sm:$0xff] %v3507_v11  ;;  %v104_v17 = vld [vmem:[#allocation2 + $0x180] sm:$0xff]  ;;  %v106_v58 = vld [vmem:[#allocation2 + $0x18c] sm:$0xff]  ;;  %2591 = vmatprep.subr.bf16.mxu1 %v7537_v19 }
  0x53   :  { %v108_v52 = vld [vmem:[#allocation2 + $0x198] sm:$0xff]  ;;  %v110_v0 = vld [vmem:[#allocation2 + $0x1a4] sm:$0xff]  ;;  %v649_v10 = vunpack.c.h.bf16 %v104_v17  ;;  %v3521_v40 = vld [vmem:[#allocation2 + $0x1b0] sm:$0xff]  ;;  %v652_v17 = vunpack.c.h.bf16 %v106_v58  ;;  %v1362_v15 = vadd.f32 %v1361_v37, %v7538_v44 }
  0x54   :  { %v3523_v16 = vld [vmem:[#allocation2 + $0x1bc] sm:$0xff]  ;;  %v3525_v18 = vld [vmem:[#allocation2 + $0x1c8] sm:$0xff]  ;;  %v655_v1 = vunpack.c.h.bf16 %v108_v52  ;;  %v3532_v20 = vld [vmem:[#allocation2 + $0x1d4] sm:$0xff]  ;;  %v658_v19 = vunpack.c.h.bf16 %v110_v0  ;;  %v661_v37 = vunpack.c.h.bf16 %v3521_v40  ;;  %v7540_v0 = vpack.c.bf16 %v3225_v24, %v3220_v23 }
  0x55   :  { %v3534_v5 = vld [vmem:[#allocation2 + $0x1e0] sm:$0xff]  ;;  %v3536_v6 = vld [vmem:[#allocation2 + $0x1ec] sm:$0xff]  ;;  %v3543_v52 = vld [vmem:[#allocation2 + $0x1f8] sm:$0xff]  ;;  %v1468_v25 = vadd.f32 %v652_v17, %v649_v10  ;;  %v664_v44 = vunpack.c.h.bf16 %v3523_v16  ;;  %v1363_v38 = vadd.f32 %v1362_v15, %v7539_v26  ;;  %v7541_v26 = vpack.c.bf16 %v3241_v29, %v3236_v28 }
  0x56   :  { %v3545_v2 = vld [vmem:[#allocation2 + $0x204] sm:$0xff]  ;;  %v3547_v21 = vld [vmem:[#allocation2 + $0x210] sm:$0xff]  ;;  %v3551_v36 = vld [vmem:[#allocation2 + $0x21c] sm:$0xff]  ;;  %2593 = vmatpush1.bf16.msra.mxu1 %v7540_v0  ;;  %v7543_v40 = vunpack.c.h.bf16 %v3430_v49  ;;  %v7551_v49 = vunpack.c.h.bf16 %v3436_v53 }
  0x57   :  { %v3553_v39 = vld [vmem:[#allocation2 + $0x228] sm:$0xff]  ;;  %v3555_v12 = vld [vmem:[#allocation2 + $0x234] sm:$0xff]  ;;  %v3565_v10 = vld [vmem:[#allocation2 + $0x240] sm:$0xff]  ;;  %v1469_v58 = vadd.f32 %v1468_v25, %v655_v1  ;;  %2595 = vmatprep.subr.bf16.mxu1 %v7541_v26  ;;  %v7548_v26 = vpack.c.bf16 %v3251_v31, %v3246_v30 }
  0x58   :  { %v3567_v17 = vld [vmem:[#allocation2 + $0x24c] sm:$0xff]  ;;  %v3569_v14 = vld [vmem:[#allocation2 + $0x258] sm:$0xff]  ;;  %v3577_v48 = vld [vmem:[#allocation2 + $0x264] sm:$0xff]  ;;  %v1364_v16 = vadd.f32 %v1363_v38, %v7543_v40 }
  0x59   :  { %v3579_v23 = vld [vmem:[#allocation2 + $0x270] sm:$0xff]  ;;  %v3581_v24 = vld [vmem:[#allocation2 + $0x27c] sm:$0xff]  ;;  %v3588_v25 = vld [vmem:[#allocation2 + $0x288] sm:$0xff]  ;;  %v1470_v15 = vadd.f32 %v1469_v58, %v658_v19 }
  0x5a   :  { %7542 = vst [vmem:[#allocation24_spill] sm:$0xff] %v3581_v24  ;;  %7544 = vst [vmem:[#allocation25_spill] sm:$0xff] %v3588_v25  ;;  %v3590_v1 = vld [vmem:[#allocation2 + $0x294] sm:$0xff]  ;;  %v3592_v28 = vld [vmem:[#allocation2 + $0x2a0] sm:$0xff]  ;;  %v1365_v29 = vadd.f32 %v1364_v16, %v7547_v13  ;;  %2597 = vmatpush1.bf16.msra.mxu1 %v7548_v26 }
  0x5b   :  { %7545 = vst [vmem:[#allocation26_spill] sm:$0xff] %v3592_v28  ;;  %v3597_v11 = vld [vmem:[#allocation2 + $0x2ac] sm:$0xff]  ;;  %v3599_v0 = vld [vmem:[#allocation2 + $0x2b8] sm:$0xff]  ;;  %v3601_v22 = vld [vmem:[#allocation2 + $0x2c4] sm:$0xff]  ;;  %v1471_v40 = vadd.f32 %v1470_v15, %v661_v37  ;;  %2599 = vmatprep.subr.bf16.mxu1 %v7549_v9  ;;  %v7555_v28 = vunpack.c.h.bf16 %v3438_v54  ;;  %v7556_v9 = vpack.c.bf16 %v3271_v35, %v3266_v34 }
  0x5c   :  { %7546 = vst [vmem:[#allocation27_spill] sm:$0xff] %v3601_v22  ;;  %v3611_v58 = vld [vmem:[#allocation2 + $0x2d0] sm:$0xff]  ;;  %v3613_v19 = vld [vmem:[#allocation2 + $0x2dc] sm:$0xff]  ;;  %v3615_v46 = vld [vmem:[#allocation2 + $0x2e8] sm:$0xff]  ;;  %v1366_v38 = vadd.f32 %v1365_v29, %v7551_v49  ;;  %v7557_v49 = vunpack.c.h.bf16 %v3525_v18  ;;  %v7562_v29 = vunpack.c.h.bf16 %v3442_v4 }
  0x5d   :  { %v3623_v13 = vld [vmem:[#allocation2 + $0x2f4] sm:$0xff]  ;;  %v3625_v30 = vld [vmem:[#allocation2 + $0x300] sm:$0xff]  ;;  %v3627_v31 = vld [vmem:[#allocation2 + $0x30c] sm:$0xff]  ;;  %v1472_v16 = vadd.f32 %v1471_v40, %v664_v44 }
  0x5e   :  { %7550 = vst [vmem:[#allocation28_spill] sm:$0xff] %v3627_v31  ;;  %v3634_v37 = vld [vmem:[#allocation2 + $0x318] sm:$0xff]  ;;  %v3636_v15 = vld [vmem:[#allocation2 + $0x324] sm:$0xff]  ;;  %v3638_v32 = vld [vmem:[#allocation2 + $0x330] sm:$0xff]  ;;  %v1367_v33 = vadd.f32 %v1366_v38, %v7555_v28  ;;  %2601 = vmatpush1.bf16.msra.mxu1 %v7556_v9  ;;  %v7558_v28 = vpack.c.bf16 %v3299_v42, %v3294_v41  ;;  %v7566_v9 = vunpack.c.h.bf16 %v3532_v20  ;;  %v7570_v42 = vunpack.c.h.bf16 %v3444_v8 }
  0x5f   :  { %7552 = vst [vmem:[#allocation29_spill] sm:$0xff] %v3636_v15  ;;  %7553 = vst [vmem:[#allocation30_spill] sm:$0xff] %v3638_v32  ;;  %v3643_v25 = vld [vmem:[#allocation2 + $0x33c] sm:$0xff]  ;;  %v3645_v26 = vld [vmem:[#allocation2 + $0x348] sm:$0xff]  ;;  %v1473_v54 = vadd.f32 %v1472_v16, %v7557_v49  ;;  %v7571_v31 = vpack.c.bf16 %v3313_v47, %v3304_v43  ;;  %v7575_v32 = vunpack.c.h.bf16 %v3534_v5 }
  0x60   :  { %v3647_v50 = vld [vmem:[#allocation2 + $0x354] sm:$0xff]  ;;  %v3657_v44 = vld [vmem:[#allocation2 + $0x360] sm:$0xff]  ;;  %v3659_v40 = vld [vmem:[#allocation2 + $0x36c] sm:$0xff]  ;;  %2603 = vmatprep.subr.bf16.mxu1 %v7558_v28  ;;  %v1368_v18 = vadd.f32 %v1367_v33, %v7562_v29  ;;  %v7580_v29 = vunpack.c.h.bf16 %v3446_v3 }
  0x61   :  { %7554 = vst [vmem:[#allocation31_spill] sm:$0xff] %v3647_v50  ;;  %v3661_v24 = vld [vmem:[#allocation2 + $0x378] sm:$0xff]  ;;  %v3671_v34 = vld [vmem:[#allocation2 + $0x384] sm:$0xff]  ;;  %v3673_v35 = vld [vmem:[#allocation2 + $0x390] sm:$0xff]  ;;  %v1474_v22 = vadd.f32 %v1473_v54, %v7566_v9 }
  0x62   :  { %7559 = vst [vmem:[#allocation32_spill] sm:$0xff] %v3671_v34  ;;  %7560 = vst [vmem:[#allocation33_spill] sm:$0xff] %v3673_v35  ;;  %v3675_v38 = vld [vmem:[#allocation2 + $0x39c] sm:$0xff]  ;;  %v3682_v16 = vld [vmem:[#allocation2 + $0x3a8] sm:$0xff]  ;;  %v1369_v28 = vadd.f32 %v1368_v18, %v7570_v42  ;;  %2605 = vmatpush1.bf16.msra.mxu1 %v7571_v31  ;;  %v7576_v18 = vpack.c.bf16 %v3347_v56, %v3342_v55  ;;  %v7584_v42 = vunpack.c.h.bf16 %v3536_v6  ;;  %v7588_v56 = vunpack.c.h.bf16 %v3452_v27 }
  0x63   :  { %7561 = vst [vmem:[#allocation34_spill] sm:$0xff] %v3675_v38  ;;  %7563 = vst [vmem:[#allocation35_spill] sm:$0xff] %v3682_v16  ;;  %v3684_v49 = vld [vmem:[#allocation2 + $0x3b4] sm:$0xff]  ;;  %v3686_v41 = vld [vmem:[#allocation2 + $0x3c0] sm:$0xff]  ;;  %v1475_v8 = vadd.f32 %v1474_v22, %v7575_v32  ;;  %v7589_v38 = vpack.c.bf16 %v3365_v62, %v3360_v61  ;;  %v7594_v62 = vunpack.c.h.bf16 %v3545_v2 }
  0x64   :  { %7564 = vst [vmem:[#allocation36_spill] sm:$0xff] %v3684_v49  ;;  %7565 = vst [vmem:[#allocation37_spill] sm:$0xff] %v3686_v41  ;;  %v3693_v15 = vld [vmem:[#allocation2 + $0x3cc] sm:$0xff]  ;;  %v3695_v53 = vld [vmem:[#allocation2 + $0x3d8] sm:$0xff]  ;;  %2607 = vmatprep.subr.bf16.mxu1 %v7576_v18  ;;  %v1370_v5 = vadd.f32 %v1369_v28, %v7580_v29  ;;  %v7590_v41 = vunpack.c.h.bf16 %v3543_v52  ;;  %v7598_v52 = vunpack.c.h.bf16 %v3456_v7 }
  0x65   :  { %7567 = vst [vmem:[#allocation38_spill] sm:$0xff] %v3693_v15  ;;  %7568 = vst [vmem:[#allocation39_spill] sm:$0xff] %v3695_v53  ;;  %v3697_v4 = vld [vmem:[#allocation2 + $0x3e4] sm:$0xff]  ;;  %v3707_v20 = vld [vmem:[#allocation2 + $0x3f0] sm:$0xff]  ;;  %v1476_v50 = vadd.f32 %v1475_v8, %v7584_v42 }
  0x66   :  { %7569 = vst [vmem:[#allocation40_spill] sm:$0xff] %v3697_v4  ;;  %7572 = vst [vmem:[#allocation41_spill] sm:$0xff] %v3707_v20  ;;  %v3709_v54 = vld [vmem:[#allocation2 + $0x3fc] sm:$0xff]  ;;  %v3711_v9 = vld [vmem:[#allocation2 + $0x408] sm:$0xff]  ;;  %v1371_v18 = vadd.f32 %v1370_v5, %v7588_v56  ;;  %2609 = vmatpush1.bf16.msra.mxu1 %v7589_v38  ;;  %v7591_v4 = vunpack.c.h.bf16 %v3454_v45 }
  0x67   :  { %7573 = vst [vmem:[#allocation42_spill] sm:$0xff] %v3709_v54  ;;  %7574 = vst [vmem:[#allocation43_spill] sm:$0xff] %v3711_v9  ;;  %v3721_v43 = vld [vmem:[#allocation2 + $0x414] sm:$0xff]  ;;  %v3723_v47 = vld [vmem:[#allocation2 + $0x420] sm:$0xff]  ;;  %v1477_v27 = vadd.f32 %v1476_v50, %v7590_v41 }
  0x68   :  { %7577 = vst [vmem:[#allocation44_spill] sm:$0xff] %v3721_v43  ;;  %7578 = vst [vmem:[#allocation45_spill] sm:$0xff] %v3723_v47  ;;  %v3725_v31 = vld [vmem:[#allocation2 + $0x42c] sm:$0xff]  ;;  %v3732_v22 = vld [vmem:[#allocation2 + $0x438] sm:$0xff]  ;;  %v1372_v28 = vadd.f32 %v1371_v18, %v7591_v4  ;;  %v7602_v4 = vunpack.c.h.bf16 %v3547_v21 }
  0x69   :  { %7579 = vst [vmem:[#allocation46_spill] sm:$0xff] %v3725_v31  ;;  %7581 = vst [vmem:[#allocation47_spill] sm:$0xff] %v3732_v22  ;;  %v3734_v32 = vld [vmem:[#allocation2 + $0x444] sm:$0xff]  ;;  %v3736_v55 = vld [vmem:[#allocation2 + $0x450] sm:$0xff]  ;;  %v1478_v38 = vadd.f32 %v1477_v27, %v7594_v62 }
  0x6a   :  { %7582 = vst [vmem:[#allocation48_spill] sm:$0xff] %v3734_v32  ;;  %7583 = vst [vmem:[#allocation49_spill] sm:$0xff] %v3736_v55  ;;  %v3743_v49 = vld [vmem:[#allocation2 + $0x45c] sm:$0xff]  ;;  %v3745_v33 = vld [vmem:[#allocation2 + $0x468] sm:$0xff]  ;;  %v1373_v41 = vadd.f32 %v1372_v28, %v7598_v52  ;;  %v7611_v28 = vunpack.c.h.bf16 %v3551_v36 }
  0x6b   :  { %7585 = vst [vmem:[#allocation50_spill] sm:$0xff] %v3743_v49  ;;  %7586 = vst [vmem:[#allocation51_spill] sm:$0xff] %v3745_v33  ;;  %v3747_v3 = vld [vmem:[#allocation2 + $0x474] sm:$0xff]  ;;  %v3757_v6 = vld [vmem:[#allocation2 + $0x480] sm:$0xff]  ;;  %v1479_v18 = vadd.f32 %v1478_v38, %v7602_v4 }
  0x6c   :  { %7587 = vst [vmem:[#allocation52_spill] sm:$0xff] %v3747_v3  ;;  %v3759_v8 = vld [vmem:[#allocation2 + $0x48c] sm:$0xff]  ;;  %v3761_v42 = vld [vmem:[#allocation2 + $0x498] sm:$0xff]  ;;  %v3768_v5 = vld [vmem:[#allocation2 + $0x4a4] sm:$0xff] }
  0x6d   :  { %v3770_v56 = vld [vmem:[#allocation2 + $0x4b0] sm:$0xff]  ;;  %v3772_v61 = vld [vmem:[#allocation2 + $0x4bc] sm:$0xff]  ;;  %v3779_v47 = vld [vmem:[#allocation2 + $0x4c8] sm:$0xff]  ;;  %v1480_v52 = vadd.f32 %v1479_v18, %v7611_v28  ;;  %v7624_v18 = vunpack.c.h.bf16 %v3465_v60 }
  0x6e   :  { %v3781_v29 = vld [vmem:[#allocation2 + $0x4d4] sm:$0xff]  ;;  %v3783_v50 = vld [vmem:[#allocation2 + $0x4e0] sm:$0xff]  ;;  %v3790_v32 = vld [vmem:[#allocation2 + $0x4ec] sm:$0xff] }
  0x6f   :  { %7592 = vst [vmem:[#allocation53_spill] sm:$0xff] %v3781_v29  ;;  %7593 = vst [vmem:[#allocation54_spill] sm:$0xff] %v3783_v50  ;;  %v3792_v9 = vld [vmem:[#allocation2 + $0x4f8] sm:$0xff]  ;;  %v3794_v45 = vld [vmem:[#allocation2 + $0x504] sm:$0xff] }
  0x70   :  { %7595 = vst [vmem:[#allocation55_spill] sm:$0xff] %v3790_v32  ;;  %7596 = vst [vmem:[#allocation56_spill] sm:$0xff] %v3792_v9  ;;  %v3801_v33 = vld [vmem:[#allocation2 + $0x510] sm:$0xff]  ;;  %v3803_v31 = vld [vmem:[#allocation2 + $0x51c] sm:$0xff] }
  0x71   :  { %7597 = vst [vmem:[#allocation57_spill] sm:$0xff] %v3794_v45  ;;  %7599 = vst [vmem:[#allocation58_spill] sm:$0xff] %v3801_v33  ;;  %v3805_v2 = vld [vmem:[#allocation2 + $0x528] sm:$0xff]  ;;  %v3812_v49 = vld [vmem:[#allocation2 + $0x534] sm:$0xff] }
  0x72   :  { %7600 = vst [vmem:[#allocation59_spill] sm:$0xff] %v3803_v31  ;;  %7601 = vst [vmem:[#allocation60_spill] sm:$0xff] %v3805_v2  ;;  %v3814_v55 = vld [vmem:[#allocation2 + $0x540] sm:$0xff]  ;;  %v3816_v7 = vld [vmem:[#allocation2 + $0x54c] sm:$0xff] }
  0x73   :  { %7603 = vst [vmem:[#allocation61_spill] sm:$0xff] %v3812_v49  ;;  %7604 = vst [vmem:[#allocation62_spill] sm:$0xff] %v3814_v55  ;;  %v7606_v27 = vld [vmem:[#allocation15_spill] sm:$0xff]  ;;  %v3825_v3 = vld [vmem:[#allocation2 + $0x564] sm:$0xff] }
  0x74   :  { %7605 = vst [vmem:[#allocation63_spill] sm:$0xff] %v3816_v7  ;;  %v7607_v43 = vunpack.c.h.bf16 %v7606_v27  ;;  %v3823_v54 = vld [vmem:[#allocation2 + $0x558] sm:$0xff]  ;;  %7609 = vst [vmem:[#allocation64_spill] sm:$0xff] %v3825_v3  ;;  %v3827_v21 = vld [vmem:[#allocation2 + $0x570] sm:$0xff] }
  0x75   :  { %7608 = vst [vmem:[#allocation15_spill] sm:$0xff] %v3823_v54  ;;  %7610 = vst [vmem:[#allocation65_spill] sm:$0xff] %v3827_v21  ;;  %v3834_v53 = vld [vmem:[#allocation2 + $0x57c] sm:$0xff]  ;;  %v3836_v22 = vld [vmem:[#allocation2 + $0x588] sm:$0xff] }
  0x76   :  { %v1374_v62 = vadd.f32 %v1373_v41, %v7607_v43  ;;  %7612 = vst [vmem:[#allocation66_spill] sm:$0xff] %v3834_v53  ;;  %7613 = vst [vmem:[#allocation67_spill] sm:$0xff] %v3836_v22  ;;  %v3838_v43 = vld [vmem:[#allocation2 + $0x594] sm:$0xff]  ;;  %v7615_v38 = vld [vmem:[#allocation16_spill] sm:$0xff]  ;;  %v7620_v41 = vunpack.c.h.bf16 %v3553_v39 }
  0x77   :  { %7614 = vst [vmem:[#allocation68_spill] sm:$0xff] %v3838_v43  ;;  %v7616_v16 = vunpack.c.h.bf16 %v7615_v38  ;;  %v3845_v9 = vld [vmem:[#allocation2 + $0x5a0] sm:$0xff]  ;;  %v3847_v20 = vld [vmem:[#allocation2 + $0x5ac] sm:$0xff]  ;;  %v3849_v36 = vld [vmem:[#allocation2 + $0x5b8] sm:$0xff] }
  0x78   :  { %7617 = vst [vmem:[#allocation16_spill] sm:$0xff] %v3845_v9  ;;  %7618 = vst [vmem:[#allocation69_spill] sm:$0xff] %v3847_v20  ;;  %v1481_v27 = vadd.f32 %v1480_v52, %v7620_v41  ;;  %v3856_v31 = vld [vmem:[#allocation2 + $0x5c4] sm:$0xff]  ;;  %v3858_v15 = vld [vmem:[#allocation2 + $0x5d0] sm:$0xff] }
  0x79   :  { %v1375_v4 = vadd.f32 %v1374_v62, %v7616_v16  ;;  %7619 = vst [vmem:[#allocation70_spill] sm:$0xff] %v3849_v36  ;;  %7621 = vst [vmem:[#allocation71_spill] sm:$0xff] %v3856_v31  ;;  %v3860_v16 = vld [vmem:[#allocation2 + $0x5dc] sm:$0xff]  ;;  %v3867_v55 = vld [vmem:[#allocation2 + $0x5e8] sm:$0xff]  ;;  %v7627_v62 = vunpack.c.h.bf16 %v3555_v12 }
  0x7a   :  { %7622 = vst [vmem:[#allocation72_spill] sm:$0xff] %v3858_v15  ;;  %7623 = vst [vmem:[#allocation73_spill] sm:$0xff] %v3860_v16  ;;  %v3869_v45 = vld [vmem:[#allocation2 + $0x5f4] sm:$0xff]  ;;  %v3871_v39 = vld [vmem:[#allocation2 + $0x600] sm:$0xff] }
  0x7b   :  { %v1376_v28 = vadd.f32 %v1375_v4, %v7624_v18  ;;  %7625 = vst [vmem:[#allocation74_spill] sm:$0xff] %v3867_v55  ;;  %7626 = vst [vmem:[#allocation75_spill] sm:$0xff] %v3869_v45  ;;  %v1482_v38 = vadd.f32 %v1481_v27, %v7627_v62  ;;  %v3878_v3 = vld [vmem:[#allocation2 + $0x60c] sm:$0xff]  ;;  %v3880_v2 = vld [vmem:[#allocation2 + $0x618] sm:$0xff]  ;;  %v7631_v4 = vunpack.c.h.bf16 %v3565_v10  ;;  %v7635_v27 = vunpack.c.h.bf16 %v3473_v63 }
  0x7c   :  { %v3882_v60 = vld [vmem:[#allocation2 + $0x624] sm:$0xff]  ;;  %v3889_v22 = vld [vmem:[#allocation2 + $0x630] sm:$0xff]  ;;  %v3891_v7 = vld [vmem:[#allocation2 + $0x63c] sm:$0xff] }
  0x7d   :  { %v7628_v52 = vld [vmem:[#allocation17_spill] sm:$0xff]  ;;  %v1483_v18 = vadd.f32 %v1482_v38, %v7631_v4  ;;  %v3900_v20 = vld [vmem:[#allocation2 + $0x654] sm:$0xff]  ;;  %v3902_v21 = vld [vmem:[#allocation2 + $0x660] sm:$0xff]  ;;  %v7643_v38 = vunpack.c.h.bf16 %v3475_v59 }
  0x7e   :  { %v7629_v53 = vunpack.c.h.bf16 %v7628_v52  ;;  %v3893_v12 = vld [vmem:[#allocation2 + $0x648] sm:$0xff]  ;;  %7632 = vst [vmem:[#allocation76_spill] sm:$0xff] %v3900_v20  ;;  %7633 = vst [vmem:[#allocation77_spill] sm:$0xff] %v3902_v21  ;;  %v3911_v15 = vld [vmem:[#allocation2 + $0x678] sm:$0xff]  ;;  %v7730_v20 = vunpack.c.h.bf16 %v3613_v19 }
  0x7f   :  { %7630 = vst [vmem:[#allocation17_spill] sm:$0xff] %v3893_v12  ;;  %7636 = vst [vmem:[#allocation79_spill] sm:$0xff] %v3911_v15  ;;  %v3913_v43 = vld [vmem:[#allocation2 + $0x684] sm:$0xff]  ;;  %v3915_v10 = vld [vmem:[#allocation2 + $0x690] sm:$0xff]  ;;  %v7764_v12 = vunpack.c.h.bf16 %v3759_v8 }
  0x80   :  { %v1377_v41 = vadd.f32 %v1376_v28, %v7629_v53  ;;  %v3904_v53 = vld [vmem:[#allocation2 + $0x66c] sm:$0xff]  ;;  %7637 = vst [vmem:[#allocation80_spill] sm:$0xff] %v3913_v43  ;;  %7638 = vst [vmem:[#allocation81_spill] sm:$0xff] %v3915_v10  ;;  %v7639_v28 = vunpack.c.h.bf16 %v3567_v17  ;;  %v3922_v45 = vld [vmem:[#allocation2 + $0x69c] sm:$0xff] }
  0x81   :  { %7634 = vst [vmem:[#allocation78_spill] sm:$0xff] %v3904_v53  ;;  %7640 = vst [vmem:[#allocation82_spill] sm:$0xff] %v3922_v45  ;;  %v3924_v36 = vld [vmem:[#allocation2 + $0x6a8] sm:$0xff]  ;;  %v3926_v63 = vld [vmem:[#allocation2 + $0x6b4] sm:$0xff] }
  0x82   :  { %v1378_v62 = vadd.f32 %v1377_v41, %v7635_v27  ;;  %v1484_v52 = vadd.f32 %v1483_v18, %v7639_v28  ;;  %7641 = vst [vmem:[#allocation83_spill] sm:$0xff] %v3924_v36  ;;  %7642 = vst [vmem:[#allocation84_spill] sm:$0xff] %v3926_v63  ;;  %v3933_v31 = vld [vmem:[#allocation2 + $0x6c0] sm:$0xff]  ;;  %v3935_v16 = vld [vmem:[#allocation2 + $0x6cc] sm:$0xff]  ;;  %v7647_v41 = vunpack.c.h.bf16 %v3569_v14  ;;  %v7651_v18 = vunpack.c.h.bf16 %v3483_v57 }
  0x83   :  { %7644 = vst [vmem:[#allocation85_spill] sm:$0xff] %v3933_v31  ;;  %7645 = vst [vmem:[#allocation86_spill] sm:$0xff] %v3935_v16  ;;  %v3937_v17 = vld [vmem:[#allocation2 + $0x6d8] sm:$0xff]  ;;  %v3944_v54 = vld [vmem:[#allocation2 + $0x6e4] sm:$0xff] }
  0x84   :  { %v1379_v4 = vadd.f32 %v1378_v62, %v7643_v38  ;;  %7646 = vst [vmem:[#allocation87_spill] sm:$0xff] %v3937_v17  ;;  %v1485_v27 = vadd.f32 %v1484_v52, %v7647_v41  ;;  %7648 = vst [vmem:[#allocation88_spill] sm:$0xff] %v3944_v54  ;;  %v3946_v55 = vld [vmem:[#allocation2 + $0x6f0] sm:$0xff]  ;;  %v3948_v59 = vld [vmem:[#allocation2 + $0x6fc] sm:$0xff]  ;;  %v7655_v62 = vunpack.c.h.bf16 %v3577_v48  ;;  %v7659_v52 = vunpack.c.h.bf16 %v3485_v51 }
  0x85   :  { %7649 = vst [vmem:[#allocation89_spill] sm:$0xff] %v3946_v55  ;;  %7650 = vst [vmem:[#allocation90_spill] sm:$0xff] %v3948_v59  ;;  %v3955_v33 = vld [vmem:[#allocation2 + $0x708] sm:$0xff]  ;;  %v3957_v9 = vld [vmem:[#allocation2 + $0x714] sm:$0xff] }
  0x86   :  { %v1380_v28 = vadd.f32 %v1379_v4, %v7651_v18  ;;  %7652 = vst [vmem:[#allocation91_spill] sm:$0xff] %v3955_v33  ;;  %7653 = vst [vmem:[#allocation92_spill] sm:$0xff] %v3957_v9  ;;  %v3959_v14 = vld [vmem:[#allocation2 + $0x720] sm:$0xff]  ;;  %v1486_v38 = vadd.f32 %v1485_v27, %v7655_v62  ;;  %v3966_v43 = vld [vmem:[#allocation2 + $0x72c] sm:$0xff]  ;;  %v7663_v4 = vunpack.c.h.bf16 %v3579_v23 }
  0x87   :  { %7654 = vst [vmem:[#allocation93_spill] sm:$0xff] %v3959_v14  ;;  %7656 = vst [vmem:[#allocation94_spill] sm:$0xff] %v3966_v43  ;;  %v3968_v49 = vld [vmem:[#allocation2 + $0x738] sm:$0xff]  ;;  %v3970_v57 = vld [vmem:[#allocation2 + $0x744] sm:$0xff] }
  0x88   :  { %7657 = vst [vmem:[#allocation95_spill] sm:$0xff] %v3968_v49  ;;  %7658 = vst [vmem:[#allocation96_spill] sm:$0xff] %v3970_v57  ;;  %v1381_v41 = vadd.f32 %v1380_v28, %v7659_v52  ;;  %v3977_v36 = vld [vmem:[#allocation2 + $0x750] sm:$0xff]  ;;  %v3979_v53 = vld [vmem:[#allocation2 + $0x75c] sm:$0xff]  ;;  %v1487_v18 = vadd.f32 %v1486_v38, %v7663_v4 }
  0x89   :  { %7660 = vst [vmem:[#allocation97_spill] sm:$0xff] %v3977_v36  ;;  %7661 = vst [vmem:[#allocation98_spill] sm:$0xff] %v3979_v53  ;;  %v3981_v48 = vld [vmem:[#allocation2 + $0x768] sm:$0xff]  ;;  %v3988_v16 = vld [vmem:[#allocation2 + $0x774] sm:$0xff] }
  0x8a   :  { %7662 = vst [vmem:[#allocation99_spill] sm:$0xff] %v3981_v48  ;;  %7664 = vst [vmem:[#allocation100_spill] sm:$0xff] %v3988_v16  ;;  %v3990_v10 = vld [vmem:[#allocation2 + $0x780] sm:$0xff]  ;;  %v3992_v51 = vld [vmem:[#allocation2 + $0x78c] sm:$0xff] }
  0x8b   :  { %v7665_v27 = vld [vmem:[#allocation18_spill] sm:$0xff]  ;;  %v4001_v63 = vld [vmem:[#allocation2 + $0x7a4] sm:$0xff]  ;;  %v4010_v9 = vld [vmem:[#allocation2 + $0x7bc] sm:$0xff] }
  0x8c   :  { %v7666_v54 = vunpack.c.h.bf16 %v7665_v27  ;;  %v3999_v55 = vld [vmem:[#allocation2 + $0x798] sm:$0xff]  ;;  %v4003_v23 = vld [vmem:[#allocation2 + $0x7b0] sm:$0xff]  ;;  %v7667_v28 = vld [vmem:[#allocation24_spill] sm:$0xff] }
  0x8d   :  { %v7668_v33 = vunpack.c.h.bf16 %v7667_v28  ;;  %v4012_v17 = vld [vmem:[#allocation2 + $0x7c8] sm:$0xff]  ;;  %v7671_v38 = vld [vmem:[#allocation19_spill] sm:$0xff]  ;;  %v4034_v14 = vld [vmem:[#allocation2 + $0x810] sm:$0xff] }
  0x8e   :  { %v1382_v62 = vadd.f32 %v1381_v41, %v7666_v54  ;;  %7669 = vst [vmem:[#allocation18_spill] sm:$0xff] %v4012_v17  ;;  %v4014_v54 = vld [vmem:[#allocation2 + $0x7d4] sm:$0xff]  ;;  %v7672_v43 = vunpack.c.h.bf16 %v7671_v38  ;;  %v4021_v49 = vld [vmem:[#allocation2 + $0x7e0] sm:$0xff]  ;;  %v4023_v59 = vld [vmem:[#allocation2 + $0x7ec] sm:$0xff] }
  0x8f   :  { %v1488_v52 = vadd.f32 %v1487_v18, %v7668_v33  ;;  %7670 = vst [vmem:[#allocation24_spill] sm:$0xff] %v4014_v54  ;;  %7673 = vst [vmem:[#allocation19_spill] sm:$0xff] %v4021_v49  ;;  %v4025_v33 = vld [vmem:[#allocation2 + $0x7f8] sm:$0xff]  ;;  %v7676_v41 = vld [vmem:[#allocation25_spill] sm:$0xff] }
  0x90   :  { %v1383_v4 = vadd.f32 %v1382_v62, %v7672_v43  ;;  %7674 = vst [vmem:[#allocation101_spill] sm:$0xff] %v4023_v59  ;;  %7675 = vst [vmem:[#allocation102_spill] sm:$0xff] %v4025_v33  ;;  %v7677_v36 = vunpack.c.h.bf16 %v7676_v41  ;;  %v4032_v53 = vld [vmem:[#allocation2 + $0x804] sm:$0xff]  ;;  %v4036_v43 = vld [vmem:[#allocation2 + $0x81c] sm:$0xff]  ;;  %v7686_v62 = vunpack.c.h.bf16 %v3590_v1 }
  0x91   :  { %7678 = vst [vmem:[#allocation25_spill] sm:$0xff] %v4032_v53  ;;  %7679 = vst [vmem:[#allocation103_spill] sm:$0xff] %v4034_v14  ;;  %v7681_v18 = vld [vmem:[#allocation20_spill] sm:$0xff]  ;;  %v4045_v57 = vld [vmem:[#allocation2 + $0x834] sm:$0xff] }
  0x92   :  { %v1489_v27 = vadd.f32 %v1488_v52, %v7677_v36  ;;  %7680 = vst [vmem:[#allocation104_spill] sm:$0xff] %v4036_v43  ;;  %v7682_v16 = vunpack.c.h.bf16 %v7681_v18  ;;  %v4043_v31 = vld [vmem:[#allocation2 + $0x828] sm:$0xff]  ;;  %7684 = vst [vmem:[#allocation105_spill] sm:$0xff] %v4045_v57  ;;  %v4047_v36 = vld [vmem:[#allocation2 + $0x840] sm:$0xff] }
  0x93   :  { %7683 = vst [vmem:[#allocation20_spill] sm:$0xff] %v4043_v31  ;;  %7685 = vst [vmem:[#allocation106_spill] sm:$0xff] %v4047_v36  ;;  %v4054_v15 = vld [vmem:[#allocation2 + $0x84c] sm:$0xff]  ;;  %v4056_v48 = vld [vmem:[#allocation2 + $0x858] sm:$0xff] }
  0x94   :  { %v1384_v28 = vadd.f32 %v1383_v4, %v7682_v16  ;;  %v1490_v38 = vadd.f32 %v1489_v27, %v7686_v62  ;;  %7687 = vst [vmem:[#allocation107_spill] sm:$0xff] %v4054_v15  ;;  %7688 = vst [vmem:[#allocation108_spill] sm:$0xff] %v4056_v48  ;;  %v4058_v16 = vld [vmem:[#allocation2 + $0x864] sm:$0xff]  ;;  %v4065_v50 = vld [vmem:[#allocation2 + $0x870] sm:$0xff] }
  0x95   :  { %7689 = vst [vmem:[#allocation109_spill] sm:$0xff] %v4058_v16  ;;  %v7690_v52 = vld [vmem:[#allocation21_spill] sm:$0xff]  ;;  %v4067_v45 = vld [vmem:[#allocation2 + $0x87c] sm:$0xff]  ;;  %v7695_v4 = vld [vmem:[#allocation26_spill] sm:$0xff] }
  0x96   :  { %v7691_v21 = vunpack.c.h.bf16 %v7690_v52  ;;  %7692 = vst [vmem:[#allocation21_spill] sm:$0xff] %v4065_v50  ;;  %7693 = vst [vmem:[#allocation110_spill] sm:$0xff] %v4067_v45  ;;  %v4069_v1 = vld [vmem:[#allocation2 + $0x888] sm:$0xff]  ;;  %v7696_v49 = vunpack.c.h.bf16 %v7695_v4  ;;  %v4076_v59 = vld [vmem:[#allocation2 + $0x894] sm:$0xff] }
  0x97   :  { %7694 = vst [vmem:[#allocation111_spill] sm:$0xff] %v4069_v1  ;;  %7697 = vst [vmem:[#allocation26_spill] sm:$0xff] %v4076_v59  ;;  %v4078_v32 = vld [vmem:[#allocation2 + $0x8a0] sm:$0xff]  ;;  %v7700_v27 = vld [vmem:[#allocation22_spill] sm:$0xff] }
  0x98   :  { %v1385_v41 = vadd.f32 %v1384_v28, %v7691_v21  ;;  %v1491_v18 = vadd.f32 %v1490_v38, %v7696_v49  ;;  %7698 = vst [vmem:[#allocation112_spill] sm:$0xff] %v4078_v32  ;;  %v4080_v21 = vld [vmem:[#allocation2 + $0x8ac] sm:$0xff]  ;;  %v7701_v53 = vunpack.c.h.bf16 %v7700_v27  ;;  %v4087_v14 = vld [vmem:[#allocation2 + $0x8b8] sm:$0xff]  ;;  %v4089_v54 = vld [vmem:[#allocation2 + $0x8c4] sm:$0xff]  ;;  %v7705_v28 = vunpack.c.h.bf16 %v3597_v11 }
  0x99   :  { %7699 = vst [vmem:[#allocation113_spill] sm:$0xff] %v4080_v21  ;;  %7702 = vst [vmem:[#allocation22_spill] sm:$0xff] %v4087_v14  ;;  %v4091_v49 = vld [vmem:[#allocation2 + $0x8d0] sm:$0xff]  ;;  %v4098_v57 = vld [vmem:[#allocation2 + $0x8dc] sm:$0xff] }
  0x9a   :  { %v1386_v62 = vadd.f32 %v1385_v41, %v7701_v53  ;;  %7703 = vst [vmem:[#allocation114_spill] sm:$0xff] %v4089_v54  ;;  %7704 = vst [vmem:[#allocation115_spill] sm:$0xff] %v4091_v49  ;;  %v1492_v52 = vadd.f32 %v1491_v18, %v7705_v28  ;;  %v4100_v33 = vld [vmem:[#allocation2 + $0x8e8] sm:$0xff]  ;;  %v4102_v53 = vld [vmem:[#allocation2 + $0x8f4] sm:$0xff]  ;;  %v7711_v41 = vunpack.c.h.bf16 %v3599_v0 }
  0x9b   :  { %7706 = vst [vmem:[#allocation116_spill] sm:$0xff] %v4098_v57  ;;  %7707 = vst [vmem:[#allocation117_spill] sm:$0xff] %v4100_v33  ;;  %v7709_v38 = vld [vmem:[#allocation23_spill] sm:$0xff]  ;;  %v4111_v43 = vld [vmem:[#allocation2 + $0x90c] sm:$0xff] }
  0x9c   :  { %7708 = vst [vmem:[#allocation118_spill] sm:$0xff] %v4102_v53  ;;  %v7710_v15 = vunpack.c.h.bf16 %v7709_v38  ;;  %v4109_v48 = vld [vmem:[#allocation2 + $0x900] sm:$0xff]  ;;  %v4113_v11 = vld [vmem:[#allocation2 + $0x918] sm:$0xff]  ;;  %v1493_v27 = vadd.f32 %v1492_v52, %v7711_v41  ;;  %v4122_v36 = vld [vmem:[#allocation2 + $0x930] sm:$0xff]  ;;  %v7723_v53 = vunpack.c.h.bf16 %v3611_v58  ;;  %v7772_v8 = vunpack.c.h.bf16 %v4111_v43 }
  0x9d   :  { %v4120_v45 = vld [vmem:[#allocation2 + $0x924] sm:$0xff]  ;;  %v4131_v28 = vld [vmem:[#allocation2 + $0x954] sm:$0xff]  ;;  %v4140_v14 = vld [vmem:[#allocation2 + $0x96c] sm:$0xff] }
  0x9e   :  { %v1387_v4 = vadd.f32 %v1386_v62, %v7710_v15  ;;  %v4124_v15 = vld [vmem:[#allocation2 + $0x93c] sm:$0xff]  ;;  %v4129_v59 = vld [vmem:[#allocation2 + $0x948] sm:$0xff]  ;;  %7713 = vst [vmem:[#allocation119_spill] sm:$0xff] %v4131_v28  ;;  %v4149_v57 = vld [vmem:[#allocation2 + $0x990] sm:$0xff] }
  0x9f   :  { %7712 = vst [vmem:[#allocation23_spill] sm:$0xff] %v4129_v59  ;;  %v4133_v16 = vld [vmem:[#allocation2 + $0x960] sm:$0xff]  ;;  %v4142_v38 = vld [vmem:[#allocation2 + $0x978] sm:$0xff]  ;;  %7720 = vst [vmem:[#allocation123_spill] sm:$0xff] %v4149_v57 }
  0xa0   :  { %v1388_v18 = vrot.slane %v1387_v4, 4  ;;  %7714 = vst [vmem:[#allocation120_spill] sm:$0xff] %v4133_v16  ;;  %v7715_v21 = vld [vmem:[#allocation27_spill] sm:$0xff]  ;;  %7718 = vst [vmem:[#allocation121_spill] sm:$0xff] %v4142_v38  ;;  %v4144_v1 = vld [vmem:[#allocation2 + $0x984] sm:$0xff] }
  0xa1   :  { %v7716_v32 = vunpack.c.h.bf16 %v7715_v21  ;;  %7717 = vst [vmem:[#allocation27_spill] sm:$0xff] %v4140_v14  ;;  %7719 = vst [vmem:[#allocation122_spill] sm:$0xff] %v4144_v1  ;;  %v4151_v52 = vld [vmem:[#allocation2 + $0x99c] sm:$0xff]  ;;  %v4153_v41 = vld [vmem:[#allocation2 + $0x9a8] sm:$0xff]  ;;  %v7737_v1 = vunpack.c.h.bf16 %v3615_v46 }
  0xa2   :  { %v1389_v0 = vadd.f32 %v1388_v18, %v1387_v4  ;;  %7721 = vst [vmem:[#allocation124_spill] sm:$0xff] %v4151_v52  ;;  %7722 = vst [vmem:[#allocation125_spill] sm:$0xff] %v4153_v41  ;;  %v4160_v33 = vld [vmem:[#allocation2 + $0x9b4] sm:$0xff]  ;;  %v4162_v54 = vld [vmem:[#allocation2 + $0x9c0] sm:$0xff] }
  0xa3   :  { %v1494_v62 = vadd.f32 %v1493_v27, %v7716_v32  ;;  %7724 = vst [vmem:[#allocation126_spill] sm:$0xff] %v4160_v33  ;;  %7725 = vst [vmem:[#allocation127_spill] sm:$0xff] %v4162_v54  ;;  %v4164_v4 = vld [vmem:[#allocation2 + $0x9cc] sm:$0xff]  ;;  %v4169_v35 = vld [vmem:[#allocation2 + $0x9d8] sm:$0xff] }
  0xa4   :  { %7726 = vst [vmem:[#allocation128_spill] sm:$0xff] %v4164_v4  ;;  %v1390_v32 = vrot.slane %v1389_v0, 2  ;;  %7727 = vst [vmem:[#allocation129_spill] sm:$0xff] %v4169_v35  ;;  %v4171_v21 = vld [vmem:[#allocation2 + $0x9e4] sm:$0xff]  ;;  %v4173_v27 = vld [vmem:[#allocation2 + $0x9f0] sm:$0xff]  ;;  %v7743_v4 = vunpack.c.h.bf16 %v3623_v13 }
  0xa5   :  { %v1495_v49 = vadd.f32 %v1494_v62, %v7723_v53  ;;  %7728 = vst [vmem:[#allocation130_spill] sm:$0xff] %v4171_v21  ;;  %7729 = vst [vmem:[#allocation131_spill] sm:$0xff] %v4173_v27  ;;  %v4180_v29 = vld [vmem:[#allocation2 + $0x9fc] sm:$0xff]  ;;  %v4182_v50 = vld [vmem:[#allocation2 + $0xa08] sm:$0xff] }
  0xa6   :  { %7731 = vst [vmem:[#allocation132_spill] sm:$0xff] %v4180_v29  ;;  %7732 = vst [vmem:[#allocation133_spill] sm:$0xff] %v4182_v50  ;;  %v4184_v31 = vld [vmem:[#allocation2 + $0xa14] sm:$0xff]  ;;  %v1391_v58 = vadd.f32 %v1390_v32, %v1389_v0  ;;  %v4189_v14 = vld [vmem:[#allocation2 + $0xa20] sm:$0xff] }
  0xa7   :  { %v1496_v18 = vadd.f32 %v1495_v49, %v7730_v20  ;;  %7733 = vst [vmem:[#allocation134_spill] sm:$0xff] %v4184_v31  ;;  %7734 = vst [vmem:[#allocation135_spill] sm:$0xff] %v4189_v14  ;;  %v4191_v53 = vld [vmem:[#allocation2 + $0xa2c] sm:$0xff]  ;;  %v4193_v62 = vld [vmem:[#allocation2 + $0xa38] sm:$0xff] }
  0xa8   :  { %7735 = vst [vmem:[#allocation136_spill] sm:$0xff] %v4191_v53  ;;  %7736 = vst [vmem:[#allocation137_spill] sm:$0xff] %v4193_v62  ;;  %v4200_v57 = vld [vmem:[#allocation2 + $0xa44] sm:$0xff]  ;;  %v4202_v28 = vld [vmem:[#allocation2 + $0xa50] sm:$0xff]  ;;  %v1392_v19 = vrot.slane %v1391_v58, 1  ;;  %v7748_v53 = vunpack.c.h.bf16 %v3625_v30 }
  0xa9   :  { %v1497_v16 = vadd.f32 %v1496_v18, %v7737_v1  ;;  %7738 = vst [vmem:[#allocation138_spill] sm:$0xff] %v4200_v57  ;;  %7739 = vst [vmem:[#allocation139_spill] sm:$0xff] %v4202_v28  ;;  %v4204_v0 = vld [vmem:[#allocation2 + $0xa5c] sm:$0xff]  ;;  %v4209_v33 = vld [vmem:[#allocation2 + $0xa68] sm:$0xff] }
  0xaa   :  { %7740 = vst [vmem:[#allocation140_spill] sm:$0xff] %v4204_v0  ;;  %7741 = vst [vmem:[#allocation141_spill] sm:$0xff] %v4209_v33  ;;  %v4211_v20 = vld [vmem:[#allocation2 + $0xa74] sm:$0xff]  ;;  %v4213_v49 = vld [vmem:[#allocation2 + $0xa80] sm:$0xff]  ;;  %v4247_v62 = vadd.f32 %v1392_v19, %v1391_v58 }
  0xab   :  { %7742 = vst [vmem:[#allocation142_spill] sm:$0xff] %v4211_v20  ;;  %v1498_v32 = vadd.f32 %v1497_v16, %v7743_v4  ;;  %v4220_v35 = vld [vmem:[#allocation2 + $0xa8c] sm:$0xff]  ;;  %v4222_v59 = vld [vmem:[#allocation2 + $0xa98] sm:$0xff]  ;;  %v4224_v41 = vld [vmem:[#allocation2 + $0xaa4] sm:$0xff]  ;;  %v1225_v57 = vunpack.c.h.bf16 %v4213_v49  ;;  %v7755_v20 = vunpack.c.h.bf16 %v3634_v37 }
  0xac   :  { %v4230_v1 = vld [vmem:[#allocation2 + $0xab0] sm:$0xff]  ;;  %v4232_v18 = vld [vmem:[#allocation2 + $0xabc] sm:$0xff]  ;;  %v4234_v13 = vld [vmem:[#allocation2 + $0xac8] sm:$0xff]  ;;  %v1228_v14 = vunpack.c.h.bf16 %v4220_v35  ;;  %v1231_v29 = vunpack.c.h.bf16 %v4222_v59 }
  0xad   :  { %7744 = vst [vmem:[#allocation143_spill] sm:$0xff] %v4234_v13  ;;  %v1499_v50 = vrot.slane %v1498_v32, 4  ;;  %v4239_v27 = vld [vmem:[#allocation2 + $0xad4] sm:$0xff]  ;;  %v4241_v21 = vld [vmem:[#allocation2 + $0xae0] sm:$0xff]  ;;  %v4243_v54 = vld [vmem:[#allocation2 + $0xaec] sm:$0xff] }
  0xae   :  { %7745 = vst [vmem:[#allocation144_spill] sm:$0xff] %v4239_v27  ;;  %7746 = vst [vmem:[#allocation145_spill] sm:$0xff] %v4241_v21  ;;  %v7749_v16 = vld [vmem:[#allocation28_spill] sm:$0xff]  ;;  %v4253_v0 = vld [vmem:[#allocation2 + $0xaf8] sm:$0xff] }
  0xaf   :  { %7747 = vst [vmem:[#allocation146_spill] sm:$0xff] %v4243_v54  ;;  %v7750_v28 = vunpack.c.h.bf16 %v7749_v16  ;;  %7751 = vst [vmem:[#allocation28_spill] sm:$0xff] %v4253_v0  ;;  %v4255_v31 = vld [vmem:[#allocation2 + $0xb04] sm:$0xff]  ;;  %v4257_v33 = vld [vmem:[#allocation2 + $0xb10] sm:$0xff]  ;;  %v1500_v49 = vadd.f32 %v1499_v50, %v1498_v32  ;;  %v7765_v54 = vunpack.c.h.bf16 %v3871_v39 }
  0xb0   :  { %7752 = vst [vmem:[#allocation147_spill] sm:$0xff] %v4255_v31  ;;  %7753 = vst [vmem:[#allocation148_spill] sm:$0xff] %v4257_v33  ;;  %v4262_v58 = vld [vmem:[#allocation2 + $0xb1c] sm:$0xff]  ;;  %v4264_v19 = vld [vmem:[#allocation2 + $0xb28] sm:$0xff] }
  0xb1   :  { %v1579_v4 = vadd.f32 %v7750_v28, %v7748_v53  ;;  %v4266_v30 = vld [vmem:[#allocation2 + $0xb34] sm:$0xff]  ;;  %v4273_v52 = vld [vmem:[#allocation2 + $0xb40] sm:$0xff]  ;;  %v4275_v59 = vld [vmem:[#allocation2 + $0xb4c] sm:$0xff]  ;;  %v1501_v28 = vrot.slane %v1500_v49, 2 }
  0xb2   :  { %7754 = vst [vmem:[#allocation149_spill] sm:$0xff] %v4266_v30  ;;  %v4277_v50 = vld [vmem:[#allocation2 + $0xb58] sm:$0xff]  ;;  %v4282_v17 = vld [vmem:[#allocation2 + $0xb64] sm:$0xff]  ;;  %v4284_v53 = vld [vmem:[#allocation2 + $0xb70] sm:$0xff]  ;;  %v7766_v30 = vunpack.c.h.bf16 %v3878_v3 }
  0xb3   :  { %v1580_v35 = vadd.f32 %v1579_v4, %v7755_v20  ;;  %7756 = vst [vmem:[#allocation150_spill] sm:$0xff] %v4277_v50  ;;  %v4286_v16 = vld [vmem:[#allocation2 + $0xb7c] sm:$0xff]  ;;  %v7757_v13 = vld [vmem:[#allocation29_spill] sm:$0xff]  ;;  %v4295_v46 = vld [vmem:[#allocation2 + $0xb94] sm:$0xff]  ;;  %v1502_v37 = vadd.f32 %v1501_v28, %v1500_v49 }
  0xb4   :  { %v7758_v34 = vunpack.c.h.bf16 %v7757_v13  ;;  %v4293_v27 = vld [vmem:[#allocation2 + $0xb88] sm:$0xff]  ;;  %v4297_v38 = vld [vmem:[#allocation2 + $0xba0] sm:$0xff]  ;;  %v4304_v20 = vld [vmem:[#allocation2 + $0xbb8] sm:$0xff] }
  0xb5   :  { %7759 = vst [vmem:[#allocation29_spill] sm:$0xff] %v4293_v27  ;;  %v4302_v0 = vld [vmem:[#allocation2 + $0xbac] sm:$0xff]  ;;  %v1503_v49 = vrot.slane %v1502_v37, 1  ;;  %v4314_v28 = vld [vmem:[#allocation2 + $0xbc4] sm:$0xff]  ;;  %v1801_v27 = vadd.f32 %v7766_v30, %v7765_v54  ;;  %v7773_v54 = vunpack.c.h.bf16 %v3761_v42  ;;  %v7780_v42 = vunpack.c.h.bf16 %v3882_v60 }
  0xb6   :  { %v1581_v32 = vadd.f32 %v1580_v35, %v7758_v34  ;;  %v7760_v4 = vld [vmem:[#allocation30_spill] sm:$0xff]  ;;  %v7762_v35 = vunpack.c.h.bf16 %v3643_v25  ;;  %v7768_v34 = vunpack.c.h.bf16 %v3645_v26  ;;  %v7774_v26 = vunpack.c.h.bf16 %v3880_v2 }
  0xb7   :  { %v7761_v33 = vunpack.c.h.bf16 %v7760_v4  ;;  %v7763_v4 = vunpack.c.h.bf16 %v3757_v6  ;;  %v4331_v13 = vld [vmem:[#allocation2 + $0xbd0] sm:$0xff]  ;;  %v7771_v6 = vunpack.c.h.bf16 %v4109_v48  ;;  %v1504_v3 = vadd.f32 %v1503_v49, %v1502_v37  ;;  %v4362_v49 = vld [vmem:[#allocation2 + $0xbe8] sm:$0xff] }
  0xb8   :  { %7767 = vst [vmem:[#allocation30_spill] sm:$0xff] %v4331_v13  ;;  %v7778_v48 = vunpack.c.h.bf16 %v4113_v11  ;;  %v2209_v2 = vmul.f32 0.00390625, %v4247_v62  ;;  %v7782_v11 = vunpack.c.h.bf16 %v4001_v63  ;;  %v7785_v60 = vunpack.c.h.bf16 %v3770_v56  ;;  %v4654_v39 = vld [vmem:[#allocation2 + $0x18c] sm:$0xff] }
  0xb9   :  { %v1582_v31 = vadd.f32 %v1581_v32, %v7761_v33  ;;  %v1690_v21 = vadd.f32 %v7764_v12, %v7763_v4  ;;  %v2023_v12 = vadd.f32 %v7772_v8, %v7771_v6  ;;  %v2134_v4 = vadd.f32 %v1228_v14, %v1225_v57  ;;  %v4636_v14 = vld [vmem:[#allocation2 + $0x174] sm:$0xff] }
  0xba   :  { %v7779_v57 = vunpack.c.h.bf16 %v3768_v5  ;;  %v7784_v5 = vunpack.c.h.bf16 %v4224_v41  ;;  %v7786_v62 = vunpack.c.h.bf16 %v3889_v22  ;;  %v4618_v22 = vld [vmem:[#allocation2 + $0x15c] sm:$0xff] }
  0xbb   :  { %v1583_v50 = vadd.f32 %v1582_v31, %v7762_v35  ;;  %v7769_v31 = vunpack.c.h.bf16 %v3990_v10  ;;  %v7770_v35 = vunpack.c.h.bf16 %v3992_v51  ;;  %v1691_v30 = vadd.f32 %v1690_v21, %v7773_v54 }
  0xbc   :  { %v7777_v51 = vunpack.c.h.bf16 %v3999_v55  ;;  %v2024_v43 = vadd.f32 %v2023_v12, %v7778_v48  ;;  %v7781_v55 = vunpack.c.h.bf16 %v3657_v44  ;;  %v2212_v54 = vmul.f32 0.00390625, %v1504_v3 }
  0xbd   :  { %v1584_v25 = vadd.f32 %v1583_v50, %v7768_v34  ;;  %v1912_v32 = vadd.f32 %v7770_v35, %v7769_v31  ;;  %v1802_v50 = vadd.f32 %v1801_v27, %v7774_v26  ;;  %v7775_v34 = vld [vmem:[#allocation31_spill] sm:$0xff]  ;;  %v2135_v35 = vadd.f32 %v2134_v4, %v1231_v29 }
  0xbe   :  { %v7776_v10 = vunpack.c.h.bf16 %v7775_v34  ;;  %v1692_v37 = vadd.f32 %v1691_v30, %v7779_v57  ;;  %v4360_v27 = vld [vmem:[#allocation2 + $0xbdc] sm:$0xff]  ;;  %v4376_v30 = vld [vmem:[#allocation2 + $0xbf4] sm:$0xff]  ;;  %v7787_v44 = vunpack.c.h.bf16 %v3659_v40  ;;  %v7789_v26 = vunpack.c.h.bf16 %v4122_v36 }
  0xbf   :  { %v1913_v31 = vadd.f32 %v1912_v32, %v7777_v51  ;;  %v1803_v21 = vadd.f32 %v1802_v50, %v7780_v42  ;;  %v2136_v8 = vadd.f32 %v2135_v35, %v7784_v5  ;;  %v7790_v50 = vunpack.c.h.bf16 %v4230_v1 }
  0xc0   :  { %v1585_v33 = vadd.f32 %v1584_v25, %v7776_v10  ;;  %v7783_v25 = vunpack.c.h.bf16 %v4120_v45  ;;  %v1693_v12 = vadd.f32 %v1692_v37, %v7785_v60  ;;  %v7791_v3 = vunpack.c.h.bf16 %v3772_v61  ;;  %v4600_v37 = vld [vmem:[#allocation2 + $0x144] sm:$0xff] }
  0xc1   :  { %v1914_v29 = vadd.f32 %v1913_v31, %v7782_v11  ;;  %v1804_v4 = vadd.f32 %v1803_v21, %v7786_v62  ;;  %v2137_v56 = vadd.f32 %v2136_v8, %v7790_v50  ;;  %v7792_v51 = vunpack.c.h.bf16 %v3891_v7  ;;  %v7798_v21 = vld [vmem:[#allocation17_spill] sm:$0xff]  ;;  %v7806_v8 = vld [vmem:[#allocation143_spill] sm:$0xff] }
  0xc2   :  { %v1586_v32 = vadd.f32 %v1585_v33, %v7781_v55  ;;  %v2025_v6 = vadd.f32 %v2024_v43, %v7783_v25  ;;  %v7788_v33 = vunpack.c.h.bf16 %v4003_v23  ;;  %v1694_v10 = vadd.f32 %v1693_v12, %v7791_v3  ;;  %v7816_v3 = vld [vmem:[#allocation24_spill] sm:$0xff] }
  0xc3   :  { %v1805_v40 = vadd.f32 %v1804_v4, %v7792_v51  ;;  %v7793_v31 = vunpack.c.h.bf16 %v3661_v24  ;;  %v7794_v48 = vunpack.c.h.bf16 %v4010_v9  ;;  %v7795_v43 = vunpack.c.h.bf16 %v4124_v15 }
  0xc4   :  { %v1587_v63 = vadd.f32 %v1586_v32, %v7787_v44  ;;  %v1915_v45 = vadd.f32 %v1914_v29, %v7788_v33  ;;  %v2026_v41 = vadd.f32 %v2025_v6, %v7789_v26  ;;  %v7796_v35 = vunpack.c.h.bf16 %v4232_v18  ;;  %v7800_v32 = vld [vmem:[#allocation32_spill] sm:$0xff]  ;;  %v7802_v29 = vld [vmem:[#allocation18_spill] sm:$0xff]  ;;  %v7804_v6 = vld [vmem:[#allocation23_spill] sm:$0xff] }
  0xc5   :  { %v7797_v61 = vunpack.c.h.bf16 %v3779_v47  ;;  %v7799_v7 = vunpack.c.h.bf16 %v7798_v21  ;;  %v4406_v24 = vsel %vm2364_vm0, %v2212_v54, %v2209_v2  ;;  %v7801_v9 = vunpack.c.h.bf16 %v7800_v32  ;;  %v7808_v47 = vld [vmem:[#allocation53_spill] sm:$0xff]  ;;  %v7810_v44 = vld [vmem:[#allocation76_spill] sm:$0xff]  ;;  %v4420_v2 = vld [vmem:[#allocation2 + $0x54] sm:$0xff] }
  0xc6   :  { %v1588_v23 = vadd.f32 %v1587_v63, %v7793_v31  ;;  %v1916_v36 = vadd.f32 %v1915_v45, %v7794_v48  ;;  %v2027_v1 = vadd.f32 %v2026_v41, %v7795_v43  ;;  %v2138_v57 = vadd.f32 %v2137_v56, %v7796_v35  ;;  %7812 = vst [vmem:[#allocation31_spill] sm:$0xff] %v4420_v2  ;;  %v4423_v45 = vld [vmem:[#allocation2 + $0x60] sm:$0xff]  ;;  %v7814_v41 = vld [vmem:[#allocation33_spill] sm:$0xff]  ;;  %v4441_v32 = vld [vmem:[#allocation2 + $0x78] sm:$0xff] }
  0xc7   :  { %v1695_v42 = vadd.f32 %v1694_v10, %v7797_v61  ;;  %v1806_v55 = vadd.f32 %v1805_v40, %v7799_v7  ;;  %v7803_v15 = vunpack.c.h.bf16 %v7802_v29  ;;  %v7805_v18 = vunpack.c.h.bf16 %v7804_v6  ;;  %7813 = vst [vmem:[#allocation17_spill] sm:$0xff] %v4423_v45  ;;  %v7818_v40 = vld [vmem:[#allocation119_spill] sm:$0xff]  ;;  %v7820_v48 = vld [vmem:[#allocation144_spill] sm:$0xff]  ;;  %v7824_v61 = vld [vmem:[#allocation77_spill] sm:$0xff] }
  0xc8   :  { %v1589_v11 = vadd.f32 %v1588_v23, %v7801_v9  ;;  %v7807_v60 = vunpack.c.h.bf16 %v7806_v8  ;;  %v7809_v62 = vunpack.c.h.bf16 %v7808_v47  ;;  %v7811_v63 = vunpack.c.h.bf16 %v7810_v44  ;;  %v4438_v7 = vld [vmem:[#allocation2 + $0x6c] sm:$0xff]  ;;  %7827 = vst [vmem:[#allocation18_spill] sm:$0xff] %v4441_v32  ;;  %v4546_v9 = vld [vmem:[#allocation2 + $0xfc] sm:$0xff] }
  0xc9   :  { %v1917_v25 = vadd.f32 %v1916_v36, %v7803_v15  ;;  %v2028_v5 = vadd.f32 %v2027_v1, %v7805_v18  ;;  %v7815_v50 = vunpack.c.h.bf16 %v7814_v41  ;;  %v7817_v10 = vunpack.c.h.bf16 %v7816_v3  ;;  %v7822_v1 = vld [vmem:[#allocation54_spill] sm:$0xff]  ;;  %7826 = vst [vmem:[#allocation32_spill] sm:$0xff] %v4438_v7  ;;  %v4456_v3 = vld [vmem:[#allocation2 + $0x84] sm:$0xff]  ;;  %v5211_v7 = vld [vmem:[#allocation2 + $0x81c] sm:$0xff] }
  0xca   :  { %v2139_v12 = vadd.f32 %v2138_v57, %v7807_v60  ;;  %v1696_v4 = vadd.f32 %v1695_v42, %v7809_v62  ;;  %v1807_v33 = vadd.f32 %v1806_v55, %v7811_v63  ;;  %v7819_v31 = vunpack.c.h.bf16 %v7818_v40  ;;  %7840 = vst [vmem:[#allocation23_spill] sm:$0xff] %v4456_v3  ;;  %v7842_v40 = vld [vmem:[#allocation35_spill] sm:$0xff]  ;;  %v4582_v54 = vld [vmem:[#allocation2 + $0x12c] sm:$0xff]  ;;  %8217 = vst [vmem:[#allocation151_spill] sm:$0xff] %v5211_v7 }
  0xcb   :  { %v1590_v56 = vadd.f32 %v1589_v11, %v7815_v50  ;;  %v1918_v51 = vadd.f32 %v1917_v25, %v7817_v10  ;;  %v7821_v36 = vunpack.c.h.bf16 %v7820_v48  ;;  %v7823_v35 = vunpack.c.h.bf16 %v7822_v1  ;;  %v7828_v11 = vld [vmem:[#allocation34_spill] sm:$0xff]  ;;  %v7830_v25 = vld [vmem:[#allocation19_spill] sm:$0xff]  ;;  %v7844_v48 = vld [vmem:[#allocation101_spill] sm:$0xff]  ;;  %7949 = vst [vmem:[#allocation35_spill] sm:$0xff] %v4600_v37 }
  0xcc   :  { %v2029_v23 = vadd.f32 %v2028_v5, %v7819_v31  ;;  %v7825_v42 = vunpack.c.h.bf16 %v7824_v61  ;;  %v7829_v29 = vunpack.c.h.bf16 %v7828_v11  ;;  %v7831_v6 = vunpack.c.h.bf16 %v7830_v25  ;;  %v7832_v5 = vld [vmem:[#allocation120_spill] sm:$0xff]  ;;  %v7846_v1 = vld [vmem:[#allocation27_spill] sm:$0xff]  ;;  %v7848_v61 = vld [vmem:[#allocation146_spill] sm:$0xff]  ;;  %7909 = vst [vmem:[#allocation34_spill] sm:$0xff] %v4546_v9 }
  0xcd   :  { %v2140_v43 = vadd.f32 %v2139_v12, %v7821_v36  ;;  %v1697_v57 = vadd.f32 %v1696_v4, %v7823_v35  ;;  %v7833_v8 = vunpack.c.h.bf16 %v7832_v5  ;;  %v7834_v12 = vld [vmem:[#allocation145_spill] sm:$0xff]  ;;  %v7836_v4 = vld [vmem:[#allocation55_spill] sm:$0xff]  ;;  %v7843_v31 = vunpack.c.h.bf16 %v7842_v40  ;;  %v7850_v11 = vld [vmem:[#allocation56_spill] sm:$0xff]  ;;  %7962 = vst [vmem:[#allocation27_spill] sm:$0xff] %v4618_v22 }
  0xce   :  { %v1808_v21 = vadd.f32 %v1807_v33, %v7825_v42  ;;  %v1591_v15 = vadd.f32 %v1590_v56, %v7829_v29  ;;  %v1919_v18 = vadd.f32 %v1918_v51, %v7831_v6  ;;  %v7835_v47 = vunpack.c.h.bf16 %v7834_v12  ;;  %v7838_v33 = vld [vmem:[#allocation78_spill] sm:$0xff]  ;;  %v7852_v6 = vld [vmem:[#allocation79_spill] sm:$0xff]  ;;  %v7860_v40 = vld [vmem:[#allocation121_spill] sm:$0xff]  ;;  %7936 = vst [vmem:[#allocation55_spill] sm:$0xff] %v4582_v54 }
  0xcf   :  { %v2030_v60 = vadd.f32 %v2029_v23, %v7833_v8  ;;  %v7837_v44 = vunpack.c.h.bf16 %v7836_v4  ;;  %v7839_v41 = vunpack.c.h.bf16 %v7838_v33  ;;  %v4459_v56 = vld [vmem:[#allocation2 + $0x90] sm:$0xff]  ;;  %v7845_v36 = vunpack.c.h.bf16 %v7844_v48  ;;  %v4474_v12 = vld [vmem:[#allocation2 + $0x9c] sm:$0xff]  ;;  %v4528_v10 = vld [vmem:[#allocation2 + $0xe4] sm:$0xff]  ;;  %7976 = vst [vmem:[#allocation56_spill] sm:$0xff] %v4636_v14 }
  0xd0   :  { %v2141_v62 = vadd.f32 %v2140_v43, %v7835_v47  ;;  %7841 = vst [vmem:[#allocation143_spill] sm:$0xff] %v4459_v56  ;;  %v1592_v23 = vadd.f32 %v1591_v15, %v7843_v31  ;;  %v7847_v35 = vunpack.c.h.bf16 %v7846_v1  ;;  %v7849_v42 = vunpack.c.h.bf16 %v7848_v61  ;;  %7854 = vst [vmem:[#allocation53_spill] sm:$0xff] %v4474_v12  ;;  %v4477_v15 = vld [vmem:[#allocation2 + $0xa8] sm:$0xff]  ;;  %v7858_v33 = vld [vmem:[#allocation102_spill] sm:$0xff] }
  0xd1   :  { %v1698_v63 = vadd.f32 %v1697_v57, %v7837_v44  ;;  %v1809_v50 = vadd.f32 %v1808_v21, %v7839_v41  ;;  %v1920_v43 = vadd.f32 %v1919_v18, %v7845_v36  ;;  %v7851_v29 = vunpack.c.h.bf16 %v7850_v11  ;;  %7855 = vst [vmem:[#allocation76_spill] sm:$0xff] %v4477_v15  ;;  %v7856_v4 = vld [vmem:[#allocation36_spill] sm:$0xff]  ;;  %v7864_v1 = vld [vmem:[#allocation57_spill] sm:$0xff]  ;;  %7896 = vst [vmem:[#allocation54_spill] sm:$0xff] %v4528_v10 }
  0xd2   :  { %v2031_v57 = vadd.f32 %v2030_v60, %v7847_v35  ;;  %v2142_v21 = vadd.f32 %v2141_v62, %v7849_v42  ;;  %v7853_v5 = vunpack.c.h.bf16 %v7852_v6  ;;  %v7857_v44 = vunpack.c.h.bf16 %v7856_v4  ;;  %v7862_v48 = vld [vmem:[#allocation28_spill] sm:$0xff]  ;;  %v4492_v6 = vld [vmem:[#allocation2 + $0xb4] sm:$0xff]  ;;  %v7870_v4 = vld [vmem:[#allocation37_spill] sm:$0xff] }
  0xd3   :  { %v1699_v25 = vadd.f32 %v1698_v63, %v7851_v29  ;;  %v7859_v41 = vunpack.c.h.bf16 %v7858_v33  ;;  %v7861_v31 = vunpack.c.h.bf16 %v7860_v40  ;;  %v7863_v36 = vunpack.c.h.bf16 %v7862_v48  ;;  %v7866_v42 = vld [vmem:[#allocation80_spill] sm:$0xff]  ;;  %7868 = vst [vmem:[#allocation33_spill] sm:$0xff] %v4492_v6  ;;  %v7872_v33 = vld [vmem:[#allocation25_spill] sm:$0xff]  ;;  %v7874_v40 = vld [vmem:[#allocation122_spill] sm:$0xff] }
  0xd4   :  { %v1810_v8 = vadd.f32 %v1809_v50, %v7853_v5  ;;  %v1593_v60 = vadd.f32 %v1592_v23, %v7857_v44  ;;  %v7865_v35 = vunpack.c.h.bf16 %v7864_v1  ;;  %v7867_v11 = vunpack.c.h.bf16 %v7866_v42  ;;  %v4495_v23 = vld [vmem:[#allocation2 + $0xc0] sm:$0xff]  ;;  %v7878_v1 = vld [vmem:[#allocation58_spill] sm:$0xff]  ;;  %v5094_v12 = vld [vmem:[#allocation2 + $0x648] sm:$0xff] }
  0xd5   :  { %v1921_v62 = vadd.f32 %v1920_v43, %v7859_v41  ;;  %v2032_v63 = vadd.f32 %v2031_v57, %v7861_v31  ;;  %v2143_v50 = vadd.f32 %v2142_v21, %v7863_v36  ;;  %7869 = vst [vmem:[#allocation24_spill] sm:$0xff] %v4495_v23  ;;  %v7871_v44 = vunpack.c.h.bf16 %v7870_v4  ;;  %v7876_v48 = vld [vmem:[#allocation147_spill] sm:$0xff]  ;;  %v4510_v47 = vld [vmem:[#allocation2 + $0xcc] sm:$0xff]  ;;  %v4672_v14 = vld [vmem:[#allocation2 + $0x1a4] sm:$0xff] }
  0xd6   :  { %v1700_v61 = vadd.f32 %v1699_v25, %v7865_v35  ;;  %v1811_v29 = vadd.f32 %v1810_v8, %v7867_v11  ;;  %v7873_v41 = vunpack.c.h.bf16 %v7872_v33  ;;  %v7875_v31 = vunpack.c.h.bf16 %v7874_v40  ;;  %v7880_v11 = vld [vmem:[#allocation81_spill] sm:$0xff]  ;;  %7882 = vst [vmem:[#allocation119_spill] sm:$0xff] %v4510_v47  ;;  %v7894_v4 = vld [vmem:[#allocation82_spill] sm:$0xff]  ;;  %v4762_v54 = vld [vmem:[#allocation2 + $0x21c] sm:$0xff] }
  0xd7   :  { %v1594_v57 = vadd.f32 %v1593_v60, %v7871_v44  ;;  %v7877_v36 = vunpack.c.h.bf16 %v7876_v48  ;;  %v7879_v35 = vunpack.c.h.bf16 %v7878_v1  ;;  %v7881_v5 = vunpack.c.h.bf16 %v7880_v11  ;;  %v4513_v60 = vld [vmem:[#allocation2 + $0xd8] sm:$0xff]  ;;  %v4726_v37 = vld [vmem:[#allocation2 + $0x1ec] sm:$0xff]  ;;  %8061 = vst [vmem:[#allocation80_spill] sm:$0xff] %v4762_v54  ;;  %v5028_v15 = vld [vmem:[#allocation2 + $0x540] sm:$0xff] }
  0xd8   :  { %v1922_v21 = vadd.f32 %v1921_v62, %v7873_v41  ;;  %v2033_v25 = vadd.f32 %v2032_v63, %v7875_v31  ;;  %7883 = vst [vmem:[#allocation144_spill] sm:$0xff] %v4513_v60  ;;  %v7884_v44 = vld [vmem:[#allocation38_spill] sm:$0xff]  ;;  %v7886_v41 = vld [vmem:[#allocation103_spill] sm:$0xff]  ;;  %v7895_v43 = vunpack.c.h.bf16 %v7894_v4  ;;  %v7904_v4 = vunpack.c.h.bf16 %v4262_v58  ;;  %8035 = vst [vmem:[#allocation102_spill] sm:$0xff] %v4726_v37 }
  0xd9   :  { %v2144_v8 = vadd.f32 %v2143_v50, %v7877_v36  ;;  %v1701_v42 = vadd.f32 %v1700_v61, %v7879_v35  ;;  %v1812_v18 = vadd.f32 %v1811_v29, %v7881_v5  ;;  %v7885_v33 = vunpack.c.h.bf16 %v7884_v44  ;;  %v7888_v31 = vld [vmem:[#allocation123_spill] sm:$0xff]  ;;  %v7890_v36 = vld [vmem:[#allocation148_spill] sm:$0xff]  ;;  %v5208_v37 = vld [vmem:[#allocation2 + $0x810] sm:$0xff] }
  0xda   :  { %v7887_v40 = vunpack.c.h.bf16 %v7886_v41  ;;  %v7889_v48 = vunpack.c.h.bf16 %v7888_v31  ;;  %v7891_v1 = vunpack.c.h.bf16 %v7890_v36  ;;  %v7892_v5 = vld [vmem:[#allocation59_spill] sm:$0xff]  ;;  %v5118_v3 = vld [vmem:[#allocation2 + $0x6a8] sm:$0xff] }
  0xdb   :  { %v1595_v63 = vadd.f32 %v1594_v57, %v7885_v33  ;;  %v7893_v35 = vunpack.c.h.bf16 %v7892_v5  ;;  %v1813_v51 = vadd.f32 %v1812_v18, %v7895_v43  ;;  %v4531_v57 = vld [vmem:[#allocation2 + $0xf0] sm:$0xff]  ;;  %v7898_v33 = vld [vmem:[#allocation39_spill] sm:$0xff]  ;;  %v7905_v43 = vld [vmem:[#allocation60_spill] sm:$0xff] }
  0xdc   :  { %v1923_v50 = vadd.f32 %v1922_v21, %v7887_v40  ;;  %v2034_v61 = vadd.f32 %v2033_v25, %v7889_v48  ;;  %v2145_v29 = vadd.f32 %v2144_v8, %v7891_v1  ;;  %7897 = vst [vmem:[#allocation77_spill] sm:$0xff] %v4531_v57  ;;  %v7899_v41 = vunpack.c.h.bf16 %v7898_v33  ;;  %v7900_v40 = vld [vmem:[#allocation104_spill] sm:$0xff]  ;;  %v4564_v55 = vld [vmem:[#allocation2 + $0x114] sm:$0xff] }
  0xdd   :  { %v1702_v11 = vadd.f32 %v1701_v42, %v7893_v35  ;;  %v7901_v31 = vunpack.c.h.bf16 %v7900_v40  ;;  %v7902_v48 = vld [vmem:[#allocation124_spill] sm:$0xff]  ;;  %v7906_v1 = vunpack.c.h.bf16 %v7905_v43  ;;  %v7907_v35 = vld [vmem:[#allocation83_spill] sm:$0xff]  ;;  %7922 = vst [vmem:[#allocation120_spill] sm:$0xff] %v4564_v55 }
  0xde   :  { %v1596_v25 = vadd.f32 %v1595_v63, %v7899_v41  ;;  %v7903_v36 = vunpack.c.h.bf16 %v7902_v48  ;;  %v2146_v18 = vadd.f32 %v2145_v29, %v7904_v4  ;;  %v7908_v44 = vunpack.c.h.bf16 %v7907_v35  ;;  %v4549_v63 = vld [vmem:[#allocation2 + $0x108] sm:$0xff]  ;;  %v4780_v55 = vld [vmem:[#allocation2 + $0x234] sm:$0xff]  ;;  %v5019_v6 = vld [vmem:[#allocation2 + $0x51c] sm:$0xff] }
  0xdf   :  { %v1924_v8 = vadd.f32 %v1923_v50, %v7901_v31  ;;  %v1703_v5 = vadd.f32 %v1702_v11, %v7906_v1  ;;  %7910 = vst [vmem:[#allocation19_spill] sm:$0xff] %v4549_v63  ;;  %v7911_v41 = vld [vmem:[#allocation40_spill] sm:$0xff]  ;;  %v7915_v48 = vld [vmem:[#allocation125_spill] sm:$0xff]  ;;  %v7917_v4 = vunpack.c.h.bf16 %v4264_v19  ;;  %8074 = vst [vmem:[#allocation25_spill] sm:$0xff] %v4780_v55 }
  0xe0   :  { %v2035_v42 = vadd.f32 %v2034_v61, %v7903_v36  ;;  %v1814_v62 = vadd.f32 %v1813_v51, %v7908_v44  ;;  %v7912_v40 = vunpack.c.h.bf16 %v7911_v41  ;;  %v7913_v31 = vld [vmem:[#allocation20_spill] sm:$0xff]  ;;  %v7916_v36 = vunpack.c.h.bf16 %v7915_v48  ;;  %v7918_v44 = vld [vmem:[#allocation61_spill] sm:$0xff]  ;;  %v7928_v48 = vld [vmem:[#allocation126_spill] sm:$0xff] }
  0xe1   :  { %v7914_v58 = vunpack.c.h.bf16 %v7913_v31  ;;  %v2147_v51 = vadd.f32 %v2146_v18, %v7917_v4  ;;  %v7919_v43 = vunpack.c.h.bf16 %v7918_v44  ;;  %v7920_v35 = vld [vmem:[#allocation84_spill] sm:$0xff]  ;;  %v7930_v4 = vld [vmem:[#allocation149_spill] sm:$0xff]  ;;  %v4799_v63 = vld [vmem:[#allocation2 + $0x258] sm:$0xff] }
  0xe2   :  { %v1597_v61 = vadd.f32 %v1596_v25, %v7912_v40  ;;  %v2036_v11 = vadd.f32 %v2035_v42, %v7916_v36  ;;  %v7921_v33 = vunpack.c.h.bf16 %v7920_v35  ;;  %v4567_v25 = vld [vmem:[#allocation2 + $0x120] sm:$0xff]  ;;  %v7924_v40 = vld [vmem:[#allocation41_spill] sm:$0xff]  ;;  %v7929_v36 = vunpack.c.h.bf16 %v7928_v48  ;;  %8086 = vst [vmem:[#allocation58_spill] sm:$0xff] %v4799_v63  ;;  %v4900_v63 = vld [vmem:[#allocation2 + $0x354] sm:$0xff] }
  0xe3   :  { %v1925_v29 = vadd.f32 %v1924_v8, %v7914_v58  ;;  %v1704_v1 = vadd.f32 %v1703_v5, %v7919_v43  ;;  %7923 = vst [vmem:[#allocation145_spill] sm:$0xff] %v4567_v25  ;;  %v7925_v31 = vunpack.c.h.bf16 %v7924_v40  ;;  %v7926_v58 = vld [vmem:[#allocation105_spill] sm:$0xff]  ;;  %v7931_v44 = vunpack.c.h.bf16 %v7930_v4  ;;  %8133 = vst [vmem:[#allocation125_spill] sm:$0xff] %v4900_v63  ;;  %v4936_v60 = vld [vmem:[#allocation2 + $0x3d8] sm:$0xff] }
  0xe4   :  { %v1815_v21 = vadd.f32 %v1814_v62, %v7921_v33  ;;  %v7927_v19 = vunpack.c.h.bf16 %v7926_v58  ;;  %v2037_v5 = vadd.f32 %v2036_v11, %v7929_v36  ;;  %v7932_v33 = vld [vmem:[#allocation62_spill] sm:$0xff]  ;;  %v7934_v41 = vld [vmem:[#allocation85_spill] sm:$0xff]  ;;  %v7942_v36 = vld [vmem:[#allocation127_spill] sm:$0xff] }
  0xe5   :  { %v1598_v42 = vadd.f32 %v1597_v61, %v7925_v31  ;;  %v2148_v62 = vadd.f32 %v2147_v51, %v7931_v44  ;;  %v7933_v43 = vunpack.c.h.bf16 %v7932_v33  ;;  %v7935_v50 = vunpack.c.h.bf16 %v7934_v41  ;;  %v4585_v61 = vld [vmem:[#allocation2 + $0x138] sm:$0xff]  ;;  %v4812_v57 = vld [vmem:[#allocation2 + $0x264] sm:$0xff]  ;;  %8144 = vst [vmem:[#allocation127_spill] sm:$0xff] %v4936_v60  ;;  %v5016_v55 = vld [vmem:[#allocation2 + $0x510] sm:$0xff] }
  0xe6   :  { %v1926_v18 = vadd.f32 %v1925_v29, %v7927_v19  ;;  %7937 = vst [vmem:[#allocation78_spill] sm:$0xff] %v4585_v61  ;;  %v7938_v31 = vld [vmem:[#allocation42_spill] sm:$0xff]  ;;  %v7943_v4 = vunpack.c.h.bf16 %v7942_v36  ;;  %v7944_v41 = vunpack.c.h.bf16 %v4273_v52  ;;  %v7955_v36 = vld [vmem:[#allocation128_spill] sm:$0xff]  ;;  %8096 = vst [vmem:[#allocation81_spill] sm:$0xff] %v4812_v57 }
  0xe7   :  { %v1705_v35 = vadd.f32 %v1704_v1, %v7933_v43  ;;  %v1816_v26 = vadd.f32 %v1815_v21, %v7935_v50  ;;  %v7939_v58 = vunpack.c.h.bf16 %v7938_v31  ;;  %v7940_v19 = vld [vmem:[#allocation106_spill] sm:$0xff]  ;;  %v7945_v50 = vld [vmem:[#allocation63_spill] sm:$0xff]  ;;  %v4744_v61 = vld [vmem:[#allocation2 + $0x204] sm:$0xff] }
  0xe8   :  { %v7941_v48 = vunpack.c.h.bf16 %v7940_v19  ;;  %v2038_v1 = vadd.f32 %v2037_v5, %v7943_v4  ;;  %v2149_v21 = vadd.f32 %v2148_v62, %v7944_v41  ;;  %v7946_v44 = vunpack.c.h.bf16 %v7945_v50  ;;  %v7947_v43 = vld [vmem:[#allocation86_spill] sm:$0xff]  ;;  %8048 = vst [vmem:[#allocation28_spill] sm:$0xff] %v4744_v61  ;;  %v4828_v57 = vld [vmem:[#allocation2 + $0x27c] sm:$0xff]  ;;  %v5229_v7 = vld [vmem:[#allocation2 + $0x864] sm:$0xff] }
  0xe9   :  { %v1599_v11 = vadd.f32 %v1598_v42, %v7939_v58  ;;  %v7948_v40 = vunpack.c.h.bf16 %v7947_v43  ;;  %v4603_v42 = vld [vmem:[#allocation2 + $0x150] sm:$0xff]  ;;  %v7951_v58 = vld [vmem:[#allocation43_spill] sm:$0xff]  ;;  %v7956_v4 = vunpack.c.h.bf16 %v7955_v36  ;;  %v7957_v41 = vunpack.c.h.bf16 %v4275_v59  ;;  %8107 = vst [vmem:[#allocation103_spill] sm:$0xff] %v4828_v57  ;;  %8223 = vst [vmem:[#allocation157_spill] sm:$0xff] %v5229_v7 }
  0xea   :  { %v1927_v51 = vadd.f32 %v1926_v18, %v7941_v48  ;;  %v1706_v33 = vadd.f32 %v1705_v35, %v7946_v44  ;;  %7950 = vst [vmem:[#allocation101_spill] sm:$0xff] %v4603_v42  ;;  %v7952_v19 = vunpack.c.h.bf16 %v7951_v58  ;;  %v7953_v48 = vld [vmem:[#allocation107_spill] sm:$0xff]  ;;  %v7968_v36 = vld [vmem:[#allocation129_spill] sm:$0xff]  ;;  %v7974_v58 = vld [vmem:[#allocation88_spill] sm:$0xff] }
  0xeb   :  { %v1817_v8 = vadd.f32 %v1816_v26, %v7948_v40  ;;  %v7954_v52 = vunpack.c.h.bf16 %v7953_v48  ;;  %v2039_v35 = vadd.f32 %v2038_v1, %v7956_v4  ;;  %v2150_v26 = vadd.f32 %v2149_v21, %v7957_v41  ;;  %v7958_v40 = vld [vmem:[#allocation15_spill] sm:$0xff]  ;;  %v7970_v41 = vld [vmem:[#allocation150_spill] sm:$0xff] }
  0xec   :  { %v1600_v5 = vadd.f32 %v1599_v11, %v7952_v19  ;;  %v7959_v50 = vunpack.c.h.bf16 %v7958_v40  ;;  %v7960_v43 = vld [vmem:[#allocation87_spill] sm:$0xff]  ;;  %v4621_v11 = vld [vmem:[#allocation2 + $0x168] sm:$0xff]  ;;  %v7969_v4 = vunpack.c.h.bf16 %v7968_v36  ;;  %v7971_v40 = vunpack.c.h.bf16 %v7970_v41 }
  0xed   :  { %v1928_v62 = vadd.f32 %v1927_v51, %v7954_v52  ;;  %v7961_v31 = vunpack.c.h.bf16 %v7960_v43  ;;  %7963 = vst [vmem:[#allocation146_spill] sm:$0xff] %v4621_v11  ;;  %v7964_v19 = vld [vmem:[#allocation44_spill] sm:$0xff]  ;;  %v7975_v18 = vunpack.c.h.bf16 %v7974_v58  ;;  %v7983_v58 = vunpack.c.h.bf16 %v4282_v17  ;;  %v4708_v42 = vld [vmem:[#allocation2 + $0x1d4] sm:$0xff]  ;;  %v5247_v7 = vld [vmem:[#allocation2 + $0x8ac] sm:$0xff] }
  0xee   :  { %v1707_v44 = vadd.f32 %v1706_v33, %v7959_v50  ;;  %v7965_v48 = vunpack.c.h.bf16 %v7964_v19  ;;  %v7966_v52 = vld [vmem:[#allocation108_spill] sm:$0xff]  ;;  %v2040_v33 = vadd.f32 %v2039_v35, %v7969_v4  ;;  %v7981_v4 = vld [vmem:[#allocation130_spill] sm:$0xff]  ;;  %8022 = vst [vmem:[#allocation79_spill] sm:$0xff] %v4708_v42  ;;  %8229 = vst [vmem:[#allocation163_spill] sm:$0xff] %v5247_v7 }
  0xef   :  { %v1818_v29 = vadd.f32 %v1817_v8, %v7961_v31  ;;  %v7967_v59 = vunpack.c.h.bf16 %v7966_v52  ;;  %v2151_v8 = vadd.f32 %v2150_v26, %v7971_v40  ;;  %v7972_v31 = vld [vmem:[#allocation64_spill] sm:$0xff]  ;;  %v7982_v41 = vunpack.c.h.bf16 %v7981_v4  ;;  %v7992_v4 = vld [vmem:[#allocation131_spill] sm:$0xff]  ;;  %v5391_v42 = vld [vmem:[#allocation2 + $0xaec] sm:$0xff] }
  0xf0   :  { %v1601_v1 = vadd.f32 %v1600_v5, %v7965_v48  ;;  %v7973_v50 = vunpack.c.h.bf16 %v7972_v31  ;;  %v4639_v5 = vld [vmem:[#allocation2 + $0x180] sm:$0xff]  ;;  %v7977_v48 = vld [vmem:[#allocation45_spill] sm:$0xff]  ;;  %v4844_v57 = vld [vmem:[#allocation2 + $0x294] sm:$0xff]  ;;  %8165 = vst [vmem:[#allocation131_spill] sm:$0xff] %v5019_v6 }
  0xf1   :  { %v1929_v21 = vadd.f32 %v1928_v62, %v7967_v59  ;;  %v1819_v34 = vadd.f32 %v1818_v29, %v7975_v18  ;;  %v7978_v52 = vunpack.c.h.bf16 %v7977_v48  ;;  %v7979_v59 = vld [vmem:[#allocation109_spill] sm:$0xff]  ;;  %v2152_v29 = vadd.f32 %v2151_v8, %v7983_v58  ;;  %v4690_v11 = vld [vmem:[#allocation2 + $0x1bc] sm:$0xff]  ;;  %8118 = vst [vmem:[#allocation148_spill] sm:$0xff] %v4844_v57  ;;  %v4953_v60 = vld [vmem:[#allocation2 + $0x414] sm:$0xff] }
  0xf2   :  { %v1708_v43 = vadd.f32 %v1707_v44, %v7973_v50  ;;  %v7980_v36 = vunpack.c.h.bf16 %v7979_v59  ;;  %v2041_v44 = vadd.f32 %v2040_v33, %v7982_v41  ;;  %v7984_v18 = vld [vmem:[#allocation65_spill] sm:$0xff]  ;;  %v7993_v41 = vunpack.c.h.bf16 %v7992_v4  ;;  %v8003_v4 = vld [vmem:[#allocation132_spill] sm:$0xff]  ;;  %8149 = vst [vmem:[#allocation128_spill] sm:$0xff] %v4953_v60  ;;  %v5010_v23 = vld [vmem:[#allocation2 + $0x4f8] sm:$0xff] }
  0xf3   :  { %v1602_v35 = vadd.f32 %v1601_v1, %v7978_v52  ;;  %v7985_v40 = vunpack.c.h.bf16 %v7984_v18  ;;  %v7986_v50 = vld [vmem:[#allocation89_spill] sm:$0xff]  ;;  %v4657_v1 = vld [vmem:[#allocation2 + $0x198] sm:$0xff]  ;;  %v7994_v58 = vunpack.c.h.bf16 %v4284_v53  ;;  %v5196_v32 = vld [vmem:[#allocation2 + $0x7e0] sm:$0xff]  ;;  %8265 = vst [vmem:[#allocation199_spill] sm:$0xff] %v5391_v42 }
  0xf4   :  { %v1930_v26 = vadd.f32 %v1929_v21, %v7980_v36  ;;  %v7987_v19 = vunpack.c.h.bf16 %v7986_v50  ;;  %v7988_v52 = vld [vmem:[#allocation46_spill] sm:$0xff]  ;;  %v7990_v36 = vld [vmem:[#allocation21_spill] sm:$0xff]  ;;  %v4971_v60 = vld [vmem:[#allocation2 + $0x45c] sm:$0xff]  ;;  %8162 = vst [vmem:[#allocation89_spill] sm:$0xff] %v5010_v23 }
  0xf5   :  { %v1709_v31 = vadd.f32 %v1708_v43, %v7985_v40  ;;  %v7989_v59 = vunpack.c.h.bf16 %v7988_v52  ;;  %v7991_v17 = vunpack.c.h.bf16 %v7990_v36  ;;  %v2042_v43 = vadd.f32 %v2041_v44, %v7993_v41  ;;  %v7997_v50 = vld [vmem:[#allocation90_spill] sm:$0xff]  ;;  %8155 = vst [vmem:[#allocation150_spill] sm:$0xff] %v4971_v60  ;;  %v4989_v60 = vld [vmem:[#allocation2 + $0x4a4] sm:$0xff]  ;;  %8164 = vst [vmem:[#allocation21_spill] sm:$0xff] %v5016_v55 }
  0xf6   :  { %v1820_v51 = vadd.f32 %v1819_v34, %v7987_v19  ;;  %v2153_v34 = vadd.f32 %v2152_v29, %v7994_v58  ;;  %v7995_v19 = vld [vmem:[#allocation66_spill] sm:$0xff]  ;;  %v7998_v48 = vunpack.c.h.bf16 %v7997_v50  ;;  %v8004_v41 = vunpack.c.h.bf16 %v8003_v4  ;;  %v8008_v50 = vld [vmem:[#allocation91_spill] sm:$0xff]  ;;  %v8014_v4 = vld [vmem:[#allocation133_spill] sm:$0xff] }
  0xf7   :  { %v1603_v33 = vadd.f32 %v1602_v35, %v7989_v59  ;;  %v1931_v8 = vadd.f32 %v1930_v26, %v7991_v17  ;;  %v7996_v18 = vunpack.c.h.bf16 %v7995_v19  ;;  %v4675_v35 = vld [vmem:[#allocation2 + $0x1b0] sm:$0xff]  ;;  %v7999_v59 = vld [vmem:[#allocation47_spill] sm:$0xff]  ;;  %v8005_v58 = vunpack.c.h.bf16 %v4286_v16  ;;  %v5037_v6 = vld [vmem:[#allocation2 + $0x564] sm:$0xff] }
  0xf8   :  { %v1821_v62 = vadd.f32 %v1820_v51, %v7998_v48  ;;  %v8000_v36 = vunpack.c.h.bf16 %v7999_v59  ;;  %v8001_v17 = vld [vmem:[#allocation110_spill] sm:$0xff]  ;;  %v8006_v48 = vld [vmem:[#allocation67_spill] sm:$0xff]  ;;  %v8009_v52 = vunpack.c.h.bf16 %v8008_v50  ;;  %v8020_v59 = vld [vmem:[#allocation92_spill] sm:$0xff]  ;;  %8168 = vst [vmem:[#allocation47_spill] sm:$0xff] %v5028_v15 }
  0xf9   :  { %v1710_v40 = vadd.f32 %v1709_v31, %v7996_v18  ;;  %v8002_v53 = vunpack.c.h.bf16 %v8001_v17  ;;  %v2043_v31 = vadd.f32 %v2042_v43, %v8004_v41  ;;  %v2154_v51 = vadd.f32 %v2153_v34, %v8005_v58  ;;  %v8016_v58 = vld [vmem:[#allocation29_spill] sm:$0xff]  ;;  %v5034_v54 = vld [vmem:[#allocation2 + $0x558] sm:$0xff]  ;;  %8171 = vst [vmem:[#allocation67_spill] sm:$0xff] %v5037_v6 }
  0xfa   :  { %v1604_v44 = vadd.f32 %v1603_v33, %v8000_v36  ;;  %v8007_v19 = vunpack.c.h.bf16 %v8006_v48  ;;  %v1822_v21 = vadd.f32 %v1821_v62, %v8009_v52  ;;  %v4693_v33 = vld [vmem:[#allocation2 + $0x1c8] sm:$0xff]  ;;  %v8015_v41 = vunpack.c.h.bf16 %v8014_v4  ;;  %8170 = vst [vmem:[#allocation132_spill] sm:$0xff] %v5034_v54  ;;  %v5052_v54 = vld [vmem:[#allocation2 + $0x5a0] sm:$0xff]  ;;  %v5097_v55 = vld [vmem:[#allocation2 + $0x654] sm:$0xff] }
  0xfb   :  { %v1932_v29 = vadd.f32 %v1931_v8, %v8002_v53  ;;  %v8010_v36 = vld [vmem:[#allocation48_spill] sm:$0xff]  ;;  %v8012_v53 = vld [vmem:[#allocation111_spill] sm:$0xff]  ;;  %v8017_v48 = vunpack.c.h.bf16 %v8016_v58  ;;  %v8021_v26 = vunpack.c.h.bf16 %v8020_v59  ;;  %v8030_v59 = vunpack.c.h.bf16 %v4295_v46  ;;  %8176 = vst [vmem:[#allocation29_spill] sm:$0xff] %v5052_v54  ;;  %v5055_v6 = vld [vmem:[#allocation2 + $0x5ac] sm:$0xff] }
  0xfc   :  { %v1711_v18 = vadd.f32 %v1710_v40, %v8007_v19  ;;  %v8011_v17 = vunpack.c.h.bf16 %v8010_v36  ;;  %v8013_v16 = vunpack.c.h.bf16 %v8012_v53  ;;  %v2044_v40 = vadd.f32 %v2043_v31, %v8015_v41  ;;  %v8018_v52 = vld [vmem:[#allocation68_spill] sm:$0xff]  ;;  %v8028_v41 = vld [vmem:[#allocation134_spill] sm:$0xff] }
  0xfd   :  { %v2155_v62 = vadd.f32 %v2154_v51, %v8017_v48  ;;  %v8019_v19 = vunpack.c.h.bf16 %v8018_v52  ;;  %v1823_v22 = vadd.f32 %v1822_v21, %v8021_v26  ;;  %v8029_v58 = vunpack.c.h.bf16 %v8028_v41  ;;  %v8031_v26 = vld [vmem:[#allocation16_spill] sm:$0xff]  ;;  %v8041_v41 = vld [vmem:[#allocation135_spill] sm:$0xff]  ;;  %8177 = vst [vmem:[#allocation68_spill] sm:$0xff] %v5055_v6 }
  0xfe   :  { %v1605_v43 = vadd.f32 %v1604_v44, %v8011_v17  ;;  %v1933_v34 = vadd.f32 %v1932_v29, %v8013_v16  ;;  %v4711_v44 = vld [vmem:[#allocation2 + $0x1e0] sm:$0xff]  ;;  %v8024_v17 = vld [vmem:[#allocation49_spill] sm:$0xff]  ;;  %v8026_v16 = vld [vmem:[#allocation26_spill] sm:$0xff]  ;;  %v8032_v48 = vunpack.c.h.bf16 %v8031_v26 }
  0xff   :  { %v1712_v50 = vadd.f32 %v1711_v18, %v8019_v19  ;;  %8023 = vst [vmem:[#allocation36_spill] sm:$0xff] %v4711_v44  ;;  %v8025_v53 = vunpack.c.h.bf16 %v8024_v17  ;;  %v8027_v4 = vunpack.c.h.bf16 %v8026_v16  ;;  %v2045_v18 = vadd.f32 %v2044_v40, %v8029_v58  ;;  %v8033_v19 = vld [vmem:[#allocation93_spill] sm:$0xff]  ;;  %v5073_v6 = vld [vmem:[#allocation2 + $0x5f4] sm:$0xff]  ;;  %v5115_v61 = vld [vmem:[#allocation2 + $0x69c] sm:$0xff] }
 0x100   :  { %v2156_v21 = vadd.f32 %v2155_v62, %v8030_v59  ;;  %v8034_v36 = vunpack.c.h.bf16 %v8033_v19  ;;  %v8042_v58 = vunpack.c.h.bf16 %v8041_v41  ;;  %v8043_v59 = vunpack.c.h.bf16 %v4297_v38  ;;  %v8046_v19 = vld [vmem:[#allocation94_spill] sm:$0xff]  ;;  %v8054_v41 = vld [vmem:[#allocation136_spill] sm:$0xff]  ;;  %8183 = vst [vmem:[#allocation93_spill] sm:$0xff] %v5073_v6 }
 0x101   :  { %v1606_v31 = vadd.f32 %v1605_v43, %v8025_v53  ;;  %v1934_v51 = vadd.f32 %v1933_v34, %v8027_v4  ;;  %v1713_v52 = vadd.f32 %v1712_v50, %v8032_v48  ;;  %v4729_v43 = vld [vmem:[#allocation2 + $0x1f8] sm:$0xff]  ;;  %v8039_v4 = vld [vmem:[#allocation112_spill] sm:$0xff]  ;;  %v8047_v17 = vunpack.c.h.bf16 %v8046_v19  ;;  %8191 = vst [vmem:[#allocation136_spill] sm:$0xff] %v5115_v61  ;;  %v5295_v44 = vld [vmem:[#allocation2 + $0x96c] sm:$0xff] }
 0x102   :  { %v1824_v8 = vadd.f32 %v1823_v22, %v8034_v36  ;;  %8036 = vst [vmem:[#allocation121_spill] sm:$0xff] %v4729_v43  ;;  %v8037_v53 = vld [vmem:[#allocation50_spill] sm:$0xff]  ;;  %v8040_v46 = vunpack.c.h.bf16 %v8039_v4  ;;  %v2046_v50 = vadd.f32 %v2045_v18, %v8042_v58  ;;  %v2157_v22 = vadd.f32 %v2156_v21, %v8043_v59  ;;  %v8044_v36 = vld [vmem:[#allocation69_spill] sm:$0xff]  ;;  %v8059_v19 = vld [vmem:[#allocation95_spill] sm:$0xff] }
 0x103   :  { %v8038_v16 = vunpack.c.h.bf16 %v8037_v53  ;;  %v8045_v26 = vunpack.c.h.bf16 %v8044_v36  ;;  %v8055_v58 = vunpack.c.h.bf16 %v8054_v41  ;;  %v8056_v59 = vunpack.c.h.bf16 %v4302_v0  ;;  %v5046_v15 = vld [vmem:[#allocation2 + $0x588] sm:$0xff]  ;;  %v5091_v6 = vld [vmem:[#allocation2 + $0x63c] sm:$0xff]  ;;  %8184 = vst [vmem:[#allocation50_spill] sm:$0xff] %v5094_v12  ;;  %8185 = vst [vmem:[#allocation112_spill] sm:$0xff] %v5097_v55 }
 0x104   :  { %v1935_v62 = vadd.f32 %v1934_v51, %v8040_v46  ;;  %v1825_v29 = vadd.f32 %v1824_v8, %v8047_v17  ;;  %v8052_v46 = vld [vmem:[#allocation113_spill] sm:$0xff]  ;;  %v8057_v17 = vld [vmem:[#allocation70_spill] sm:$0xff]  ;;  %v8060_v53 = vunpack.c.h.bf16 %v8059_v19  ;;  %8174 = vst [vmem:[#allocation111_spill] sm:$0xff] %v5046_v15  ;;  %8239 = vst [vmem:[#allocation173_spill] sm:$0xff] %v5295_v44 }
 0x105   :  { %v1607_v40 = vadd.f32 %v1606_v31, %v8038_v16  ;;  %v1714_v48 = vadd.f32 %v1713_v52, %v8045_v26  ;;  %v4747_v31 = vld [vmem:[#allocation2 + $0x210] sm:$0xff]  ;;  %v8050_v16 = vld [vmem:[#allocation51_spill] sm:$0xff]  ;;  %v8053_v38 = vunpack.c.h.bf16 %v8052_v46  ;;  %v2047_v52 = vadd.f32 %v2046_v50, %v8055_v58  ;;  %v5070_v54 = vld [vmem:[#allocation2 + $0x5e8] sm:$0xff]  ;;  %8192 = vst [vmem:[#allocation70_spill] sm:$0xff] %v5118_v3 }
 0x106   :  { %8049 = vst [vmem:[#allocation57_spill] sm:$0xff] %v4747_v31  ;;  %v8051_v4 = vunpack.c.h.bf16 %v8050_v16  ;;  %v2158_v8 = vadd.f32 %v2157_v22, %v8056_v59  ;;  %v8058_v36 = vunpack.c.h.bf16 %v8057_v17  ;;  %v1826_v34 = vadd.f32 %v1825_v29, %v8060_v53  ;;  %v8067_v58 = vld [vmem:[#allocation137_spill] sm:$0xff]  ;;  %v8070_v53 = vld [vmem:[#allocation71_spill] sm:$0xff]  ;;  %v8072_v16 = vld [vmem:[#allocation96_spill] sm:$0xff] }
 0x107   :  { %v1936_v21 = vadd.f32 %v1935_v62, %v8053_v38  ;;  %v8065_v38 = vld [vmem:[#allocation22_spill] sm:$0xff]  ;;  %v8068_v59 = vunpack.c.h.bf16 %v8067_v58  ;;  %v8069_v17 = vunpack.c.h.bf16 %v4304_v20  ;;  %v8073_v51 = vunpack.c.h.bf16 %v8072_v16  ;;  %v8081_v16 = vld [vmem:[#allocation72_spill] sm:$0xff]  ;;  %8182 = vst [vmem:[#allocation16_spill] sm:$0xff] %v5070_v54 }
 0x108   :  { %v1608_v18 = vadd.f32 %v1607_v40, %v8051_v4  ;;  %v1715_v26 = vadd.f32 %v1714_v48, %v8058_v36  ;;  %v4765_v40 = vld [vmem:[#allocation2 + $0x228] sm:$0xff]  ;;  %v8066_v41 = vunpack.c.h.bf16 %v8065_v38  ;;  %v8071_v36 = vunpack.c.h.bf16 %v8070_v53  ;;  %v8076_v38 = vld [vmem:[#allocation114_spill] sm:$0xff] }
 0x109   :  { %8062 = vst [vmem:[#allocation37_spill] sm:$0xff] %v4765_v40  ;;  %v8063_v4 = vld [vmem:[#allocation52_spill] sm:$0xff]  ;;  %v2048_v48 = vadd.f32 %v2047_v52, %v8068_v59  ;;  %v2159_v29 = vadd.f32 %v2158_v8, %v8069_v17  ;;  %v1827_v25 = vadd.f32 %v1826_v34, %v8073_v51  ;;  %v8077_v52 = vunpack.c.h.bf16 %v8076_v38  ;;  %v8078_v58 = vld [vmem:[#allocation138_spill] sm:$0xff]  ;;  %v8083_v53 = vld [vmem:[#allocation97_spill] sm:$0xff] }
 0x10a   :  { %v8064_v46 = vunpack.c.h.bf16 %v8063_v4  ;;  %v1937_v22 = vadd.f32 %v1936_v21, %v8066_v41  ;;  %v1716_v19 = vadd.f32 %v1715_v26, %v8071_v36  ;;  %v8079_v8 = vunpack.c.h.bf16 %v8078_v58  ;;  %v4796_v62 = vld [vmem:[#allocation2 + $0x24c] sm:$0xff]  ;;  %v5025_v40 = vld [vmem:[#allocation2 + $0x534] sm:$0xff]  ;;  %v5133_v61 = vld [vmem:[#allocation2 + $0x6e4] sm:$0xff] }
 0x10b   :  { %v8080_v26 = vunpack.c.h.bf16 %v4314_v28  ;;  %v8082_v34 = vunpack.c.h.bf16 %v8081_v16  ;;  %v8084_v36 = vunpack.c.h.bf16 %v8083_v53  ;;  %8085 = vst [vmem:[#allocation147_spill] sm:$0xff] %v4796_v62  ;;  %8167 = vst [vmem:[#allocation90_spill] sm:$0xff] %v5025_v40  ;;  %v5043_v40 = vld [vmem:[#allocation2 + $0x57c] sm:$0xff]  ;;  %v5064_v15 = vld [vmem:[#allocation2 + $0x5d0] sm:$0xff] }
 0x10c   :  { %v1609_v50 = vadd.f32 %v1608_v18, %v8064_v46  ;;  %v4783_v18 = vld [vmem:[#allocation2 + $0x240] sm:$0xff]  ;;  %v1938_v41 = vadd.f32 %v1937_v22, %v8077_v52  ;;  %v2049_v59 = vadd.f32 %v2048_v48, %v8079_v8  ;;  %8173 = vst [vmem:[#allocation48_spill] sm:$0xff] %v5043_v40  ;;  %8180 = vst [vmem:[#allocation26_spill] sm:$0xff] %v5064_v15  ;;  %v5082_v15 = vld [vmem:[#allocation2 + $0x618] sm:$0xff] }
 0x10d   :  { %8075 = vst [vmem:[#allocation122_spill] sm:$0xff] %v4783_v18  ;;  %v2160_v17 = vadd.f32 %v2159_v29, %v8080_v26  ;;  %v1717_v51 = vadd.f32 %v1716_v19, %v8082_v34  ;;  %v1828_v4 = vadd.f32 %v1827_v25, %v8084_v36  ;;  %v8087_v52 = vld [vmem:[#allocation115_spill] sm:$0xff]  ;;  %v8091_v19 = vunpack.c.h.bf16 %v4331_v13  ;;  %v8092_v34 = vld [vmem:[#allocation73_spill] sm:$0xff]  ;;  %v8094_v36 = vld [vmem:[#allocation98_spill] sm:$0xff] }
 0x10e   :  { %v1610_v46 = vrot.slane %v1609_v50, 4  ;;  %v8088_v48 = vunpack.c.h.bf16 %v8087_v52  ;;  %v8089_v8 = vld [vmem:[#allocation139_spill] sm:$0xff]  ;;  %v8093_v25 = vunpack.c.h.bf16 %v8092_v34  ;;  %v8095_v9 = vunpack.c.h.bf16 %v8094_v36  ;;  %v4943_v18 = vld [vmem:[#allocation2 + $0x3f0] sm:$0xff]  ;;  %v5061_v40 = vld [vmem:[#allocation2 + $0x5c4] sm:$0xff]  ;;  %8197 = vst [vmem:[#allocation71_spill] sm:$0xff] %v5133_v61 }
 0x10f   :  { %v8090_v29 = vunpack.c.h.bf16 %v8089_v8  ;;  %v2161_v16 = vadd.f32 %v2160_v17, %v8091_v19  ;;  %v8100_v17 = vld [vmem:[#allocation140_spill] sm:$0xff]  ;;  %v8105_v36 = vld [vmem:[#allocation99_spill] sm:$0xff]  ;;  %8146 = vst [vmem:[#allocation86_spill] sm:$0xff] %v4943_v18  ;;  %8179 = vst [vmem:[#allocation49_spill] sm:$0xff] %v5061_v40 }
 0x110   :  { %v1611_v38 = vadd.f32 %v1610_v46, %v1609_v50  ;;  %v1939_v58 = vadd.f32 %v1938_v41, %v8088_v48  ;;  %v1718_v53 = vadd.f32 %v1717_v51, %v8093_v25  ;;  %v1829_v21 = vadd.f32 %v1828_v4, %v8095_v9  ;;  %v4815_v46 = vld [vmem:[#allocation2 + $0x270] sm:$0xff]  ;;  %v5004_v18 = vld [vmem:[#allocation2 + $0x4e0] sm:$0xff]  ;;  %v5106_v56 = vld [vmem:[#allocation2 + $0x678] sm:$0xff] }
 0x111   :  { %v2050_v26 = vadd.f32 %v2049_v59, %v8090_v29  ;;  %8097 = vst [vmem:[#allocation38_spill] sm:$0xff] %v4815_v46  ;;  %v8098_v59 = vld [vmem:[#allocation116_spill] sm:$0xff]  ;;  %v8101_v29 = vunpack.c.h.bf16 %v8100_v17  ;;  %v8102_v51 = vunpack.c.h.bf16 %v4360_v27  ;;  %v8103_v9 = vld [vmem:[#allocation74_spill] sm:$0xff]  ;;  %v8106_v22 = vunpack.c.h.bf16 %v8105_v36  ;;  %8160 = vst [vmem:[#allocation130_spill] sm:$0xff] %v5004_v18 }
 0x112   :  { %v1612_v52 = vrot.slane %v1611_v38, 2  ;;  %v8099_v48 = vunpack.c.h.bf16 %v8098_v59  ;;  %v8104_v4 = vunpack.c.h.bf16 %v8103_v9  ;;  %v4831_v46 = vld [vmem:[#allocation2 + $0x288] sm:$0xff]  ;;  %v5088_v54 = vld [vmem:[#allocation2 + $0x630] sm:$0xff]  ;;  %8188 = vst [vmem:[#allocation94_spill] sm:$0xff] %v5106_v56  ;;  %v5124_v56 = vld [vmem:[#allocation2 + $0x6c0] sm:$0xff] }
 0x113   :  { %v2051_v19 = vadd.f32 %v2050_v26, %v8101_v29  ;;  %v2162_v34 = vadd.f32 %v2161_v16, %v8102_v51  ;;  %v1830_v50 = vadd.f32 %v1829_v21, %v8106_v22  ;;  %8108 = vst [vmem:[#allocation123_spill] sm:$0xff] %v4831_v46  ;;  %v8111_v29 = vld [vmem:[#allocation141_spill] sm:$0xff]  ;;  %v8116_v36 = vld [vmem:[#allocation100_spill] sm:$0xff]  ;;  %v5121_v23 = vld [vmem:[#allocation2 + $0x6b4] sm:$0xff] }
 0x114   :  { %v1940_v8 = vadd.f32 %v1939_v58, %v8099_v48  ;;  %v1719_v25 = vadd.f32 %v1718_v53, %v8104_v4  ;;  %v1613_v59 = vadd.f32 %v1612_v52, %v1611_v38  ;;  %v8109_v48 = vld [vmem:[#allocation117_spill] sm:$0xff]  ;;  %v8112_v16 = vunpack.c.h.bf16 %v8111_v29  ;;  %v8114_v4 = vld [vmem:[#allocation75_spill] sm:$0xff]  ;;  %v8122_v29 = vld [vmem:[#allocation142_spill] sm:$0xff]  ;;  %8193 = vst [vmem:[#allocation95_spill] sm:$0xff] %v5121_v23 }
 0x115   :  { %v8110_v26 = vunpack.c.h.bf16 %v8109_v48  ;;  %v8113_v53 = vunpack.c.h.bf16 %v4362_v49  ;;  %v8115_v21 = vunpack.c.h.bf16 %v8114_v4  ;;  %v8117_v10 = vunpack.c.h.bf16 %v8116_v36  ;;  %v4847_v38 = vld [vmem:[#allocation2 + $0x2a0] sm:$0xff]  ;;  %v8120_v48 = vld [vmem:[#allocation118_spill] sm:$0xff]  ;;  %8194 = vst [vmem:[#allocation52_spill] sm:$0xff] %v5124_v56  ;;  %v5142_v56 = vld [vmem:[#allocation2 + $0x708] sm:$0xff] }
 0x116   :  { %v2052_v51 = vadd.f32 %v2051_v19, %v8112_v16  ;;  %8119 = vst [vmem:[#allocation59_spill] sm:$0xff] %v4847_v38  ;;  %v8121_v19 = vunpack.c.h.bf16 %v8120_v48  ;;  %v4859_v36 = vld [vmem:[#allocation2 + $0x2b8] sm:$0xff]  ;;  %v5079_v40 = vld [vmem:[#allocation2 + $0x60c] sm:$0xff]  ;;  %8200 = vst [vmem:[#allocation138_spill] sm:$0xff] %v5142_v56 }
 0x117   :  { %v1941_v17 = vadd.f32 %v1940_v8, %v8110_v26  ;;  %v2163_v9 = vadd.f32 %v2162_v34, %v8113_v53  ;;  %v1720_v22 = vadd.f32 %v1719_v25, %v8115_v21  ;;  %v1831_v41 = vadd.f32 %v1830_v50, %v8117_v10  ;;  %v4856_v50 = vld [vmem:[#allocation2 + $0x2ac] sm:$0xff]  ;;  %8126 = vst [vmem:[#allocation39_spill] sm:$0xff] %v4859_v36  ;;  %v5139_v23 = vld [vmem:[#allocation2 + $0x6fc] sm:$0xff]  ;;  %v5193_v43 = vld [vmem:[#allocation2 + $0x7d4] sm:$0xff] }
 0x118   :  { %v1614_v8 = vrot.slane %v1613_v59, 1  ;;  %v8123_v34 = vunpack.c.h.bf16 %v8122_v29  ;;  %v8124_v25 = vunpack.c.h.bf16 %v4376_v30  ;;  %8125 = vst [vmem:[#allocation82_spill] sm:$0xff] %v4856_v50  ;;  %v5103_v31 = vld [vmem:[#allocation2 + $0x66c] sm:$0xff]  ;;  %8199 = vst [vmem:[#allocation114_spill] sm:$0xff] %v5139_v23  ;;  %v5157_v23 = vld [vmem:[#allocation2 + $0x744] sm:$0xff] }
 0x119   :  { %v1942_v26 = vadd.f32 %v1941_v17, %v8121_v19  ;;  %v1721_v4 = vrot.slane %v1720_v22, 4  ;;  %v1832_v10 = vrot.slane %v1831_v41, 4  ;;  %8187 = vst [vmem:[#allocation69_spill] sm:$0xff] %v5103_v31  ;;  %v5136_v3 = vld [vmem:[#allocation2 + $0x6f0] sm:$0xff]  ;;  %8205 = vst [vmem:[#allocation73_spill] sm:$0xff] %v5157_v23  ;;  %v5298_v45 = vld [vmem:[#allocation2 + $0x978] sm:$0xff] }
 0x11a   :  { %v2053_v16 = vadd.f32 %v2052_v51, %v8123_v34  ;;  %v2164_v53 = vadd.f32 %v2163_v9, %v8124_v25  ;;  %v1615_v58 = vadd.f32 %v1614_v8, %v1613_v59  ;;  %v4862_v51 = vld [vmem:[#allocation2 + $0x2c4] sm:$0xff]  ;;  %v4865_v34 = vld [vmem:[#allocation2 + $0x2d0] sm:$0xff]  ;;  %v4868_v8 = vld [vmem:[#allocation2 + $0x2dc] sm:$0xff]  ;;  %8198 = vst [vmem:[#allocation96_spill] sm:$0xff] %v5136_v3 }
 0x11b   :  { %v1943_v38 = vrot.slane %v1942_v26, 4  ;;  %v1722_v19 = vadd.f32 %v1721_v4, %v1720_v22  ;;  %v1833_v29 = vadd.f32 %v1832_v10, %v1831_v41  ;;  %8127 = vst [vmem:[#allocation104_spill] sm:$0xff] %v4862_v51  ;;  %8128 = vst [vmem:[#allocation124_spill] sm:$0xff] %v4865_v34  ;;  %v4871_v22 = vld [vmem:[#allocation2 + $0x2e8] sm:$0xff]  ;;  %v5154_v3 = vld [vmem:[#allocation2 + $0x738] sm:$0xff] }
 0x11c   :  { %v2054_v48 = vrot.slane %v2053_v16, 4  ;;  %v2165_v17 = vrot.slane %v2164_v53, 4  ;;  %v2215_v46 = vmul.f32 0.00390625, %v1615_v58  ;;  %8129 = vst [vmem:[#allocation60_spill] sm:$0xff] %v4868_v8  ;;  %8130 = vst [vmem:[#allocation83_spill] sm:$0xff] %v4871_v22  ;;  %v4882_v22 = vld [vmem:[#allocation2 + $0x30c] sm:$0xff] }
 0x11d   :  { %v1944_v57 = vadd.f32 %v1943_v38, %v1942_v26  ;;  %v1723_v52 = vrot.slane %v1722_v19, 2  ;;  %v1834_v59 = vrot.slane %v1833_v29, 2  ;;  %v5151_v61 = vld [vmem:[#allocation2 + $0x72c] sm:$0xff]  ;;  %8204 = vst [vmem:[#allocation139_spill] sm:$0xff] %v5154_v3  ;;  %v5172_v3 = vld [vmem:[#allocation2 + $0x780] sm:$0xff]  ;;  %8211 = vst [vmem:[#allocation117_spill] sm:$0xff] %v5193_v43 }
 0x11e   :  { %v2055_v21 = vadd.f32 %v2054_v48, %v2053_v16  ;;  %v2166_v50 = vadd.f32 %v2165_v17, %v2164_v53  ;;  %v2379_v38 = vsel %vm2366_vm1, %v2215_v46, %v4406_v24  ;;  %v4876_v16 = vld [vmem:[#allocation2 + $0x2f4] sm:$0xff]  ;;  %v4879_v48 = vld [vmem:[#allocation2 + $0x300] sm:$0xff]  ;;  %8203 = vst [vmem:[#allocation115_spill] sm:$0xff] %v5151_v61  ;;  %v5175_v23 = vld [vmem:[#allocation2 + $0x78c] sm:$0xff] }
 0x11f   :  { %v1945_v10 = vrot.slane %v1944_v57, 2  ;;  %v1724_v58 = vadd.f32 %v1723_v52, %v1722_v19  ;;  %v1835_v26 = vadd.f32 %v1834_v59, %v1833_v29  ;;  %8131 = vst [vmem:[#allocation40_spill] sm:$0xff] %v4876_v16  ;;  %v4885_v52 = vld [vmem:[#allocation2 + $0x318] sm:$0xff]  ;;  %v4888_v29 = vld [vmem:[#allocation2 + $0x324] sm:$0xff]  ;;  %v5160_v56 = vld [vmem:[#allocation2 + $0x750] sm:$0xff] }
 0x120   :  { %v2056_v9 = vrot.slane %v2055_v21, 2  ;;  %v2167_v51 = vrot.slane %v2166_v50, 2  ;;  %v4897_v16 = vld [vmem:[#allocation2 + $0x348] sm:$0xff]  ;;  %8206 = vst [vmem:[#allocation98_spill] sm:$0xff] %v5160_v56  ;;  %v5169_v61 = vld [vmem:[#allocation2 + $0x774] sm:$0xff]  ;;  %8212 = vst [vmem:[#allocation141_spill] sm:$0xff] %v5196_v32 }
 0x121   :  { %v1946_v41 = vadd.f32 %v1945_v10, %v1944_v57  ;;  %v1725_v24 = vrot.slane %v1724_v58, 1  ;;  %v1836_v46 = vrot.slane %v1835_v26, 1  ;;  %v4894_v10 = vld [vmem:[#allocation2 + $0x33c] sm:$0xff]  ;;  %8132 = vst [vmem:[#allocation20_spill] sm:$0xff] %v4897_v16  ;;  %8209 = vst [vmem:[#allocation74_spill] sm:$0xff] %v5169_v61  ;;  %v5199_v31 = vld [vmem:[#allocation2 + $0x7ec] sm:$0xff] }
 0x122   :  { %v2057_v4 = vadd.f32 %v2056_v9, %v2055_v21  ;;  %v2168_v25 = vadd.f32 %v2167_v51, %v2166_v50  ;;  %v4891_v21 = vld [vmem:[#allocation2 + $0x330] sm:$0xff]  ;;  %v4903_v50 = vld [vmem:[#allocation2 + $0x360] sm:$0xff]  ;;  %v5178_v56 = vld [vmem:[#allocation2 + $0x798] sm:$0xff]  ;;  %8213 = vst [vmem:[#allocation75_spill] sm:$0xff] %v5199_v31 }
 0x123   :  { %v1947_v53 = vrot.slane %v1946_v41, 1  ;;  %v1726_v51 = vadd.f32 %v1725_v24, %v1724_v58  ;;  %v1837_v9 = vadd.f32 %v1836_v46, %v1835_v26  ;;  %8134 = vst [vmem:[#allocation61_spill] sm:$0xff] %v4903_v50  ;;  %v4906_v26 = vld [vmem:[#allocation2 + $0x36c] sm:$0xff]  ;;  %v4926_v24 = vld [vmem:[#allocation2 + $0x3b4] sm:$0xff]  ;;  %v5187_v61 = vld [vmem:[#allocation2 + $0x7bc] sm:$0xff] }
 0x124   :  { %v2058_v17 = vrot.slane %v2057_v4, 1  ;;  %v2169_v57 = vrot.slane %v2168_v25, 1  ;;  %8135 = vst [vmem:[#allocation84_spill] sm:$0xff] %v4906_v26  ;;  %8141 = vst [vmem:[#allocation85_spill] sm:$0xff] %v4926_v24  ;;  %v4933_v58 = vld [vmem:[#allocation2 + $0x3cc] sm:$0xff]  ;;  %v5013_v24 = vld [vmem:[#allocation2 + $0x504] sm:$0xff] }
 0x125   :  { %v1948_v34 = vadd.f32 %v1947_v53, %v1946_v41  ;;  %v2218_v62 = vmul.f32 0.00390625, %v1726_v51  ;;  %v2221_v47 = vmul.f32 0.00390625, %v1837_v9  ;;  %v4909_v41 = vld [vmem:[#allocation2 + $0x378] sm:$0xff]  ;;  %v4913_v53 = vld [vmem:[#allocation2 + $0x384] sm:$0xff]  ;;  %8143 = vst [vmem:[#allocation106_spill] sm:$0xff] %v4933_v58  ;;  %v5007_v58 = vld [vmem:[#allocation2 + $0x4ec] sm:$0xff] }
 0x126   :  { %v2059_v36 = vadd.f32 %v2058_v17, %v2057_v4  ;;  %v2170_v59 = vadd.f32 %v2169_v57, %v2168_v25  ;;  %8136 = vst [vmem:[#allocation41_spill] sm:$0xff] %v4909_v41  ;;  %8137 = vst [vmem:[#allocation105_spill] sm:$0xff] %v4913_v53  ;;  %v4916_v57 = vld [vmem:[#allocation2 + $0x390] sm:$0xff]  ;;  %v4919_v9 = vld [vmem:[#allocation2 + $0x39c] sm:$0xff] }
 0x127   :  { %v2224_v46 = vmul.f32 0.00390625, %v1948_v34  ;;  %v2380_v4 = vsel %vm2368_vm2, %v2218_v62, %v2379_v38  ;;  %8138 = vst [vmem:[#allocation126_spill] sm:$0xff] %v4916_v57  ;;  %8139 = vst [vmem:[#allocation149_spill] sm:$0xff] %v4919_v9  ;;  %v4929_v38 = vld [vmem:[#allocation2 + $0x3c0] sm:$0xff]  ;;  %v4977_v17 = vld [vmem:[#allocation2 + $0x474] sm:$0xff] }
 0x128   :  { %v2227_v8 = vmul.f32 0.00390625, %v2059_v36  ;;  %v2230_v19 = vmul.f32 0.00390625, %v2170_v59  ;;  %v2381_v36 = vsel %vm2370_vm3, %v2221_v47, %v2380_v4  ;;  %v4923_v59 = vld [vmem:[#allocation2 + $0x3a8] sm:$0xff]  ;;  %8142 = vst [vmem:[#allocation42_spill] sm:$0xff] %v4929_v38  ;;  %v4946_v38 = vld [vmem:[#allocation2 + $0x3fc] sm:$0xff]  ;;  %8157 = vst [vmem:[#allocation88_spill] sm:$0xff] %v4977_v17 }
 0x129   :  { %8140 = vst [vmem:[#allocation62_spill] sm:$0xff] %v4923_v59  ;;  %v2382_v51 = vsel %vm2372_vm4, %v2224_v46, %v2381_v36  ;;  %v4939_v4 = vld [vmem:[#allocation2 + $0x3e4] sm:$0xff]  ;;  %8147 = vst [vmem:[#allocation43_spill] sm:$0xff] %v4946_v38  ;;  %v4962_v46 = vld [vmem:[#allocation2 + $0x438] sm:$0xff]  ;;  %v8287_v38 = vunpack.c.l.bf16 %v4882_v22  ;;  %v8296_v22 = vunpack.c.l.bf16 %v4657_v1 }
 0x12a   :  { %8145 = vst [vmem:[#allocation63_spill] sm:$0xff] %v4939_v4  ;;  %v2383_v62 = vsel %vm2374_vm5, %v2227_v8, %v2382_v51  ;;  %v4949_v36 = vld [vmem:[#allocation2 + $0x408] sm:$0xff]  ;;  %v4956_v4 = vld [vmem:[#allocation2 + $0x420] sm:$0xff]  ;;  %8152 = vst [vmem:[#allocation44_spill] sm:$0xff] %v4962_v46  ;;  %v8284_v8 = vunpack.c.l.bf16 %v4639_v5  ;;  %v8292_v5 = vunpack.c.l.bf16 %v5172_v3  ;;  %v8301_v3 = vunpack.c.l.bf16 %v4885_v52 }
 0x12b   :  { %8148 = vst [vmem:[#allocation107_spill] sm:$0xff] %v4949_v36  ;;  %v2384_v47 = vsel %vm2376_vm6, %v2230_v19, %v2383_v62  ;;  %8150 = vst [vmem:[#allocation15_spill] sm:$0xff] %v4956_v4  ;;  %v4959_v51 = vld [vmem:[#allocation2 + $0x42c] sm:$0xff]  ;;  %v4965_v34 = vld [vmem:[#allocation2 + $0x444] sm:$0xff] }
 0x12c   :  { %8151 = vst [vmem:[#allocation87_spill] sm:$0xff] %v4959_v51  ;;  %2459 = vmatprep.mubr.f32.mxu1 %v2384_v47  ;;  %8153 = vst [vmem:[#allocation108_spill] sm:$0xff] %v4965_v34  ;;  %v4968_v62 = vld [vmem:[#allocation2 + $0x450] sm:$0xff]  ;;  %v4974_v4 = vld [vmem:[#allocation2 + $0x468] sm:$0xff] }
 0x12d   :  { %8154 = vst [vmem:[#allocation129_spill] sm:$0xff] %v4968_v62  ;;  %8156 = vst [vmem:[#allocation64_spill] sm:$0xff] %v4974_v4  ;;  %v4980_v46 = vld [vmem:[#allocation2 + $0x480] sm:$0xff]  ;;  %v4983_v34 = vld [vmem:[#allocation2 + $0x48c] sm:$0xff] }
 0x12e   :  { %v4986_v62 = vld [vmem:[#allocation2 + $0x498] sm:$0xff]  ;;  %v4992_v4 = vld [vmem:[#allocation2 + $0x4b0] sm:$0xff]  ;;  %v4998_v51 = vld [vmem:[#allocation2 + $0x4c8] sm:$0xff]  ;;  %8161 = vst [vmem:[#allocation65_spill] sm:$0xff] %v5007_v58  ;;  %v8289_v19 = vunpack.c.l.bf16 %v4983_v34 }
 0x12f   :  { %v4995_v17 = vld [vmem:[#allocation2 + $0x4bc] sm:$0xff]  ;;  %8158 = vst [vmem:[#allocation45_spill] sm:$0xff] %v4998_v51  ;;  %v5001_v36 = vld [vmem:[#allocation2 + $0x4d4] sm:$0xff]  ;;  %8163 = vst [vmem:[#allocation46_spill] sm:$0xff] %v5013_v24 }
 0x130   :  { %8159 = vst [vmem:[#allocation109_spill] sm:$0xff] %v5001_v36  ;;  %v5022_v59 = vld [vmem:[#allocation2 + $0x528] sm:$0xff]  ;;  %v5100_v57 = vld [vmem:[#allocation2 + $0x660] sm:$0xff]  ;;  %v5112_v53 = vld [vmem:[#allocation2 + $0x690] sm:$0xff] }
 0x131   :  { %8166 = vst [vmem:[#allocation66_spill] sm:$0xff] %v5022_v59  ;;  %v5031_v9 = vld [vmem:[#allocation2 + $0x54c] sm:$0xff]  ;;  %8186 = vst [vmem:[#allocation135_spill] sm:$0xff] %v5100_v57  ;;  %v5109_v24 = vld [vmem:[#allocation2 + $0x684] sm:$0xff] }
 0x132   :  { %8169 = vst [vmem:[#allocation110_spill] sm:$0xff] %v5031_v9  ;;  %v5040_v59 = vld [vmem:[#allocation2 + $0x570] sm:$0xff]  ;;  %8189 = vst [vmem:[#allocation51_spill] sm:$0xff] %v5109_v24  ;;  %v5190_v41 = vld [vmem:[#allocation2 + $0x7c8] sm:$0xff] }
 0x133   :  { %8172 = vst [vmem:[#allocation91_spill] sm:$0xff] %v5040_v59  ;;  %v5049_v9 = vld [vmem:[#allocation2 + $0x594] sm:$0xff]  ;;  %8190 = vst [vmem:[#allocation113_spill] sm:$0xff] %v5112_v53  ;;  %v5127_v24 = vld [vmem:[#allocation2 + $0x6cc] sm:$0xff] }
 0x134   :  { %8175 = vst [vmem:[#allocation133_spill] sm:$0xff] %v5049_v9  ;;  %v5058_v59 = vld [vmem:[#allocation2 + $0x5b8] sm:$0xff]  ;;  %8195 = vst [vmem:[#allocation22_spill] sm:$0xff] %v5127_v24  ;;  %v5205_v26 = vld [vmem:[#allocation2 + $0x804] sm:$0xff] }
 0x135   :  { %8178 = vst [vmem:[#allocation92_spill] sm:$0xff] %v5058_v59  ;;  %v5067_v9 = vld [vmem:[#allocation2 + $0x5dc] sm:$0xff]  ;;  %v5145_v24 = vld [vmem:[#allocation2 + $0x714] sm:$0xff]  ;;  %8210 = vst [vmem:[#allocation99_spill] sm:$0xff] %v5190_v41 }
 0x136   :  { %8181 = vst [vmem:[#allocation134_spill] sm:$0xff] %v5067_v9  ;;  %v5076_v59 = vld [vmem:[#allocation2 + $0x600] sm:$0xff]  ;;  %v5130_v53 = vld [vmem:[#allocation2 + $0x6d8] sm:$0xff]  ;;  %8201 = vst [vmem:[#allocation72_spill] sm:$0xff] %v5145_v24 }
 0x137   :  { %v5085_v9 = vld [vmem:[#allocation2 + $0x624] sm:$0xff]  ;;  %8196 = vst [vmem:[#allocation137_spill] sm:$0xff] %v5130_v53  ;;  %v5163_v24 = vld [vmem:[#allocation2 + $0x75c] sm:$0xff]  ;;  %8215 = vst [vmem:[#allocation118_spill] sm:$0xff] %v5205_v26 }
 0x138   :  { %v5148_v53 = vld [vmem:[#allocation2 + $0x720] sm:$0xff]  ;;  %8207 = vst [vmem:[#allocation116_spill] sm:$0xff] %v5163_v24  ;;  %v5202_v58 = vld [vmem:[#allocation2 + $0x7f8] sm:$0xff]  ;;  %8216 = vst [vmem:[#allocation142_spill] sm:$0xff] %v5208_v37 }
 0x139   :  { %8202 = vst [vmem:[#allocation97_spill] sm:$0xff] %v5148_v53  ;;  %v5166_v53 = vld [vmem:[#allocation2 + $0x768] sm:$0xff]  ;;  %8214 = vst [vmem:[#allocation100_spill] sm:$0xff] %v5202_v58  ;;  %v5217_v31 = vld [vmem:[#allocation2 + $0x834] sm:$0xff] }
 0x13a   :  { %8208 = vst [vmem:[#allocation140_spill] sm:$0xff] %v5166_v53  ;;  %v5181_v24 = vld [vmem:[#allocation2 + $0x7a4] sm:$0xff]  ;;  %v5184_v53 = vld [vmem:[#allocation2 + $0x7b0] sm:$0xff]  ;;  %8219 = vst [vmem:[#allocation153_spill] sm:$0xff] %v5217_v31 }
 0x13b   :  { %v5214_v32 = vld [vmem:[#allocation2 + $0x828] sm:$0xff]  ;;  %v5220_v58 = vld [vmem:[#allocation2 + $0x840] sm:$0xff]  ;;  %v5226_v37 = vld [vmem:[#allocation2 + $0x858] sm:$0xff]  ;;  %8240 = vst [vmem:[#allocation174_spill] sm:$0xff] %v5298_v45 }
 0x13c   :  { %8218 = vst [vmem:[#allocation152_spill] sm:$0xff] %v5214_v32  ;;  %8220 = vst [vmem:[#allocation154_spill] sm:$0xff] %v5220_v58  ;;  %v5223_v26 = vld [vmem:[#allocation2 + $0x84c] sm:$0xff]  ;;  %v5235_v31 = vld [vmem:[#allocation2 + $0x87c] sm:$0xff] }
 0x13d   :  { %8221 = vst [vmem:[#allocation155_spill] sm:$0xff] %v5223_v26  ;;  %8222 = vst [vmem:[#allocation156_spill] sm:$0xff] %v5226_v37  ;;  %v5232_v32 = vld [vmem:[#allocation2 + $0x870] sm:$0xff]  ;;  %v5238_v58 = vld [vmem:[#allocation2 + $0x888] sm:$0xff] }
 0x13e   :  { %8224 = vst [vmem:[#allocation158_spill] sm:$0xff] %v5232_v32  ;;  %8225 = vst [vmem:[#allocation159_spill] sm:$0xff] %v5235_v31  ;;  %v5241_v26 = vld [vmem:[#allocation2 + $0x894] sm:$0xff]  ;;  %v5244_v37 = vld [vmem:[#allocation2 + $0x8a0] sm:$0xff] }
 0x13f   :  { %8226 = vst [vmem:[#allocation160_spill] sm:$0xff] %v5238_v58  ;;  %8227 = vst [vmem:[#allocation161_spill] sm:$0xff] %v5241_v26  ;;  %v5250_v32 = vld [vmem:[#allocation2 + $0x8b8] sm:$0xff]  ;;  %v5253_v31 = vld [vmem:[#allocation2 + $0x8c4] sm:$0xff] }
 0x140   :  { %8228 = vst [vmem:[#allocation162_spill] sm:$0xff] %v5244_v37  ;;  %8230 = vst [vmem:[#allocation164_spill] sm:$0xff] %v5250_v32  ;;  %v5256_v58 = vld [vmem:[#allocation2 + $0x8d0] sm:$0xff]  ;;  %v5259_v26 = vld [vmem:[#allocation2 + $0x8dc] sm:$0xff] }
 0x141   :  { %8231 = vst [vmem:[#allocation165_spill] sm:$0xff] %v5253_v31  ;;  %8232 = vst [vmem:[#allocation166_spill] sm:$0xff] %v5256_v58  ;;  %v5262_v37 = vld [vmem:[#allocation2 + $0x8e8] sm:$0xff]  ;;  %v5265_v7 = vld [vmem:[#allocation2 + $0x8f4] sm:$0xff] }
 0x142   :  { %8233 = vst [vmem:[#allocation167_spill] sm:$0xff] %v5259_v26  ;;  %8234 = vst [vmem:[#allocation168_spill] sm:$0xff] %v5262_v37  ;;  %v5268_v32 = vld [vmem:[#allocation2 + $0x900] sm:$0xff]  ;;  %v5271_v31 = vld [vmem:[#allocation2 + $0x90c] sm:$0xff] }
 0x143   :  { %8235 = vst [vmem:[#allocation169_spill] sm:$0xff] %v5265_v7  ;;  %v5274_v58 = vld [vmem:[#allocation2 + $0x918] sm:$0xff]  ;;  %v5277_v26 = vld [vmem:[#allocation2 + $0x924] sm:$0xff]  ;;  %v5280_v37 = vld [vmem:[#allocation2 + $0x930] sm:$0xff] }
 0x144   :  { %v5283_v7 = vld [vmem:[#allocation2 + $0x93c] sm:$0xff]  ;;  %v5286_v57 = vld [vmem:[#allocation2 + $0x948] sm:$0xff]  ;;  %v5289_v18 = vld [vmem:[#allocation2 + $0x954] sm:$0xff] }
 0x145   :  { %8236 = vst [vmem:[#allocation170_spill] sm:$0xff] %v5286_v57  ;;  %8237 = vst [vmem:[#allocation171_spill] sm:$0xff] %v5289_v18  ;;  %v5292_v50 = vld [vmem:[#allocation2 + $0x960] sm:$0xff]  ;;  %v5304_v55 = vld [vmem:[#allocation2 + $0x990] sm:$0xff] }
 0x146   :  { %8238 = vst [vmem:[#allocation172_spill] sm:$0xff] %v5292_v50  ;;  %v5301_v43 = vld [vmem:[#allocation2 + $0x984] sm:$0xff]  ;;  %8242 = vst [vmem:[#allocation176_spill] sm:$0xff] %v5304_v55  ;;  %v5307_v18 = vld [vmem:[#allocation2 + $0x99c] sm:$0xff] }
 0x147   :  { %8241 = vst [vmem:[#allocation175_spill] sm:$0xff] %v5301_v43  ;;  %8243 = vst [vmem:[#allocation177_spill] sm:$0xff] %v5307_v18  ;;  %v5310_v50 = vld [vmem:[#allocation2 + $0x9a8] sm:$0xff]  ;;  %v5313_v44 = vld [vmem:[#allocation2 + $0x9b4] sm:$0xff] }
 0x148   :  { %8244 = vst [vmem:[#allocation178_spill] sm:$0xff] %v5310_v50  ;;  %8245 = vst [vmem:[#allocation179_spill] sm:$0xff] %v5313_v44  ;;  %v5316_v45 = vld [vmem:[#allocation2 + $0x9c0] sm:$0xff]  ;;  %v5319_v43 = vld [vmem:[#allocation2 + $0x9cc] sm:$0xff] }
 0x149   :  { %8246 = vst [vmem:[#allocation180_spill] sm:$0xff] %v5316_v45  ;;  %8247 = vst [vmem:[#allocation181_spill] sm:$0xff] %v5319_v43  ;;  %v5322_v55 = vld [vmem:[#allocation2 + $0x9d8] sm:$0xff]  ;;  %v5325_v18 = vld [vmem:[#allocation2 + $0x9e4] sm:$0xff] }
 0x14a   :  { %8248 = vst [vmem:[#allocation182_spill] sm:$0xff] %v5322_v55  ;;  %8249 = vst [vmem:[#allocation183_spill] sm:$0xff] %v5325_v18  ;;  %v5328_v50 = vld [vmem:[#allocation2 + $0x9f0] sm:$0xff]  ;;  %v5331_v44 = vld [vmem:[#allocation2 + $0x9fc] sm:$0xff] }
 0x14b   :  { %8250 = vst [vmem:[#allocation184_spill] sm:$0xff] %v5328_v50  ;;  %8251 = vst [vmem:[#allocation185_spill] sm:$0xff] %v5331_v44  ;;  %v5334_v45 = vld [vmem:[#allocation2 + $0xa08] sm:$0xff]  ;;  %v5337_v43 = vld [vmem:[#allocation2 + $0xa14] sm:$0xff] }
 0x14c   :  { %8252 = vst [vmem:[#allocation186_spill] sm:$0xff] %v5334_v45  ;;  %8253 = vst [vmem:[#allocation187_spill] sm:$0xff] %v5337_v43  ;;  %v5340_v55 = vld [vmem:[#allocation2 + $0xa20] sm:$0xff]  ;;  %v5343_v18 = vld [vmem:[#allocation2 + $0xa2c] sm:$0xff] }
 0x14d   :  { %8254 = vst [vmem:[#allocation188_spill] sm:$0xff] %v5340_v55  ;;  %8255 = vst [vmem:[#allocation189_spill] sm:$0xff] %v5343_v18  ;;  %v5346_v50 = vld [vmem:[#allocation2 + $0xa38] sm:$0xff]  ;;  %v5349_v44 = vld [vmem:[#allocation2 + $0xa44] sm:$0xff] }
 0x14e   :  { %8256 = vst [vmem:[#allocation190_spill] sm:$0xff] %v5346_v50  ;;  %8257 = vst [vmem:[#allocation191_spill] sm:$0xff] %v5349_v44  ;;  %v5352_v45 = vld [vmem:[#allocation2 + $0xa50] sm:$0xff]  ;;  %v5355_v43 = vld [vmem:[#allocation2 + $0xa5c] sm:$0xff] }
 0x14f   :  { %8258 = vst [vmem:[#allocation192_spill] sm:$0xff] %v5352_v45  ;;  %8259 = vst [vmem:[#allocation193_spill] sm:$0xff] %v5355_v43  ;;  %v5358_v55 = vld [vmem:[#allocation2 + $0xa68] sm:$0xff]  ;;  %v5361_v18 = vld [vmem:[#allocation2 + $0xa74] sm:$0xff] }
 0x150   :  { %8260 = vst [vmem:[#allocation194_spill] sm:$0xff] %v5358_v55  ;;  %8261 = vst [vmem:[#allocation195_spill] sm:$0xff] %v5361_v18  ;;  %v5364_v50 = vld [vmem:[#allocation2 + $0xa80] sm:$0xff]  ;;  %v5367_v44 = vld [vmem:[#allocation2 + $0xa8c] sm:$0xff] }
 0x151   :  { %v5370_v45 = vld [vmem:[#allocation2 + $0xa98] sm:$0xff]  ;;  %v5373_v43 = vld [vmem:[#allocation2 + $0xaa4] sm:$0xff]  ;;  %v5376_v55 = vld [vmem:[#allocation2 + $0xab0] sm:$0xff] }
 0x152   :  { %v5379_v18 = vld [vmem:[#allocation2 + $0xabc] sm:$0xff]  ;;  %v5382_v36 = vld [vmem:[#allocation2 + $0xac8] sm:$0xff]  ;;  %v5385_v63 = vld [vmem:[#allocation2 + $0xad4] sm:$0xff] }
 0x153   :  { %8262 = vst [vmem:[#allocation196_spill] sm:$0xff] %v5382_v36  ;;  %8263 = vst [vmem:[#allocation197_spill] sm:$0xff] %v5385_v63  ;;  %v5388_v57 = vld [vmem:[#allocation2 + $0xae0] sm:$0xff]  ;;  %v5394_v2 = vld [vmem:[#allocation2 + $0xaf8] sm:$0xff] }
 0x154   :  { %8264 = vst [vmem:[#allocation198_spill] sm:$0xff] %v5388_v57  ;;  %8266 = vst [vmem:[#allocation200_spill] sm:$0xff] %v5394_v2  ;;  %v5397_v41 = vld [vmem:[#allocation2 + $0xb04] sm:$0xff]  ;;  %v5400_v36 = vld [vmem:[#allocation2 + $0xb10] sm:$0xff] }
 0x155   :  { %8267 = vst [vmem:[#allocation201_spill] sm:$0xff] %v5397_v41  ;;  %8268 = vst [vmem:[#allocation202_spill] sm:$0xff] %v5400_v36  ;;  %v5403_v63 = vld [vmem:[#allocation2 + $0xb1c] sm:$0xff]  ;;  %v5406_v57 = vld [vmem:[#allocation2 + $0xb28] sm:$0xff] }
 0x156   :  { %8269 = vst [vmem:[#allocation203_spill] sm:$0xff] %v5403_v63  ;;  %8270 = vst [vmem:[#allocation204_spill] sm:$0xff] %v5406_v57  ;;  %v5409_v42 = vld [vmem:[#allocation2 + $0xb34] sm:$0xff]  ;;  %v5412_v2 = vld [vmem:[#allocation2 + $0xb40] sm:$0xff] }
 0x157   :  { %8271 = vst [vmem:[#allocation205_spill] sm:$0xff] %v5409_v42  ;;  %8272 = vst [vmem:[#allocation206_spill] sm:$0xff] %v5412_v2  ;;  %v5415_v41 = vld [vmem:[#allocation2 + $0xb4c] sm:$0xff]  ;;  %v5418_v36 = vld [vmem:[#allocation2 + $0xb58] sm:$0xff] }
 0x158   :  { %8273 = vst [vmem:[#allocation207_spill] sm:$0xff] %v5415_v41  ;;  %8274 = vst [vmem:[#allocation208_spill] sm:$0xff] %v5418_v36  ;;  %v5421_v63 = vld [vmem:[#allocation2 + $0xb64] sm:$0xff]  ;;  %v5424_v57 = vld [vmem:[#allocation2 + $0xb70] sm:$0xff] }
 0x159   :  { %8275 = vst [vmem:[#allocation209_spill] sm:$0xff] %v5421_v63  ;;  %8276 = vst [vmem:[#allocation210_spill] sm:$0xff] %v5424_v57  ;;  %v5427_v42 = vld [vmem:[#allocation2 + $0xb7c] sm:$0xff]  ;;  %v5430_v2 = vld [vmem:[#allocation2 + $0xb88] sm:$0xff]  ;;  %v8285_v63 = vunpack.c.l.bf16 %v4654_v39  ;;  %v8286_v57 = vunpack.c.l.bf16 %v4879_v48  ;;  %v8293_v39 = vunpack.c.l.bf16 %v5175_v23 }
 0x15a   :  { %8277 = vst [vmem:[#allocation211_spill] sm:$0xff] %v5427_v42  ;;  %8278 = vst [vmem:[#allocation212_spill] sm:$0xff] %v5430_v2  ;;  %v5433_v41 = vld [vmem:[#allocation2 + $0xb94] sm:$0xff]  ;;  %v5436_v36 = vld [vmem:[#allocation2 + $0xba0] sm:$0xff]  ;;  %v8288_v42 = vunpack.c.l.bf16 %v4980_v46 }
 0x15b   :  { %8279 = vst [vmem:[#allocation213_spill] sm:$0xff] %v5433_v41  ;;  %v8280_v12 = vld [vmem:[#allocation8_spill] sm:$0xff]  ;;  %v8282_v41 = vld [vmem:[#allocation9_spill] sm:$0xff]  ;;  %v1431_v47 = vadd.f32 %v8285_v63, %v8284_v8  ;;  %v1542_v13 = vadd.f32 %v8287_v38, %v8286_v57  ;;  %v1875_v63 = vadd.f32 %v8293_v39, %v8292_v5  ;;  %v8294_v8 = vld [vmem:[#allocation10_spill] sm:$0xff]  ;;  %v8297_v38 = vunpack.c.l.bf16 %v5268_v32 }
 0x15c   :  { %v8281_v25 = vunpack.c.l.bf16 %v8280_v12  ;;  %v8283_v51 = vunpack.c.l.bf16 %v8282_v41  ;;  %v1653_v2 = vadd.f32 %v8289_v19, %v8288_v42  ;;  %v8290_v12 = vunpack.c.l.bf16 %v5076_v59 }
 0x15d   :  { %v8291_v41 = vunpack.c.l.bf16 %v5079_v40  ;;  %v8295_v48 = vunpack.c.l.bf16 %v8294_v8  ;;  %v1432_v57 = vadd.f32 %v1431_v47, %v8296_v22  ;;  %v8298_v42 = vunpack.c.l.bf16 %v5271_v31 }
 0x15e   :  { %v1320_v16 = vadd.f32 %v8283_v51, %v8281_v25  ;;  %v8299_v59 = vunpack.c.l.bf16 %v5364_v50  ;;  %v8300_v40 = vunpack.c.l.bf16 %v5367_v44  ;;  %v1543_v23 = vadd.f32 %v1542_v13, %v8301_v3 }
 0x15f   :  { %v1764_v25 = vadd.f32 %v8291_v41, %v8290_v12  ;;  %v1986_v34 = vadd.f32 %v8298_v42, %v8297_v38  ;;  %v8302_v19 = vunpack.c.l.bf16 %v4986_v62  ;;  %v8304_v47 = vunpack.c.l.bf16 %v5178_v56  ;;  %v8305_v41 = vld [vmem:[#allocation11_spill] sm:$0xff] }
 0x160   :  { %v1321_v51 = vadd.f32 %v1320_v16, %v8295_v48  ;;  %v2097_v46 = vadd.f32 %v8300_v40, %v8299_v59  ;;  %v8303_v16 = vunpack.c.l.bf16 %v5082_v15  ;;  %v8306_v31 = vunpack.c.l.bf16 %v8305_v41 }
 0x161   :  { %v1654_v12 = vadd.f32 %v1653_v2, %v8302_v19  ;;  %v1876_v32 = vadd.f32 %v1875_v63, %v8304_v47  ;;  %v8307_v50 = vunpack.c.l.bf16 %v4672_v14  ;;  %v8308_v44 = vunpack.c.l.bf16 %v5274_v58  ;;  %v8314_v14 = vld [vmem:[#allocation12_spill] sm:$0xff] }
 0x162   :  { %v1765_v1 = vadd.f32 %v1764_v25, %v8303_v16  ;;  %v1322_v5 = vadd.f32 %v1321_v51, %v8306_v31  ;;  %v8309_v13 = vunpack.c.l.bf16 %v5370_v45  ;;  %v8310_v2 = vunpack.c.l.bf16 %v4888_v29 }
 0x163   :  { %v1433_v39 = vadd.f32 %v1432_v57, %v8307_v50  ;;  %v1987_v8 = vadd.f32 %v1986_v34, %v8308_v44  ;;  %v8311_v15 = vunpack.c.l.bf16 %v4989_v60  ;;  %v8312_v56 = vunpack.c.l.bf16 %v5085_v9 }
 0x164   :  { %v2098_v52 = vadd.f32 %v2097_v46, %v8309_v13  ;;  %v1544_v62 = vadd.f32 %v1543_v23, %v8310_v2  ;;  %v8313_v48 = vunpack.c.l.bf16 %v5181_v24  ;;  %v8315_v22 = vunpack.c.l.bf16 %v8314_v14 }
 0x165   :  { %v1655_v25 = vadd.f32 %v1654_v12, %v8311_v15  ;;  %v1766_v63 = vadd.f32 %v1765_v1, %v8312_v56  ;;  %v8316_v58 = vunpack.c.l.bf16 %v4675_v35  ;;  %v8317_v45 = vunpack.c.l.bf16 %v5277_v26  ;;  %v8323_v35 = vld [vmem:[#allocation13_spill] sm:$0xff] }
 0x166   :  { %v1877_v51 = vadd.f32 %v1876_v32, %v8313_v48  ;;  %v1323_v57 = vadd.f32 %v1322_v5, %v8315_v22  ;;  %v8318_v29 = vunpack.c.l.bf16 %v5373_v43  ;;  %v8319_v60 = vunpack.c.l.bf16 %v4891_v21  ;;  %v8343_v48 = vld [vmem:[#allocation99_spill] sm:$0xff] }
 0x167   :  { %v1434_v38 = vadd.f32 %v1433_v39, %v8316_v58  ;;  %v1988_v42 = vadd.f32 %v1987_v8, %v8317_v45  ;;  %v8320_v9 = vunpack.c.l.bf16 %v4992_v4  ;;  %v8321_v24 = vunpack.c.l.bf16 %v5088_v54 }
 0x168   :  { %v2099_v34 = vadd.f32 %v2098_v52, %v8318_v29  ;;  %v1545_v59 = vadd.f32 %v1544_v62, %v8319_v60  ;;  %v8322_v3 = vunpack.c.l.bf16 %v5184_v53  ;;  %v8324_v19 = vunpack.c.l.bf16 %v8323_v35  ;;  %v8351_v29 = vld [vmem:[#allocation196_spill] sm:$0xff] }
 0x169   :  { %v1656_v40 = vadd.f32 %v1655_v25, %v8320_v9  ;;  %v1767_v46 = vadd.f32 %v1766_v63, %v8321_v24  ;;  %v8325_v26 = vunpack.c.l.bf16 %v4690_v11  ;;  %v8326_v43 = vunpack.c.l.bf16 %v5280_v37  ;;  %v8332_v11 = vld [vmem:[#allocation14_spill] sm:$0xff]  ;;  %v8355_v24 = vld [vmem:[#allocation109_spill] sm:$0xff] }
 0x16a   :  { %v1878_v23 = vadd.f32 %v1877_v51, %v8322_v3  ;;  %v1324_v12 = vadd.f32 %v1323_v57, %v8324_v19  ;;  %v8327_v21 = vunpack.c.l.bf16 %v5376_v55  ;;  %v8328_v4 = vunpack.c.l.bf16 %v4894_v10 }
 0x16b   :  { %v1435_v16 = vadd.f32 %v1434_v38, %v8325_v26  ;;  %v1989_v1 = vadd.f32 %v1988_v42, %v8326_v43  ;;  %v8329_v54 = vunpack.c.l.bf16 %v4995_v17  ;;  %v8330_v53 = vunpack.c.l.bf16 %v5091_v6  ;;  %v8337_v17 = vld [vmem:[#allocation20_spill] sm:$0xff]  ;;  %v8339_v6 = vld [vmem:[#allocation45_spill] sm:$0xff] }
 0x16c   :  { %v2100_v47 = vadd.f32 %v2099_v34, %v8327_v21  ;;  %v1546_v32 = vadd.f32 %v1545_v59, %v8328_v4  ;;  %v8331_v5 = vunpack.c.l.bf16 %v5187_v61  ;;  %v8333_v39 = vunpack.c.l.bf16 %v8332_v11  ;;  %v8341_v61 = vld [vmem:[#allocation50_spill] sm:$0xff]  ;;  %v8353_v59 = vld [vmem:[#allocation125_spill] sm:$0xff] }
 0x16d   :  { %v1657_v41 = vadd.f32 %v1656_v40, %v8329_v54  ;;  %v1768_v31 = vadd.f32 %v1767_v46, %v8330_v53  ;;  %v8334_v37 = vunpack.c.l.bf16 %v4693_v33  ;;  %v8335_v55 = vunpack.c.l.bf16 %v5283_v7  ;;  %v8345_v33 = vld [vmem:[#allocation31_spill] sm:$0xff]  ;;  %v8361_v43 = vld [vmem:[#allocation17_spill] sm:$0xff] }
 0x16e   :  { %v1879_v50 = vadd.f32 %v1878_v23, %v8331_v5  ;;  %v1325_v44 = vadd.f32 %v1324_v12, %v8333_v39  ;;  %v8336_v10 = vunpack.c.l.bf16 %v5379_v18  ;;  %v8338_v2 = vunpack.c.l.bf16 %v8337_v17  ;;  %v8347_v7 = vld [vmem:[#allocation79_spill] sm:$0xff]  ;;  %v8349_v18 = vld [vmem:[#allocation170_spill] sm:$0xff]  ;;  %v8357_v23 = vld [vmem:[#allocation112_spill] sm:$0xff] }
 0x16f   :  { %v1436_v8 = vadd.f32 %v1435_v16, %v8334_v37  ;;  %v1990_v13 = vadd.f32 %v1989_v1, %v8335_v55  ;;  %v8340_v15 = vunpack.c.l.bf16 %v8339_v6  ;;  %v8342_v56 = vunpack.c.l.bf16 %v8341_v61  ;;  %v8359_v12 = vld [vmem:[#allocation117_spill] sm:$0xff]  ;;  %v8365_v54 = vld [vmem:[#allocation171_spill] sm:$0xff]  ;;  %v8371_v37 = vld [vmem:[#allocation130_spill] sm:$0xff] }
 0x170   :  { %v2101_v52 = vadd.f32 %v2100_v47, %v8336_v10  ;;  %v1547_v62 = vadd.f32 %v1546_v32, %v8338_v2  ;;  %v8344_v51 = vunpack.c.l.bf16 %v8343_v48  ;;  %v8346_v22 = vunpack.c.l.bf16 %v8345_v33  ;;  %v8363_v47 = vld [vmem:[#allocation36_spill] sm:$0xff]  ;;  %v8369_v11 = vld [vmem:[#allocation61_spill] sm:$0xff]  ;;  %v8379_v61 = vld [vmem:[#allocation102_spill] sm:$0xff] }
 0x171   :  { %v1658_v25 = vadd.f32 %v1657_v41, %v8340_v15  ;;  %v1769_v63 = vadd.f32 %v1768_v31, %v8342_v56  ;;  %v8348_v58 = vunpack.c.l.bf16 %v8347_v7  ;;  %v8350_v45 = vunpack.c.l.bf16 %v8349_v18  ;;  %v8367_v31 = vld [vmem:[#allocation197_spill] sm:$0xff]  ;;  %v8377_v6 = vld [vmem:[#allocation32_spill] sm:$0xff]  ;;  %v8383_v33 = vld [vmem:[#allocation198_spill] sm:$0xff] }
 0x172   :  { %v1880_v14 = vadd.f32 %v1879_v50, %v8344_v51  ;;  %v1326_v57 = vadd.f32 %v1325_v44, %v8346_v22  ;;  %v8352_v34 = vunpack.c.l.bf16 %v8351_v29  ;;  %v8354_v9 = vunpack.c.l.bf16 %v8353_v59  ;;  %v8375_v17 = vld [vmem:[#allocation141_spill] sm:$0xff]  ;;  %v8381_v48 = vld [vmem:[#allocation172_spill] sm:$0xff]  ;;  %v8391_v59 = vld [vmem:[#allocation75_spill] sm:$0xff] }
 0x173   :  { %v1437_v38 = vadd.f32 %v1436_v8, %v8348_v58  ;;  %v1991_v42 = vadd.f32 %v1990_v13, %v8350_v45  ;;  %v8356_v46 = vunpack.c.l.bf16 %v8355_v24  ;;  %v8358_v35 = vunpack.c.l.bf16 %v8357_v23  ;;  %v8373_v13 = vld [vmem:[#allocation135_spill] sm:$0xff]  ;;  %v8385_v7 = vld [vmem:[#allocation84_spill] sm:$0xff]  ;;  %v8387_v18 = vld [vmem:[#allocation65_spill] sm:$0xff] }
 0x174   :  { %v2102_v60 = vadd.f32 %v2101_v52, %v8352_v34  ;;  %v1548_v40 = vadd.f32 %v1547_v62, %v8354_v9  ;;  %v8360_v26 = vunpack.c.l.bf16 %v8359_v12  ;;  %v8362_v1 = vunpack.c.l.bf16 %v8361_v43  ;;  %v8389_v29 = vld [vmem:[#allocation69_spill] sm:$0xff]  ;;  %v8393_v24 = vld [vmem:[#allocation18_spill] sm:$0xff]  ;;  %v8399_v43 = vld [vmem:[#allocation199_spill] sm:$0xff] }
 0x175   :  { %v1659_v3 = vadd.f32 %v1658_v25, %v8356_v46  ;;  %v1770_v19 = vadd.f32 %v1769_v63, %v8358_v35  ;;  %v8364_v4 = vunpack.c.l.bf16 %v8363_v47  ;;  %v8366_v41 = vunpack.c.l.bf16 %v8365_v54  ;;  %v8395_v23 = vld [vmem:[#allocation121_spill] sm:$0xff] }
 0x176   :  { %v1881_v16 = vadd.f32 %v1880_v14, %v8360_v26  ;;  %v1327_v21 = vadd.f32 %v1326_v57, %v8362_v1  ;;  %v8368_v5 = vunpack.c.l.bf16 %v8367_v31  ;;  %v8370_v39 = vunpack.c.l.bf16 %v8369_v11  ;;  %v8397_v12 = vld [vmem:[#allocation173_spill] sm:$0xff]  ;;  %v8405_v31 = vld [vmem:[#allocation94_spill] sm:$0xff]  ;;  %v8407_v11 = vld [vmem:[#allocation100_spill] sm:$0xff] }
 0x177   :  { %v1438_v32 = vadd.f32 %v1437_v38, %v8364_v4  ;;  %v1992_v53 = vadd.f32 %v1991_v42, %v8366_v41  ;;  %v8372_v8 = vunpack.c.l.bf16 %v8371_v37  ;;  %v8374_v10 = vunpack.c.l.bf16 %v8373_v13  ;;  %v8401_v47 = vld [vmem:[#allocation41_spill] sm:$0xff]  ;;  %v8409_v37 = vld [vmem:[#allocation23_spill] sm:$0xff]  ;;  %v8411_v13 = vld [vmem:[#allocation28_spill] sm:$0xff] }
 0x178   :  { %v2103_v50 = vadd.f32 %v2102_v60, %v8368_v5  ;;  %v1549_v44 = vadd.f32 %v1548_v40, %v8370_v39  ;;  %v8376_v2 = vunpack.c.l.bf16 %v8375_v17  ;;  %v8378_v15 = vunpack.c.l.bf16 %v8377_v6  ;;  %v8403_v54 = vld [vmem:[#allocation89_spill] sm:$0xff]  ;;  %v8413_v17 = vld [vmem:[#allocation174_spill] sm:$0xff]  ;;  %v8415_v6 = vld [vmem:[#allocation200_spill] sm:$0xff] }
 0x179   :  { %v1660_v55 = vadd.f32 %v1659_v3, %v8372_v8  ;;  %v1771_v52 = vadd.f32 %v1770_v19, %v8374_v10  ;;  %v8380_v56 = vunpack.c.l.bf16 %v8379_v61  ;;  %v8382_v51 = vunpack.c.l.bf16 %v8381_v48  ;;  %v8417_v61 = vld [vmem:[#allocation105_spill] sm:$0xff]  ;;  %v8419_v48 = vld [vmem:[#allocation46_spill] sm:$0xff] }
 0x17a   :  { %v1882_v62 = vadd.f32 %v1881_v16, %v8376_v2  ;;  %v1328_v25 = vadd.f32 %v1327_v21, %v8378_v15  ;;  %v8384_v22 = vunpack.c.l.bf16 %v8383_v33  ;;  %v8386_v58 = vunpack.c.l.bf16 %v8385_v7  ;;  %v8421_v33 = vld [vmem:[#allocation51_spill] sm:$0xff]  ;;  %v8423_v7 = vld [vmem:[#allocation118_spill] sm:$0xff] }
 0x17b   :  { %v1439_v63 = vadd.f32 %v1438_v32, %v8380_v56  ;;  %v1993_v14 = vadd.f32 %v1992_v53, %v8382_v51  ;;  %v8388_v45 = vunpack.c.l.bf16 %v8387_v18  ;;  %v8390_v34 = vunpack.c.l.bf16 %v8389_v29  ;;  %v8425_v18 = vld [vmem:[#allocation143_spill] sm:$0xff]  ;;  %v8427_v29 = vld [vmem:[#allocation57_spill] sm:$0xff] }
 0x17c   :  { %v2104_v57 = vadd.f32 %v2103_v50, %v8384_v22  ;;  %v1550_v38 = vadd.f32 %v1549_v44, %v8386_v58  ;;  %v8392_v9 = vunpack.c.l.bf16 %v8391_v59  ;;  %v8394_v46 = vunpack.c.l.bf16 %v8393_v24  ;;  %v8429_v59 = vld [vmem:[#allocation175_spill] sm:$0xff]  ;;  %v8431_v24 = vld [vmem:[#allocation201_spill] sm:$0xff] }
 0x17d   :  { %v1661_v42 = vadd.f32 %v1660_v55, %v8388_v45  ;;  %v1772_v60 = vadd.f32 %v1771_v52, %v8390_v34  ;;  %v8396_v35 = vunpack.c.l.bf16 %v8395_v23  ;;  %v8398_v26 = vunpack.c.l.bf16 %v8397_v12  ;;  %v8433_v23 = vld [vmem:[#allocation126_spill] sm:$0xff]  ;;  %v8435_v12 = vld [vmem:[#allocation21_spill] sm:$0xff] }
 0x17e   :  { %v1883_v40 = vadd.f32 %v1882_v62, %v8392_v9  ;;  %v1329_v3 = vadd.f32 %v1328_v25, %v8394_v46  ;;  %v8400_v1 = vunpack.c.l.bf16 %v8399_v43  ;;  %v8402_v4 = vunpack.c.l.bf16 %v8401_v47  ;;  %v8437_v43 = vld [vmem:[#allocation113_spill] sm:$0xff]  ;;  %v8439_v47 = vld [vmem:[#allocation142_spill] sm:$0xff] }
 0x17f   :  { %v1440_v19 = vadd.f32 %v1439_v63, %v8396_v35  ;;  %v1994_v16 = vadd.f32 %v1993_v14, %v8398_v26  ;;  %v8404_v41 = vunpack.c.l.bf16 %v8403_v54  ;;  %v8406_v5 = vunpack.c.l.bf16 %v8405_v31  ;;  %v8441_v54 = vld [vmem:[#allocation53_spill] sm:$0xff]  ;;  %v8443_v31 = vld [vmem:[#allocation80_spill] sm:$0xff] }
 0x180   :  { %v2105_v21 = vadd.f32 %v2104_v57, %v8400_v1  ;;  %v1551_v32 = vadd.f32 %v1550_v38, %v8402_v4  ;;  %v8408_v39 = vunpack.c.l.bf16 %v8407_v11  ;;  %v8410_v8 = vunpack.c.l.bf16 %v8409_v37  ;;  %v8445_v11 = vld [vmem:[#allocation176_spill] sm:$0xff]  ;;  %v8447_v37 = vld [vmem:[#allocation202_spill] sm:$0xff] }
 0x181   :  { %v1662_v53 = vadd.f32 %v1661_v42, %v8404_v41  ;;  %v1773_v50 = vadd.f32 %v1772_v60, %v8406_v5  ;;  %v8412_v10 = vunpack.c.l.bf16 %v8411_v13  ;;  %v8414_v2 = vunpack.c.l.bf16 %v8413_v17  ;;  %v8449_v13 = vld [vmem:[#allocation149_spill] sm:$0xff]  ;;  %v8451_v17 = vld [vmem:[#allocation131_spill] sm:$0xff] }
 0x182   :  { %v1884_v44 = vadd.f32 %v1883_v40, %v8408_v39  ;;  %v1330_v55 = vadd.f32 %v1329_v3, %v8410_v8  ;;  %v8416_v15 = vunpack.c.l.bf16 %v8415_v6  ;;  %v8418_v56 = vunpack.c.l.bf16 %v8417_v61  ;;  %v8453_v6 = vld [vmem:[#allocation136_spill] sm:$0xff]  ;;  %v8455_v61 = vld [vmem:[#allocation151_spill] sm:$0xff] }
 0x183   :  { %v1441_v52 = vadd.f32 %v1440_v19, %v8412_v10  ;;  %v1995_v62 = vadd.f32 %v1994_v16, %v8414_v2  ;;  %v8420_v51 = vunpack.c.l.bf16 %v8419_v48  ;;  %v8422_v22 = vunpack.c.l.bf16 %v8421_v33  ;;  %v8457_v48 = vld [vmem:[#allocation76_spill] sm:$0xff]  ;;  %v8459_v33 = vld [vmem:[#allocation37_spill] sm:$0xff] }
 0x184   :  { %v2106_v25 = vadd.f32 %v2105_v21, %v8416_v15  ;;  %v1552_v63 = vadd.f32 %v1551_v32, %v8418_v56  ;;  %v8424_v58 = vunpack.c.l.bf16 %v8423_v7  ;;  %v8426_v45 = vunpack.c.l.bf16 %v8425_v18  ;;  %v8461_v7 = vld [vmem:[#allocation177_spill] sm:$0xff]  ;;  %v8463_v18 = vld [vmem:[#allocation203_spill] sm:$0xff] }
 0x185   :  { %v1663_v14 = vadd.f32 %v1662_v53, %v8420_v51  ;;  %v1774_v57 = vadd.f32 %v1773_v50, %v8422_v22  ;;  %v8428_v34 = vunpack.c.l.bf16 %v8427_v29  ;;  %v8430_v9 = vunpack.c.l.bf16 %v8429_v59  ;;  %v8465_v29 = vld [vmem:[#allocation62_spill] sm:$0xff] }
 0x186   :  { %v1885_v38 = vadd.f32 %v1884_v44, %v8424_v58  ;;  %v1331_v42 = vadd.f32 %v1330_v55, %v8426_v45  ;;  %v8432_v46 = vunpack.c.l.bf16 %v8431_v24  ;;  %v8434_v35 = vunpack.c.l.bf16 %v8433_v23  ;;  %v8467_v59 = vld [vmem:[#allocation66_spill] sm:$0xff]  ;;  %v8471_v23 = vld [vmem:[#allocation152_spill] sm:$0xff] }
 0x187   :  { %v1442_v60 = vadd.f32 %v1441_v52, %v8428_v34  ;;  %v1996_v40 = vadd.f32 %v1995_v62, %v8430_v9  ;;  %v8436_v26 = vunpack.c.l.bf16 %v8435_v12  ;;  %v8438_v1 = vunpack.c.l.bf16 %v8437_v43  ;;  %v8469_v24 = vld [vmem:[#allocation70_spill] sm:$0xff]  ;;  %v8473_v12 = vld [vmem:[#allocation33_spill] sm:$0xff] }
 0x188   :  { %v2107_v3 = vadd.f32 %v2106_v25, %v8432_v46  ;;  %v1553_v19 = vadd.f32 %v1552_v63, %v8434_v35  ;;  %v8440_v4 = vunpack.c.l.bf16 %v8439_v47  ;;  %v8442_v41 = vunpack.c.l.bf16 %v8441_v54  ;;  %v8475_v43 = vld [vmem:[#allocation25_spill] sm:$0xff]  ;;  %v8477_v47 = vld [vmem:[#allocation178_spill] sm:$0xff]  ;;  %v8479_v54 = vld [vmem:[#allocation204_spill] sm:$0xff] }
 0x189   :  { %v1664_v16 = vadd.f32 %v1663_v14, %v8436_v26  ;;  %v1775_v21 = vadd.f32 %v1774_v57, %v8438_v1  ;;  %v8444_v5 = vunpack.c.l.bf16 %v8443_v31  ;;  %v8446_v39 = vunpack.c.l.bf16 %v8445_v11  ;;  %v8481_v31 = vld [vmem:[#allocation85_spill] sm:$0xff]  ;;  %v8483_v11 = vld [vmem:[#allocation90_spill] sm:$0xff] }
 0x18a   :  { %v1886_v32 = vadd.f32 %v1885_v38, %v8440_v4  ;;  %v1332_v53 = vadd.f32 %v1331_v42, %v8442_v41  ;;  %v8448_v8 = vunpack.c.l.bf16 %v8447_v37  ;;  %v8450_v10 = vunpack.c.l.bf16 %v8449_v13  ;;  %v8485_v37 = vld [vmem:[#allocation95_spill] sm:$0xff]  ;;  %v8487_v13 = vld [vmem:[#allocation153_spill] sm:$0xff] }
 0x18b   :  { %v1443_v50 = vadd.f32 %v1442_v60, %v8444_v5  ;;  %v1997_v44 = vadd.f32 %v1996_v40, %v8446_v39  ;;  %v8452_v2 = vunpack.c.l.bf16 %v8451_v17  ;;  %v8454_v15 = vunpack.c.l.bf16 %v8453_v6  ;;  %v8489_v17 = vld [vmem:[#allocation24_spill] sm:$0xff]  ;;  %v8491_v6 = vld [vmem:[#allocation122_spill] sm:$0xff] }
 0x18c   :  { %v2108_v55 = vadd.f32 %v2107_v3, %v8448_v8  ;;  %v1554_v52 = vadd.f32 %v1553_v19, %v8450_v10  ;;  %v8456_v56 = vunpack.c.l.bf16 %v8455_v61  ;;  %v8458_v51 = vunpack.c.l.bf16 %v8457_v48  ;;  %v8493_v61 = vld [vmem:[#allocation179_spill] sm:$0xff]  ;;  %v8495_v48 = vld [vmem:[#allocation205_spill] sm:$0xff] }
 0x18d   :  { %v1665_v62 = vadd.f32 %v1664_v16, %v8452_v2  ;;  %v1776_v25 = vadd.f32 %v1775_v21, %v8454_v15  ;;  %v8460_v22 = vunpack.c.l.bf16 %v8459_v33  ;;  %v8462_v58 = vunpack.c.l.bf16 %v8461_v7  ;;  %v8497_v33 = vld [vmem:[#allocation42_spill] sm:$0xff]  ;;  %v8499_v7 = vld [vmem:[#allocation47_spill] sm:$0xff] }
 0x18e   :  { %v1887_v63 = vadd.f32 %v1886_v32, %v8456_v56  ;;  %v1333_v14 = vadd.f32 %v1332_v53, %v8458_v51  ;;  %v8464_v45 = vunpack.c.l.bf16 %v8463_v18  ;;  %v8466_v34 = vunpack.c.l.bf16 %v8465_v29  ;;  %v8501_v18 = vld [vmem:[#allocation52_spill] sm:$0xff]  ;;  %v8503_v29 = vld [vmem:[#allocation154_spill] sm:$0xff] }
 0x18f   :  { %v1444_v57 = vadd.f32 %v1443_v50, %v8460_v22  ;;  %v1998_v38 = vadd.f32 %v1997_v44, %v8462_v58  ;;  %v8468_v9 = vunpack.c.l.bf16 %v8467_v59  ;;  %v8470_v46 = vunpack.c.l.bf16 %v8469_v24  ;;  %v8505_v59 = vld [vmem:[#allocation119_spill] sm:$0xff] }
 0x190   :  { %v2109_v42 = vadd.f32 %v2108_v55, %v8464_v45  ;;  %v1555_v60 = vadd.f32 %v1554_v52, %v8466_v34  ;;  %v8472_v35 = vunpack.c.l.bf16 %v8471_v23  ;;  %v8474_v26 = vunpack.c.l.bf16 %v8473_v12  ;;  %v8507_v24 = vld [vmem:[#allocation147_spill] sm:$0xff]  ;;  %v8509_v23 = vld [vmem:[#allocation180_spill] sm:$0xff]  ;;  %v8511_v12 = vld [vmem:[#allocation206_spill] sm:$0xff] }
 0x191   :  { %v1666_v40 = vadd.f32 %v1665_v62, %v8468_v9  ;;  %v1777_v3 = vadd.f32 %v1776_v25, %v8470_v46  ;;  %v8476_v1 = vunpack.c.l.bf16 %v8475_v43  ;;  %v8478_v4 = vunpack.c.l.bf16 %v8477_v47  ;;  %v8513_v43 = vld [vmem:[#allocation106_spill] sm:$0xff] }
 0x192   :  { %v1888_v19 = vadd.f32 %v1887_v63, %v8472_v35  ;;  %v1334_v16 = vadd.f32 %v1333_v14, %v8474_v26  ;;  %v8480_v41 = vunpack.c.l.bf16 %v8479_v54  ;;  %v8482_v5 = vunpack.c.l.bf16 %v8481_v31  ;;  %v8515_v47 = vld [vmem:[#allocation110_spill] sm:$0xff]  ;;  %v8519_v31 = vld [vmem:[#allocation155_spill] sm:$0xff] }
 0x193   :  { %v1445_v21 = vadd.f32 %v1444_v57, %v8476_v1  ;;  %v1999_v32 = vadd.f32 %v1998_v38, %v8478_v4  ;;  %v8484_v39 = vunpack.c.l.bf16 %v8483_v11  ;;  %v8486_v8 = vunpack.c.l.bf16 %v8485_v37  ;;  %v8517_v54 = vld [vmem:[#allocation22_spill] sm:$0xff]  ;;  %v8521_v11 = vld [vmem:[#allocation144_spill] sm:$0xff] }
 0x194   :  { %v2110_v53 = vadd.f32 %v2109_v42, %v8480_v41  ;;  %v1556_v50 = vadd.f32 %v1555_v60, %v8482_v5  ;;  %v8488_v10 = vunpack.c.l.bf16 %v8487_v13  ;;  %v8490_v2 = vunpack.c.l.bf16 %v8489_v17  ;;  %v8523_v37 = vld [vmem:[#allocation58_spill] sm:$0xff]  ;;  %v8525_v13 = vld [vmem:[#allocation181_spill] sm:$0xff]  ;;  %v8527_v17 = vld [vmem:[#allocation207_spill] sm:$0xff] }
 0x195   :  { %v1667_v44 = vadd.f32 %v1666_v40, %v8484_v39  ;;  %v1778_v55 = vadd.f32 %v1777_v3, %v8486_v8  ;;  %v8492_v15 = vunpack.c.l.bf16 %v8491_v6  ;;  %v8494_v56 = vunpack.c.l.bf16 %v8493_v61  ;;  %v8529_v6 = vld [vmem:[#allocation127_spill] sm:$0xff]  ;;  %v8531_v61 = vld [vmem:[#allocation132_spill] sm:$0xff] }
 0x196   :  { %v1889_v52 = vadd.f32 %v1888_v19, %v8488_v10  ;;  %v1335_v62 = vadd.f32 %v1334_v16, %v8490_v2  ;;  %v8496_v51 = vunpack.c.l.bf16 %v8495_v48  ;;  %v8498_v22 = vunpack.c.l.bf16 %v8497_v33  ;;  %v8533_v48 = vld [vmem:[#allocation137_spill] sm:$0xff]  ;;  %v8535_v33 = vld [vmem:[#allocation156_spill] sm:$0xff] }
 0x197   :  { %v1446_v25 = vadd.f32 %v1445_v21, %v8492_v15  ;;  %v2000_v63 = vadd.f32 %v1999_v32, %v8494_v56  ;;  %v8500_v58 = vunpack.c.l.bf16 %v8499_v7  ;;  %v8502_v45 = vunpack.c.l.bf16 %v8501_v18  ;;  %v8537_v7 = vld [vmem:[#allocation54_spill] sm:$0xff]  ;;  %v8539_v18 = vld [vmem:[#allocation81_spill] sm:$0xff] }
 0x198   :  { %v2111_v14 = vadd.f32 %v2110_v53, %v8496_v51  ;;  %v1557_v57 = vadd.f32 %v1556_v50, %v8498_v22  ;;  %v8504_v34 = vunpack.c.l.bf16 %v8503_v29  ;;  %v8506_v9 = vunpack.c.l.bf16 %v8505_v59  ;;  %v8541_v29 = vld [vmem:[#allocation182_spill] sm:$0xff]  ;;  %v8543_v59 = vld [vmem:[#allocation208_spill] sm:$0xff] }
 0x199   :  { %v1668_v38 = vadd.f32 %v1667_v44, %v8500_v58  ;;  %v1779_v42 = vadd.f32 %v1778_v55, %v8502_v45  ;;  %v8508_v46 = vunpack.c.l.bf16 %v8507_v24  ;;  %v8510_v35 = vunpack.c.l.bf16 %v8509_v23  ;;  %v8545_v24 = vld [vmem:[#allocation63_spill] sm:$0xff] }
 0x19a   :  { %v1890_v60 = vadd.f32 %v1889_v52, %v8504_v34  ;;  %v1336_v40 = vadd.f32 %v1335_v62, %v8506_v9  ;;  %v8512_v26 = vunpack.c.l.bf16 %v8511_v12  ;;  %v8514_v1 = vunpack.c.l.bf16 %v8513_v43  ;;  %v8547_v23 = vld [vmem:[#allocation67_spill] sm:$0xff]  ;;  %v8551_v43 = vld [vmem:[#allocation157_spill] sm:$0xff] }
 0x19b   :  { %v1447_v3 = vadd.f32 %v1446_v25, %v8508_v46  ;;  %v2001_v19 = vadd.f32 %v2000_v63, %v8510_v35  ;;  %v8516_v4 = vunpack.c.l.bf16 %v8515_v47  ;;  %v8518_v41 = vunpack.c.l.bf16 %v8517_v54  ;;  %v8549_v12 = vld [vmem:[#allocation71_spill] sm:$0xff]  ;;  %v8553_v47 = vld [vmem:[#allocation77_spill] sm:$0xff]  ;;  %v8555_v54 = vld [vmem:[#allocation38_spill] sm:$0xff] }
 0x19c   :  { %v2112_v16 = vadd.f32 %v2111_v14, %v8512_v26  ;;  %v1558_v21 = vadd.f32 %v1557_v57, %v8514_v1  ;;  %v8520_v5 = vunpack.c.l.bf16 %v8519_v31  ;;  %v8522_v39 = vunpack.c.l.bf16 %v8521_v11  ;;  %v8557_v31 = vld [vmem:[#allocation183_spill] sm:$0xff]  ;;  %v8559_v11 = vld [vmem:[#allocation209_spill] sm:$0xff] }
 0x19d   :  { %v1669_v32 = vadd.f32 %v1668_v38, %v8516_v4  ;;  %v1780_v53 = vadd.f32 %v1779_v42, %v8518_v41  ;;  %v8524_v8 = vunpack.c.l.bf16 %v8523_v37  ;;  %v8526_v10 = vunpack.c.l.bf16 %v8525_v13  ;;  %v8561_v37 = vld [vmem:[#allocation86_spill] sm:$0xff]  ;;  %v8563_v13 = vld [vmem:[#allocation91_spill] sm:$0xff] }
 0x19e   :  { %v1891_v50 = vadd.f32 %v1890_v60, %v8520_v5  ;;  %v1337_v44 = vadd.f32 %v1336_v40, %v8522_v39  ;;  %v8528_v2 = vunpack.c.l.bf16 %v8527_v17  ;;  %v8530_v15 = vunpack.c.l.bf16 %v8529_v6  ;;  %v8565_v17 = vld [vmem:[#allocation96_spill] sm:$0xff]  ;;  %v8567_v6 = vld [vmem:[#allocation158_spill] sm:$0xff] }
 0x19f   :  { %v1448_v55 = vadd.f32 %v1447_v3, %v8524_v8  ;;  %v2002_v52 = vadd.f32 %v2001_v19, %v8526_v10  ;;  %v8532_v56 = vunpack.c.l.bf16 %v8531_v61  ;;  %v8534_v51 = vunpack.c.l.bf16 %v8533_v48  ;;  %v8569_v61 = vld [vmem:[#allocation34_spill] sm:$0xff]  ;;  %v8571_v48 = vld [vmem:[#allocation103_spill] sm:$0xff] }
 0x1a0   :  { %v2113_v62 = vadd.f32 %v2112_v16, %v8528_v2  ;;  %v1559_v25 = vadd.f32 %v1558_v21, %v8530_v15  ;;  %v8536_v22 = vunpack.c.l.bf16 %v8535_v33  ;;  %v8538_v58 = vunpack.c.l.bf16 %v8537_v7  ;;  %v8573_v33 = vld [vmem:[#allocation184_spill] sm:$0xff]  ;;  %v8575_v7 = vld [vmem:[#allocation210_spill] sm:$0xff] }
 0x1a1   :  { %v1670_v63 = vadd.f32 %v1669_v32, %v8532_v56  ;;  %v1781_v14 = vadd.f32 %v1780_v53, %v8534_v51  ;;  %v8540_v45 = vunpack.c.l.bf16 %v8539_v18  ;;  %v8542_v34 = vunpack.c.l.bf16 %v8541_v29  ;;  %v8577_v18 = vld [vmem:[#allocation43_spill] sm:$0xff]  ;;  %v8579_v29 = vld [vmem:[#allocation48_spill] sm:$0xff] }
 0x1a2   :  { %v1892_v57 = vadd.f32 %v1891_v50, %v8536_v22  ;;  %v1338_v38 = vadd.f32 %v1337_v44, %v8538_v58  ;;  %v8544_v9 = vunpack.c.l.bf16 %v8543_v59  ;;  %v8546_v46 = vunpack.c.l.bf16 %v8545_v24  ;;  %v8581_v59 = vld [vmem:[#allocation114_spill] sm:$0xff]  ;;  %v8583_v24 = vld [vmem:[#allocation159_spill] sm:$0xff] }
 0x1a3   :  { %v1449_v42 = vadd.f32 %v1448_v55, %v8540_v45  ;;  %v2003_v60 = vadd.f32 %v2002_v52, %v8542_v34  ;;  %v8548_v35 = vunpack.c.l.bf16 %v8547_v23  ;;  %v8550_v26 = vunpack.c.l.bf16 %v8549_v12  ;;  %v8585_v23 = vld [vmem:[#allocation19_spill] sm:$0xff] }
 0x1a4   :  { %v2114_v40 = vadd.f32 %v2113_v62, %v8544_v9  ;;  %v1560_v3 = vadd.f32 %v1559_v25, %v8546_v46  ;;  %v8552_v1 = vunpack.c.l.bf16 %v8551_v43  ;;  %v8554_v4 = vunpack.c.l.bf16 %v8553_v47  ;;  %v8587_v12 = vld [vmem:[#allocation123_spill] sm:$0xff]  ;;  %v8589_v43 = vld [vmem:[#allocation185_spill] sm:$0xff] }
 0x1a5   :  { %v1671_v19 = vadd.f32 %v1670_v63, %v8548_v35  ;;  %v1782_v16 = vadd.f32 %v1781_v14, %v8550_v26  ;;  %v8556_v41 = vunpack.c.l.bf16 %v8555_v54  ;;  %v8558_v5 = vunpack.c.l.bf16 %v8557_v31  ;;  %v8591_v47 = vld [vmem:[#allocation211_spill] sm:$0xff] }
 0x1a6   :  { %v1893_v21 = vadd.f32 %v1892_v57, %v8552_v1  ;;  %v1339_v32 = vadd.f32 %v1338_v38, %v8554_v4  ;;  %v8560_v39 = vunpack.c.l.bf16 %v8559_v11  ;;  %v8562_v8 = vunpack.c.l.bf16 %v8561_v37  ;;  %v8593_v54 = vld [vmem:[#allocation107_spill] sm:$0xff]  ;;  %v8597_v11 = vld [vmem:[#allocation138_spill] sm:$0xff]  ;;  %v8599_v37 = vld [vmem:[#allocation160_spill] sm:$0xff] }
 0x1a7   :  { %v1450_v53 = vadd.f32 %v1449_v42, %v8556_v41  ;;  %v2004_v50 = vadd.f32 %v2003_v60, %v8558_v5  ;;  %v8564_v10 = vunpack.c.l.bf16 %v8563_v13  ;;  %v8566_v2 = vunpack.c.l.bf16 %v8565_v17  ;;  %v8595_v31 = vld [vmem:[#allocation111_spill] sm:$0xff]  ;;  %v8601_v13 = vld [vmem:[#allocation120_spill] sm:$0xff] }
 0x1a8   :  { %v2115_v44 = vadd.f32 %v2114_v40, %v8560_v39  ;;  %v1561_v55 = vadd.f32 %v1560_v3, %v8562_v8  ;;  %v8568_v15 = vunpack.c.l.bf16 %v8567_v6  ;;  %v8570_v56 = vunpack.c.l.bf16 %v8569_v61  ;;  %v8603_v17 = vld [vmem:[#allocation148_spill] sm:$0xff]  ;;  %v8605_v6 = vld [vmem:[#allocation186_spill] sm:$0xff] }
 0x1a9   :  { %v1672_v52 = vadd.f32 %v1671_v19, %v8564_v10  ;;  %v1783_v62 = vadd.f32 %v1782_v16, %v8566_v2  ;;  %v8572_v51 = vunpack.c.l.bf16 %v8571_v48  ;;  %v8574_v22 = vunpack.c.l.bf16 %v8573_v33  ;;  %v8607_v61 = vld [vmem:[#allocation212_spill] sm:$0xff]  ;;  %v8611_v33 = vld [vmem:[#allocation133_spill] sm:$0xff] }
 0x1aa   :  { %v1894_v25 = vadd.f32 %v1893_v21, %v8568_v15  ;;  %v1340_v63 = vadd.f32 %v1339_v32, %v8570_v56  ;;  %v8576_v58 = vunpack.c.l.bf16 %v8575_v7  ;;  %v8578_v45 = vunpack.c.l.bf16 %v8577_v18  ;;  %v8609_v48 = vld [vmem:[#allocation128_spill] sm:$0xff]  ;;  %v8615_v18 = vld [vmem:[#allocation161_spill] sm:$0xff] }
 0x1ab   :  { %v1451_v14 = vadd.f32 %v1450_v53, %v8572_v51  ;;  %v2005_v57 = vadd.f32 %v2004_v50, %v8574_v22  ;;  %v8580_v34 = vunpack.c.l.bf16 %v8579_v29  ;;  %v8582_v9 = vunpack.c.l.bf16 %v8581_v59  ;;  %v8613_v7 = vld [vmem:[#allocation72_spill] sm:$0xff]  ;;  %v8617_v29 = vld [vmem:[#allocation145_spill] sm:$0xff]  ;;  %v8619_v59 = vld [vmem:[#allocation59_spill] sm:$0xff] }
 0x1ac   :  { %v2116_v38 = vadd.f32 %v2115_v44, %v8576_v58  ;;  %v1562_v42 = vadd.f32 %v1561_v55, %v8578_v45  ;;  %v8584_v46 = vunpack.c.l.bf16 %v8583_v24  ;;  %v8586_v35 = vunpack.c.l.bf16 %v8585_v23  ;;  %v8621_v24 = vld [vmem:[#allocation187_spill] sm:$0xff]  ;;  %v8623_v23 = vld [vmem:[#allocation213_spill] sm:$0xff] }
 0x1ad   :  { %v1673_v60 = vadd.f32 %v1672_v52, %v8580_v34  ;;  %v1784_v40 = vadd.f32 %v1783_v62, %v8582_v9  ;;  %v8588_v26 = vunpack.c.l.bf16 %v8587_v12  ;;  %v8590_v1 = vunpack.c.l.bf16 %v8589_v43  ;;  %v8625_v12 = vld [vmem:[#allocation15_spill] sm:$0xff]  ;;  %v8627_v43 = vld [vmem:[#allocation29_spill] sm:$0xff] }
 0x1ae   :  { %v1895_v3 = vadd.f32 %v1894_v25, %v8584_v46  ;;  %v1341_v19 = vadd.f32 %v1340_v63, %v8586_v35  ;;  %v8592_v4 = vunpack.c.l.bf16 %v8591_v47  ;;  %v8594_v41 = vunpack.c.l.bf16 %v8593_v54  ;;  %v8629_v47 = vld [vmem:[#allocation97_spill] sm:$0xff]  ;;  %v8631_v54 = vld [vmem:[#allocation162_spill] sm:$0xff] }
 0x1af   :  { %v1452_v16 = vadd.f32 %v1451_v14, %v8588_v26  ;;  %v2006_v21 = vadd.f32 %v2005_v57, %v8590_v1  ;;  %v8596_v5 = vunpack.c.l.bf16 %v8595_v31  ;;  %v8598_v39 = vunpack.c.l.bf16 %v8597_v11  ;;  %v8633_v31 = vld [vmem:[#allocation55_spill] sm:$0xff]  ;;  %v8635_v11 = vld [vmem:[#allocation82_spill] sm:$0xff] }
 0x1b0   :  { %v2117_v32 = vadd.f32 %v2116_v38, %v8592_v4  ;;  %v1563_v53 = vadd.f32 %v1562_v42, %v8594_v41  ;;  %v8600_v8 = vunpack.c.l.bf16 %v8599_v37  ;;  %v8602_v10 = vunpack.c.l.bf16 %v8601_v13  ;;  %v8637_v37 = vld [vmem:[#allocation188_spill] sm:$0xff] }
 0x1b1   :  { %v1674_v50 = vadd.f32 %v1673_v60, %v8596_v5  ;;  %v1785_v44 = vadd.f32 %v1784_v40, %v8598_v39  ;;  %v8604_v2 = vunpack.c.l.bf16 %v8603_v17  ;;  %v8606_v15 = vunpack.c.l.bf16 %v8605_v6 }
 0x1b2   :  { %v1896_v55 = vadd.f32 %v1895_v3, %v8600_v8  ;;  %v1342_v52 = vadd.f32 %v1341_v19, %v8602_v10  ;;  %v8608_v56 = vunpack.c.l.bf16 %v8607_v61  ;;  %v8610_v51 = vunpack.c.l.bf16 %v8609_v48 }
 0x1b3   :  { %v1453_v62 = vadd.f32 %v1452_v16, %v8604_v2  ;;  %v2007_v25 = vadd.f32 %v2006_v21, %v8606_v15  ;;  %v8612_v22 = vunpack.c.l.bf16 %v8611_v33  ;;  %v8614_v58 = vunpack.c.l.bf16 %v8613_v7 }
 0x1b4   :  { %v2118_v63 = vadd.f32 %v2117_v32, %v8608_v56  ;;  %v1564_v14 = vadd.f32 %v1563_v53, %v8610_v51  ;;  %v8616_v45 = vunpack.c.l.bf16 %v8615_v18  ;;  %v8618_v34 = vunpack.c.l.bf16 %v8617_v29  ;;  %v8655_v29 = vld [vmem:[#allocation44_spill] sm:$0xff] }
 0x1b5   :  { %v1675_v57 = vadd.f32 %v1674_v50, %v8612_v22  ;;  %v1786_v38 = vadd.f32 %v1785_v44, %v8614_v58  ;;  %v8620_v9 = vunpack.c.l.bf16 %v8619_v59  ;;  %v8622_v46 = vunpack.c.l.bf16 %v8621_v24  ;;  %v8657_v59 = vld [vmem:[#allocation92_spill] sm:$0xff]  ;;  %v8659_v24 = vld [vmem:[#allocation139_spill] sm:$0xff] }
 0x1b6   :  { %v1897_v42 = vadd.f32 %v1896_v55, %v8616_v45  ;;  %v1343_v60 = vadd.f32 %v1342_v52, %v8618_v34  ;;  %v8624_v35 = vunpack.c.l.bf16 %v8623_v23  ;;  %v8626_v26 = vunpack.c.l.bf16 %v8625_v12  ;;  %v8640_v52 = vld [vmem:[#allocation87_spill] sm:$0xff]  ;;  %v8661_v23 = vld [vmem:[#allocation164_spill] sm:$0xff] }
 0x1b7   :  { %v1454_v40 = vadd.f32 %v1453_v62, %v8620_v9  ;;  %v2008_v3 = vadd.f32 %v2007_v25, %v8622_v46  ;;  %v8628_v1 = vunpack.c.l.bf16 %v8627_v43  ;;  %v8630_v4 = vunpack.c.l.bf16 %v8629_v47  ;;  %v8642_v62 = vld [vmem:[#allocation68_spill] sm:$0xff]  ;;  %v8644_v25 = vld [vmem:[#allocation115_spill] sm:$0xff] }
 0x1b8   :  { %v2119_v19 = vadd.f32 %v2118_v63, %v8624_v35  ;;  %v1565_v16 = vadd.f32 %v1564_v14, %v8626_v26  ;;  %v8632_v41 = vunpack.c.l.bf16 %v8631_v54  ;;  %v8634_v5 = vunpack.c.l.bf16 %v8633_v31  ;;  %v8646_v63 = vld [vmem:[#allocation163_spill] sm:$0xff]  ;;  %v8648_v14 = vld [vmem:[#allocation78_spill] sm:$0xff]  ;;  %v8665_v43 = vld [vmem:[#allocation104_spill] sm:$0xff] }
 0x1b9   :  { %v1676_v21 = vadd.f32 %v1675_v57, %v8628_v1  ;;  %v1787_v32 = vadd.f32 %v1786_v38, %v8630_v4  ;;  %v8636_v39 = vunpack.c.l.bf16 %v8635_v11  ;;  %v8638_v8 = vunpack.c.l.bf16 %v8637_v37  ;;  %v8650_v57 = vld [vmem:[#allocation39_spill] sm:$0xff] }
 0x1ba   :  { %v1898_v53 = vadd.f32 %v1897_v42, %v8632_v41  ;;  %v1344_v50 = vadd.f32 %v1343_v60, %v8634_v5  ;;  %v8639_v13 = vunpack.c.l.bf16 %v5436_v36  ;;  %v8641_v17 = vunpack.c.l.bf16 %v8640_v52  ;;  %v8652_v36 = vld [vmem:[#allocation189_spill] sm:$0xff]  ;;  %v8663_v12 = vld [vmem:[#allocation35_spill] sm:$0xff]  ;;  %v8670_v41 = vld [vmem:[#allocation108_spill] sm:$0xff] }
 0x1bb   :  { %v1455_v44 = vadd.f32 %v1454_v40, %v8636_v39  ;;  %v2009_v55 = vadd.f32 %v2008_v3, %v8638_v8  ;;  %v8643_v6 = vunpack.c.l.bf16 %v8642_v62  ;;  %v8645_v61 = vunpack.c.l.bf16 %v8644_v25  ;;  %v8672_v5 = vld [vmem:[#allocation49_spill] sm:$0xff] }
 0x1bc   :  { %v2120_v10 = vadd.f32 %v2119_v19, %v8639_v13  ;;  %v1566_v2 = vadd.f32 %v1565_v16, %v8641_v17  ;;  %v8647_v48 = vunpack.c.l.bf16 %v8646_v63  ;;  %v8649_v33 = vunpack.c.l.bf16 %v8648_v14  ;;  %v8674_v39 = vld [vmem:[#allocation73_spill] sm:$0xff]  ;;  %v8687_v14 = vld [vmem:[#allocation26_spill] sm:$0xff] }
 0x1bd   :  { %v1677_v15 = vadd.f32 %v1676_v21, %v8643_v6  ;;  %v1788_v56 = vadd.f32 %v1787_v32, %v8645_v61  ;;  %v8651_v7 = vunpack.c.l.bf16 %v8650_v57  ;;  %v8653_v38 = vunpack.c.l.bf16 %v8652_v36  ;;  %v8676_v8 = vld [vmem:[#allocation165_spill] sm:$0xff]  ;;  %v8689_v57 = vld [vmem:[#allocation98_spill] sm:$0xff] }
 0x1be   :  { %v1899_v51 = vadd.f32 %v1898_v53, %v8647_v48  ;;  %v1345_v22 = vadd.f32 %v1344_v50, %v8649_v33  ;;  %v8654_v45 = vunpack.c.l.bf16 %v4302_v0  ;;  %v8656_v34 = vunpack.c.l.bf16 %v8655_v29  ;;  %v8667_v0 = vld [vmem:[#allocation190_spill] sm:$0xff]  ;;  %v8685_v63 = vld [vmem:[#allocation129_spill] sm:$0xff] }
 0x1bf   :  { %v1456_v58 = vadd.f32 %v1455_v44, %v8651_v7  ;;  %v2010_v18 = vadd.f32 %v2009_v55, %v8653_v38  ;;  %v8658_v9 = vunpack.c.l.bf16 %v8657_v59  ;;  %v8660_v46 = vunpack.c.l.bf16 %v8659_v24  ;;  %v8691_v36 = vld [vmem:[#allocation166_spill] sm:$0xff] }
 0x1c0   :  { %v2121_v42 = vadd.f32 %v2120_v10, %v8654_v45  ;;  %v1567_v60 = vadd.f32 %v1566_v2, %v8656_v34  ;;  %v8662_v35 = vunpack.c.l.bf16 %v8661_v23  ;;  %v8664_v26 = vunpack.c.l.bf16 %v8663_v12  ;;  %v8678_v10 = vld [vmem:[#allocation101_spill] sm:$0xff]  ;;  %v8680_v2 = vld [vmem:[#allocation124_spill] sm:$0xff]  ;;  %v8693_v45 = vld [vmem:[#allocation27_spill] sm:$0xff] }
 0x1c1   :  { %v1678_v40 = vadd.f32 %v1677_v15, %v8658_v9  ;;  %v1789_v3 = vadd.f32 %v1788_v56, %v8660_v46  ;;  %v8666_v1 = vunpack.c.l.bf16 %v8665_v43  ;;  %v8668_v47 = vunpack.c.l.bf16 %v8667_v0  ;;  %v8695_v34 = vld [vmem:[#allocation60_spill] sm:$0xff]  ;;  %v8699_v24 = vld [vmem:[#allocation30_spill] sm:$0xff]  ;;  %v8707_v0 = vld [vmem:[#allocation167_spill] sm:$0xff] }
 0x1c2   :  { %v1900_v19 = vadd.f32 %v1899_v51, %v8662_v35  ;;  %v1346_v16 = vadd.f32 %v1345_v22, %v8664_v26  ;;  %v8669_v32 = vunpack.c.l.bf16 %v4304_v20  ;;  %v8671_v53 = vunpack.c.l.bf16 %v8670_v41  ;;  %v8682_v20 = vld [vmem:[#allocation191_spill] sm:$0xff]  ;;  %v8701_v23 = vld [vmem:[#allocation150_spill] sm:$0xff]  ;;  %v8705_v43 = vld [vmem:[#allocation116_spill] sm:$0xff] }
 0x1c3   :  { %v1457_v21 = vadd.f32 %v1456_v58, %v8666_v1  ;;  %v2011_v4 = vadd.f32 %v2010_v18, %v8668_v47  ;;  %v8673_v50 = vunpack.c.l.bf16 %v8672_v5  ;;  %v8675_v44 = vunpack.c.l.bf16 %v8674_v39  ;;  %v8703_v12 = vld [vmem:[#allocation134_spill] sm:$0xff] }
 0x1c4   :  { %v2122_v54 = vadd.f32 %v2121_v42, %v8669_v32  ;;  %v1568_v31 = vadd.f32 %v1567_v60, %v8671_v53  ;;  %v8677_v55 = vunpack.c.l.bf16 %v8676_v8  ;;  %v8679_v52 = vunpack.c.l.bf16 %v8678_v10  ;;  %v8709_v32 = vld [vmem:[#allocation146_spill] sm:$0xff]  ;;  %v8711_v53 = vld [vmem:[#allocation83_spill] sm:$0xff]  ;;  %v8716_v8 = vld [vmem:[#allocation64_spill] sm:$0xff] }
 0x1c5   :  { %v1679_v11 = vadd.f32 %v1678_v40, %v8673_v50  ;;  %v1790_v37 = vadd.f32 %v1789_v3, %v8675_v44  ;;  %v8681_v62 = vunpack.c.l.bf16 %v8680_v2  ;;  %v8683_v15 = vunpack.c.l.bf16 %v8682_v20  ;;  %v8713_v50 = vld [vmem:[#allocation193_spill] sm:$0xff]  ;;  %v8718_v10 = vld [vmem:[#allocation16_spill] sm:$0xff] }
 0x1c6   :  { %v1901_v13 = vadd.f32 %v1900_v19, %v8677_v55  ;;  %v1347_v17 = vadd.f32 %v1346_v16, %v8679_v52  ;;  %v8684_v61 = vunpack.c.l.bf16 %v4314_v28  ;;  %v8686_v48 = vunpack.c.l.bf16 %v8685_v63  ;;  %v8697_v28 = vld [vmem:[#allocation192_spill] sm:$0xff] }
 0x1c7   :  { %v1458_v6 = vadd.f32 %v1457_v21, %v8681_v62  ;;  %v2012_v25 = vadd.f32 %v2011_v4, %v8683_v15  ;;  %v8688_v33 = vunpack.c.l.bf16 %v8687_v14  ;;  %v8690_v7 = vunpack.c.l.bf16 %v8689_v57  ;;  %v8720_v2 = vld [vmem:[#allocation140_spill] sm:$0xff] }
 0x1c8   :  { %v2123_v56 = vadd.f32 %v2122_v54, %v8684_v61  ;;  %v1569_v51 = vadd.f32 %v1568_v31, %v8686_v48  ;;  %v8692_v38 = vunpack.c.l.bf16 %v8691_v36  ;;  %v8694_v42 = vunpack.c.l.bf16 %v8693_v45  ;;  %v8722_v20 = vld [vmem:[#allocation168_spill] sm:$0xff] }
 0x1c9   :  { %v1680_v22 = vadd.f32 %v1679_v11, %v8688_v33  ;;  %v1791_v58 = vadd.f32 %v1790_v37, %v8690_v7  ;;  %v8696_v60 = vunpack.c.l.bf16 %v8695_v34  ;;  %v8698_v9 = vunpack.c.l.bf16 %v8697_v28  ;;  %v8724_v61 = vld [vmem:[#allocation56_spill] sm:$0xff] }
 0x1ca   :  { %v1902_v18 = vadd.f32 %v1901_v13, %v8692_v38  ;;  %v1348_v29 = vadd.f32 %v1347_v17, %v8694_v42  ;;  %v8700_v46 = vunpack.c.l.bf16 %v8699_v24  ;;  %v8702_v35 = vunpack.c.l.bf16 %v8701_v23  ;;  %v8726_v48 = vld [vmem:[#allocation40_spill] sm:$0xff] }
 0x1cb   :  { %v1459_v59 = vadd.f32 %v1458_v6, %v8696_v60  ;;  %v2013_v40 = vadd.f32 %v2012_v25, %v8698_v9  ;;  %v8704_v26 = vunpack.c.l.bf16 %v8703_v12  ;;  %v8706_v1 = vunpack.c.l.bf16 %v8705_v43 }
 0x1cc   :  { %v2124_v3 = vadd.f32 %v2123_v56, %v8700_v46  ;;  %v1570_v19 = vadd.f32 %v1569_v51, %v8702_v35  ;;  %v8708_v47 = vunpack.c.l.bf16 %v8707_v0  ;;  %v8710_v54 = vunpack.c.l.bf16 %v8709_v32  ;;  %v8739_v46 = vld [vmem:[#allocation195_spill] sm:$0xff] }
 0x1cd   :  { %v1681_v16 = vadd.f32 %v1680_v22, %v8704_v26  ;;  %v1792_v21 = vadd.f32 %v1791_v58, %v8706_v1  ;;  %v8712_v31 = vunpack.c.l.bf16 %v8711_v53  ;;  %v8714_v11 = vunpack.c.l.bf16 %v8713_v50  ;;  %v8731_v58 = vld [vmem:[#allocation88_spill] sm:$0xff] }
 0x1ce   :  { %v1903_v4 = vadd.f32 %v1902_v18, %v8708_v47  ;;  %v1349_v41 = vadd.f32 %v1348_v29, %v8710_v54  ;;  %v8715_v44 = vunpack.c.l.bf16 %v4360_v27  ;;  %v8717_v55 = vunpack.c.l.bf16 %v8716_v8  ;;  %v8728_v27 = vld [vmem:[#allocation194_spill] sm:$0xff]  ;;  %v8733_v18 = vld [vmem:[#allocation93_spill] sm:$0xff] }
 0x1cf   :  { %v1460_v5 = vadd.f32 %v1459_v59, %v8712_v31  ;;  %v2014_v39 = vadd.f32 %v2013_v40, %v8714_v11  ;;  %v8719_v52 = vunpack.c.l.bf16 %v8718_v10  ;;  %v8721_v62 = vunpack.c.l.bf16 %v8720_v2  ;;  %v8735_v29 = vld [vmem:[#allocation74_spill] sm:$0xff]  ;;  %v8737_v59 = vld [vmem:[#allocation169_spill] sm:$0xff] }
 0x1d0   :  { %v2125_v37 = vadd.f32 %v2124_v3, %v8715_v44  ;;  %v1571_v13 = vadd.f32 %v1570_v19, %v8717_v55  ;;  %v8723_v15 = vunpack.c.l.bf16 %v8722_v20  ;;  %v8725_v56 = vunpack.c.l.bf16 %v8724_v61 }
 0x1d1   :  { %v1682_v17 = vadd.f32 %v1681_v16, %v8719_v52  ;;  %v1793_v6 = vadd.f32 %v1792_v21, %v8721_v62  ;;  %v8727_v51 = vunpack.c.l.bf16 %v8726_v48  ;;  %v8729_v33 = vunpack.c.l.bf16 %v8728_v27 }
 0x1d2   :  { %v1904_v25 = vadd.f32 %v1903_v4, %v8723_v15  ;;  %v1350_v63 = vadd.f32 %v1349_v41, %v8725_v56  ;;  %v8730_v57 = vunpack.c.l.bf16 %v4362_v49  ;;  %v8732_v36 = vunpack.c.l.bf16 %v8731_v58 }
 0x1d3   :  { %v1461_v14 = vadd.f32 %v1460_v5, %v8727_v51  ;;  %v2015_v22 = vadd.f32 %v2014_v39, %v8729_v33  ;;  %v8734_v45 = vunpack.c.l.bf16 %v8733_v18  ;;  %v8736_v34 = vunpack.c.l.bf16 %v8735_v29 }
 0x1d4   :  { %v2126_v7 = vadd.f32 %v2125_v37, %v8730_v57  ;;  %v1572_v38 = vadd.f32 %v1571_v13, %v8732_v36  ;;  %v8738_v28 = vunpack.c.l.bf16 %v8737_v59  ;;  %v1351_v40 = vrot.slane %v1350_v63, 4 }
 0x1d5   :  { %v1683_v42 = vadd.f32 %v1682_v17, %v8734_v45  ;;  %v1794_v60 = vadd.f32 %v1793_v6, %v8736_v34  ;;  %v1462_v24 = vrot.slane %v1461_v14, 4  ;;  %v8740_v3 = vunpack.c.l.bf16 %v8739_v46  ;;  %v5960_v45 = vld [vmem:[#allocation2 + $0x20] ss:$12 sps:$4 sm:$0xff]   ;;  %v5967_v46 = vld [vmem:[#allocation2 + $0x68] ss:$12 sps:$4 sm:$0xff]  }
 0x1d6   :  { %v1905_v9 = vadd.f32 %v1904_v25, %v8738_v28  ;;  %v8741_v49 = vunpack.c.l.bf16 %v4376_v30  ;;  %v1573_v19 = vrot.slane %v1572_v38, 4  ;;  %v1352_v43 = vadd.f32 %v1351_v40, %v1350_v63  ;;  %v5964_v28 = vld [vmem:[#allocation2 + $0x50] ss:$12 sps:$4 sm:$0xff]  }
 0x1d7   :  { %v2016_v23 = vadd.f32 %v2015_v22, %v8740_v3  ;;  %v1684_v12 = vrot.slane %v1683_v42, 4  ;;  %v1795_v26 = vrot.slane %v1794_v60, 4  ;;  %v1463_v1 = vadd.f32 %v1462_v24, %v1461_v14 }
 0x1d8   :  { %v2127_v35 = vadd.f32 %v2126_v7, %v8741_v49  ;;  %v1906_v16 = vrot.slane %v1905_v9, 4  ;;  %v1574_v47 = vadd.f32 %v1573_v19, %v1572_v38  ;;  %v1353_v41 = vrot.slane %v1352_v43, 2  ;;  %v5958_v7 = vld [vmem:[#allocation2 + $0x8] ss:$12 sps:$4 sm:$0xff]   ;;  %v5970_v49 = vld [vmem:[#allocation2 + $0x80] ss:$12 sps:$4 sm:$0xff]  }
 0x1d9   :  { %v2017_v21 = vrot.slane %v2016_v23, 4  ;;  %v1685_v4 = vadd.f32 %v1684_v12, %v1683_v42  ;;  %v1796_v32 = vadd.f32 %v1795_v26, %v1794_v60  ;;  %v1464_v53 = vrot.slane %v1463_v1, 2  ;;  %v5962_v42 = vld [vmem:[#allocation2 + $0x38] ss:$12 sps:$4 sm:$0xff]   ;;  %v6149_v12 = vld [vmem:[#allocation2 + $0x4a0] ss:$12 sps:$4 sm:$0xff]  }
 0x1da   :  { %v2128_v0 = vrot.slane %v2127_v35, 4  ;;  %v1907_v54 = vadd.f32 %v1906_v16, %v1905_v9  ;;  %v1575_v50 = vrot.slane %v1574_v47, 2  ;;  %v1354_v44 = vadd.f32 %v1353_v41, %v1352_v43  ;;  %v5976_v16 = vld [vmem:[#allocation2 + $0x98] ss:$12 sps:$4 sm:$0xff]   ;;  %v5978_v43 = vld [vmem:[#allocation2 + $0xb0] ss:$12 sps:$4 sm:$0xff]  }
 0x1db   :  { %v2018_v31 = vadd.f32 %v2017_v21, %v2016_v23  ;;  %v1686_v11 = vrot.slane %v1685_v4, 2  ;;  %v1797_v30 = vrot.slane %v1796_v32, 2  ;;  %v1465_v37 = vadd.f32 %v1464_v53, %v1463_v1  ;;  %8742 = vst [vmem:[#allocation8_spill] sm:$0xff] %v5976_v16  ;;  %8743 = vst [vmem:[#allocation9_spill] sm:$0xff] %v5978_v43  ;;  %v6109_v41 = vld [vmem:[#allocation2 + $0x3b0] ss:$12 sps:$4 sm:$0xff]  }
 0x1dc   :  { %v2129_v5 = vadd.f32 %v2128_v0, %v2127_v35  ;;  %v1908_v39 = vrot.slane %v1907_v54, 2  ;;  %v1576_v13 = vadd.f32 %v1575_v50, %v1574_v47  ;;  %v1355_v2 = vrot.slane %v1354_v44, 1  ;;  %v6101_v50 = vld [vmem:[#allocation2 + $0x380] ss:$12 sps:$4 sm:$0xff]   ;;  %8763 = vst [vmem:[#allocation171_spill] sm:$0xff] %v6109_v41 }
 0x1dd   :  { %v2019_v8 = vrot.slane %v2018_v31, 2  ;;  %v1687_v10 = vadd.f32 %v1686_v11, %v1685_v4  ;;  %v1798_v52 = vadd.f32 %v1797_v30, %v1796_v32  ;;  %v1466_v62 = vrot.slane %v1465_v37, 1  ;;  %v5984_v4 = vld [vmem:[#allocation2 + $0xc8] ss:$12 sps:$4 sm:$0xff]   ;;  %v6085_v30 = vld [vmem:[#allocation2 + $0x320] ss:$12 sps:$4 sm:$0xff]  }
 0x1de   :  { %v2130_v55 = vrot.slane %v2129_v5, 2  ;;  %v1909_v17 = vadd.f32 %v1908_v39, %v1907_v54  ;;  %v1577_v15 = vrot.slane %v1576_v13, 1  ;;  %v1356_v63 = vadd.f32 %v1355_v2, %v1354_v44  ;;  %8744 = vst [vmem:[#allocation10_spill] sm:$0xff] %v5984_v4  ;;  %v5998_v44 = vld [vmem:[#allocation2 + $0x110] ss:$12 sps:$4 sm:$0xff]  }
 0x1df   :  { %v2020_v6 = vadd.f32 %v2019_v8, %v2018_v31  ;;  %v1688_v25 = vrot.slane %v1687_v10, 1  ;;  %v1799_v61 = vrot.slane %v1798_v52, 1  ;;  %v1467_v48 = vadd.f32 %v1466_v62, %v1465_v37  ;;  %v5990_v31 = vld [vmem:[#allocation2 + $0xe0] ss:$12 sps:$4 sm:$0xff]   ;;  %8747 = vst [vmem:[#allocation13_spill] sm:$0xff] %v5998_v44 }
 0x1e0   :  { %v2131_v20 = vadd.f32 %v2130_v55, %v2129_v5  ;;  %v1910_v56 = vrot.slane %v1909_v17, 1  ;;  %v1578_v27 = vadd.f32 %v1577_v15, %v1576_v13  ;;  %v2208_v38 = vmul.f32 0.00390625, %v1356_v63  ;;  %8745 = vst [vmem:[#allocation11_spill] sm:$0xff] %v5990_v31  ;;  %v5992_v5 = vld [vmem:[#allocation2 + $0xf8] ss:$12 sps:$4 sm:$0xff]  }
 0x1e1   :  { %v2021_v51 = vrot.slane %v2020_v6, 1  ;;  %v1689_v33 = vadd.f32 %v1688_v25, %v1687_v10  ;;  %v1800_v22 = vadd.f32 %v1799_v61, %v1798_v52  ;;  %v2211_v18 = vmul.f32 0.00390625, %v1467_v48  ;;  %8746 = vst [vmem:[#allocation12_spill] sm:$0xff] %v5992_v5  ;;  %v6000_v37 = vld [vmem:[#allocation2 + $0x128] ss:$12 sps:$4 sm:$0xff]  }
 0x1e2   :  { %v2132_v14 = vrot.slane %v2131_v20, 1  ;;  %v1911_v57 = vadd.f32 %v1910_v56, %v1909_v17  ;;  %v2214_v29 = vmul.f32 0.00390625, %v1578_v27  ;;  %v2945_v23 = vmov 0.0   ;;  %8748 = vst [vmem:[#allocation14_spill] sm:$0xff] %v6000_v37  ;;  %v6006_v52 = vld [vmem:[#allocation2 + $0x140] ss:$12 sps:$4 sm:$0xff]  }
 0x1e3   :  { %v2022_v58 = vadd.f32 %v2021_v51, %v2020_v6  ;;  %v2217_v34 = vmul.f32 0.00390625, %v1689_v33  ;;  %v2220_v60 = vmul.f32 0.00390625, %v1800_v22  ;;  %v2365_v24 = vsel %vm2364_vm0, %v2211_v18, %v2208_v38  ;;  %2530 = vmatprep.mubr.f32.mxu0 %v2945_v23  ;;  %8749 = vst [vmem:[#allocation20_spill] sm:$0xff] %v6006_v52  ;;  %v6008_v17 = vld [vmem:[#allocation2 + $0x158] ss:$12 sps:$4 sm:$0xff]  }
 0x1e4   :  { %v2133_v36 = vadd.f32 %v2132_v14, %v2131_v20  ;;  %v2223_v59 = vmul.f32 0.00390625, %v1911_v57  ;;  %v2367_v3 = vsel %vm2366_vm1, %v2214_v29, %v2365_v24  ;;  %8750 = vst [vmem:[#allocation45_spill] sm:$0xff] %v6008_v17  ;;  %v6013_v20 = vld [vmem:[#allocation2 + $0x170] ss:$12 sps:$4 sm:$0xff]   ;;  %v6015_v15 = vld [vmem:[#allocation2 + $0x188] ss:$12 sps:$4 sm:$0xff]  }
 0x1e5   :  { %v2226_v9 = vmul.f32 0.00390625, %v2022_v58  ;;  %v2369_v26 = vsel %vm2368_vm2, %v2217_v34, %v2367_v3  ;;  %8751 = vst [vmem:[#allocation50_spill] sm:$0xff] %v6013_v20  ;;  %v6021_v48 = vld [vmem:[#allocation2 + $0x1a0] ss:$12 sps:$4 sm:$0xff]   ;;  %v6023_v51 = vld [vmem:[#allocation2 + $0x1b8] ss:$12 sps:$4 sm:$0xff]  }
 0x1e6   :  { %v2229_v40 = vmul.f32 0.00390625, %v2133_v36  ;;  %v2371_v47 = vsel %vm2370_vm3, %v2220_v60, %v2369_v26  ;;  %v6029_v57 = vld [vmem:[#allocation2 + $0x1d0] ss:$12 sps:$4 sm:$0xff]   ;;  %v6031_v58 = vld [vmem:[#allocation2 + $0x1e8] ss:$12 sps:$4 sm:$0xff]  }
 0x1e7   :  { %v2373_v53 = vsel %vm2372_vm4, %v2223_v59, %v2371_v47  ;;  %v6037_v34 = vld [vmem:[#allocation2 + $0x200] ss:$12 sps:$4 sm:$0xff]   ;;  %v6039_v60 = vld [vmem:[#allocation2 + $0x218] ss:$12 sps:$4 sm:$0xff]   ;;  %v6045_v3 = vld [vmem:[#allocation2 + $0x230] ss:$12 sps:$4 sm:$0xff]  }
 0x1e8   :  { %v2375_v39 = vsel %vm2374_vm5, %v2226_v9, %v2373_v53  ;;  %8752 = vst [vmem:[#allocation99_spill] sm:$0xff] %v6039_v60  ;;  %8753 = vst [vmem:[#allocation31_spill] sm:$0xff] %v6045_v3  ;;  %v6047_v23 = vld [vmem:[#allocation2 + $0x248] ss:$12 sps:$4 sm:$0xff]   ;;  %v6055_v59 = vld [vmem:[#allocation2 + $0x278] ss:$12 sps:$4 sm:$0xff]  }
 0x1e9   :  { %v2377_v10 = vsel %vm2376_vm6, %v2229_v40, %v2375_v39  ;;  %8754 = vst [vmem:[#allocation79_spill] sm:$0xff] %v6047_v23  ;;  %8756 = vst [vmem:[#allocation196_spill] sm:$0xff] %v6055_v59  ;;  %v6061_v36 = vld [vmem:[#allocation2 + $0x290] ss:$12 sps:$4 sm:$0xff]   ;;  %v6063_v22 = vld [vmem:[#allocation2 + $0x2a8] ss:$12 sps:$4 sm:$0xff]  }
 0x1ea   :  { %2460 = vmatmul.mubr.f32.vlgmr.msra.gmra.mrb[0].mxu1 %v2377_v10  ;;  %v6053_v10 = vld [vmem:[#allocation2 + $0x260] ss:$12 sps:$4 sm:$0xff]   ;;  %8757 = vst [vmem:[#allocation125_spill] sm:$0xff] %v6061_v36  ;;  %8758 = vst [vmem:[#allocation109_spill] sm:$0xff] %v6063_v22  ;;  %v6071_v61 = vld [vmem:[#allocation2 + $0x2d8] ss:$12 sps:$4 sm:$0xff]  }
 0x1eb   :  { %8755 = vst [vmem:[#allocation170_spill] sm:$0xff] %v6053_v10  ;;  %v6069_v56 = vld [vmem:[#allocation2 + $0x2c0] ss:$12 sps:$4 sm:$0xff]   ;;  %8760 = vst [vmem:[#allocation117_spill] sm:$0xff] %v6071_v61  ;;  %v6077_v13 = vld [vmem:[#allocation2 + $0x2f0] ss:$12 sps:$4 sm:$0xff]  }
 0x1ec   :  { %8759 = vst [vmem:[#allocation112_spill] sm:$0xff] %v6069_v56  ;;  %8761 = vst [vmem:[#allocation17_spill] sm:$0xff] %v6077_v13  ;;  %v6079_v55 = vld [vmem:[#allocation2 + $0x308] ss:$12 sps:$4 sm:$0xff]   ;;  %v6087_v25 = vld [vmem:[#allocation2 + $0x338] ss:$12 sps:$4 sm:$0xff]  }
 0x1ed   :  { %v6093_v11 = vld [vmem:[#allocation2 + $0x350] ss:$12 sps:$4 sm:$0xff]   ;;  %v6095_v14 = vld [vmem:[#allocation2 + $0x368] ss:$12 sps:$4 sm:$0xff]   ;;  %v6103_v62 = vld [vmem:[#allocation2 + $0x398] ss:$12 sps:$4 sm:$0xff]  }
 0x1ee   :  { %8762 = vst [vmem:[#allocation36_spill] sm:$0xff] %v6103_v62  ;;  %v6111_v8 = vld [vmem:[#allocation2 + $0x3c8] ss:$12 sps:$4 sm:$0xff]   ;;  %v6117_v54 = vld [vmem:[#allocation2 + $0x3e0] ss:$12 sps:$4 sm:$0xff]   ;;  %v8825_v62 = vunpack.c.l.bf16 %v6015_v15 }
 0x1ef   :  { %8764 = vst [vmem:[#allocation197_spill] sm:$0xff] %v6111_v8  ;;  %8765 = vst [vmem:[#allocation61_spill] sm:$0xff] %v6117_v54  ;;  %v6119_v6 = vld [vmem:[#allocation2 + $0x3f8] ss:$12 sps:$4 sm:$0xff]   ;;  %v6125_v0 = vld [vmem:[#allocation2 + $0x410] ss:$12 sps:$4 sm:$0xff]  }
 0x1f0   :  { %8766 = vst [vmem:[#allocation130_spill] sm:$0xff] %v6119_v6  ;;  %8767 = vst [vmem:[#allocation135_spill] sm:$0xff] %v6125_v0  ;;  %v6127_v53 = vld [vmem:[#allocation2 + $0x428] ss:$12 sps:$4 sm:$0xff]   ;;  %v6133_v47 = vld [vmem:[#allocation2 + $0x440] ss:$12 sps:$4 sm:$0xff]  }
 0x1f1   :  { %8768 = vst [vmem:[#allocation141_spill] sm:$0xff] %v6127_v53  ;;  %8769 = vst [vmem:[#allocation32_spill] sm:$0xff] %v6133_v47  ;;  %v6135_v33 = vld [vmem:[#allocation2 + $0x458] ss:$12 sps:$4 sm:$0xff]   ;;  %v6141_v63 = vld [vmem:[#allocation2 + $0x470] ss:$12 sps:$4 sm:$0xff]  }
 0x1f2   :  { %8770 = vst [vmem:[#allocation102_spill] sm:$0xff] %v6135_v33  ;;  %8771 = vst [vmem:[#allocation172_spill] sm:$0xff] %v6141_v63  ;;  %v6143_v27 = vld [vmem:[#allocation2 + $0x488] ss:$12 sps:$4 sm:$0xff]   ;;  %v6151_v32 = vld [vmem:[#allocation2 + $0x4b8] ss:$12 sps:$4 sm:$0xff]  }
 0x1f3   :  { %v6157_v2 = vld [vmem:[#allocation2 + $0x4d0] ss:$12 sps:$4 sm:$0xff]   ;;  %v6159_v21 = vld [vmem:[#allocation2 + $0x4e8] ss:$12 sps:$4 sm:$0xff]   ;;  %v6165_v40 = vld [vmem:[#allocation2 + $0x500] ss:$12 sps:$4 sm:$0xff]  }
 0x1f4   :  { %8772 = vst [vmem:[#allocation198_spill] sm:$0xff] %v6165_v40  ;;  %v6167_v9 = vld [vmem:[#allocation2 + $0x518] ss:$12 sps:$4 sm:$0xff]   ;;  %v6173_v35 = vld [vmem:[#allocation2 + $0x530] ss:$12 sps:$4 sm:$0xff]  }
 0x1f5   :  { %8773 = vst [vmem:[#allocation84_spill] sm:$0xff] %v6167_v9  ;;  %8774 = vst [vmem:[#allocation65_spill] sm:$0xff] %v6173_v35  ;;  %v6175_v29 = vld [vmem:[#allocation2 + $0x548] ss:$12 sps:$4 sm:$0xff]   ;;  %v6181_v20 = vld [vmem:[#allocation2 + $0x560] ss:$12 sps:$4 sm:$0xff]  }
 0x1f6   :  { %8775 = vst [vmem:[#allocation69_spill] sm:$0xff] %v6175_v29  ;;  %8776 = vst [vmem:[#allocation75_spill] sm:$0xff] %v6181_v20  ;;  %v6183_v39 = vld [vmem:[#allocation2 + $0x578] ss:$12 sps:$4 sm:$0xff]   ;;  %v6189_v33 = vld [vmem:[#allocation2 + $0x590] ss:$12 sps:$4 sm:$0xff]  }
 0x1f7   :  { %8777 = vst [vmem:[#allocation18_spill] sm:$0xff] %v6183_v39  ;;  %8778 = vst [vmem:[#allocation121_spill] sm:$0xff] %v6189_v33  ;;  %v6191_v38 = vld [vmem:[#allocation2 + $0x5a8] ss:$12 sps:$4 sm:$0xff]   ;;  %v6197_v17 = vld [vmem:[#allocation2 + $0x5c0] ss:$12 sps:$4 sm:$0xff]  }
 0x1f8   :  { %8779 = vst [vmem:[#allocation173_spill] sm:$0xff] %v6191_v38  ;;  %8780 = vst [vmem:[#allocation199_spill] sm:$0xff] %v6197_v17  ;;  %v6199_v18 = vld [vmem:[#allocation2 + $0x5d8] ss:$12 sps:$4 sm:$0xff]   ;;  %v6205_v56 = vld [vmem:[#allocation2 + $0x5f0] ss:$12 sps:$4 sm:$0xff]  }
 0x1f9   :  { %8781 = vst [vmem:[#allocation41_spill] sm:$0xff] %v6199_v18  ;;  %8782 = vst [vmem:[#allocation89_spill] sm:$0xff] %v6205_v56  ;;  %v6207_v26 = vld [vmem:[#allocation2 + $0x608] ss:$12 sps:$4 sm:$0xff]   ;;  %v6213_v53 = vld [vmem:[#allocation2 + $0x620] ss:$12 sps:$4 sm:$0xff]  }
 0x1fa   :  { %v6215_v1 = vld [vmem:[#allocation2 + $0x638] ss:$12 sps:$4 sm:$0xff]   ;;  %v6221_v37 = vld [vmem:[#allocation2 + $0x650] ss:$12 sps:$4 sm:$0xff]   ;;  %v6223_v24 = vld [vmem:[#allocation2 + $0x668] ss:$12 sps:$4 sm:$0xff]  }
 0x1fb   :  { %v6229_v36 = vld [vmem:[#allocation2 + $0x680] ss:$12 sps:$4 sm:$0xff]   ;;  %v6231_v19 = vld [vmem:[#allocation2 + $0x698] ss:$12 sps:$4 sm:$0xff]   ;;  %v6237_v33 = vld [vmem:[#allocation2 + $0x6b0] ss:$12 sps:$4 sm:$0xff]  }
 0x1fc   :  { %8783 = vst [vmem:[#allocation94_spill] sm:$0xff] %v6229_v36  ;;  %8784 = vst [vmem:[#allocation100_spill] sm:$0xff] %v6231_v19  ;;  %v6239_v13 = vld [vmem:[#allocation2 + $0x6c8] ss:$12 sps:$4 sm:$0xff]   ;;  %v6245_v17 = vld [vmem:[#allocation2 + $0x6e0] ss:$12 sps:$4 sm:$0xff]  }
 0x1fd   :  { %8785 = vst [vmem:[#allocation23_spill] sm:$0xff] %v6237_v33  ;;  %8786 = vst [vmem:[#allocation28_spill] sm:$0xff] %v6239_v13  ;;  %v6247_v63 = vld [vmem:[#allocation2 + $0x6f8] ss:$12 sps:$4 sm:$0xff]   ;;  %v6253_v44 = vld [vmem:[#allocation2 + $0x710] ss:$12 sps:$4 sm:$0xff]  }
 0x1fe   :  { %8787 = vst [vmem:[#allocation174_spill] sm:$0xff] %v6245_v17  ;;  %8788 = vst [vmem:[#allocation200_spill] sm:$0xff] %v6247_v63  ;;  %v6255_v61 = vld [vmem:[#allocation2 + $0x728] ss:$12 sps:$4 sm:$0xff]   ;;  %v6261_v6 = vld [vmem:[#allocation2 + $0x740] ss:$12 sps:$4 sm:$0xff]  }
 0x1ff   :  { %8789 = vst [vmem:[#allocation105_spill] sm:$0xff] %v6253_v44  ;;  %8790 = vst [vmem:[#allocation46_spill] sm:$0xff] %v6255_v61  ;;  %v6263_v22 = vld [vmem:[#allocation2 + $0x758] ss:$12 sps:$4 sm:$0xff]   ;;  %v6269_v5 = vld [vmem:[#allocation2 + $0x770] ss:$12 sps:$4 sm:$0xff]  }
 0x200   :  { %8791 = vst [vmem:[#allocation51_spill] sm:$0xff] %v6261_v6  ;;  %8792 = vst [vmem:[#allocation118_spill] sm:$0xff] %v6263_v22  ;;  %v6271_v52 = vld [vmem:[#allocation2 + $0x788] ss:$12 sps:$4 sm:$0xff]   ;;  %v6277_v54 = vld [vmem:[#allocation2 + $0x7a0] ss:$12 sps:$4 sm:$0xff]  }
 0x201   :  { %8793 = vst [vmem:[#allocation143_spill] sm:$0xff] %v6269_v5  ;;  %v6279_v47 = vld [vmem:[#allocation2 + $0x7b8] ss:$12 sps:$4 sm:$0xff]   ;;  %v6285_v31 = vld [vmem:[#allocation2 + $0x7d0] ss:$12 sps:$4 sm:$0xff]  }
 0x202   :  { %v6287_v0 = vld [vmem:[#allocation2 + $0x7e8] ss:$12 sps:$4 sm:$0xff]   ;;  %v6293_v17 = vld [vmem:[#allocation2 + $0x800] ss:$12 sps:$4 sm:$0xff]   ;;  %v6295_v38 = vld [vmem:[#allocation2 + $0x818] ss:$12 sps:$4 sm:$0xff]  }
 0x203   :  { %8794 = vst [vmem:[#allocation57_spill] sm:$0xff] %v6293_v17  ;;  %8795 = vst [vmem:[#allocation175_spill] sm:$0xff] %v6295_v38  ;;  %v6301_v44 = vld [vmem:[#allocation2 + $0x830] ss:$12 sps:$4 sm:$0xff]   ;;  %v6303_v18 = vld [vmem:[#allocation2 + $0x848] ss:$12 sps:$4 sm:$0xff]  }
 0x204   :  { %8796 = vst [vmem:[#allocation201_spill] sm:$0xff] %v6301_v44  ;;  %8797 = vst [vmem:[#allocation126_spill] sm:$0xff] %v6303_v18  ;;  %v6309_v6 = vld [vmem:[#allocation2 + $0x860] ss:$12 sps:$4 sm:$0xff]   ;;  %v6311_v56 = vld [vmem:[#allocation2 + $0x878] ss:$12 sps:$4 sm:$0xff]  }
 0x205   :  { %8798 = vst [vmem:[#allocation21_spill] sm:$0xff] %v6309_v6  ;;  %8799 = vst [vmem:[#allocation113_spill] sm:$0xff] %v6311_v56  ;;  %v6317_v13 = vld [vmem:[#allocation2 + $0x890] ss:$12 sps:$4 sm:$0xff]   ;;  %v6319_v39 = vld [vmem:[#allocation2 + $0x8a8] ss:$12 sps:$4 sm:$0xff]  }
 0x206   :  { %8800 = vst [vmem:[#allocation142_spill] sm:$0xff] %v6317_v13  ;;  %8801 = vst [vmem:[#allocation53_spill] sm:$0xff] %v6319_v39  ;;  %v6325_v8 = vld [vmem:[#allocation2 + $0x8c0] ss:$12 sps:$4 sm:$0xff]   ;;  %v6327_v10 = vld [vmem:[#allocation2 + $0x8d8] ss:$12 sps:$4 sm:$0xff]  }
 0x207   :  { %8802 = vst [vmem:[#allocation80_spill] sm:$0xff] %v6325_v8  ;;  %8803 = vst [vmem:[#allocation176_spill] sm:$0xff] %v6327_v10  ;;  %v6333_v4 = vld [vmem:[#allocation2 + $0x8f0] ss:$12 sps:$4 sm:$0xff]   ;;  %v6335_v20 = vld [vmem:[#allocation2 + $0x908] ss:$12 sps:$4 sm:$0xff]  }
 0x208   :  { %8804 = vst [vmem:[#allocation202_spill] sm:$0xff] %v6333_v4  ;;  %v6341_v35 = vld [vmem:[#allocation2 + $0x920] ss:$12 sps:$4 sm:$0xff]   ;;  %v6343_v59 = vld [vmem:[#allocation2 + $0x938] ss:$12 sps:$4 sm:$0xff]  }
 0x209   :  { %v6349_v44 = vld [vmem:[#allocation2 + $0x950] ss:$12 sps:$4 sm:$0xff]   ;;  %v6351_v63 = vld [vmem:[#allocation2 + $0x968] ss:$12 sps:$4 sm:$0xff]   ;;  %v6357_v6 = vld [vmem:[#allocation2 + $0x980] ss:$12 sps:$4 sm:$0xff]  }
 0x20a   :  { %8805 = vst [vmem:[#allocation149_spill] sm:$0xff] %v6357_v6  ;;  %v6359_v61 = vld [vmem:[#allocation2 + $0x998] ss:$12 sps:$4 sm:$0xff]   ;;  %v6365_v13 = vld [vmem:[#allocation2 + $0x9b0] ss:$12 sps:$4 sm:$0xff]   ;;  %v8830_v6 = vunpack.c.h.bf16 %v6143_v27 }
 0x20b   :  { %8806 = vst [vmem:[#allocation131_spill] sm:$0xff] %v6359_v61  ;;  %8807 = vst [vmem:[#allocation136_spill] sm:$0xff] %v6365_v13  ;;  %v6367_v22 = vld [vmem:[#allocation2 + $0x9c8] ss:$12 sps:$4 sm:$0xff]   ;;  %v6373_v8 = vld [vmem:[#allocation2 + $0x9e0] ss:$12 sps:$4 sm:$0xff]   ;;  %v8829_v61 = vunpack.c.l.bf16 %v6143_v27 }
 0x20c   :  { %8808 = vst [vmem:[#allocation151_spill] sm:$0xff] %v6367_v22  ;;  %8809 = vst [vmem:[#allocation76_spill] sm:$0xff] %v6373_v8  ;;  %v6375_v5 = vld [vmem:[#allocation2 + $0x9f8] ss:$12 sps:$4 sm:$0xff]   ;;  %v6381_v41 = vld [vmem:[#allocation2 + $0xa10] ss:$12 sps:$4 sm:$0xff]  }
 0x20d   :  { %8810 = vst [vmem:[#allocation37_spill] sm:$0xff] %v6375_v5  ;;  %8811 = vst [vmem:[#allocation177_spill] sm:$0xff] %v6381_v41  ;;  %v6383_v29 = vld [vmem:[#allocation2 + $0xa28] ss:$12 sps:$4 sm:$0xff]   ;;  %v6389_v43 = vld [vmem:[#allocation2 + $0xa40] ss:$12 sps:$4 sm:$0xff]  }
 0x20e   :  { %8812 = vst [vmem:[#allocation203_spill] sm:$0xff] %v6383_v29  ;;  %8813 = vst [vmem:[#allocation62_spill] sm:$0xff] %v6389_v43  ;;  %v6391_v18 = vld [vmem:[#allocation2 + $0xa58] ss:$12 sps:$4 sm:$0xff]   ;;  %v6397_v19 = vld [vmem:[#allocation2 + $0xa70] ss:$12 sps:$4 sm:$0xff]  }
 0x20f   :  { %8814 = vst [vmem:[#allocation66_spill] sm:$0xff] %v6391_v18  ;;  %8815 = vst [vmem:[#allocation70_spill] sm:$0xff] %v6397_v19  ;;  %v6399_v33 = vld [vmem:[#allocation2 + $0xa88] ss:$12 sps:$4 sm:$0xff]   ;;  %v6405_v9 = vld [vmem:[#allocation2 + $0xaa0] ss:$12 sps:$4 sm:$0xff]   ;;  %v8824_v19 = vunpack.c.h.bf16 %v5958_v7  ;;  %v8828_v18 = vunpack.c.h.bf16 %v6079_v55 }
 0x210   :  { %v6407_v23 = vld [vmem:[#allocation2 + $0xab8] ss:$12 sps:$4 sm:$0xff]   ;;  %v6413_v13 = vld [vmem:[#allocation2 + $0xad0] ss:$12 sps:$4 sm:$0xff]   ;;  %v6415_v56 = vld [vmem:[#allocation2 + $0xae8] ss:$12 sps:$4 sm:$0xff]   ;;  %v1226_v38 = vunpack.c.l.bf16 %v6399_v33  ;;  %v1229_v29 = vunpack.c.h.bf16 %v6399_v33  ;;  %v1232_v3 = vunpack.c.l.bf16 %v6405_v9  ;;  %v1235_v5 = vunpack.c.h.bf16 %v6405_v9 }
 0x211   :  { %v6421_v8 = vld [vmem:[#allocation2 + $0xb00] ss:$12 sps:$4 sm:$0xff]   ;;  %v6423_v39 = vld [vmem:[#allocation2 + $0xb18] ss:$12 sps:$4 sm:$0xff]   ;;  %v6429_v41 = vld [vmem:[#allocation2 + $0xb30] ss:$12 sps:$4 sm:$0xff]   ;;  %v8826_v33 = vunpack.c.h.bf16 %v6015_v15  ;;  %v1727_v9 = vadd.f32 %v8830_v6, %v8829_v61  ;;  %v8834_v15 = vunpack.c.h.bf16 %v6271_v52  ;;  %v8838_v6 = vunpack.c.h.bf16 %v6335_v20 }
 0x212   :  { %8816 = vst [vmem:[#allocation152_spill] sm:$0xff] %v6423_v39  ;;  %v6431_v10 = vld [vmem:[#allocation2 + $0xb48] ss:$12 sps:$4 sm:$0xff]   ;;  %v6437_v43 = vld [vmem:[#allocation2 + $0xb60] ss:$12 sps:$4 sm:$0xff]   ;;  %v8823_v39 = vunpack.c.l.bf16 %v5958_v7  ;;  %v8832_v7 = vunpack.c.h.bf16 %v6207_v26  ;;  %v2171_v27 = vadd.f32 %v1229_v29, %v1226_v38  ;;  %v8845_v38 = vunpack.c.l.bf16 %v6341_v35 }
 0x213   :  { %8817 = vst [vmem:[#allocation33_spill] sm:$0xff] %v6431_v10  ;;  %v6439_v4 = vld [vmem:[#allocation2 + $0xb78] ss:$12 sps:$4 sm:$0xff]   ;;  %v6445_v60 = vld [vmem:[#allocation2 + $0xb90] ss:$12 sps:$4 sm:$0xff]   ;;  %v1505_v36 = vadd.f32 %v8826_v33, %v8825_v62  ;;  %v8827_v10 = vunpack.c.l.bf16 %v6079_v55  ;;  %v8835_v33 = vunpack.c.l.bf16 %v5960_v45  ;;  %v8836_v55 = vunpack.c.l.bf16 %v6021_v48 }
 0x214   :  { %8818 = vst [vmem:[#allocation25_spill] sm:$0xff] %v6445_v60  ;;  %v6447_v16 = vld [vmem:[#allocation2 + $0xba8] ss:$12 sps:$4 sm:$0xff]   ;;  %v6453_v17 = vld [vmem:[#allocation2 + $0xbc0] ss:$12 sps:$4 sm:$0xff]   ;;  %v1394_v60 = vadd.f32 %v8824_v19, %v8823_v39  ;;  %v8833_v39 = vunpack.c.l.bf16 %v6271_v52  ;;  %v8841_v52 = vunpack.c.l.bf16 %v6213_v53 }
 0x215   :  { %8819 = vst [vmem:[#allocation178_spill] sm:$0xff] %v6447_v16  ;;  %8820 = vst [vmem:[#allocation204_spill] sm:$0xff] %v6453_v17  ;;  %v6455_v22 = vld [vmem:[#allocation2 + $0xbd8] ss:$12 sps:$4 sm:$0xff]   ;;  %v6461_v40 = vld [vmem:[#allocation2 + $0xbf0] ss:$12 sps:$4 sm:$0xff]   ;;  %v1616_v17 = vadd.f32 %v8828_v18, %v8827_v10  ;;  %v1506_v18 = vadd.f32 %v1505_v36, %v8836_v55  ;;  %v8837_v10 = vunpack.c.l.bf16 %v6335_v20  ;;  %v8843_v36 = vunpack.c.h.bf16 %v5960_v45 }
 0x216   :  { %8821 = vst [vmem:[#allocation85_spill] sm:$0xff] %v6455_v22  ;;  %8822 = vst [vmem:[#allocation90_spill] sm:$0xff] %v6461_v40  ;;  %v8831_v40 = vunpack.c.l.bf16 %v6207_v26  ;;  %v1949_v62 = vadd.f32 %v8834_v15, %v8833_v39  ;;  %v1395_v22 = vadd.f32 %v1394_v60, %v8835_v33  ;;  %v8839_v26 = vunpack.c.l.bf16 %v6085_v30 }
 0x217   :  { %v2060_v61 = vadd.f32 %v8838_v6, %v8837_v10  ;;  %v8842_v60 = vunpack.c.l.bf16 %v6277_v54  ;;  %v8844_v55 = vunpack.c.h.bf16 %v6021_v48  ;;  %v2172_v10 = vadd.f32 %v2171_v27, %v1232_v3 }
 0x218   :  { %v1838_v19 = vadd.f32 %v8832_v7, %v8831_v40  ;;  %v1617_v40 = vadd.f32 %v1616_v17, %v8839_v26  ;;  %v8840_v7 = vunpack.c.l.bf16 %v6149_v12  ;;  %v1396_v33 = vadd.f32 %v1395_v22, %v8843_v36 }
 0x219   :  { %v1950_v15 = vadd.f32 %v1949_v62, %v8842_v60  ;;  %v1507_v20 = vadd.f32 %v1506_v18, %v8844_v55  ;;  %v2061_v29 = vadd.f32 %v2060_v61, %v8845_v38  ;;  %v8846_v17 = vunpack.c.h.bf16 %v6085_v30 }
 0x21a   :  { %v1728_v16 = vadd.f32 %v1727_v9, %v8840_v7  ;;  %v1839_v39 = vadd.f32 %v1838_v19, %v8841_v52  ;;  %v8847_v9 = vunpack.c.h.bf16 %v6149_v12  ;;  %v8848_v19 = vunpack.c.h.bf16 %v6213_v53 }
 0x21b   :  { %v1618_v6 = vadd.f32 %v1617_v40, %v8846_v17  ;;  %v8849_v62 = vunpack.c.h.bf16 %v6277_v54  ;;  %v8850_v22 = vunpack.c.l.bf16 %v5962_v42  ;;  %v8851_v18 = vunpack.c.l.bf16 %v6023_v51 }
 0x21c   :  { %v1729_v26 = vadd.f32 %v1728_v16, %v8847_v9  ;;  %v1840_v7 = vadd.f32 %v1839_v39, %v8848_v19  ;;  %v8852_v3 = vunpack.c.h.bf16 %v6341_v35  ;;  %v2173_v30 = vadd.f32 %v2172_v10, %v1235_v5 }
 0x21d   :  { %v1951_v45 = vadd.f32 %v1950_v15, %v8849_v62  ;;  %v1397_v48 = vadd.f32 %v1396_v33, %v8850_v22  ;;  %v1508_v52 = vadd.f32 %v1507_v20, %v8851_v18  ;;  %v8853_v27 = vunpack.c.l.bf16 %v6087_v25 }
 0x21e   :  { %v2062_v61 = vadd.f32 %v2061_v29, %v8852_v3  ;;  %v8854_v16 = vunpack.c.l.bf16 %v6151_v32  ;;  %v8855_v40 = vunpack.c.l.bf16 %v6215_v1  ;;  %v8856_v39 = vunpack.c.l.bf16 %v6279_v47 }
 0x21f   :  { %v1619_v12 = vadd.f32 %v1618_v6, %v8853_v27  ;;  %v8857_v15 = vunpack.c.h.bf16 %v5962_v42  ;;  %v8858_v33 = vunpack.c.h.bf16 %v6023_v51  ;;  %v8859_v5 = vunpack.c.l.bf16 %v6343_v59 }
 0x220   :  { %v1730_v53 = vadd.f32 %v1729_v26, %v8854_v16  ;;  %v1841_v54 = vadd.f32 %v1840_v7, %v8855_v40  ;;  %v1952_v60 = vadd.f32 %v1951_v45, %v8856_v39  ;;  %v8860_v20 = vunpack.c.l.bf16 %v6407_v23 }
 0x221   :  { %v1398_v36 = vadd.f32 %v1397_v48, %v8857_v15  ;;  %v1509_v35 = vadd.f32 %v1508_v52, %v8858_v33  ;;  %v2063_v55 = vadd.f32 %v2062_v61, %v8859_v5  ;;  %v8861_v29 = vunpack.c.h.bf16 %v6087_v25 }
 0x222   :  { %v2174_v38 = vadd.f32 %v2173_v30, %v8860_v20  ;;  %v8862_v17 = vunpack.c.h.bf16 %v6151_v32  ;;  %v8863_v9 = vunpack.c.h.bf16 %v6215_v1  ;;  %v8864_v42 = vunpack.c.h.bf16 %v6279_v47 }
 0x223   :  { %v1620_v10 = vadd.f32 %v1619_v12, %v8861_v29  ;;  %v8865_v51 = vunpack.c.l.bf16 %v5964_v28  ;;  %v8866_v62 = vunpack.c.l.bf16 %v6029_v57  ;;  %v8867_v22 = vunpack.c.h.bf16 %v6343_v59 }
 0x224   :  { %v1731_v6 = vadd.f32 %v1730_v53, %v8862_v17  ;;  %v1842_v26 = vadd.f32 %v1841_v54, %v8863_v9  ;;  %v1953_v19 = vadd.f32 %v1952_v60, %v8864_v42  ;;  %v8868_v25 = vunpack.c.h.bf16 %v6407_v23 }
 0x225   :  { %v1399_v7 = vadd.f32 %v1398_v36, %v8865_v51  ;;  %v1510_v45 = vadd.f32 %v1509_v35, %v8866_v62  ;;  %v2064_v48 = vadd.f32 %v2063_v55, %v8867_v22  ;;  %v8869_v32 = vunpack.c.l.bf16 %v6093_v11 }
 0x226   :  { %v2175_v18 = vadd.f32 %v2174_v38, %v8868_v25  ;;  %v8870_v1 = vunpack.c.l.bf16 %v6157_v2  ;;  %v8871_v47 = vunpack.c.l.bf16 %v6221_v37  ;;  %v8872_v30 = vunpack.c.l.bf16 %v6285_v31 }
 0x227   :  { %v1621_v52 = vadd.f32 %v1620_v10, %v8869_v32  ;;  %v8873_v12 = vunpack.c.h.bf16 %v5964_v28  ;;  %v8874_v59 = vunpack.c.h.bf16 %v6029_v57  ;;  %v8875_v23 = vunpack.c.l.bf16 %v6349_v44 }
 0x228   :  { %v1732_v3 = vadd.f32 %v1731_v6, %v8870_v1  ;;  %v1843_v61 = vadd.f32 %v1842_v26, %v8871_v47  ;;  %v1954_v27 = vadd.f32 %v1953_v19, %v8872_v30  ;;  %v8876_v54 = vunpack.c.l.bf16 %v6413_v13 }
 0x229   :  { %v1400_v16 = vadd.f32 %v1399_v7, %v8873_v12  ;;  %v1511_v53 = vadd.f32 %v1510_v45, %v8874_v59  ;;  %v2065_v40 = vadd.f32 %v2064_v48, %v8875_v23  ;;  %v8877_v60 = vunpack.c.h.bf16 %v6093_v11 }
 0x22a   :  { %v2176_v39 = vadd.f32 %v2175_v18, %v8876_v54  ;;  %v8878_v36 = vunpack.c.h.bf16 %v6157_v2  ;;  %v8879_v35 = vunpack.c.h.bf16 %v6221_v37  ;;  %v8880_v28 = vunpack.c.h.bf16 %v6285_v31 }
 0x22b   :  { %v1622_v15 = vadd.f32 %v1621_v52, %v8877_v60  ;;  %v8881_v57 = vunpack.c.l.bf16 %v5967_v46  ;;  %v8882_v38 = vunpack.c.l.bf16 %v6031_v58  ;;  %v8883_v10 = vunpack.c.h.bf16 %v6349_v44 }
 0x22c   :  { %v1733_v33 = vadd.f32 %v1732_v3, %v8878_v36  ;;  %v1844_v5 = vadd.f32 %v1843_v61, %v8879_v35  ;;  %v1955_v55 = vadd.f32 %v1954_v27, %v8880_v28  ;;  %v8884_v11 = vunpack.c.h.bf16 %v6413_v13 }
 0x22d   :  { %v1401_v20 = vadd.f32 %v1400_v16, %v8881_v57  ;;  %v1512_v29 = vadd.f32 %v1511_v53, %v8882_v38  ;;  %v2066_v17 = vadd.f32 %v2065_v40, %v8883_v10  ;;  %v8885_v2 = vunpack.c.l.bf16 %v6095_v14 }
 0x22e   :  { %v2177_v6 = vadd.f32 %v2176_v39, %v8884_v11  ;;  %v8886_v37 = vunpack.c.l.bf16 %v6159_v21  ;;  %v8887_v31 = vunpack.c.l.bf16 %v6223_v24  ;;  %v8888_v19 = vunpack.c.l.bf16 %v6287_v0 }
 0x22f   :  { %v1623_v9 = vadd.f32 %v1622_v15, %v8885_v2  ;;  %v8889_v7 = vunpack.c.h.bf16 %v5967_v46  ;;  %v8890_v44 = vunpack.c.h.bf16 %v6031_v58  ;;  %v8891_v13 = vunpack.c.l.bf16 %v6351_v63  ;;  %v8906_v15 = vld [vmem:[#allocation57_spill] sm:$0xff] }
 0x230   :  { %v1734_v26 = vadd.f32 %v1733_v33, %v8886_v37  ;;  %v1845_v42 = vadd.f32 %v1844_v5, %v8887_v31  ;;  %v1956_v51 = vadd.f32 %v1955_v55, %v8888_v19  ;;  %v8892_v48 = vunpack.c.l.bf16 %v6415_v56  ;;  %v8919_v31 = vld [vmem:[#allocation99_spill] sm:$0xff] }
 0x231   :  { %v1402_v62 = vadd.f32 %v1401_v20, %v8889_v7  ;;  %v1513_v45 = vadd.f32 %v1512_v29, %v8890_v44  ;;  %v2067_v22 = vadd.f32 %v2066_v17, %v8891_v13  ;;  %v8893_v18 = vunpack.c.h.bf16 %v6095_v14  ;;  %v8923_v44 = vld [vmem:[#allocation36_spill] sm:$0xff] }
 0x232   :  { %v2178_v25 = vadd.f32 %v2177_v6, %v8892_v48  ;;  %v8894_v52 = vunpack.c.h.bf16 %v6159_v21  ;;  %v8895_v3 = vunpack.c.h.bf16 %v6223_v24  ;;  %v8896_v46 = vunpack.c.h.bf16 %v6287_v0  ;;  %v8902_v24 = vld [vmem:[#allocation198_spill] sm:$0xff] }
 0x233   :  { %v1624_v32 = vadd.f32 %v1623_v9, %v8893_v18  ;;  %v8897_v58 = vunpack.c.l.bf16 %v5970_v49  ;;  %v8898_v27 = vunpack.c.l.bf16 %v6037_v34  ;;  %v8899_v16 = vunpack.c.h.bf16 %v6351_v63  ;;  %v8904_v0 = vld [vmem:[#allocation94_spill] sm:$0xff]  ;;  %v8927_v18 = vld [vmem:[#allocation100_spill] sm:$0xff] }
 0x234   :  { %v1735_v1 = vadd.f32 %v1734_v26, %v8894_v52  ;;  %v1846_v47 = vadd.f32 %v1845_v42, %v8895_v3  ;;  %v1957_v61 = vadd.f32 %v1956_v51, %v8896_v46  ;;  %v8900_v14 = vunpack.c.h.bf16 %v6415_v56  ;;  %v8910_v56 = vld [vmem:[#allocation149_spill] sm:$0xff] }
 0x235   :  { %v1403_v30 = vadd.f32 %v1402_v62, %v8897_v58  ;;  %v1514_v12 = vadd.f32 %v1513_v45, %v8898_v27  ;;  %v2068_v59 = vadd.f32 %v2067_v22, %v8899_v16  ;;  %v8901_v21 = vunpack.c.l.bf16 %v6101_v50  ;;  %v8925_v22 = vld [vmem:[#allocation84_spill] sm:$0xff] }
 0x236   :  { %v2179_v53 = vadd.f32 %v2178_v25, %v8900_v14  ;;  %v8903_v40 = vunpack.c.l.bf16 %v8902_v24  ;;  %v8905_v39 = vunpack.c.l.bf16 %v8904_v0  ;;  %v8907_v36 = vunpack.c.l.bf16 %v8906_v15  ;;  %v8935_v16 = vld [vmem:[#allocation152_spill] sm:$0xff] }
 0x237   :  { %v1625_v23 = vadd.f32 %v1624_v32, %v8901_v21  ;;  %v8908_v35 = vunpack.c.h.bf16 %v5970_v49  ;;  %v8909_v63 = vunpack.c.h.bf16 %v6037_v34  ;;  %v8911_v55 = vunpack.c.l.bf16 %v8910_v56  ;;  %v8917_v34 = vld [vmem:[#allocation8_spill] sm:$0xff] }
 0x238   :  { %v1736_v54 = vadd.f32 %v1735_v1, %v8903_v40  ;;  %v1847_v60 = vadd.f32 %v1846_v47, %v8905_v39  ;;  %v1958_v33 = vadd.f32 %v1957_v61, %v8907_v36  ;;  %v8912_v20 = vunpack.c.l.bf16 %v6421_v8  ;;  %v8929_v1 = vld [vmem:[#allocation175_spill] sm:$0xff] }
 0x239   :  { %v1404_v5 = vadd.f32 %v1403_v30, %v8908_v35  ;;  %v1515_v28 = vadd.f32 %v1514_v12, %v8909_v63  ;;  %v2069_v57 = vadd.f32 %v2068_v59, %v8911_v55  ;;  %v8913_v29 = vunpack.c.h.bf16 %v6101_v50 }
 0x23a   :  { %v2180_v38 = vadd.f32 %v2179_v53, %v8912_v20  ;;  %v8914_v17 = vunpack.c.h.bf16 %v8902_v24  ;;  %v8915_v6 = vunpack.c.h.bf16 %v8904_v0  ;;  %v8916_v49 = vunpack.c.h.bf16 %v8906_v15 }
 0x23b   :  { %v1626_v10 = vadd.f32 %v1625_v23, %v8913_v29  ;;  %v8918_v37 = vunpack.c.l.bf16 %v8917_v34  ;;  %v8920_v42 = vunpack.c.l.bf16 %v8919_v31  ;;  %v8921_v51 = vunpack.c.h.bf16 %v8910_v56  ;;  %v8949_v29 = vld [vmem:[#allocation65_spill] sm:$0xff] }
 0x23c   :  { %v1737_v11 = vadd.f32 %v1736_v54, %v8914_v17  ;;  %v1848_v2 = vadd.f32 %v1847_v60, %v8915_v6  ;;  %v1959_v9 = vadd.f32 %v1958_v33, %v8916_v49  ;;  %v8922_v50 = vunpack.c.h.bf16 %v6421_v8  ;;  %v8933_v8 = vld [vmem:[#allocation131_spill] sm:$0xff]  ;;  %v8941_v60 = vld [vmem:[#allocation9_spill] sm:$0xff] }
 0x23d   :  { %v1405_v26 = vadd.f32 %v1404_v5, %v8918_v37  ;;  %v1516_v19 = vadd.f32 %v1515_v28, %v8920_v42  ;;  %v2070_v7 = vadd.f32 %v2069_v57, %v8921_v51  ;;  %v8924_v45 = vunpack.c.l.bf16 %v8923_v44  ;;  %v8943_v33 = vld [vmem:[#allocation31_spill] sm:$0xff]  ;;  %v8953_v49 = vld [vmem:[#allocation201_spill] sm:$0xff] }
 0x23e   :  { %v2181_v62 = vadd.f32 %v2180_v38, %v8922_v50  ;;  %v8926_v48 = vunpack.c.l.bf16 %v8925_v22  ;;  %v8928_v32 = vunpack.c.l.bf16 %v8927_v18  ;;  %v8930_v3 = vunpack.c.l.bf16 %v8929_v1  ;;  %v8947_v57 = vld [vmem:[#allocation171_spill] sm:$0xff] }
 0x23f   :  { %v1627_v13 = vadd.f32 %v1626_v10, %v8924_v45  ;;  %v8931_v46 = vunpack.c.h.bf16 %v8917_v34  ;;  %v8932_v58 = vunpack.c.h.bf16 %v8919_v31  ;;  %v8934_v27 = vunpack.c.l.bf16 %v8933_v8 }
 0x240   :  { %v1738_v25 = vadd.f32 %v1737_v11, %v8926_v48  ;;  %v1849_v52 = vadd.f32 %v1848_v2, %v8928_v32  ;;  %v1960_v47 = vadd.f32 %v1959_v9, %v8930_v3  ;;  %v8936_v59 = vunpack.c.l.bf16 %v8935_v16  ;;  %v8951_v11 = vld [vmem:[#allocation23_spill] sm:$0xff] }
 0x241   :  { %v1406_v61 = vadd.f32 %v1405_v26, %v8931_v46  ;;  %v1517_v30 = vadd.f32 %v1516_v19, %v8932_v58  ;;  %v2071_v12 = vadd.f32 %v2070_v7, %v8934_v27  ;;  %v8937_v53 = vunpack.c.h.bf16 %v8923_v44  ;;  %v8957_v19 = vld [vmem:[#allocation136_spill] sm:$0xff] }
 0x242   :  { %v2182_v14 = vadd.f32 %v2181_v62, %v8936_v59  ;;  %v8938_v23 = vunpack.c.h.bf16 %v8925_v22  ;;  %v8939_v40 = vunpack.c.h.bf16 %v8927_v18  ;;  %v8940_v0 = vunpack.c.h.bf16 %v8929_v1 }
 0x243   :  { %v1628_v21 = vadd.f32 %v1627_v13, %v8937_v53  ;;  %v8942_v15 = vunpack.c.l.bf16 %v8941_v60  ;;  %v8944_v35 = vunpack.c.l.bf16 %v8943_v33  ;;  %v8945_v63 = vunpack.c.h.bf16 %v8933_v8 }
 0x244   :  { %v1739_v24 = vadd.f32 %v1738_v25, %v8938_v23  ;;  %v1850_v54 = vadd.f32 %v1849_v52, %v8939_v40  ;;  %v1961_v39 = vadd.f32 %v1960_v47, %v8940_v0  ;;  %v8946_v56 = vunpack.c.h.bf16 %v8935_v16  ;;  %v8964_v52 = vld [vmem:[#allocation10_spill] sm:$0xff]  ;;  %v8966_v47 = vld [vmem:[#allocation79_spill] sm:$0xff]  ;;  %v8974_v23 = vld [vmem:[#allocation28_spill] sm:$0xff] }
 0x245   :  { %v1407_v36 = vadd.f32 %v1406_v61, %v8942_v15  ;;  %v1518_v5 = vadd.f32 %v1517_v30, %v8944_v35  ;;  %v2072_v28 = vadd.f32 %v2071_v12, %v8945_v63  ;;  %v8948_v20 = vunpack.c.l.bf16 %v8947_v57  ;;  %v8970_v12 = vld [vmem:[#allocation197_spill] sm:$0xff] }
 0x246   :  { %v2183_v55 = vadd.f32 %v2182_v14, %v8946_v56  ;;  %v8950_v10 = vunpack.c.l.bf16 %v8949_v29  ;;  %v8952_v6 = vunpack.c.l.bf16 %v8951_v11  ;;  %v8954_v9 = vunpack.c.l.bf16 %v8953_v49  ;;  %v8972_v14 = vld [vmem:[#allocation69_spill] sm:$0xff] }
 0x247   :  { %v1629_v38 = vadd.f32 %v1628_v21, %v8948_v20  ;;  %v8955_v37 = vunpack.c.h.bf16 %v8941_v60  ;;  %v8956_v31 = vunpack.c.h.bf16 %v8943_v33  ;;  %v8958_v51 = vunpack.c.l.bf16 %v8957_v19  ;;  %v8982_v63 = vld [vmem:[#allocation33_spill] sm:$0xff] }
 0x248   :  { %v1740_v17 = vadd.f32 %v1739_v24, %v8950_v10  ;;  %v1851_v2 = vadd.f32 %v1850_v54, %v8952_v6  ;;  %v1962_v34 = vadd.f32 %v1961_v39, %v8954_v9  ;;  %v8959_v50 = vunpack.c.l.bf16 %v6429_v41  ;;  %v8976_v54 = vld [vmem:[#allocation126_spill] sm:$0xff]  ;;  %v8988_v6 = vld [vmem:[#allocation11_spill] sm:$0xff] }
 0x249   :  { %v1408_v26 = vadd.f32 %v1407_v36, %v8955_v37  ;;  %v1519_v42 = vadd.f32 %v1518_v5, %v8956_v31  ;;  %v2073_v7 = vadd.f32 %v2072_v28, %v8958_v51  ;;  %v8960_v44 = vunpack.c.h.bf16 %v8947_v57  ;;  %v8990_v9 = vld [vmem:[#allocation170_spill] sm:$0xff]  ;;  %v8994_v51 = vld [vmem:[#allocation61_spill] sm:$0xff] }
 0x24a   :  { %v2184_v62 = vadd.f32 %v2183_v55, %v8959_v50  ;;  %v8961_v13 = vunpack.c.h.bf16 %v8949_v29  ;;  %v8962_v48 = vunpack.c.h.bf16 %v8951_v11  ;;  %v8963_v18 = vunpack.c.h.bf16 %v8953_v49 }
 0x24b   :  { %v1630_v45 = vadd.f32 %v1629_v38, %v8960_v44  ;;  %v8965_v1 = vunpack.c.l.bf16 %v8964_v52  ;;  %v8967_v46 = vunpack.c.l.bf16 %v8966_v47  ;;  %v8968_v58 = vunpack.c.h.bf16 %v8957_v19 }
 0x24c   :  { %v1741_v22 = vadd.f32 %v1740_v17, %v8961_v13  ;;  %v1852_v25 = vadd.f32 %v1851_v2, %v8962_v48  ;;  %v1963_v32 = vadd.f32 %v1962_v34, %v8963_v18  ;;  %v8969_v8 = vunpack.c.h.bf16 %v6429_v41  ;;  %v8980_v41 = vld [vmem:[#allocation151_spill] sm:$0xff]  ;;  %v8998_v13 = vld [vmem:[#allocation174_spill] sm:$0xff] }
 0x24d   :  { %v1409_v3 = vadd.f32 %v1408_v26, %v8965_v1  ;;  %v1520_v61 = vadd.f32 %v1519_v42, %v8967_v46  ;;  %v2074_v30 = vadd.f32 %v2073_v7, %v8968_v58  ;;  %v8971_v16 = vunpack.c.l.bf16 %v8970_v12  ;;  %v9004_v46 = vld [vmem:[#allocation76_spill] sm:$0xff] }
 0x24e   :  { %v2185_v27 = vadd.f32 %v2184_v62, %v8969_v8  ;;  %v8973_v53 = vunpack.c.l.bf16 %v8972_v14  ;;  %v8975_v24 = vunpack.c.l.bf16 %v8974_v23  ;;  %v8977_v0 = vunpack.c.l.bf16 %v8976_v54  ;;  %v8996_v62 = vld [vmem:[#allocation75_spill] sm:$0xff] }
 0x24f   :  { %v1631_v59 = vadd.f32 %v1630_v45, %v8971_v16  ;;  %v8978_v60 = vunpack.c.h.bf16 %v8964_v52  ;;  %v8979_v36 = vunpack.c.h.bf16 %v8966_v47  ;;  %v8981_v35 = vunpack.c.l.bf16 %v8980_v41 }
 0x250   :  { %v1742_v21 = vadd.f32 %v1741_v22, %v8973_v53  ;;  %v1853_v40 = vadd.f32 %v1852_v25, %v8975_v24  ;;  %v1964_v39 = vadd.f32 %v1963_v32, %v8977_v0  ;;  %v8983_v28 = vunpack.c.l.bf16 %v8982_v63  ;;  %v9000_v25 = vld [vmem:[#allocation21_spill] sm:$0xff]  ;;  %v9011_v24 = vld [vmem:[#allocation12_spill] sm:$0xff] }
 0x251   :  { %v1410_v15 = vadd.f32 %v1409_v3, %v8978_v60  ;;  %v1521_v33 = vadd.f32 %v1520_v61, %v8979_v36  ;;  %v2075_v5 = vadd.f32 %v2074_v30, %v8981_v35  ;;  %v8984_v55 = vunpack.c.h.bf16 %v8970_v12  ;;  %v9013_v0 = vld [vmem:[#allocation196_spill] sm:$0xff]  ;;  %v9017_v35 = vld [vmem:[#allocation130_spill] sm:$0xff] }
 0x252   :  { %v2186_v56 = vadd.f32 %v2185_v27, %v8983_v28  ;;  %v8985_v20 = vunpack.c.h.bf16 %v8972_v14  ;;  %v8986_v29 = vunpack.c.h.bf16 %v8974_v23  ;;  %v8987_v17 = vunpack.c.h.bf16 %v8976_v54  ;;  %v9019_v28 = vld [vmem:[#allocation18_spill] sm:$0xff] }
 0x253   :  { %v1632_v57 = vadd.f32 %v1631_v59, %v8984_v55  ;;  %v8989_v2 = vunpack.c.l.bf16 %v8988_v6  ;;  %v8991_v34 = vunpack.c.l.bf16 %v8990_v9  ;;  %v8992_v26 = vunpack.c.h.bf16 %v8980_v41 }
 0x254   :  { %v1743_v38 = vadd.f32 %v1742_v21, %v8985_v20  ;;  %v1854_v10 = vadd.f32 %v1853_v40, %v8986_v29  ;;  %v1965_v11 = vadd.f32 %v1964_v39, %v8987_v17  ;;  %v8993_v42 = vunpack.c.h.bf16 %v8982_v63  ;;  %v9023_v29 = vld [vmem:[#allocation113_spill] sm:$0xff] }
 0x255   :  { %v1411_v49 = vadd.f32 %v1410_v15, %v8989_v2  ;;  %v1522_v37 = vadd.f32 %v1521_v33, %v8991_v34  ;;  %v2076_v31 = vadd.f32 %v2075_v5, %v8992_v26  ;;  %v8995_v7 = vunpack.c.l.bf16 %v8994_v51 }
 0x256   :  { %v2187_v19 = vadd.f32 %v2186_v56, %v8993_v42  ;;  %v8997_v44 = vunpack.c.l.bf16 %v8996_v62  ;;  %v8999_v22 = vunpack.c.l.bf16 %v8998_v13  ;;  %v9001_v18 = vunpack.c.l.bf16 %v9000_v25 }
 0x257   :  { %v1633_v50 = vadd.f32 %v1632_v57, %v8995_v7  ;;  %v9002_v52 = vunpack.c.h.bf16 %v8988_v6  ;;  %v9003_v3 = vunpack.c.h.bf16 %v8990_v9  ;;  %v9005_v61 = vunpack.c.l.bf16 %v9004_v46  ;;  %v9021_v57 = vld [vmem:[#allocation200_spill] sm:$0xff] }
 0x258   :  { %v1744_v45 = vadd.f32 %v1743_v38, %v8997_v44  ;;  %v1855_v48 = vadd.f32 %v1854_v10, %v8999_v22  ;;  %v1966_v32 = vadd.f32 %v1965_v11, %v9001_v18  ;;  %v9006_v30 = vunpack.c.l.bf16 %v6437_v43 }
 0x259   :  { %v1412_v1 = vadd.f32 %v1411_v49, %v9002_v52  ;;  %v1523_v47 = vadd.f32 %v1522_v37, %v9003_v3  ;;  %v2077_v58 = vadd.f32 %v2076_v31, %v9005_v61  ;;  %v9007_v27 = vunpack.c.h.bf16 %v8994_v51 }
 0x25a   :  { %v2188_v8 = vadd.f32 %v2187_v19, %v9006_v30  ;;  %v9008_v16 = vunpack.c.h.bf16 %v8996_v62  ;;  %v9009_v14 = vunpack.c.h.bf16 %v8998_v13  ;;  %v9010_v21 = vunpack.c.h.bf16 %v9000_v25 }
 0x25b   :  { %v1634_v12 = vadd.f32 %v1633_v50, %v9007_v27  ;;  %v9012_v40 = vunpack.c.l.bf16 %v9011_v24  ;;  %v9014_v39 = vunpack.c.l.bf16 %v9013_v0  ;;  %v9015_v15 = vunpack.c.h.bf16 %v9004_v46  ;;  %v9044_v27 = vld [vmem:[#allocation105_spill] sm:$0xff] }
 0x25c   :  { %v1745_v59 = vadd.f32 %v1744_v45, %v9008_v16  ;;  %v1856_v53 = vadd.f32 %v1855_v48, %v9009_v14  ;;  %v1967_v23 = vadd.f32 %v1966_v32, %v9010_v21  ;;  %v9016_v33 = vunpack.c.h.bf16 %v6437_v43  ;;  %v9027_v43 = vld [vmem:[#allocation37_spill] sm:$0xff] }
 0x25d   :  { %v1413_v54 = vadd.f32 %v1412_v1, %v9012_v40  ;;  %v1524_v60 = vadd.f32 %v1523_v47, %v9014_v39  ;;  %v2078_v36 = vadd.f32 %v2077_v58, %v9015_v15  ;;  %v9018_v5 = vunpack.c.l.bf16 %v9017_v35  ;;  %v9034_v45 = vld [vmem:[#allocation13_spill] sm:$0xff]  ;;  %v9040_v47 = vld [vmem:[#allocation135_spill] sm:$0xff] }
 0x25e   :  { %v2189_v41 = vadd.f32 %v2188_v8, %v9016_v33  ;;  %v9020_v56 = vunpack.c.l.bf16 %v9019_v28  ;;  %v9022_v20 = vunpack.c.l.bf16 %v9021_v57  ;;  %v9024_v10 = vunpack.c.l.bf16 %v9023_v29  ;;  %v9036_v48 = vld [vmem:[#allocation125_spill] sm:$0xff] }
 0x25f   :  { %v1635_v63 = vadd.f32 %v1634_v12, %v9018_v5  ;;  %v9025_v11 = vunpack.c.h.bf16 %v9011_v24  ;;  %v9026_v2 = vunpack.c.h.bf16 %v9013_v0  ;;  %v9028_v9 = vunpack.c.l.bf16 %v9027_v43  ;;  %v9042_v58 = vld [vmem:[#allocation121_spill] sm:$0xff] }
 0x260   :  { %v1746_v55 = vadd.f32 %v1745_v59, %v9020_v56  ;;  %v1857_v38 = vadd.f32 %v1856_v53, %v9022_v20  ;;  %v1968_v17 = vadd.f32 %v1967_v23, %v9024_v10  ;;  %v9029_v37 = vunpack.c.l.bf16 %v6439_v4  ;;  %v9046_v59 = vld [vmem:[#allocation142_spill] sm:$0xff]  ;;  %v9052_v39 = vld [vmem:[#allocation25_spill] sm:$0xff] }
 0x261   :  { %v1414_v6 = vadd.f32 %v1413_v54, %v9025_v11  ;;  %v1525_v49 = vadd.f32 %v1524_v60, %v9026_v2  ;;  %v2079_v34 = vadd.f32 %v2078_v36, %v9028_v9  ;;  %v9030_v31 = vunpack.c.h.bf16 %v9017_v35 }
 0x262   :  { %v2190_v26 = vadd.f32 %v2189_v41, %v9029_v37  ;;  %v9031_v19 = vunpack.c.h.bf16 %v9019_v28  ;;  %v9032_v7 = vunpack.c.h.bf16 %v9021_v57  ;;  %v9033_v62 = vunpack.c.h.bf16 %v9023_v29 }
 0x263   :  { %v1636_v42 = vadd.f32 %v1635_v63, %v9030_v31  ;;  %v9035_v13 = vunpack.c.l.bf16 %v9034_v45  ;;  %v9037_v25 = vunpack.c.l.bf16 %v9036_v48  ;;  %v9038_v32 = vunpack.c.h.bf16 %v9027_v43  ;;  %v9068_v31 = vld [vmem:[#allocation46_spill] sm:$0xff] }
 0x264   :  { %v1747_v51 = vadd.f32 %v1746_v55, %v9031_v19  ;;  %v1858_v50 = vadd.f32 %v1857_v38, %v9032_v7  ;;  %v1969_v44 = vadd.f32 %v1968_v17, %v9033_v62  ;;  %v9039_v1 = vunpack.c.h.bf16 %v6439_v4  ;;  %v9050_v4 = vld [vmem:[#allocation177_spill] sm:$0xff]  ;;  %v9058_v55 = vld [vmem:[#allocation14_spill] sm:$0xff] }
 0x265   :  { %v1415_v22 = vadd.f32 %v1414_v6, %v9035_v13  ;;  %v1526_v18 = vadd.f32 %v1525_v49, %v9037_v25  ;;  %v2080_v52 = vadd.f32 %v2079_v34, %v9038_v32  ;;  %v9041_v46 = vunpack.c.l.bf16 %v9040_v47  ;;  %v9060_v38 = vld [vmem:[#allocation109_spill] sm:$0xff] }
 0x266   :  { %v2191_v3 = vadd.f32 %v2190_v26, %v9039_v1  ;;  %v9043_v30 = vunpack.c.l.bf16 %v9042_v58  ;;  %v9045_v12 = vunpack.c.l.bf16 %v9044_v27  ;;  %v9047_v14 = vunpack.c.l.bf16 %v9046_v59  ;;  %v9064_v49 = vld [vmem:[#allocation141_spill] sm:$0xff] }
 0x267   :  { %v1637_v61 = vadd.f32 %v1636_v42, %v9041_v46  ;;  %v9048_v21 = vunpack.c.h.bf16 %v9034_v45  ;;  %v9049_v24 = vunpack.c.h.bf16 %v9036_v48  ;;  %v9051_v54 = vunpack.c.l.bf16 %v9050_v4  ;;  %v9066_v34 = vld [vmem:[#allocation173_spill] sm:$0xff] }
 0x268   :  { %v1748_v8 = vadd.f32 %v1747_v51, %v9043_v30  ;;  %v1859_v16 = vadd.f32 %v1858_v50, %v9045_v12  ;;  %v1970_v53 = vadd.f32 %v1969_v44, %v9047_v14  ;;  %v9053_v60 = vunpack.c.l.bf16 %v9052_v39  ;;  %v9070_v51 = vld [vmem:[#allocation53_spill] sm:$0xff] }
 0x269   :  { %v1416_v23 = vadd.f32 %v1415_v22, %v9048_v21  ;;  %v1527_v40 = vadd.f32 %v1526_v18, %v9049_v24  ;;  %v2081_v0 = vadd.f32 %v2080_v52, %v9051_v54  ;;  %v9054_v36 = vunpack.c.h.bf16 %v9040_v47  ;;  %v9074_v22 = vld [vmem:[#allocation203_spill] sm:$0xff]  ;;  %v9076_v18 = vld [vmem:[#allocation178_spill] sm:$0xff] }
 0x26a   :  { %v2192_v15 = vadd.f32 %v2191_v3, %v9053_v60  ;;  %v9055_v41 = vunpack.c.h.bf16 %v9042_v58  ;;  %v9056_v5 = vunpack.c.h.bf16 %v9044_v27  ;;  %v9057_v28 = vunpack.c.h.bf16 %v9046_v59  ;;  %v9082_v27 = vld [vmem:[#allocation20_spill] sm:$0xff] }
 0x26b   :  { %v1638_v33 = vadd.f32 %v1637_v61, %v9054_v36  ;;  %v9059_v57 = vunpack.c.l.bf16 %v9058_v55  ;;  %v9061_v29 = vunpack.c.l.bf16 %v9060_v38  ;;  %v9062_v17 = vunpack.c.h.bf16 %v9050_v4  ;;  %v9084_v59 = vld [vmem:[#allocation112_spill] sm:$0xff]  ;;  %v9092_v36 = vld [vmem:[#allocation51_spill] sm:$0xff] }
 0x26c   :  { %v1749_v35 = vadd.f32 %v1748_v8, %v9055_v41  ;;  %v1860_v63 = vadd.f32 %v1859_v16, %v9056_v5  ;;  %v1971_v56 = vadd.f32 %v1970_v53, %v9057_v28  ;;  %v9063_v6 = vunpack.c.h.bf16 %v9052_v39  ;;  %v9088_v4 = vld [vmem:[#allocation32_spill] sm:$0xff]  ;;  %v9090_v39 = vld [vmem:[#allocation199_spill] sm:$0xff] }
 0x26d   :  { %v1417_v20 = vadd.f32 %v1416_v23, %v9059_v57  ;;  %v1528_v10 = vadd.f32 %v1527_v40, %v9061_v29  ;;  %v2082_v11 = vadd.f32 %v2081_v0, %v9062_v17  ;;  %v9065_v43 = vunpack.c.l.bf16 %v9064_v49 }
 0x26e   :  { %v2193_v2 = vadd.f32 %v2192_v15, %v9063_v6  ;;  %v9067_v37 = vunpack.c.l.bf16 %v9066_v34  ;;  %v9069_v42 = vunpack.c.l.bf16 %v9068_v31  ;;  %v9071_v7 = vunpack.c.l.bf16 %v9070_v51 }
 0x26f   :  { %v1639_v9 = vadd.f32 %v1638_v33, %v9065_v43  ;;  %v9072_v62 = vunpack.c.h.bf16 %v9058_v55  ;;  %v9073_v45 = vunpack.c.h.bf16 %v9060_v38  ;;  %v9075_v48 = vunpack.c.l.bf16 %v9074_v22 }
 0x270   :  { %v1750_v26 = vadd.f32 %v1749_v35, %v9067_v37  ;;  %v1861_v19 = vadd.f32 %v1860_v63, %v9069_v42  ;;  %v1972_v50 = vadd.f32 %v1971_v56, %v9071_v7  ;;  %v9077_v32 = vunpack.c.l.bf16 %v9076_v18  ;;  %v9094_v35 = vld [vmem:[#allocation80_spill] sm:$0xff] }
 0x271   :  { %v1418_v44 = vadd.f32 %v1417_v20, %v9072_v62  ;;  %v1529_v13 = vadd.f32 %v1528_v10, %v9073_v45  ;;  %v2083_v25 = vadd.f32 %v2082_v11, %v9075_v48  ;;  %v9078_v1 = vunpack.c.h.bf16 %v9064_v49  ;;  %v9098_v20 = vld [vmem:[#allocation62_spill] sm:$0xff]  ;;  %v9100_v10 = vld [vmem:[#allocation204_spill] sm:$0xff] }
 0x272   :  { %v2194_v52 = vadd.f32 %v2193_v2, %v9077_v32  ;;  %v9079_v47 = vunpack.c.h.bf16 %v9066_v34  ;;  %v9080_v61 = vunpack.c.h.bf16 %v9068_v31  ;;  %v9081_v30 = vunpack.c.h.bf16 %v9070_v51  ;;  %v9106_v31 = vld [vmem:[#allocation45_spill] sm:$0xff] }
 0x273   :  { %v1640_v3 = vadd.f32 %v1639_v9, %v9078_v1  ;;  %v9083_v12 = vunpack.c.l.bf16 %v9082_v27  ;;  %v9085_v14 = vunpack.c.l.bf16 %v9084_v59  ;;  %v9086_v21 = vunpack.c.h.bf16 %v9074_v22  ;;  %v9108_v51 = vld [vmem:[#allocation117_spill] sm:$0xff]  ;;  %v9112_v22 = vld [vmem:[#allocation102_spill] sm:$0xff] }
 0x274   :  { %v1751_v46 = vadd.f32 %v1750_v26, %v9079_v47  ;;  %v1862_v58 = vadd.f32 %v1861_v19, %v9080_v61  ;;  %v1973_v8 = vadd.f32 %v1972_v50, %v9081_v30  ;;  %v9087_v24 = vunpack.c.h.bf16 %v9076_v18  ;;  %v9114_v18 = vld [vmem:[#allocation41_spill] sm:$0xff]  ;;  %v9116_v1 = vld [vmem:[#allocation118_spill] sm:$0xff] }
 0x275   :  { %v1419_v16 = vadd.f32 %v1418_v44, %v9083_v12  ;;  %v1530_v53 = vadd.f32 %v1529_v13, %v9085_v14  ;;  %v2084_v23 = vadd.f32 %v2083_v25, %v9086_v21  ;;  %v9089_v54 = vunpack.c.l.bf16 %v9088_v4 }
 0x276   :  { %v2195_v40 = vadd.f32 %v2194_v52, %v9087_v24  ;;  %v9091_v60 = vunpack.c.l.bf16 %v9090_v39  ;;  %v9093_v33 = vunpack.c.l.bf16 %v9092_v36  ;;  %v9095_v5 = vunpack.c.l.bf16 %v9094_v35 }
 0x277   :  { %v1641_v0 = vadd.f32 %v1640_v3, %v9089_v54  ;;  %v9096_v28 = vunpack.c.h.bf16 %v9082_v27  ;;  %v9097_v55 = vunpack.c.h.bf16 %v9084_v59  ;;  %v9099_v38 = vunpack.c.l.bf16 %v9098_v20 }
 0x278   :  { %v1752_v15 = vadd.f32 %v1751_v46, %v9091_v60  ;;  %v1863_v41 = vadd.f32 %v1862_v58, %v9093_v33  ;;  %v1974_v63 = vadd.f32 %v1973_v8, %v9095_v5  ;;  %v9101_v17 = vunpack.c.l.bf16 %v9100_v10  ;;  %v9118_v46 = vld [vmem:[#allocation176_spill] sm:$0xff] }
 0x279   :  { %v1420_v56 = vadd.f32 %v1419_v16, %v9096_v28  ;;  %v1531_v57 = vadd.f32 %v1530_v53, %v9097_v55  ;;  %v2085_v29 = vadd.f32 %v2084_v23, %v9099_v38  ;;  %v9102_v6 = vunpack.c.h.bf16 %v9088_v4  ;;  %v9122_v16 = vld [vmem:[#allocation66_spill] sm:$0xff]  ;;  %v9124_v53 = vld [vmem:[#allocation85_spill] sm:$0xff] }
 0x27a   :  { %v2196_v11 = vadd.f32 %v2195_v40, %v9101_v17  ;;  %v9103_v49 = vunpack.c.h.bf16 %v9090_v39  ;;  %v9104_v9 = vunpack.c.h.bf16 %v9092_v36  ;;  %v9105_v37 = vunpack.c.h.bf16 %v9094_v35  ;;  %v9130_v36 = vld [vmem:[#allocation50_spill] sm:$0xff]  ;;  %v9132_v35 = vld [vmem:[#allocation17_spill] sm:$0xff] }
 0x27b   :  { %v1642_v2 = vadd.f32 %v1641_v0, %v9102_v6  ;;  %v9107_v42 = vunpack.c.l.bf16 %v9106_v31  ;;  %v9109_v7 = vunpack.c.l.bf16 %v9108_v51  ;;  %v9110_v62 = vunpack.c.h.bf16 %v9098_v20  ;;  %v9136_v20 = vld [vmem:[#allocation172_spill] sm:$0xff]  ;;  %v9140_v6 = vld [vmem:[#allocation143_spill] sm:$0xff] }
 0x27c   :  { %v1753_v43 = vadd.f32 %v1752_v15, %v9103_v49  ;;  %v1864_v34 = vadd.f32 %v1863_v41, %v9104_v9  ;;  %v1975_v26 = vadd.f32 %v1974_v63, %v9105_v37  ;;  %v9111_v45 = vunpack.c.h.bf16 %v9100_v10  ;;  %v9138_v10 = vld [vmem:[#allocation89_spill] sm:$0xff] }
 0x27d   :  { %v1421_v19 = vadd.f32 %v1420_v56, %v9107_v42  ;;  %v1532_v50 = vadd.f32 %v1531_v57, %v9109_v7  ;;  %v2086_v44 = vadd.f32 %v2085_v29, %v9110_v62  ;;  %v9113_v48 = vunpack.c.l.bf16 %v9112_v22 }
 0x27e   :  { %v2197_v13 = vadd.f32 %v2196_v11, %v9111_v45  ;;  %v9115_v32 = vunpack.c.l.bf16 %v9114_v18  ;;  %v9117_v3 = vunpack.c.l.bf16 %v9116_v1  ;;  %v9119_v61 = vunpack.c.l.bf16 %v9118_v46 }
 0x27f   :  { %v1643_v25 = vadd.f32 %v1642_v2, %v9113_v48  ;;  %v9120_v30 = vunpack.c.h.bf16 %v9106_v31  ;;  %v9121_v27 = vunpack.c.h.bf16 %v9108_v51  ;;  %v9123_v59 = vunpack.c.l.bf16 %v9122_v16 }
 0x280   :  { %v1754_v52 = vadd.f32 %v1753_v43, %v9115_v32  ;;  %v1865_v47 = vadd.f32 %v1864_v34, %v9117_v3  ;;  %v1976_v58 = vadd.f32 %v1975_v26, %v9119_v61  ;;  %v9125_v21 = vunpack.c.l.bf16 %v9124_v53  ;;  %v9142_v43 = vld [vmem:[#allocation202_spill] sm:$0xff] }
 0x281   :  { %v1422_v8 = vadd.f32 %v1421_v19, %v9120_v30  ;;  %v1533_v12 = vadd.f32 %v1532_v50, %v9121_v27  ;;  %v2087_v14 = vadd.f32 %v2086_v44, %v9123_v59  ;;  %v9126_v24 = vunpack.c.h.bf16 %v9112_v22  ;;  %v9146_v19 = vld [vmem:[#allocation70_spill] sm:$0xff] }
 0x282   :  { %v2198_v23 = vadd.f32 %v2197_v13, %v9125_v21  ;;  %v9127_v4 = vunpack.c.h.bf16 %v9114_v18  ;;  %v9128_v0 = vunpack.c.h.bf16 %v9116_v1  ;;  %v9129_v60 = vunpack.c.h.bf16 %v9118_v46  ;;  %v9148_v50 = vld [vmem:[#allocation90_spill] sm:$0xff] }
 0x283   :  { %v1644_v40 = vadd.f32 %v1643_v25, %v9126_v24  ;;  %v9131_v33 = vunpack.c.l.bf16 %v9130_v36  ;;  %v9133_v5 = vunpack.c.l.bf16 %v9132_v35  ;;  %v9134_v28 = vunpack.c.h.bf16 %v9122_v16 }
 0x284   :  { %v1755_v54 = vadd.f32 %v1754_v52, %v9127_v4  ;;  %v1866_v39 = vadd.f32 %v1865_v47, %v9128_v0  ;;  %v1977_v15 = vadd.f32 %v1976_v58, %v9129_v60  ;;  %v9135_v55 = vunpack.c.h.bf16 %v9124_v53 }
 0x285   :  { %v1423_v41 = vadd.f32 %v1422_v8, %v9131_v33  ;;  %v1534_v63 = vadd.f32 %v1533_v12, %v9133_v5  ;;  %v2088_v56 = vadd.f32 %v2087_v14, %v9134_v28  ;;  %v9137_v38 = vunpack.c.l.bf16 %v9136_v20 }
 0x286   :  { %v2199_v57 = vadd.f32 %v2198_v23, %v9135_v55  ;;  %v9139_v17 = vunpack.c.l.bf16 %v9138_v10  ;;  %v9141_v2 = vunpack.c.l.bf16 %v9140_v6  ;;  %v9143_v9 = vunpack.c.l.bf16 %v9142_v43 }
 0x287   :  { %v1645_v29 = vadd.f32 %v1644_v40, %v9137_v38  ;;  %v9144_v37 = vunpack.c.h.bf16 %v9130_v36  ;;  %v9145_v31 = vunpack.c.h.bf16 %v9132_v35  ;;  %v9147_v51 = vunpack.c.l.bf16 %v9146_v19 }
 0x288   :  { %v1756_v11 = vadd.f32 %v1755_v54, %v9139_v17  ;;  %v1867_v49 = vadd.f32 %v1866_v39, %v9141_v2  ;;  %v1978_v34 = vadd.f32 %v1977_v15, %v9143_v9  ;;  %v9149_v62 = vunpack.c.l.bf16 %v9148_v50 }
 0x289   :  { %v1424_v26 = vadd.f32 %v1423_v41, %v9144_v37  ;;  %v1535_v42 = vadd.f32 %v1534_v63, %v9145_v31  ;;  %v2089_v7 = vadd.f32 %v2088_v56, %v9147_v51  ;;  %v9150_v45 = vunpack.c.h.bf16 %v9136_v20 }
 0x28a   :  { %v2200_v44 = vadd.f32 %v2199_v57, %v9149_v62  ;;  %v9151_v22 = vunpack.c.h.bf16 %v9138_v10  ;;  %v9152_v25 = vunpack.c.h.bf16 %v9140_v6  ;;  %v9153_v32 = vunpack.c.h.bf16 %v9142_v43 }
 0x28b   :  { %v1646_v13 = vadd.f32 %v1645_v29, %v9150_v45  ;;  %v1425_v1 = vrot.slane %v1424_v26, 4  ;;  %v1536_v3 = vrot.slane %v1535_v42, 4  ;;  %v9154_v47 = vunpack.c.h.bf16 %v9146_v19 }
 0x28c   :  { %v1757_v48 = vadd.f32 %v1756_v11, %v9151_v22  ;;  %v1868_v18 = vadd.f32 %v1867_v49, %v9152_v25  ;;  %v1979_v52 = vadd.f32 %v1978_v34, %v9153_v32  ;;  %v9155_v61 = vunpack.c.h.bf16 %v9148_v50 }
 0x28d   :  { %v2090_v46 = vadd.f32 %v2089_v7, %v9154_v47  ;;  %v1647_v30 = vrot.slane %v1646_v13, 4  ;;  %v1426_v16 = vadd.f32 %v1425_v1, %v1424_v26  ;;  %v1537_v59 = vadd.f32 %v1536_v3, %v1535_v42 }
 0x28e   :  { %v2201_v58 = vadd.f32 %v2200_v44, %v9155_v61  ;;  %v1758_v8 = vrot.slane %v1757_v48, 4  ;;  %v1869_v27 = vrot.slane %v1868_v18, 4  ;;  %v1980_v12 = vrot.slane %v1979_v52, 4 }
 0x28f   :  { %v2091_v14 = vrot.slane %v2090_v46, 4  ;;  %v1648_v21 = vadd.f32 %v1647_v30, %v1646_v13  ;;  %v1427_v4 = vrot.slane %v1426_v16, 2  ;;  %v1538_v54 = vrot.slane %v1537_v59, 2 }
 0x290   :  { %v2202_v53 = vrot.slane %v2201_v58, 4  ;;  %v1759_v23 = vadd.f32 %v1758_v8, %v1757_v48  ;;  %v1870_v24 = vadd.f32 %v1869_v27, %v1868_v18  ;;  %v1981_v40 = vadd.f32 %v1980_v12, %v1979_v52  ;;  %v2328_v27 = vld [vmem:[#allocation4] sm:$0x3] }
 0x291   :  { %v2092_v0 = vadd.f32 %v2091_v14, %v2090_v46  ;;  %v1649_v60 = vrot.slane %v1648_v21, 2  ;;  %v1428_v41 = vadd.f32 %v1427_v4, %v1426_v16  ;;  %v1539_v35 = vadd.f32 %v1538_v54, %v1537_v59 }
 0x292   :  { %v2203_v39 = vadd.f32 %v2202_v53, %v2201_v58  ;;  %v1760_v15 = vrot.slane %v1759_v23, 2  ;;  %v1871_v36 = vrot.slane %v1870_v24, 2  ;;  %v1982_v33 = vrot.slane %v1981_v40, 2 }
 0x293   :  { %v2093_v5 = vrot.slane %v2092_v0, 2  ;;  %v1650_v28 = vadd.f32 %v1649_v60, %v1648_v21  ;;  %v1429_v20 = vrot.slane %v1428_v41, 1  ;;  %v1540_v38 = vrot.slane %v1539_v35, 1 }
 0x294   :  { %v2204_v63 = vrot.slane %v2203_v39, 2  ;;  %v1761_v56 = vadd.f32 %v1760_v15, %v1759_v23  ;;  %v1872_v55 = vadd.f32 %v1871_v36, %v1870_v24  ;;  %v1983_v57 = vadd.f32 %v1982_v33, %v1981_v40 }
 0x295   :  { %v2094_v29 = vadd.f32 %v2093_v5, %v2092_v0  ;;  %v1651_v17 = vrot.slane %v1650_v28, 1  ;;  %v1430_v49 = vadd.f32 %v1429_v20, %v1428_v41  ;;  %v1541_v43 = vadd.f32 %v1540_v38, %v1539_v35 }
 0x296   :  { %v2205_v10 = vadd.f32 %v2204_v63, %v2203_v39  ;;  %v1762_v11 = vrot.slane %v1761_v56, 1  ;;  %v1873_v6 = vrot.slane %v1872_v55, 1  ;;  %v1984_v2 = vrot.slane %v1983_v57, 1 }
 0x297   :  { %v2095_v9 = vrot.slane %v2094_v29, 1  ;;  %v1652_v37 = vadd.f32 %v1651_v17, %v1650_v28  ;;  %v2210_v7 = vmul.f32 0.00390625, %v1430_v49  ;;  %v2213_v50 = vmul.f32 0.00390625, %v1541_v43 }
 0x298   :  { %v2206_v34 = vrot.slane %v2205_v10, 1  ;;  %v1763_v26 = vadd.f32 %v1762_v11, %v1761_v56  ;;  %v1874_v31 = vadd.f32 %v1873_v6, %v1872_v55  ;;  %v1985_v42 = vadd.f32 %v1984_v2, %v1983_v57 }
 0x299   :  { %v2096_v19 = vadd.f32 %v2095_v9, %v2094_v29  ;;  %v2216_v62 = vmul.f32 0.00390625, %v1652_v37  ;;  %v2385_v22 = vsel %vm2364_vm0, %v2213_v50, %v2210_v7  ;;  %v2330_v58 = vlaneseq }
 0x29a   :  { %v2207_v51 = vadd.f32 %v2206_v34, %v2205_v10  ;;  %v2219_v44 = vmul.f32 0.00390625, %v1763_v26  ;;  %v2222_v45 = vmul.f32 0.00390625, %v1874_v31  ;;  %v2225_v13 = vmul.f32 0.00390625, %v1985_v42 }
 0x29b   :  { %v2228_v48 = vmul.f32 0.00390625, %v2096_v19  ;;  %v2386_v25 = vsel %vm2366_vm1, %v2216_v62, %v2385_v22  ;;  %v2331_v30 = vshrl.u32 %v2330_v58, 7 }
 0x29c   :  { %v2231_v18 = vmul.f32 0.00390625, %v2207_v51  ;;  %v2387_v32 = vsel %vm2368_vm2, %v2219_v44, %v2386_v25 }
 0x29d   :  { %v2388_v52 = vsel %vm2370_vm3, %v2222_v45, %v2387_v32  ;;  %v2332_v8 = vsub.s32 0, %v2331_v30  ;;  %v2336_v12 = vsub.s32 1, %v2331_v30 }
 0x29e   :  { %v2389_v1 = vsel %vm2372_vm4, %v2225_v13, %v2388_v52 }
 0x29f   :  { %v2390_v3 = vsel %vm2374_vm5, %v2228_v48, %v2389_v1  ;;  %v2333_v16 = vrot.slane %v2328_v27, %v2332_v8  ;;  %v2337_v59 = vrot.slane %v2328_v27, %v2336_v12 }
 0x2a0   :  { %v2391_v47 = vsel %vm2376_vm6, %v2231_v18, %v2390_v3 }
 0x2a1   :  { %2531 = vmatmul.mubr.f32.vlgmr.msra.gmra.mrb[0].mxu0 %v2391_v47 }
 0x2bd   :  { %v2461_v46 = vpop.f32.mrb[0].mxu1 }
 0x2be   :  { %v2463_v61 = vpop.f32.mrb[1].mxu1  ;;  %v2462_v14 = vadd.f32 %v2461_v46, %v2333_v16 }
 0x2bf   :  { %v2464_v53 = vadd.f32 %v2463_v61, %v2337_v59 }
 0x374   :  { %v2532_v21 = vpop.f32.mrb[0].mxu0 }
 0x375   :  { %v2533_v23 = vadd.f32 %v2532_v21, %v2462_v14  ;;  %v2534_v24 = vpop.f32.mrb[1].mxu0 }
 0x376   :  { %v2535_v40 = vadd.f32 %v2534_v24, %v2464_v53 }
 0x377   :  { %2537 = vst [vmem:[%s6997_s3] sm:$0xff] %v2533_v23 }
 0x378   :  { %2539 = vst.msk [vmem:[%s6997_s3 + $0x8] sm:$0xff] %vm2538_vm7, %v2535_v40 }
 0x379   :  { %2544 = vsyncpa [#allocation3], 1 }
 0x37a   :  { %2545 = vsyncpa [#allocation5], 1 }

// kernel: hipt_lgp_fc_forward.3
= control target key start
LH: loop header
LB: loop body
LE: loop exit
PB: predicated region body
PF: predicated region fallthrough
CT: control target
= control target key end

     0   :  { %11 = vsyncpa [#allocation3], 0  ;;  %s5618_s0 = inlined_call_operand.vmem [shape: f32[8,192], index: 0, kind: input, shape index: {}]   ;;  %s5619_s1 = inlined_call_operand.hbm [shape: f32[16,192,192], index: 1, kind: input, shape index: {}]   ;;  %s5620_s2 = inlined_call_operand.hbm [shape: f32[25,1,192], index: 2, kind: input, shape index: {}]   ;;  %s5621_s3 = inlined_call_operand.vmem [shape: f32[192,8], index: 3, kind: input, shape index: {}]   ;;  %s5622_s4 = inlined_call_operand.vmem [shape: f32[1,4], index: 4, kind: output, shape index: {0}]   ;;  %s5623_s5 = inlined_call_operand.hbm [shape: f32[1,4], index: 5, kind: output, shape index: {1}]  }
   0x1   :  { %12 = vsyncpa [#allocation6], 0 }
   0x2   :  { %13 = vsyncpa [#allocation4], 0  ;;  %s5095_s18 = smov [#allocation2]   ;;  %s5023_s22 = scalar_lea.hbm %s5619_s1, 98304 }
   0x3   :  { %s21_s19 = sshll.u32 %s5095_s18, 4  ;;  %p5024_p0 = scmp.ne.s32.totalorder %s5619_s1, %s5023_s22  ;;  %s22_s19 = int_to_ptr.vmem [resolvable:$true] %s21_s19 }
   0x4   :  { %p5027_p1 = scmp.lt.u32.totalorder %s5023_s22, %s5619_s1 }
   0x6   :  { %p5029_p2 = pnand %p5027_p1, %p5024_p0 }
   0x8   :  { %5032 = shalt.err (!%p5029_p2)
}
   0x9   :  { %s5033_s27 = scalar_lea.vmem %s22_s19, 98304  ;;  %p5038_p4 = scmp.lt.s32.totalorder %s22_s19, %s22_s19 }
   0xa   :  { %p5034_p3 = scmp.ne.s32.totalorder %s22_s19, %s5033_s27  ;;  %p5039_p5 = scmp.lt.s32.totalorder %s5033_s27, %s5033_s27 }
   0xc   :  { %p5040_p6 = por %p5039_p5, %p5038_p4 }
   0xe   :  { %p5041_p7 = pnand %p5040_p6, %p5034_p3 }
  0x10   :  { %5044 = shalt.err (!%p5041_p7)
}
  0x11   :  { %s5096_s28 = smov 256   ;;  %s5097_s29 = smov 16  }
  0x12   :  { %27 = dma.hbm_to_vmem [thread:$0]  %s5619_s1, 98304, %s22_s19, [#allocation3], %s5096_s28, %s5096_s28, %s5097_s29  }
  0x13   :  { %s5098_s7 = smov [#allocation5]   ;;  %s5045_s11 = scalar_lea.hbm %s5620_s2, 800 }
  0x14   :  { %s33_s8 = sshll.u32 %s5098_s7, 4  ;;  %p5046_p8 = scmp.ne.s32.totalorder %s5620_s2, %s5045_s11  ;;  %s34_s8 = int_to_ptr.vmem [resolvable:$true] %s33_s8 }
  0x15   :  { %p5049_p9 = scmp.lt.u32.totalorder %s5045_s11, %s5620_s2 }
  0x17   :  { %p5051_p10 = pnand %p5049_p9, %p5046_p8 }
  0x19   :  { %5054 = shalt.err (!%p5051_p10)
}
  0x1a   :  { %s5055_s16 = scalar_lea.vmem %s34_s8, 800  ;;  %p5060_p12 = scmp.lt.s32.totalorder %s34_s8, %s34_s8 }
  0x1b   :  { %p5056_p11 = scmp.ne.s32.totalorder %s34_s8, %s5055_s16  ;;  %p5061_p13 = scmp.lt.s32.totalorder %s5055_s16, %s5055_s16 }
  0x1d   :  { %p5062_p0 = por %p5061_p13, %p5060_p12 }
  0x1f   :  { %p5063_p1 = pnand %p5062_p0, %p5056_p11 }
  0x21   :  { %5066 = shalt.err (!%p5063_p1)
}
  0x22   :  { %s5099_s1 = smov 32   ;;  %s5100_s17 = smov 2  }
  0x23   :  { %39 = dma.hbm_to_vmem [thread:$0]  %s5620_s2, 800, %s34_s8, [#allocation6], %s5099_s1, %s5099_s1, %s5100_s17  }
  0x24   :  { %5089 = dma.done.wait [#allocation3], 98304  }
  0x25   :  { %5090 = vsyncadd [#allocation3], 4294868992 }
  0x26   :  { %5091 = dma.done.wait [#allocation6], 800  }
  0x27   :  { %5092 = vsyncadd [#allocation6], 4294966496  ;;  %v51_v0 = vld [vmem:[#allocation2 + $0x8] sm:$0xff]  ;;  %v53_v1 = vld [vmem:[#allocation2 + $0x18] sm:$0xff]  ;;  %vm110_vm0 = vcmask 523264   ;;  %vm5102_vm1 = vmmov 0  }
  0x28   :  { %v50_v2 = vld [vmem:[#allocation2] sm:$0xff]  ;;  %v4109_v3 = vpack.c.bf16 %v53_v1, %v51_v0  ;;  %v52_v4 = vld [vmem:[#allocation2 + $0x10] sm:$0xff]  ;;  %v55_v5 = vld [vmem:[#allocation2 + $0x28] sm:$0xff]  ;;  %vm715_vm2 = vcmask 64512   ;;  %vm3684_vm3 = vcmask 7168   ;;  %vm3942_vm4 = vcmask 32776  }
  0x29   :  { %v57_v6 = vld [vmem:[#allocation2 + $0x38] sm:$0xff]  ;;  %v4111_v7 = vpack.c.bf16 %v52_v4, %v50_v2  ;;  %v54_v9 = vld [vmem:[#allocation2 + $0x20] sm:$0xff]  ;;  %v56_v10 = vld [vmem:[#allocation2 + $0x30] sm:$0xff]  ;;  %vm3940_vm5 = vcmask 24576   ;;  %s5107_s17 = smov [#allocation7]  }
  0x2a   :  { %v4113_v8 = vpack.c.bf16 %v57_v6, %v55_v5  ;;  %v59_v11 = vld [vmem:[#allocation2 + $0x48] sm:$0xff]  ;;  %4110 = vmatprep.subr.bf16.mxu0 %v4109_v3  ;;  %v61_v12 = vld [vmem:[#allocation2 + $0x58] sm:$0xff]  ;;  %v4115_v13 = vpack.c.bf16 %v56_v10, %v54_v9  ;;  %v58_v15 = vld [vmem:[#allocation2 + $0x40] sm:$0xff]  ;;  %s3971_s18 = sshll.u32 %s5107_s17, 4  ;;  %s3972_s18 = int_to_ptr.vmem [resolvable:$true] %s3971_s18 }
  0x2b   :  { %4112 = vmatpush1.bf16.msra.mxu0 %v4111_v7  ;;  %v4117_v14 = vpack.c.bf16 %v61_v12, %v59_v11  ;;  %v60_v16 = vld [vmem:[#allocation2 + $0x50] sm:$0xff]  ;;  %v63_v17 = vld [vmem:[#allocation2 + $0x68] sm:$0xff]  ;;  %v65_v18 = vld [vmem:[#allocation2 + $0x78] sm:$0xff]  ;;  %s5067_s19 = scalar_lea.vmem %s3972_s18, 16  ;;  %s5071_s2 = scalar_lea.vmem %s3972_s18, 32 }
  0x2c   :  { %4114 = vmatprep.subr.bf16.mxu0 %v4113_v8  ;;  %v4119_v19 = vpack.c.bf16 %v60_v16, %v58_v15  ;;  %v4121_v20 = vpack.c.bf16 %v65_v18, %v63_v17  ;;  %v62_v21 = vld [vmem:[#allocation2 + $0x60] sm:$0xff]  ;;  %v64_v22 = vld [vmem:[#allocation2 + $0x70] sm:$0xff]  ;;  %v67_v23 = vld [vmem:[#allocation2 + $0x88] sm:$0xff]  ;;  %p5068_p2 = scmp.ne.s32.totalorder %s3972_s18, %s5067_s19  ;;  %p5072_p3 = scmp.lt.s32.totalorder %s3972_s18, %s3972_s18 }
  0x2d   :  { %v69_v24 = vld [vmem:[#allocation2 + $0x98] sm:$0xff]  ;;  %v4123_v25 = vpack.c.bf16 %v64_v22, %v62_v21  ;;  %v66_v27 = vld [vmem:[#allocation2 + $0x80] sm:$0xff]  ;;  %v68_v28 = vld [vmem:[#allocation2 + $0x90] sm:$0xff]  ;;  %p5073_p4 = scmp.lt.s32.totalorder %s5071_s2, %s5067_s19 }
  0x2e   :  { %v4125_v26 = vpack.c.bf16 %v69_v24, %v67_v23  ;;  %v71_v29 = vld [vmem:[#allocation2 + $0xa8] sm:$0xff]  ;;  %v73_v30 = vld [vmem:[#allocation2 + $0xb8] sm:$0xff]  ;;  %v70_v31 = vld [vmem:[#allocation2 + $0xa0] sm:$0xff]  ;;  %v4127_v32 = vpack.c.bf16 %v68_v28, %v66_v27 }
  0x2f   :  { %4116 = vmatpush1.bf16.msra.mxu0 %v4115_v13  ;;  %v72_v33 = vld [vmem:[#allocation2 + $0xb0] sm:$0xff]  ;;  %v49_v34 = vld [vmem:[%s5618_s0 + $0x8] sm:$0xff]  ;;  %v4129_v36 = vpack.c.bf16 %v73_v30, %v71_v29  ;;  %v191_v37 = vld [vmem:[#allocation2 + $0x198] sm:$0xff]  ;;  %p5074_p5 = por %p5073_p4, %p5072_p3 }
  0x30   :  { %4118 = vmatprep.subr.bf16.mxu0 %v4117_v14  ;;  %v189_v35 = vld [vmem:[#allocation2 + $0x188] sm:$0xff]  ;;  %3983 = vmatprep.mubr.msk.f32.mxu0 %vm110_vm0, %v49_v34  ;;  %v188_v38 = vld [vmem:[#allocation2 + $0x180] sm:$0xff]  ;;  %v190_v39 = vld [vmem:[#allocation2 + $0x190] sm:$0xff]  ;;  %v4131_v46 = vpack.c.bf16 %v72_v33, %v70_v31 }
  0x31   :  { %v75_v40 = vld [vmem:[#allocation2 + $0xc8] sm:$0xff]  ;;  %v77_v41 = vld [vmem:[#allocation2 + $0xd8] sm:$0xff]  ;;  %v4157_v42 = vpack.c.bf16 %v191_v37, %v189_v35  ;;  %v4159_v43 = vpack.c.bf16 %v190_v39, %v188_v38  ;;  %v74_v47 = vld [vmem:[#allocation2 + $0xc0] sm:$0xff]  ;;  %p5075_p6 = pnand %p5074_p5, %p5068_p2 }
  0x32   :  { %v193_v44 = vld [vmem:[#allocation2 + $0x1a8] sm:$0xff]  ;;  %v195_v45 = vld [vmem:[#allocation2 + $0x1b8] sm:$0xff]  ;;  %v192_v49 = vld [vmem:[#allocation2 + $0x1a0] sm:$0xff]  ;;  %v4133_v51 = vpack.c.bf16 %v77_v41, %v75_v40 }
  0x33   :  { %4120 = vmatpush1.bf16.msra.mxu0 %v4119_v19  ;;  %4158 = vmatprep.subr.bf16.mxu1 %v4157_v42  ;;  %v4161_v48 = vpack.c.bf16 %v195_v45, %v193_v44  ;;  %v194_v50 = vld [vmem:[#allocation2 + $0x1b0] sm:$0xff]  ;;  %v79_v53 = vld [vmem:[#allocation2 + $0xe8] sm:$0xff]  ;;  %v81_v54 = vld [vmem:[#allocation2 + $0xf8] sm:$0xff] }
  0x34   :  { %4122 = vmatprep.subr.bf16.mxu0 %v4121_v20  ;;  %v76_v52 = vld [vmem:[#allocation2 + $0xd0] sm:$0xff]  ;;  %4160 = vmatpush1.bf16.msra.mxu1 %v4159_v43  ;;  %v4163_v55 = vpack.c.bf16 %v194_v50, %v192_v49  ;;  %v197_v56 = vld [vmem:[#allocation2 + $0x1c8] sm:$0xff]  ;;  %v199_v57 = vld [vmem:[#allocation2 + $0x1d8] sm:$0xff]  ;;  %v4137_v0 = vpack.c.bf16 %v81_v54, %v79_v53 }
  0x35   :  { %4162 = vmatprep.subr.bf16.mxu1 %v4161_v48  ;;  %v196_v58 = vld [vmem:[#allocation2 + $0x1c0] sm:$0xff]  ;;  %v4165_v59 = vpack.c.bf16 %v199_v57, %v197_v56  ;;  %v198_v60 = vld [vmem:[#allocation2 + $0x1d0] sm:$0xff]  ;;  %v4135_v61 = vpack.c.bf16 %v76_v52, %v74_v47  ;;  %v201_v63 = vld [vmem:[#allocation2 + $0x1e8] sm:$0xff] }
  0x36   :  { %v78_v62 = vld [vmem:[#allocation2 + $0xe0] sm:$0xff]  ;;  %v80_v1 = vld [vmem:[#allocation2 + $0xf0] sm:$0xff]  ;;  %v83_v2 = vld [vmem:[#allocation2 + $0x108] sm:$0xff]  ;;  %v4167_v3 = vpack.c.bf16 %v198_v60, %v196_v58 }
  0x37   :  { %4124 = vmatpush1.bf16.msra.mxu0 %v4123_v25  ;;  %v203_v4 = vld [vmem:[#allocation2 + $0x1f8] sm:$0xff]  ;;  %v200_v7 = vld [vmem:[#allocation2 + $0x1e0] sm:$0xff]  ;;  %v202_v8 = vld [vmem:[#allocation2 + $0x1f0] sm:$0xff]  ;;  %v4139_v11 = vpack.c.bf16 %v80_v1, %v78_v62 }
  0x38   :  { %4126 = vmatprep.subr.bf16.mxu0 %v4125_v26  ;;  %4164 = vmatpush1.bf16.msra.mxu1 %v4163_v55  ;;  %v85_v5 = vld [vmem:[#allocation2 + $0x118] sm:$0xff]  ;;  %v4169_v6 = vpack.c.bf16 %v203_v4, %v201_v63  ;;  %v205_v9 = vld [vmem:[#allocation2 + $0x208] sm:$0xff]  ;;  %v82_v13 = vld [vmem:[#allocation2 + $0x100] sm:$0xff]  ;;  %v4171_v16 = vpack.c.bf16 %v202_v8, %v200_v7 }
  0x39   :  { %4166 = vmatprep.subr.bf16.mxu1 %v4165_v59  ;;  %v207_v10 = vld [vmem:[#allocation2 + $0x218] sm:$0xff]  ;;  %v4141_v12 = vpack.c.bf16 %v85_v5, %v83_v2  ;;  %v84_v14 = vld [vmem:[#allocation2 + $0x110] sm:$0xff]  ;;  %v87_v15 = vld [vmem:[#allocation2 + $0x128] sm:$0xff] }
  0x3a   :  { %v89_v17 = vld [vmem:[#allocation2 + $0x138] sm:$0xff]  ;;  %v4173_v18 = vpack.c.bf16 %v207_v10, %v205_v9  ;;  %v204_v19 = vld [vmem:[#allocation2 + $0x200] sm:$0xff]  ;;  %v206_v20 = vld [vmem:[#allocation2 + $0x210] sm:$0xff]  ;;  %v4143_v23 = vpack.c.bf16 %v84_v14, %v82_v13 }
  0x3b   :  { %4128 = vmatpush1.bf16.msra.mxu0 %v4127_v32  ;;  %v209_v21 = vld [vmem:[#allocation2 + $0x228] sm:$0xff]  ;;  %v211_v22 = vld [vmem:[#allocation2 + $0x238] sm:$0xff]  ;;  %v4145_v24 = vpack.c.bf16 %v89_v17, %v87_v15  ;;  %v86_v25 = vld [vmem:[#allocation2 + $0x120] sm:$0xff]  ;;  %v4175_v28 = vpack.c.bf16 %v206_v20, %v204_v19 }
  0x3c   :  { %4130 = vmatprep.subr.bf16.mxu0 %v4129_v36  ;;  %4168 = vmatpush1.bf16.msra.mxu1 %v4167_v3  ;;  %v88_v26 = vld [vmem:[#allocation2 + $0x130] sm:$0xff]  ;;  %v91_v27 = vld [vmem:[#allocation2 + $0x148] sm:$0xff]  ;;  %v93_v29 = vld [vmem:[#allocation2 + $0x158] sm:$0xff]  ;;  %v4177_v30 = vpack.c.bf16 %v211_v22, %v209_v21 }
  0x3d   :  { %4170 = vmatprep.subr.bf16.mxu1 %v4169_v6  ;;  %v208_v31 = vld [vmem:[#allocation2 + $0x220] sm:$0xff]  ;;  %v210_v32 = vld [vmem:[#allocation2 + $0x230] sm:$0xff]  ;;  %v213_v33 = vld [vmem:[#allocation2 + $0x248] sm:$0xff]  ;;  %v4147_v35 = vpack.c.bf16 %v88_v26, %v86_v25  ;;  %v4149_v36 = vpack.c.bf16 %v93_v29, %v91_v27 }
  0x3e   :  { %v215_v34 = vld [vmem:[#allocation2 + $0x258] sm:$0xff]  ;;  %v90_v37 = vld [vmem:[#allocation2 + $0x140] sm:$0xff]  ;;  %v92_v38 = vld [vmem:[#allocation2 + $0x150] sm:$0xff]  ;;  %v4179_v40 = vpack.c.bf16 %v210_v32, %v208_v31 }
  0x3f   :  { %4132 = vmatpush1.bf16.msra.mxu0 %v4131_v46  ;;  %v95_v39 = vld [vmem:[#allocation2 + $0x168] sm:$0xff]  ;;  %v97_v41 = vld [vmem:[#allocation2 + $0x178] sm:$0xff]  ;;  %v4181_v42 = vpack.c.bf16 %v215_v34, %v213_v33  ;;  %v212_v43 = vld [vmem:[#allocation2 + $0x240] sm:$0xff]  ;;  %v4151_v47 = vpack.c.bf16 %v92_v38, %v90_v37 }
  0x40   :  { %4134 = vmatprep.subr.bf16.mxu0 %v4133_v51  ;;  %4172 = vmatpush1.bf16.msra.mxu1 %v4171_v16  ;;  %v214_v44 = vld [vmem:[#allocation2 + $0x250] sm:$0xff]  ;;  %v217_v45 = vld [vmem:[#allocation2 + $0x268] sm:$0xff]  ;;  %v219_v46 = vld [vmem:[#allocation2 + $0x278] sm:$0xff]  ;;  %v4153_v48 = vpack.c.bf16 %v97_v41, %v95_v39 }
  0x41   :  { %4174 = vmatprep.subr.bf16.mxu1 %v4173_v18  ;;  %v94_v49 = vld [vmem:[#allocation2 + $0x160] sm:$0xff]  ;;  %v96_v50 = vld [vmem:[#allocation2 + $0x170] sm:$0xff]  ;;  %v325_v51 = vld [vmem:[#allocation2 + $0x308] sm:$0xff]  ;;  %v4183_v52 = vpack.c.bf16 %v214_v44, %v212_v43  ;;  %v4185_v54 = vpack.c.bf16 %v219_v46, %v217_v45 }
  0x42   :  { %v327_v53 = vld [vmem:[#allocation2 + $0x318] sm:$0xff]  ;;  %v216_v55 = vld [vmem:[#allocation2 + $0x260] sm:$0xff]  ;;  %v218_v56 = vld [vmem:[#allocation2 + $0x270] sm:$0xff]  ;;  %v4155_v59 = vpack.c.bf16 %v96_v50, %v94_v49 }
  0x43   :  { %4136 = vmatpush1.bf16.msra.mxu0 %v4135_v61  ;;  %v221_v57 = vld [vmem:[#allocation2 + $0x288] sm:$0xff]  ;;  %v223_v58 = vld [vmem:[#allocation2 + $0x298] sm:$0xff]  ;;  %v4205_v60 = vpack.c.bf16 %v327_v53, %v325_v51  ;;  %v324_v61 = vld [vmem:[#allocation2 + $0x300] sm:$0xff] }
  0x44   :  { %4138 = vmatprep.subr.bf16.mxu0 %v4137_v0  ;;  %4176 = vmatpush1.bf16.msra.mxu1 %v4175_v28  ;;  %v326_v62 = vld [vmem:[#allocation2 + $0x310] sm:$0xff]  ;;  %v329_v63 = vld [vmem:[#allocation2 + $0x328] sm:$0xff]  ;;  %v4187_v0 = vpack.c.bf16 %v218_v56, %v216_v55  ;;  %v331_v1 = vld [vmem:[#allocation2 + $0x338] sm:$0xff]  ;;  %v4189_v2 = vpack.c.bf16 %v223_v58, %v221_v57 }
  0x45   :  { %4178 = vmatprep.subr.bf16.mxu1 %v4177_v30  ;;  %v220_v3 = vld [vmem:[#allocation2 + $0x280] sm:$0xff]  ;;  %v222_v4 = vld [vmem:[#allocation2 + $0x290] sm:$0xff]  ;;  %v225_v5 = vld [vmem:[#allocation2 + $0x2a8] sm:$0xff]  ;;  %v4207_v8 = vpack.c.bf16 %v326_v62, %v324_v61  ;;  %v4209_v9 = vpack.c.bf16 %v331_v1, %v329_v63 }
  0x46   :  { %v227_v6 = vld [vmem:[#allocation2 + $0x2b8] sm:$0xff]  ;;  %v48_v7 = vld [vmem:[%s5618_s0] sm:$0xff]  ;;  %v4191_v13 = vpack.c.bf16 %v222_v4, %v220_v3  ;;  %v226_v17 = vld [vmem:[#allocation2 + $0x2b0] sm:$0xff]  ;;  %s5103_s0 = smov 64  }
  0x47   :  { %4140 = vmatpush1.bf16.msra.mxu0 %v4139_v11  ;;  %v328_v10 = vld [vmem:[#allocation2 + $0x320] sm:$0xff]  ;;  %v330_v11 = vld [vmem:[#allocation2 + $0x330] sm:$0xff]  ;;  %v335_v14 = vld [vmem:[#allocation2 + $0x358] sm:$0xff]  ;;  %v4193_v15 = vpack.c.bf16 %v227_v6, %v225_v5 }
  0x48   :  { %4142 = vmatprep.subr.bf16.mxu0 %v4141_v12  ;;  %4180 = vmatpush1.bf16.msra.mxu1 %v4179_v40  ;;  %v333_v12 = vld [vmem:[#allocation2 + $0x348] sm:$0xff]  ;;  %v224_v16 = vld [vmem:[#allocation2 + $0x2a0] sm:$0xff]  ;;  %v231_v19 = vld [vmem:[#allocation2 + $0x2d8] sm:$0xff]  ;;  %v4211_v20 = vpack.c.bf16 %v330_v11, %v328_v10 }
  0x49   :  { %4182 = vmatprep.subr.bf16.mxu1 %v4181_v42  ;;  %v229_v18 = vld [vmem:[#allocation2 + $0x2c8] sm:$0xff]  ;;  %v4213_v21 = vpack.c.bf16 %v335_v14, %v333_v12  ;;  %v332_v22 = vld [vmem:[#allocation2 + $0x340] sm:$0xff]  ;;  %v4195_v25 = vpack.c.bf16 %v226_v17, %v224_v16  ;;  %v339_v26 = vld [vmem:[#allocation2 + $0x378] sm:$0xff] }
  0x4a   :  { %v4197_v27 = vpack.c.bf16 %v231_v19, %v229_v18  ;;  %v228_v28 = vld [vmem:[#allocation2 + $0x2c0] sm:$0xff]  ;;  %v230_v29 = vld [vmem:[#allocation2 + $0x2d0] sm:$0xff]  ;;  %v345_v41 = vld [vmem:[#allocation2 + $0x3a8] sm:$0xff] }
  0x4b   :  { %4144 = vmatpush1.bf16.msra.mxu0 %v4143_v23  ;;  %v334_v23 = vld [vmem:[#allocation2 + $0x350] sm:$0xff]  ;;  %v336_v32 = vld [vmem:[#allocation2 + $0x360] sm:$0xff]  ;;  %v4199_v34 = vpack.c.bf16 %v230_v29, %v228_v28  ;;  %v347_v42 = vld [vmem:[#allocation2 + $0x3b8] sm:$0xff]  ;;  %v100_v29 = vlaneseq }
  0x4c   :  { %4146 = vmatprep.subr.bf16.mxu0 %v4145_v24  ;;  %4184 = vmatpush1.bf16.msra.mxu1 %v4183_v52  ;;  %v337_v24 = vld [vmem:[#allocation2 + $0x368] sm:$0xff]  ;;  %v4215_v30 = vpack.c.bf16 %v334_v23, %v332_v22  ;;  %v338_v33 = vld [vmem:[#allocation2 + $0x370] sm:$0xff]  ;;  %v340_v39 = vld [vmem:[#allocation2 + $0x380] sm:$0xff]  ;;  %v4225_v44 = vpack.c.bf16 %v347_v42, %v345_v41 }
  0x4d   :  { %4186 = vmatprep.subr.bf16.mxu1 %v4185_v54  ;;  %v4217_v31 = vpack.c.bf16 %v339_v26, %v337_v24  ;;  %v4219_v37 = vpack.c.bf16 %v338_v33, %v336_v32  ;;  %v342_v40 = vld [vmem:[#allocation2 + $0x390] sm:$0xff]  ;;  %v344_v45 = vld [vmem:[#allocation2 + $0x3a0] sm:$0xff]  ;;  %v353_v53 = vld [vmem:[#allocation2 + $0x3e8] sm:$0xff] }
  0x4e   :  { %v4223_v43 = vpack.c.bf16 %v342_v40, %v340_v39  ;;  %v346_v46 = vld [vmem:[#allocation2 + $0x3b0] sm:$0xff]  ;;  %v348_v51 = vld [vmem:[#allocation2 + $0x3c0] sm:$0xff]  ;;  %v355_v54 = vld [vmem:[#allocation2 + $0x3f8] sm:$0xff] }
  0x4f   :  { %4148 = vmatpush1.bf16.msra.mxu0 %v4147_v35  ;;  %v341_v35 = vld [vmem:[#allocation2 + $0x388] sm:$0xff]  ;;  %v4227_v49 = vpack.c.bf16 %v346_v46, %v344_v45  ;;  %v350_v52 = vld [vmem:[#allocation2 + $0x3d0] sm:$0xff]  ;;  %v4233_v56 = vpack.c.bf16 %v355_v54, %v353_v53  ;;  %v352_v57 = vld [vmem:[#allocation2 + $0x3e0] sm:$0xff] }
  0x50   :  { %4150 = vmatprep.subr.bf16.mxu0 %v4149_v36  ;;  %4188 = vmatpush1.bf16.msra.mxu1 %v4187_v0  ;;  %v343_v36 = vld [vmem:[#allocation2 + $0x398] sm:$0xff]  ;;  %v4231_v55 = vpack.c.bf16 %v350_v52, %v348_v51  ;;  %v354_v58 = vld [vmem:[#allocation2 + $0x3f0] sm:$0xff]  ;;  %v356_v63 = vld [vmem:[#allocation2 + $0x400] sm:$0xff] }
  0x51   :  { %4190 = vmatprep.subr.bf16.mxu1 %v4189_v2  ;;  %v4221_v38 = vpack.c.bf16 %v343_v36, %v341_v35  ;;  %v4235_v61 = vpack.c.bf16 %v354_v58, %v352_v57  ;;  %v358_v0 = vld [vmem:[#allocation2 + $0x410] sm:$0xff]  ;;  %v361_v1 = vld [vmem:[#allocation2 + $0x428] sm:$0xff]  ;;  %v363_v2 = vld [vmem:[#allocation2 + $0x438] sm:$0xff] }
  0x52   :  { %v4239_v3 = vpack.c.bf16 %v358_v0, %v356_v63  ;;  %v4241_v4 = vpack.c.bf16 %v363_v2, %v361_v1  ;;  %v360_v5 = vld [vmem:[#allocation2 + $0x420] sm:$0xff]  ;;  %v362_v6 = vld [vmem:[#allocation2 + $0x430] sm:$0xff]  ;;  %v233_v14 = vld [vmem:[#allocation2 + $0x2e8] sm:$0xff] }
  0x53   :  { %4152 = vmatpush1.bf16.msra.mxu0 %v4151_v47  ;;  %v349_v47 = vld [vmem:[#allocation2 + $0x3c8] sm:$0xff]  ;;  %v364_v11 = vld [vmem:[#allocation2 + $0x440] sm:$0xff]  ;;  %v366_v12 = vld [vmem:[#allocation2 + $0x450] sm:$0xff] }
  0x54   :  { %4154 = vmatprep.subr.bf16.mxu0 %v4153_v48  ;;  %4192 = vmatpush1.bf16.msra.mxu1 %v4191_v13  ;;  %v351_v48 = vld [vmem:[#allocation2 + $0x3d8] sm:$0xff]  ;;  %v4247_v13 = vpack.c.bf16 %v366_v12, %v364_v11  ;;  %v232_v17 = vld [vmem:[#allocation2 + $0x2e0] sm:$0xff]  ;;  %v234_v18 = vld [vmem:[#allocation2 + $0x2f0] sm:$0xff] }
  0x55   :  { %4194 = vmatprep.subr.bf16.mxu1 %v4193_v15  ;;  %v4229_v50 = vpack.c.bf16 %v351_v48, %v349_v47  ;;  %v235_v15 = vld [vmem:[#allocation2 + $0x2f8] sm:$0xff]  ;;  %v369_v19 = vld [vmem:[#allocation2 + $0x468] sm:$0xff]  ;;  %v368_v22 = vld [vmem:[#allocation2 + $0x460] sm:$0xff] }
  0x56   :  { %v4201_v16 = vpack.c.bf16 %v235_v15, %v233_v14  ;;  %v370_v23 = vld [vmem:[#allocation2 + $0x470] sm:$0xff]  ;;  %v458_v26 = vld [vmem:[#allocation2 + $0x488] sm:$0xff]  ;;  %v98_v32 = vld [vmem:[#allocation5] sm:$0x3] }
  0x57   :  { %4156 = vmatpush1.bf16.msra.mxu0 %v4155_v59  ;;  %v357_v59 = vld [vmem:[#allocation2 + $0x408] sm:$0xff]  ;;  %v457_v39 = vld [vmem:[#allocation2 + $0x480] sm:$0xff]  ;;  %v459_v40 = vld [vmem:[#allocation2 + $0x490] sm:$0xff] }
  0x58   :  { %4206 = vmatprep.subr.bf16.mxu0 %v4205_v60  ;;  %4196 = vmatpush1.bf16.msra.mxu1 %v4195_v25  ;;  %v359_v60 = vld [vmem:[#allocation2 + $0x418] sm:$0xff]  ;;  %v4251_v25 = vpack.c.bf16 %v370_v23, %v368_v22  ;;  %v462_v42 = vld [vmem:[#allocation2 + $0x4a8] sm:$0xff]  ;;  %v4255_v45 = vpack.c.bf16 %v459_v40, %v457_v39  ;;  %v461_v48 = vld [vmem:[#allocation2 + $0x4a0] sm:$0xff] }
  0x59   :  { %4198 = vmatprep.subr.bf16.mxu1 %v4197_v27  ;;  %v4237_v62 = vpack.c.bf16 %v359_v60, %v357_v59  ;;  %v460_v27 = vld [vmem:[#allocation2 + $0x498] sm:$0xff]  ;;  %v465_v54 = vld [vmem:[#allocation2 + $0x4c0] sm:$0xff]  ;;  %v483_v15 = vld [vmem:[#allocation2 + $0x550] sm:$0xff] }
  0x5a   :  { %179 = vmatmul.mubr.f32.vlgmr.msra.gmra.mrb[0].mxu0 %v48_v7  ;;  %v365_v7 = vld [vmem:[#allocation2 + $0x448] sm:$0xff]  ;;  %v4253_v28 = vpack.c.bf16 %v460_v27, %v458_v26  ;;  %v468_v51 = vld [vmem:[#allocation2 + $0x4d8] sm:$0xff]  ;;  %v469_v60 = vld [vmem:[#allocation2 + $0x4e0] sm:$0xff] }
  0x5b   :  { %4208 = vmatpush1.bf16.msra.mxu0 %v4207_v8  ;;  %v367_v8 = vld [vmem:[#allocation2 + $0x458] sm:$0xff]  ;;  %v473_v2 = vld [vmem:[#allocation2 + $0x500] sm:$0xff]  ;;  %v490_v22 = vld [vmem:[#allocation2 + $0x588] sm:$0xff] }
  0x5c   :  { %4210 = vmatprep.subr.bf16.mxu0 %v4209_v9  ;;  %4200 = vmatpush1.bf16.msra.mxu1 %v4199_v34  ;;  %v4243_v9 = vpack.c.bf16 %v362_v6, %v360_v5  ;;  %v4245_v10 = vpack.c.bf16 %v367_v8, %v365_v7  ;;  %v472_v57 = vld [vmem:[#allocation2 + $0x4f8] sm:$0xff]  ;;  %v477_v8 = vld [vmem:[#allocation2 + $0x520] sm:$0xff]  ;;  %v491_v27 = vld [vmem:[#allocation2 + $0x590] sm:$0xff] }
  0x5d   :  { %4202 = vmatprep.subr.bf16.mxu1 %v4201_v16  ;;  %v476_v63 = vld [vmem:[#allocation2 + $0x518] sm:$0xff]  ;;  %v481_v14 = vld [vmem:[#allocation2 + $0x540] sm:$0xff]  ;;  %v486_v16 = vld [vmem:[#allocation2 + $0x568] sm:$0xff] }
  0x5e   :  { %v480_v5 = vld [vmem:[#allocation2 + $0x538] sm:$0xff]  ;;  %v489_v26 = vld [vmem:[#allocation2 + $0x580] sm:$0xff] }
  0x5f   :  { %4212 = vmatpush1.bf16.msra.mxu0 %v4211_v20  ;;  %v4203_v20 = vpack.c.bf16 %v234_v18, %v232_v17  ;;  %v484_v11 = vld [vmem:[#allocation2 + $0x558] sm:$0xff]  ;;  %v4279_v18 = vpack.c.bf16 %v483_v15, %v481_v14  ;;  %v497_v40 = vld [vmem:[#allocation2 + $0x5c0] sm:$0xff] }
  0x60   :  { %4214 = vmatprep.subr.bf16.mxu0 %v4213_v21  ;;  %v371_v21 = vld [vmem:[#allocation2 + $0x478] sm:$0xff] }
  0x61   :  { %v4249_v24 = vpack.c.bf16 %v371_v21, %v369_v19  ;;  %4204 = vmatpush1.bf16.msra.mxu1 %v4203_v20  ;;  %v488_v17 = vld [vmem:[#allocation2 + $0x578] sm:$0xff]  ;;  %v485_v20 = vld [vmem:[#allocation2 + $0x560] sm:$0xff]  ;;  %v487_v21 = vld [vmem:[#allocation2 + $0x570] sm:$0xff] }
  0x62   :  { %4254 = vmatprep.subr.bf16.mxu1 %v4253_v28  ;;  %v4281_v19 = vpack.c.bf16 %v488_v17, %v486_v16  ;;  %v492_v23 = vld [vmem:[#allocation2 + $0x598] sm:$0xff]  ;;  %v494_v28 = vld [vmem:[#allocation2 + $0x5a8] sm:$0xff] }
  0x63   :  { %4216 = vmatpush1.bf16.msra.mxu0 %v4215_v30  ;;  %v101_v30 = vshrl.u32 %v100_v29, 7  ;;  %v496_v29 = vld [vmem:[#allocation2 + $0x5b8] sm:$0xff] }
  0x64   :  { %4218 = vmatprep.subr.bf16.mxu0 %v4217_v31 }
  0x65   :  { %v5169_v31 = vsub.s32 0, %v101_v30  ;;  %v5171_v33 = vsub.s32 1, %v101_v30  ;;  %v4287_v30 = vpack.c.bf16 %v491_v27, %v489_v26 }
  0x67   :  { %4220 = vmatpush1.bf16.msra.mxu0 %v4219_v37  ;;  %v103_v34 = vrot.slane %v98_v32, %v5169_v31  ;;  %v107_v35 = vrot.slane %v98_v32, %v5171_v33  ;;  %v4289_v32 = vpack.c.bf16 %v496_v29, %v494_v28 }
  0x68   :  { %4222 = vmatprep.subr.bf16.mxu0 %v4221_v38 }
  0x6b   :  { %4224 = vmatpush1.bf16.msra.mxu0 %v4223_v43  ;;  %v464_v43 = vld [vmem:[#allocation2 + $0x4b8] sm:$0xff] }
  0x6c   :  { %4226 = vmatprep.subr.bf16.mxu0 %v4225_v44  ;;  %v4257_v47 = vpack.c.bf16 %v464_v43, %v462_v42  ;;  %v502_v42 = vld [vmem:[#allocation2 + $0x5e8] sm:$0xff]  ;;  %v504_v43 = vld [vmem:[#allocation2 + $0x5f8] sm:$0xff] }
  0x6f   :  { %4228 = vmatpush1.bf16.msra.mxu0 %v4227_v49  ;;  %v463_v49 = vld [vmem:[#allocation2 + $0x4b0] sm:$0xff] }
  0x70   :  { %4230 = vmatprep.subr.bf16.mxu0 %v4229_v50  ;;  %v466_v50 = vld [vmem:[#allocation2 + $0x4c8] sm:$0xff]  ;;  %v4259_v52 = vpack.c.bf16 %v463_v49, %v461_v48  ;;  %v501_v48 = vld [vmem:[#allocation2 + $0x5e0] sm:$0xff]  ;;  %v503_v49 = vld [vmem:[#allocation2 + $0x5f0] sm:$0xff] }
  0x71   :  { %v4261_v53 = vpack.c.bf16 %v468_v51, %v466_v50  ;;  %v4299_v50 = vpack.c.bf16 %v503_v49, %v501_v48  ;;  %v5101_v51 = vmov 0.0   ;;  %v617_v48 = vld [vmem:[#allocation2 + $0x6d8] sm:$0xff] }
  0x73   :  { %4232 = vmatpush1.bf16.msra.mxu0 %v4231_v55  ;;  %v467_v55 = vld [vmem:[#allocation2 + $0x4d0] sm:$0xff] }
  0x74   :  { %4234 = vmatprep.subr.bf16.mxu0 %v4233_v56  ;;  %v470_v56 = vld [vmem:[#allocation2 + $0x4e8] sm:$0xff]  ;;  %v4263_v58 = vpack.c.bf16 %v467_v55, %v465_v54 }
  0x75   :  { %v4265_v59 = vpack.c.bf16 %v472_v57, %v470_v56 }
  0x77   :  { %4236 = vmatpush1.bf16.msra.mxu0 %v4235_v61  ;;  %v471_v61 = vld [vmem:[#allocation2 + $0x4f0] sm:$0xff] }
  0x78   :  { %4238 = vmatprep.subr.bf16.mxu0 %v4237_v62  ;;  %v474_v62 = vld [vmem:[#allocation2 + $0x508] sm:$0xff]  ;;  %v4267_v0 = vpack.c.bf16 %v471_v61, %v469_v60 }
  0x79   :  { %v4269_v1 = vpack.c.bf16 %v476_v63, %v474_v62 }
  0x7b   :  { %4240 = vmatpush1.bf16.msra.mxu0 %v4239_v3  ;;  %v475_v3 = vld [vmem:[#allocation2 + $0x510] sm:$0xff] }
  0x7c   :  { %4242 = vmatprep.subr.bf16.mxu0 %v4241_v4  ;;  %v478_v4 = vld [vmem:[#allocation2 + $0x528] sm:$0xff]  ;;  %v4271_v6 = vpack.c.bf16 %v475_v3, %v473_v2 }
  0x7d   :  { %v4273_v7 = vpack.c.bf16 %v480_v5, %v478_v4 }
  0x7f   :  { %4244 = vmatpush1.bf16.msra.mxu0 %v4243_v9  ;;  %v479_v9 = vld [vmem:[#allocation2 + $0x530] sm:$0xff] }
  0x80   :  { %4246 = vmatprep.subr.bf16.mxu0 %v4245_v10  ;;  %v482_v10 = vld [vmem:[#allocation2 + $0x548] sm:$0xff]  ;;  %v4275_v12 = vpack.c.bf16 %v479_v9, %v477_v8 }
  0x83   :  { %4248 = vmatpush1.bf16.msra.mxu0 %v4247_v13  ;;  %v4277_v13 = vpack.c.bf16 %v484_v11, %v482_v10 }
  0x84   :  { %4250 = vmatprep.subr.bf16.mxu0 %v4249_v24  ;;  %v4283_v24 = vpack.c.bf16 %v487_v21, %v485_v20 }
  0x87   :  { %4252 = vmatpush1.bf16.msra.mxu0 %v4251_v25  ;;  %v4285_v25 = vpack.c.bf16 %v492_v23, %v490_v22 }
  0x88   :  { %4049 = vmatprep.subr.mxu0 %v5101_v51 }
 0x12d   :  { %v180_v36 = vpop.f32.mrb[0].mxu0 }
 0x12e   :  { %v181_v37 = vadd.f32 %v180_v36, %v103_v34  ;;  %v182_v38 = vpop.f32.mrb[1].mxu0  ;;  %v493_v34 = vld [vmem:[#allocation2 + $0x5a0] sm:$0xff]  ;;  %v498_v36 = vld [vmem:[#allocation2 + $0x5c8] sm:$0xff] }
 0x12f   :  { %v183_v41 = vadd.f32 %v182_v38, %v107_v35  ;;  %v495_v35 = vld [vmem:[#allocation2 + $0x5b0] sm:$0xff] }
 0x130   :  { %v5177_v46 = vmax.f32 %v181_v37, 0.0  ;;  %v500_v37 = vld [vmem:[#allocation2 + $0x5d8] sm:$0xff]  ;;  %v4291_v38 = vpack.c.bf16 %v495_v35, %v493_v34  ;;  %v607_v34 = vld [vmem:[#allocation2 + $0x688] sm:$0xff] }
 0x131   :  { %v5175_v44 = vmax.f32 %v183_v41, 0.0  ;;  %v4293_v39 = vpack.c.bf16 %v500_v37, %v498_v36  ;;  %v499_v41 = vld [vmem:[#allocation2 + $0x5d0] sm:$0xff]  ;;  %v609_v35 = vld [vmem:[#allocation2 + $0x698] sm:$0xff]  ;;  %v606_v36 = vld [vmem:[#allocation2 + $0x680] sm:$0xff] }
 0x132   :  { %v4301_v37 = vpack.c.bf16 %v609_v35, %v607_v34 }
 0x133   :  { %3984 = vmatprep.mubr.msk.f32.mxu1 %vm110_vm0, %v5175_v44  ;;  %3985 = vmatprep.mubr.msk.f32.mxu0 %vm110_vm0, %v5175_v44 }
 0x134   :  { %317 = vmatmul.mubr.f32.vlgmr.msra.gmra.mrb[0].mxu1 %v5177_v46  ;;  %450 = vmatmul.mubr.f32.vlgmr.msra.gmra.mrb[2].mxu0 %v5177_v46 }
 0x135   :  { %4256 = vmatpush1.bf16.msra.mxu1 %v4255_v45  ;;  %3986 = vmatprep.mubr.msk.f32.mxu1 %vm110_vm0, %v5175_v44  ;;  %v4295_v45 = vpack.c.bf16 %v499_v41, %v497_v40  ;;  %v613_v40 = vld [vmem:[#allocation2 + $0x6b8] sm:$0xff] }
 0x136   :  { %4258 = vmatprep.subr.bf16.mxu1 %v4257_v47  ;;  %v4297_v47 = vpack.c.bf16 %v504_v43, %v502_v42  ;;  %4051 = vmatprep.mubr.msk.f32.mxu0 %vm5102_vm1, %v5101_v51  ;;  %v610_v43 = vld [vmem:[#allocation2 + $0x6a0] sm:$0xff] }
 0x139   :  { %4260 = vmatpush1.bf16.msra.mxu1 %v4259_v52  ;;  %v5194_v52 = vld [vmem:[#allocation5 + $0xa] sm:$0x3] }
 0x13a   :  { %4262 = vmatprep.subr.bf16.mxu1 %v4261_v53  ;;  %v373_v53 = vld [vmem:[#allocation5 + $0xc] sm:$0x3]  ;;  %v242_v54 = vrot.slane %v5194_v52, %v5169_v31 }
 0x13b   :  { %v378_v55 = vrot.slane %v373_v53, %v5169_v31  ;;  %v382_v56 = vrot.slane %v373_v53, %v5171_v33  ;;  %v614_v53 = vld [vmem:[#allocation2 + $0x6c0] sm:$0xff] }
 0x13d   :  { %4264 = vmatpush1.bf16.msra.mxu1 %v4263_v58 }
 0x13e   :  { %4266 = vmatprep.subr.bf16.mxu1 %v4265_v59 }
 0x141   :  { %4268 = vmatpush1.bf16.msra.mxu1 %v4267_v0 }
 0x142   :  { %4270 = vmatprep.subr.bf16.mxu1 %v4269_v1  ;;  %v506_v1 = vld [vmem:[#allocation5 + $0xe] sm:$0x3] }
 0x143   :  { %v511_v2 = vrot.slane %v506_v1, %v5169_v31  ;;  %v515_v3 = vrot.slane %v506_v1, %v5171_v33  ;;  %v246_v1 = vrot.slane %v5194_v52, %v5171_v33  ;;  %v591_v52 = vld [vmem:[#allocation2 + $0x608] sm:$0xff] }
 0x145   :  { %4272 = vmatpush1.bf16.msra.mxu1 %v4271_v6 }
 0x146   :  { %4274 = vmatprep.subr.bf16.mxu1 %v4273_v7 }
 0x149   :  { %4276 = vmatpush1.bf16.msra.mxu1 %v4275_v12 }
 0x14a   :  { %4278 = vmatprep.subr.bf16.mxu1 %v4277_v13 }
 0x14d   :  { %4280 = vmatpush1.bf16.msra.mxu1 %v4279_v18 }
 0x14e   :  { %4282 = vmatprep.subr.bf16.mxu1 %v4281_v19 }
 0x151   :  { %4284 = vmatpush1.bf16.msra.mxu1 %v4283_v24 }
 0x152   :  { %4286 = vmatprep.subr.bf16.mxu1 %v4285_v25 }
 0x155   :  { %4288 = vmatpush1.bf16.msra.mxu1 %v4287_v30 }
 0x156   :  { %4290 = vmatprep.subr.bf16.mxu1 %v4289_v32 }
 0x159   :  { %4292 = vmatpush1.bf16.msra.mxu1 %v4291_v38  ;;  %v608_v38 = vld [vmem:[#allocation2 + $0x690] sm:$0xff] }
 0x15a   :  { %4294 = vmatprep.subr.bf16.mxu1 %v4293_v39  ;;  %v611_v39 = vld [vmem:[#allocation2 + $0x6a8] sm:$0xff]  ;;  %v4303_v41 = vpack.c.bf16 %v608_v38, %v606_v36 }
 0x15b   :  { %v4305_v42 = vpack.c.bf16 %v613_v40, %v611_v39  ;;  %v623_v40 = vld [vmem:[#allocation2 + $0x708] sm:$0xff] }
 0x15d   :  { %4296 = vmatpush1.bf16.msra.mxu1 %v4295_v45  ;;  %v612_v45 = vld [vmem:[#allocation2 + $0x6b0] sm:$0xff] }
 0x15e   :  { %4298 = vmatprep.subr.bf16.mxu1 %v4297_v47  ;;  %v615_v47 = vld [vmem:[#allocation2 + $0x6c8] sm:$0xff]  ;;  %v4307_v49 = vpack.c.bf16 %v612_v45, %v610_v43  ;;  %v624_v45 = vld [vmem:[#allocation2 + $0x710] sm:$0xff] }
 0x161   :  { %4300 = vmatpush1.bf16.msra.mxu1 %v4299_v50  ;;  %v4309_v50 = vpack.c.bf16 %v617_v48, %v615_v47  ;;  %v627_v47 = vld [vmem:[#allocation2 + $0x728] sm:$0xff]  ;;  %v629_v48 = vld [vmem:[#allocation2 + $0x738] sm:$0xff] }
 0x162   :  { %4064 = vmatprep.subr.mxu1 %v5101_v51 }
 0x164   :  { %583 = vmatmul.mubr.f32.vlgmr.msra.gmra.mrb[2].mxu1 %v5177_v46 }
 0x165   :  { %4066 = vmatprep.mubr.msk.f32.mxu1 %vm5102_vm1, %v5101_v51 }
 0x207   :  { %v318_v57 = vpop.f32.mrb[0].mxu1  ;;  %v451_v58 = vpop.f32.mrb[2].mxu0 }
 0x208   :  { %v319_v59 = vadd.f32 %v318_v57, %v242_v54  ;;  %v452_v60 = vadd.f32 %v451_v58, %v378_v55  ;;  %v5200_v61 = vpop.f32.mrb[1].mxu1  ;;  %v453_v62 = vpop.f32.mrb[3].mxu0  ;;  %v616_v54 = vld [vmem:[#allocation2 + $0x6d0] sm:$0xff]  ;;  %v619_v55 = vld [vmem:[#allocation2 + $0x6e8] sm:$0xff] }
 0x209   :  { %v5202_v63 = vadd.f32 %v453_v62, %v382_v56  ;;  %v621_v56 = vld [vmem:[#allocation2 + $0x6f8] sm:$0xff]  ;;  %v4311_v57 = vpack.c.bf16 %v616_v54, %v614_v53  ;;  %v628_v53 = vld [vmem:[#allocation2 + $0x730] sm:$0xff]  ;;  %v631_v54 = vld [vmem:[#allocation2 + $0x748] sm:$0xff] }
 0x20a   :  { %v638_v0 = vmul.f32 0.125, %v319_v59  ;;  %802 = vrot.lane.b32.xlu1 %v452_v60, %s5103_s0  ;;  %4050 = vmatpush3.xpose.msk.msra.mxu0 %vm110_vm0, %v452_v60  ;;  %v4313_v58 = vpack.c.bf16 %v621_v56, %v619_v55  ;;  %v618_v59 = vld [vmem:[#allocation2 + $0x6e0] sm:$0xff]  ;;  %v620_v60 = vld [vmem:[#allocation2 + $0x6f0] sm:$0xff]  ;;  %v633_v55 = vld [vmem:[#allocation2 + $0x758] sm:$0xff] }
 0x20b   :  { %4054 = vmatprep.subr.mxu0 %v5101_v51  ;;  %v4315_v62 = vpack.c.bf16 %v620_v60, %v618_v59  ;;  %v632_v59 = vld [vmem:[#allocation2 + $0x750] sm:$0xff]  ;;  %v635_v60 = vld [vmem:[#allocation2 + $0x768] sm:$0xff] }
 0x20d   :  { %4052 = vmatmul.mubr.msk.f32.vlgmr.msra.gmra.mrb[4].mxu0 %vm110_vm0, %v638_v0 }
 0x20e   :  { %800 = vrot.lane.b32.xlu1 %v638_v0, %s5103_s0  ;;  %4056 = vmatprep.mubr.msk.f32.mxu0 %vm5102_vm1, %v5101_v51 }
 0x237   :  { %v584_v4 = vpop.f32.mrb[2].mxu1 }
 0x238   :  { %v585_v5 = vadd.f32 %v584_v4, %v511_v2  ;;  %v586_v6 = vpop.f32.mrb[3].mxu1 }
 0x239   :  { %v5213_v7 = vadd.f32 %v586_v6, %v515_v3  ;;  %v321_v3 = vadd.f32 %v5200_v61, %v246_v1  ;;  %v593_v61 = vld [vmem:[#allocation2 + $0x618] sm:$0xff] }
 0x23a   :  { %4055 = vmatpush3.msra.mxu0 %v585_v5  ;;  %v4317_v6 = vpack.c.bf16 %v593_v61, %v591_v52 }
 0x23b   :  { %4059 = vmatprep.subr.mxu0 %v5101_v51 }
 0x27c   :  { %v803_v18 = vpop.permute.xlu1 %802 }
 0x280   :  { %v801_v20 = vpop.permute.xlu1 %800 }
 0x2e0   :  { %v711_v8 = vpop.f32.mrb[4].mxu0 }
 0x2e1   :  { %v4053_v9 = vpop.f32.mrb[5].mxu0  ;;  %v716_v10 = vsel %vm715_vm2, %v711_v8, -inf }
 0x2e2   :  { %717 = vmax.xlane.f32.xlu0 %v716_v10  ;;  %v592_v9 = vld [vmem:[#allocation2 + $0x610] sm:$0xff]  ;;  %v597_v10 = vld [vmem:[#allocation2 + $0x638] sm:$0xff] }
 0x36f   :  { %v718_v11 = vpop.xlane.xlu0 %717 }
 0x370   :  { %v719_v12 = vsub.f32 %v711_v8, %v718_v11  ;;  %v590_v8 = vld [vmem:[#allocation2 + $0x600] sm:$0xff] }
 0x371   :  { %v4319_v11 = vpack.c.bf16 %v592_v9, %v590_v8  ;;  %v1352_v9 = vld [vmem:[#allocation5 + $0x10] sm:$0x3] }
 0x372   :  { %v720_v13 = vmul.f32 1.442695, %v719_v12 }
 0x374   :  { %4971 = vpow2.f32 %v720_v13  ;;  %v594_v13 = vld [vmem:[#allocation2 + $0x620] sm:$0xff] }
 0x37e   :  { %v4972_v14 = vpop.eup %4971 }
 0x37f   :  { %v722_v15 = vsel %vm715_vm2, %v4972_v14, 0.0 }
 0x380   :  { %723 = vadd.xlane.f32.xlu0 %v722_v15 }
 0x40d   :  { %v724_v16 = vpop.xlane.xlu0 %723 }
 0x40e   :  { %4973 = vrcp.f32 %v724_v16  ;;  %v599_v16 = vld [vmem:[#allocation2 + $0x648] sm:$0xff] }
 0x418   :  { %v4974_v17 = vpop.eup %4973 }
 0x419   :  { %v726_v19 = vmul.f32 %v4974_v17, %v4972_v14  ;;  %v596_v14 = vld [vmem:[#allocation2 + $0x630] sm:$0xff]  ;;  %v601_v17 = vld [vmem:[#allocation2 + $0x658] sm:$0xff] }
 0x41b   :  { %4057 = vmatmul.mubr.msk.f32.vlgmr.msra.gmra.mrb[6].mxu0 %vm715_vm2, %v726_v19  ;;  %v4325_v19 = vpack.c.bf16 %v601_v17, %v599_v16 }
 0x41c   :  { %4060 = vmatpush3.xpose.msk.msra.mxu0 %vm110_vm0, %v803_v18  ;;  %4061 = vmatprep.mubr.msk.f32.mxu0 %vm5102_vm1, %v5101_v51 }
 0x41d   :  { %4302 = vmatprep.subr.bf16.mxu0 %v4301_v37 }
 0x41f   :  { %4062 = vmatmul.mubr.msk.f32.vlgmr.msra.gmra.mrb[8].mxu0 %vm110_vm0, %v801_v20  ;;  %v598_v20 = vld [vmem:[#allocation2 + $0x640] sm:$0xff] }
 0x420   :  { %1033 = vmatprep.mubr.f32.mxu0 %v5101_v51  ;;  %4304 = vmatpush1.bf16.msra.mxu0 %v4303_v41  ;;  %v625_v41 = vld [vmem:[#allocation2 + $0x718] sm:$0xff] }
 0x421   :  { %4306 = vmatprep.subr.bf16.mxu0 %v4305_v42  ;;  %v622_v42 = vld [vmem:[#allocation2 + $0x700] sm:$0xff]  ;;  %v4333_v43 = vpack.c.bf16 %v625_v41, %v623_v40  ;;  %v1432_v41 = vld [vmem:[#allocation2 + $0x7f0] sm:$0xff] }
 0x422   :  { %v1430_v40 = vld [vmem:[#allocation2 + $0x7e0] sm:$0xff] }
 0x424   :  { %4308 = vmatpush1.bf16.msra.mxu0 %v4307_v49  ;;  %v4335_v49 = vpack.c.bf16 %v624_v45, %v622_v42  ;;  %v1435_v42 = vld [vmem:[#allocation2 + $0x808] sm:$0xff]  ;;  %v4363_v45 = vpack.c.bf16 %v1432_v41, %v1430_v40  ;;  %v1556_v40 = vld [vmem:[#allocation2 + $0x900] sm:$0xff] }
 0x425   :  { %4310 = vmatprep.subr.bf16.mxu0 %v4309_v50  ;;  %v4337_v50 = vpack.c.bf16 %v629_v48, %v627_v47  ;;  %v1434_v48 = vld [vmem:[#allocation2 + $0x800] sm:$0xff] }
 0x428   :  { %4312 = vmatpush1.bf16.msra.mxu0 %v4311_v57  ;;  %v4341_v57 = vpack.c.bf16 %v633_v55, %v631_v54  ;;  %v1438_v55 = vld [vmem:[#allocation2 + $0x820] sm:$0xff] }
 0x429   :  { %4314 = vmatprep.subr.bf16.mxu0 %v4313_v58  ;;  %v630_v58 = vld [vmem:[#allocation2 + $0x740] sm:$0xff] }
 0x42c   :  { %4316 = vmatpush1.bf16.msra.mxu0 %v4315_v62  ;;  %v637_v62 = vld [vmem:[#allocation2 + $0x778] sm:$0xff] }
 0x42d   :  { %4318 = vmatprep.subr.bf16.mxu0 %v4317_v6  ;;  %v4345_v1 = vpack.c.bf16 %v637_v62, %v635_v60  ;;  %v1442_v62 = vld [vmem:[#allocation2 + $0x840] sm:$0xff] }
 0x4ee   :  { %v5224_v21 = vpop.f32.mrb[6].mxu0 }
 0x4ef   :  { %v4058_v22 = vpop.f32.mrb[7].mxu0 }
 0x4f0   :  { %v600_v22 = vld [vmem:[#allocation2 + $0x650] sm:$0xff] }
 0x4f2   :  { %v874_v23 = vpop.f32.mrb[8].mxu0 }
 0x4f3   :  { %v4063_v24 = vpop.f32.mrb[9].mxu0  ;;  %v878_v25 = vsel %vm715_vm2, %v874_v23, -inf }
 0x4f4   :  { %879 = vmax.xlane.f32.xlu0 %v878_v25  ;;  %v603_v24 = vld [vmem:[#allocation2 + $0x668] sm:$0xff]  ;;  %v605_v25 = vld [vmem:[#allocation2 + $0x678] sm:$0xff] }
 0x50a   :  { %890 = vrot.lane.b32.xlu0 %v585_v5, %s5103_s0  ;;  %v1114_v5 = vmul.f32 0.125, %v321_v3  ;;  %v636_v3 = vld [vmem:[#allocation2 + $0x770] sm:$0xff] }
 0x581   :  { %v880_v26 = vpop.xlane.xlu0 %879 }
 0x582   :  { %v881_v27 = vsub.f32 %v874_v23, %v880_v26 }
 0x584   :  { %v882_v28 = vmul.f32 1.442695, %v881_v27 }
 0x585   :  { %v891_v29 = vpop.permute.xlu0 %890 }
 0x586   :  { %4975 = vpow2.f32 %v882_v28  ;;  %4065 = vmatpush3.msra.mxu1 %v891_v29  ;;  %v4327_v28 = vpack.c.bf16 %v600_v22, %v598_v20  ;;  %v4329_v29 = vpack.c.bf16 %v605_v25, %v603_v24  ;;  %v1418_v20 = vld [vmem:[#allocation2 + $0x780] sm:$0xff]  ;;  %v1423_v24 = vld [vmem:[#allocation2 + $0x7a8] sm:$0xff]  ;;  %v1425_v25 = vld [vmem:[#allocation2 + $0x7b8] sm:$0xff] }
 0x587   :  { %4069 = vmatprep.subr.mxu1 %v5101_v51 }
 0x590   :  { %v4976_v30 = vpop.eup %4975 }
 0x591   :  { %v884_v32 = vsel %vm715_vm2, %v4976_v30, 0.0 }
 0x592   :  { %885 = vadd.xlane.f32.xlu1 %v884_v32  ;;  %v604_v32 = vld [vmem:[#allocation2 + $0x670] sm:$0xff] }
 0x61f   :  { %v886_v0 = vpop.xlane.xlu1 %885 }
 0x620   :  { %4977 = vrcp.f32 %v886_v0  ;;  %v4343_v0 = vpack.c.bf16 %v632_v59, %v630_v58  ;;  %v1445_v58 = vld [vmem:[#allocation2 + $0x858] sm:$0xff] }
 0x62a   :  { %v4978_v2 = vpop.eup %4977 }
 0x62b   :  { %v888_v4 = vmul.f32 %v4978_v2, %v4976_v30  ;;  %v602_v30 = vld [vmem:[#allocation2 + $0x660] sm:$0xff] }
 0x62c   :  { %v4331_v34 = vpack.c.bf16 %v604_v32, %v602_v30  ;;  %v634_v2 = vld [vmem:[#allocation2 + $0x760] sm:$0xff]  ;;  %v1429_v30 = vld [vmem:[#allocation2 + $0x7d8] sm:$0xff] }
 0x62d   :  { %4067 = vmatmul.mubr.msk.f32.vlgmr.msra.gmra.mrb[4].mxu1 %vm715_vm2, %v888_v4  ;;  %v4347_v4 = vpack.c.bf16 %v636_v3, %v634_v2 }
 0x62e   :  { %4070 = vmatpush3.xpose.msk.msra.mxu1 %vm110_vm0, %v5202_v63  ;;  %4071 = vmatprep.mubr.msk.f32.mxu1 %vm5102_vm1, %v5101_v51  ;;  %v595_v63 = vld [vmem:[#allocation2 + $0x628] sm:$0xff] }
 0x62f   :  { %4074 = vmatprep.subr.mxu1 %v5101_v51  ;;  %v4321_v12 = vpack.c.bf16 %v597_v10, %v595_v63  ;;  %v1357_v63 = vrot.slane %v1352_v9, %v5169_v31  ;;  %v1361_v10 = vrot.slane %v1352_v9, %v5171_v33  ;;  %v1447_v9 = vld [vmem:[#allocation2 + $0x868] sm:$0xff] }
 0x631   :  { %4072 = vmatmul.mubr.msk.f32.vlgmr.msra.gmra.mrb[6].mxu1 %vm110_vm0, %v1114_v5 }
 0x632   :  { %4075 = vmatpush3.msra.mxu1 %v5213_v7  ;;  %4076 = vmatprep.mubr.msk.f32.mxu1 %vm5102_vm1, %v5101_v51  ;;  %v4323_v7 = vpack.c.bf16 %v596_v14, %v594_v13 }
 0x700   :  { %v962_v15 = vpop.f32.mrb[4].mxu1 }
 0x701   :  { %v4068_v18 = vpop.f32.mrb[5].mxu1  ;;  %3993 = vmatmul.mubr.msk.f32.vlgmr.msra.gmra.mrb[10].mxu0 %vm110_vm0, %v962_v15 }
 0x702   :  { %4320 = vmatpush1.bf16.msra.mxu0 %v4319_v11  ;;  %1107 = vmatprep.mubr.f32.mxu0 %v5101_v51 }
 0x703   :  { %4322 = vmatprep.subr.bf16.mxu0 %v4321_v12 }
 0x704   :  { %v1187_v23 = vpop.f32.mrb[6].mxu1 }
 0x705   :  { %v4073_v26 = vpop.f32.mrb[7].mxu1  ;;  %v1191_v27 = vsel %vm715_vm2, %v1187_v23, -inf }
 0x706   :  { %4324 = vmatpush1.bf16.msra.mxu0 %v4323_v7  ;;  %1192 = vmax.xlane.f32.xlu0 %v1191_v27  ;;  %v1419_v7 = vld [vmem:[#allocation2 + $0x788] sm:$0xff]  ;;  %v4353_v27 = vpack.c.bf16 %v1425_v25, %v1423_v24  ;;  %v1456_v24 = vld [vmem:[#allocation2 + $0x8b0] sm:$0xff] }
 0x707   :  { %4326 = vmatprep.subr.bf16.mxu0 %v4325_v19  ;;  %v1421_v19 = vld [vmem:[#allocation2 + $0x798] sm:$0xff]  ;;  %v1459_v25 = vld [vmem:[#allocation2 + $0x8c8] sm:$0xff] }
 0x708   :  { %v4349_v22 = vpack.c.bf16 %v1421_v19, %v1419_v7  ;;  %v1455_v7 = vld [vmem:[#allocation2 + $0x8a8] sm:$0xff]  ;;  %v1457_v19 = vld [vmem:[#allocation2 + $0x8b8] sm:$0xff] }
 0x70a   :  { %4328 = vmatpush1.bf16.msra.mxu0 %v4327_v28  ;;  %v1422_v28 = vld [vmem:[#allocation2 + $0x7a0] sm:$0xff]  ;;  %4350 = vmatprep.subr.bf16.mxu1 %v4349_v22  ;;  %v4385_v22 = vpack.c.bf16 %v1457_v19, %v1455_v7  ;;  %v1582_v7 = vld [vmem:[#allocation2 + $0x9d0] sm:$0xff]  ;;  %v1585_v19 = vld [vmem:[#allocation2 + $0x9e8] sm:$0xff] }
 0x70b   :  { %4330 = vmatprep.subr.bf16.mxu0 %v4329_v29  ;;  %v1424_v29 = vld [vmem:[#allocation2 + $0x7b0] sm:$0xff] }
 0x70e   :  { %4332 = vmatpush1.bf16.msra.mxu0 %v4331_v34  ;;  %v1426_v34 = vld [vmem:[#allocation2 + $0x7c0] sm:$0xff] }
 0x70f   :  { %4334 = vmatprep.subr.bf16.mxu0 %v4333_v43  ;;  %v1437_v43 = vld [vmem:[#allocation2 + $0x818] sm:$0xff] }
 0x710   :  { %v4365_v47 = vpack.c.bf16 %v1437_v43, %v1435_v42  ;;  %v1558_v42 = vld [vmem:[#allocation2 + $0x910] sm:$0xff]  ;;  %v1561_v43 = vld [vmem:[#allocation2 + $0x928] sm:$0xff] }
 0x711   :  { %3994 = vmatmul.mubr.msk.f32.vlgmr.msra.gmra.mrb[10].mxu0 %vm110_vm0, %v5224_v21  ;;  %v626_v21 = vld [vmem:[#allocation2 + $0x720] sm:$0xff] }
 0x712   :  { %1342 = vmatprep.mubr.f32.mxu0 %v5101_v51  ;;  %4336 = vmatpush1.bf16.msra.mxu0 %v4335_v49  ;;  %v4339_v56 = vpack.c.bf16 %v628_v53, %v626_v21  ;;  %v1436_v49 = vld [vmem:[#allocation2 + $0x810] sm:$0xff]  ;;  %v1441_v21 = vld [vmem:[#allocation2 + $0x838] sm:$0xff] }
 0x713   :  { %4338 = vmatprep.subr.bf16.mxu0 %v4337_v50  ;;  %v1439_v50 = vld [vmem:[#allocation2 + $0x828] sm:$0xff]  ;;  %v4367_v53 = vpack.c.bf16 %v1436_v49, %v1434_v48  ;;  %v1560_v49 = vld [vmem:[#allocation2 + $0x920] sm:$0xff] }
 0x714   :  { %v4369_v54 = vpack.c.bf16 %v1441_v21, %v1439_v50  ;;  %v1562_v50 = vld [vmem:[#allocation2 + $0x930] sm:$0xff]  ;;  %v1565_v21 = vld [vmem:[#allocation2 + $0x948] sm:$0xff] }
 0x716   :  { %4340 = vmatpush1.bf16.msra.mxu0 %v4339_v56  ;;  %v1440_v56 = vld [vmem:[#allocation2 + $0x830] sm:$0xff] }
 0x717   :  { %4342 = vmatprep.subr.bf16.mxu0 %v4341_v57  ;;  %v1443_v57 = vld [vmem:[#allocation2 + $0x848] sm:$0xff]  ;;  %v4371_v59 = vpack.c.bf16 %v1440_v56, %v1438_v55  ;;  %v1564_v56 = vld [vmem:[#allocation2 + $0x940] sm:$0xff] }
 0x718   :  { %v4373_v60 = vpack.c.bf16 %v1445_v58, %v1443_v57  ;;  %v1566_v57 = vld [vmem:[#allocation2 + $0x950] sm:$0xff]  ;;  %v1569_v58 = vld [vmem:[#allocation2 + $0x968] sm:$0xff] }
 0x71a   :  { %4344 = vmatpush1.bf16.msra.mxu0 %v4343_v0  ;;  %v1444_v0 = vld [vmem:[#allocation2 + $0x850] sm:$0xff] }
 0x71b   :  { %4346 = vmatprep.subr.bf16.mxu0 %v4345_v1  ;;  %v4375_v1 = vpack.c.bf16 %v1444_v0, %v1442_v62  ;;  %v1568_v0 = vld [vmem:[#allocation2 + $0x960] sm:$0xff] }
 0x71e   :  { %4348 = vmatpush1.bf16.msra.mxu0 %v4347_v4 }
 0x793   :  { %v1193_v35 = vpop.xlane.xlu0 %1192 }
 0x794   :  { %v1194_v36 = vsub.f32 %v1187_v23, %v1193_v35  ;;  %v1420_v23 = vld [vmem:[#allocation2 + $0x790] sm:$0xff] }
 0x795   :  { %v4351_v26 = vpack.c.bf16 %v1420_v23, %v1418_v20  ;;  %v1428_v35 = vld [vmem:[#allocation2 + $0x7d0] sm:$0xff]  ;;  %v1454_v23 = vld [vmem:[#allocation2 + $0x8a0] sm:$0xff] }
 0x796   :  { %v1195_v37 = vmul.f32 1.442695, %v1194_v36  ;;  %v1431_v36 = vld [vmem:[#allocation2 + $0x7e8] sm:$0xff] }
 0x798   :  { %4979 = vpow2.f32 %v1195_v37  ;;  %v1433_v37 = vld [vmem:[#allocation2 + $0x7f8] sm:$0xff] }
 0x7a2   :  { %v4980_v38 = vpop.eup %4979 }
 0x7a3   :  { %v1197_v39 = vsel %vm715_vm2, %v4980_v38, 0.0 }
 0x7a4   :  { %1198 = vadd.xlane.f32.xlu1 %v1197_v39  ;;  %v4361_v39 = vpack.c.bf16 %v1433_v37, %v1431_v36  ;;  %v1464_v36 = vld [vmem:[#allocation2 + $0x8f0] sm:$0xff] }
 0x831   :  { %v1199_v5 = vpop.xlane.xlu1 %1198 }
 0x832   :  { %4981 = vrcp.f32 %v1199_v5 }
 0x83c   :  { %v4982_v52 = vpop.eup %4981 }
 0x83d   :  { %v1201_v61 = vmul.f32 %v4982_v52, %v4980_v38  ;;  %v4359_v38 = vpack.c.bf16 %v1428_v35, %v1426_v34  ;;  %v1462_v35 = vld [vmem:[#allocation2 + $0x8e0] sm:$0xff] }
 0x83e   :  { %v4395_v37 = vpack.c.bf16 %v1464_v36, %v1462_v35  ;;  %v1592_v36 = vld [vmem:[#allocation2 + $0xa20] sm:$0xff] }
 0x83f   :  { %4077 = vmatmul.mubr.msk.f32.vlgmr.msra.gmra.mrb[8].mxu1 %vm715_vm2, %v1201_v61 }
 0x840   :  { %4352 = vmatpush1.bf16.msra.mxu1 %v4351_v26  ;;  %v1461_v26 = vld [vmem:[#allocation2 + $0x8d8] sm:$0xff] }
 0x841   :  { %4354 = vmatprep.subr.bf16.mxu1 %v4353_v27  ;;  %v4387_v27 = vpack.c.bf16 %v1456_v24, %v1454_v23  ;;  %v1584_v24 = vld [vmem:[#allocation2 + $0x9e0] sm:$0xff] }
 0x912   :  { %v1271_v6 = vpop.f32.mrb[8].mxu1 }
 0x913   :  { %v4078_v8 = vpop.f32.mrb[9].mxu1  ;;  %3998 = vmatmul.mubr.msk.f32.vlgmr.msra.gmra.mrb[10].mxu0 %vm110_vm0, %v1271_v6 }
 0x9e6   :  { %v1344_v11 = vpop.f32.mrb[10].mxu0 }
 0x9e7   :  { %v1364_v12 = vadd.f32 %v1357_v63, %v1344_v11  ;;  %v1346_v13 = vpop.f32.mrb[11].mxu0  ;;  %v1449_v63 = vld [vmem:[#allocation2 + $0x878] sm:$0xff]  ;;  %v1446_v11 = vld [vmem:[#allocation2 + $0x860] sm:$0xff] }
 0x9e8   :  { %v1365_v14 = vadd.f32 %v1361_v10, %v1346_v13  ;;  %v4377_v10 = vpack.c.bf16 %v1449_v63, %v1447_v9  ;;  %v1577_v9 = vld [vmem:[#allocation2 + $0x9a8] sm:$0xff]  ;;  %v1579_v63 = vld [vmem:[#allocation2 + $0x9b8] sm:$0xff] }
 0x9e9   :  { %v1366_v16 = vadd.f32 %v1364_v12, %v5177_v46  ;;  %v4355_v46 = vpack.c.bf16 %v1424_v29, %v1422_v28  ;;  %v1448_v12 = vld [vmem:[#allocation2 + $0x870] sm:$0xff]  ;;  %v4389_v28 = vpack.c.bf16 %v1461_v26, %v1459_v25  ;;  %v1458_v29 = vld [vmem:[#allocation2 + $0x8c0] sm:$0xff]  ;;  %v1589_v26 = vld [vmem:[#allocation2 + $0xa08] sm:$0xff] }
 0x9ea   :  { %v5255_v15 = vadd.f32 %v1365_v14, %v5175_v44  ;;  %v1427_v44 = vld [vmem:[#allocation2 + $0x7c8] sm:$0xff]  ;;  %v4379_v13 = vpack.c.bf16 %v1448_v12, %v1446_v11  ;;  %v4417_v11 = vpack.c.bf16 %v1579_v63, %v1577_v9  ;;  %v1576_v12 = vld [vmem:[#allocation2 + $0x9a0] sm:$0xff]  ;;  %v1586_v25 = vld [vmem:[#allocation2 + $0x9f0] sm:$0xff] }
 0x9eb   :  { %v4357_v32 = vpack.c.bf16 %v1429_v30, %v1427_v44  ;;  %4356 = vmatpush1.bf16.msra.mxu1 %v4355_v46  ;;  %v1451_v14 = vld [vmem:[#allocation2 + $0x888] sm:$0xff]  ;;  %v1460_v44 = vld [vmem:[#allocation2 + $0x8d0] sm:$0xff]  ;;  %v1465_v46 = vld [vmem:[#allocation2 + $0x8f8] sm:$0xff] }
 0x9ec   :  { %v1372_v17 = vsel %vm110_vm0, %v5255_v15, 0.0  ;;  %v1463_v30 = vld [vmem:[#allocation2 + $0x8e8] sm:$0xff] }
 0x9ed   :  { %v1373_v18 = vadd.f32 %v1372_v17, %v1366_v16  ;;  %4358 = vmatprep.subr.bf16.mxu1 %v4357_v32  ;;  %v4391_v32 = vpack.c.bf16 %v1460_v44, %v1458_v29  ;;  %v4393_v34 = vpack.c.bf16 %v1465_v46, %v1463_v30  ;;  %v1588_v44 = vld [vmem:[#allocation2 + $0xa00] sm:$0xff]  ;;  %v1590_v30 = vld [vmem:[#allocation2 + $0xa10] sm:$0xff]  ;;  %v1593_v46 = vld [vmem:[#allocation2 + $0xa28] sm:$0xff] }
 0x9ef   :  { %1374 = vadd.xlane.f32.xlu1 %v1373_v18  ;;  %4360 = vmatpush1.bf16.msra.mxu1 %v4359_v38  ;;  %v1452_v18 = vld [vmem:[#allocation2 + $0x890] sm:$0xff]  ;;  %v1557_v38 = vld [vmem:[#allocation2 + $0x908] sm:$0xff] }
 0x9f0   :  { %4362 = vmatprep.subr.bf16.mxu1 %v4361_v39  ;;  %v1559_v39 = vld [vmem:[#allocation2 + $0x918] sm:$0xff] }
 0x9f1   :  { %v4397_v41 = vpack.c.bf16 %v1559_v39, %v1557_v38  ;;  %v1597_v38 = vld [vmem:[#allocation2 + $0xa48] sm:$0xff]  ;;  %v1599_v39 = vld [vmem:[#allocation2 + $0xa58] sm:$0xff] }
 0x9f3   :  { %4364 = vmatpush1.bf16.msra.mxu1 %v4363_v45  ;;  %v1563_v45 = vld [vmem:[#allocation2 + $0x938] sm:$0xff]  ;;  %4398 = vmatprep.subr.bf16.mxu0 %v4397_v41  ;;  %v4437_v41 = vpack.c.bf16 %v1599_v39, %v1597_v38 }
 0x9f4   :  { %4366 = vmatprep.subr.bf16.mxu1 %v4365_v47  ;;  %v4399_v47 = vpack.c.bf16 %v1558_v42, %v1556_v40  ;;  %v4401_v48 = vpack.c.bf16 %v1563_v45, %v1561_v43  ;;  %v1749_v39 = vld [vmem:[#allocation2 + $0xab8] sm:$0xff] }
 0x9f6   :  { %4400 = vmatpush1.bf16.msra.mxu0 %v4399_v47  ;;  %v1369_v47 = vld [vmem:[#allocation5 + $0x12] sm:$0x3] }
 0x9f7   :  { %4368 = vmatpush1.bf16.msra.mxu1 %v4367_v53  ;;  %v1567_v53 = vld [vmem:[#allocation2 + $0x958] sm:$0xff]  ;;  %4402 = vmatprep.subr.bf16.mxu0 %v4401_v48  ;;  %v1371_v48 = vld [vmem:[#allocation5 + $0x14] sm:$0x3] }
 0x9f8   :  { %4370 = vmatprep.subr.bf16.mxu1 %v4369_v54  ;;  %v4403_v54 = vpack.c.bf16 %v1562_v50, %v1560_v49  ;;  %v4405_v55 = vpack.c.bf16 %v1567_v53, %v1565_v21  ;;  %v1399_v49 = vrot.slane %v1369_v47, %v5171_v33  ;;  %v1395_v50 = vrot.slane %v1369_v47, %v5169_v31  ;;  %v1885_v47 = vld [vmem:[#allocation2 + $0xc38] sm:$0xff] }
 0x9fa   :  { %4404 = vmatpush1.bf16.msra.mxu0 %v4403_v54  ;;  %v1412_v54 = vrot.slane %v1371_v48, %v5171_v33 }
 0x9fb   :  { %4372 = vmatpush1.bf16.msra.mxu1 %v4371_v59  ;;  %v1571_v59 = vld [vmem:[#allocation2 + $0x978] sm:$0xff]  ;;  %4406 = vmatprep.subr.bf16.mxu0 %v4405_v55 }
 0x9fc   :  { %4374 = vmatprep.subr.bf16.mxu1 %v4373_v60  ;;  %v4407_v60 = vpack.c.bf16 %v1566_v57, %v1564_v56  ;;  %v4409_v62 = vpack.c.bf16 %v1571_v59, %v1569_v58  ;;  %v1408_v56 = vrot.slane %v1371_v48, %v5169_v31  ;;  %v1882_v48 = vld [vmem:[#allocation2 + $0xc20] sm:$0xff] }
 0x9fe   :  { %4408 = vmatpush1.bf16.msra.mxu0 %v4407_v60 }
 0x9ff   :  { %4376 = vmatpush1.bf16.msra.mxu1 %v4375_v1  ;;  %v1570_v1 = vld [vmem:[#allocation2 + $0x970] sm:$0xff]  ;;  %4410 = vmatprep.subr.bf16.mxu0 %v4409_v62  ;;  %v1596_v62 = vld [vmem:[#allocation2 + $0xa40] sm:$0xff] }
 0xa00   :  { %4378 = vmatprep.subr.bf16.mxu1 %v4377_v10 }
 0xa03   :  { %4380 = vmatpush1.bf16.msra.mxu1 %v4379_v13  ;;  %v1578_v13 = vld [vmem:[#allocation2 + $0x9b0] sm:$0xff] }
 0xa7c   :  { %v1375_v2 = vpop.xlane.xlu1 %1374 }
 0xa7d   :  { %v1377_v3 = vmul.f32 0.0052083335, %v1375_v2  ;;  %v1573_v2 = vld [vmem:[#allocation2 + $0x988] sm:$0xff] }
 0xa7f   :  { %v5260_v4 = vsub.f32 %v1366_v16, %v1377_v3  ;;  %v5263_v5 = vsub.f32 %v5255_v15, %v1377_v3  ;;  %v1453_v15 = vld [vmem:[#allocation2 + $0x898] sm:$0xff]  ;;  %v1450_v16 = vld [vmem:[#allocation2 + $0x880] sm:$0xff] }
 0xa80   :  { %v4381_v17 = vpack.c.bf16 %v1453_v15, %v1451_v14  ;;  %v4383_v20 = vpack.c.bf16 %v1452_v18, %v1450_v16  ;;  %v1575_v3 = vld [vmem:[#allocation2 + $0x998] sm:$0xff]  ;;  %v1581_v14 = vld [vmem:[#allocation2 + $0x9c8] sm:$0xff]  ;;  %v4419_v16 = vpack.c.bf16 %v1578_v13, %v1576_v12  ;;  %v1580_v18 = vld [vmem:[#allocation2 + $0x9c0] sm:$0xff] }
 0xa81   :  { %v1380_v52 = vmul.f32 %v5260_v4, %v5260_v4  ;;  %v1381_v61 = vmul.f32 %v5263_v5, %v5263_v5  ;;  %v1583_v15 = vld [vmem:[#allocation2 + $0x9d8] sm:$0xff] }
 0xa82   :  { %4382 = vmatprep.subr.bf16.mxu1 %v4381_v17  ;;  %v4421_v17 = vpack.c.bf16 %v1583_v15, %v1581_v14  ;;  %v1605_v15 = vld [vmem:[#allocation5 + $0x18] sm:$0x3] }
 0xa83   :  { %v1382_v6 = vsel %vm110_vm0, %v1381_v61, 0.0  ;;  %4384 = vmatpush1.bf16.msra.mxu1 %v4383_v20  ;;  %v4413_v61 = vpack.c.bf16 %v1575_v3, %v1573_v2  ;;  %v1587_v20 = vld [vmem:[#allocation2 + $0x9f8] sm:$0xff]  ;;  %v1601_v2 = vld [vmem:[#allocation2 + $0xa68] sm:$0xff] }
 0xa84   :  { %v1383_v8 = vadd.f32 %v1382_v6, %v1380_v52  ;;  %4386 = vmatprep.subr.bf16.mxu1 %v4385_v22  ;;  %v4411_v52 = vpack.c.bf16 %v1570_v1, %v1568_v0  ;;  %v1572_v6 = vld [vmem:[#allocation2 + $0x980] sm:$0xff]  ;;  %v4423_v22 = vpack.c.bf16 %v1582_v7, %v1580_v18  ;;  %v4425_v23 = vpack.c.bf16 %v1587_v20, %v1585_v19  ;;  %v1598_v0 = vld [vmem:[#allocation2 + $0xa50] sm:$0xff]  ;;  %v1603_v3 = vld [vmem:[#allocation2 + $0xa78] sm:$0xff] }
 0xa85   :  { %v4439_v1 = vpack.c.bf16 %v1598_v0, %v1596_v62  ;;  %v1888_v62 = vld [vmem:[#allocation2 + $0xc50] sm:$0xff] }
 0xa86   :  { %1384 = vadd.xlane.f32.xlu1 %v1383_v8  ;;  %v1574_v8 = vld [vmem:[#allocation2 + $0x990] sm:$0xff]  ;;  %4412 = vmatpush1.bf16.msra.mxu0 %v4411_v52  ;;  %v1600_v52 = vld [vmem:[#allocation2 + $0xa60] sm:$0xff] }
 0xa87   :  { %4388 = vmatpush1.bf16.msra.mxu1 %v4387_v27  ;;  %v4415_v10 = vpack.c.bf16 %v1574_v8, %v1572_v6  ;;  %4414 = vmatprep.subr.bf16.mxu0 %v4413_v61  ;;  %v1591_v27 = vld [vmem:[#allocation2 + $0xa18] sm:$0xff]  ;;  %v1602_v61 = vld [vmem:[#allocation2 + $0xa70] sm:$0xff] }
 0xa88   :  { %4390 = vmatprep.subr.bf16.mxu1 %v4389_v28  ;;  %v4427_v28 = vpack.c.bf16 %v1586_v25, %v1584_v24  ;;  %v4429_v29 = vpack.c.bf16 %v1591_v27, %v1589_v26  ;;  %v4443_v6 = vpack.c.bf16 %v1602_v61, %v1600_v52  ;;  %v1743_v26 = vld [vmem:[#allocation2 + $0xa88] sm:$0xff]  ;;  %v1745_v27 = vld [vmem:[#allocation2 + $0xa98] sm:$0xff] }
 0xa8a   :  { %4416 = vmatpush1.bf16.msra.mxu0 %v4415_v10 }
 0xa8b   :  { %4392 = vmatpush1.bf16.msra.mxu1 %v4391_v32  ;;  %4418 = vmatprep.subr.bf16.mxu0 %v4417_v11  ;;  %v1595_v32 = vld [vmem:[#allocation2 + $0xa38] sm:$0xff] }
 0xa8c   :  { %4394 = vmatprep.subr.bf16.mxu1 %v4393_v34  ;;  %v4431_v34 = vpack.c.bf16 %v1590_v30, %v1588_v44  ;;  %v4433_v35 = vpack.c.bf16 %v1595_v32, %v1593_v46  ;;  %v1744_v44 = vld [vmem:[#allocation2 + $0xa90] sm:$0xff]  ;;  %v1879_v30 = vld [vmem:[#allocation2 + $0xc08] sm:$0xff]  ;;  %v1881_v46 = vld [vmem:[#allocation2 + $0xc18] sm:$0xff] }
 0xa8e   :  { %4420 = vmatpush1.bf16.msra.mxu0 %v4419_v16  ;;  %v1610_v16 = vrot.slane %v1605_v15, %v5169_v31 }
 0xa8f   :  { %4396 = vmatpush1.bf16.msra.mxu1 %v4395_v37  ;;  %4422 = vmatprep.subr.bf16.mxu0 %v4421_v17  ;;  %v1594_v37 = vld [vmem:[#allocation2 + $0xa30] sm:$0xff]  ;;  %v1614_v17 = vrot.slane %v1605_v15, %v5171_v33  ;;  %v1897_v15 = vld [vmem:[#allocation2 + $0xc98] sm:$0xff] }
 0xa90   :  { %v4435_v40 = vpack.c.bf16 %v1594_v37, %v1592_v36  ;;  %v1880_v36 = vld [vmem:[#allocation2 + $0xc10] sm:$0xff]  ;;  %v1747_v37 = vld [vmem:[#allocation2 + $0xaa8] sm:$0xff] }
 0xa92   :  { %4424 = vmatpush1.bf16.msra.mxu0 %v4423_v22 }
 0xa93   :  { %4426 = vmatprep.subr.bf16.mxu0 %v4425_v23 }
 0xa96   :  { %4428 = vmatpush1.bf16.msra.mxu0 %v4427_v28  ;;  %v1742_v28 = vld [vmem:[#allocation2 + $0xa80] sm:$0xff] }
 0xa97   :  { %4430 = vmatprep.subr.bf16.mxu0 %v4429_v29  ;;  %v4445_v29 = vpack.c.bf16 %v1745_v27, %v1743_v26  ;;  %v4447_v32 = vpack.c.bf16 %v1744_v44, %v1742_v28  ;;  %v1765_v26 = vld [vmem:[#allocation2 + $0xb38] sm:$0xff]  ;;  %v1899_v27 = vld [vmem:[#allocation2 + $0xca8] sm:$0xff] }
 0xa98   :  { %v1901_v28 = vld [vmem:[#allocation2 + $0xcb8] sm:$0xff] }
 0xa99   :  { %4446 = vmatprep.subr.bf16.mxu1 %v4445_v29 }
 0xa9a   :  { %4432 = vmatpush1.bf16.msra.mxu0 %v4431_v34  ;;  %v4493_v34 = vpack.c.bf16 %v1881_v46, %v1879_v30  ;;  %v1762_v46 = vld [vmem:[#allocation2 + $0xb20] sm:$0xff] }
 0xa9b   :  { %4434 = vmatprep.subr.bf16.mxu0 %v4433_v35  ;;  %v1878_v35 = vld [vmem:[#allocation2 + $0xc00] sm:$0xff] }
 0xa9c   :  { %v4495_v38 = vpack.c.bf16 %v1880_v36, %v1878_v35  ;;  %v4513_v35 = vpack.c.bf16 %v1901_v28, %v1899_v27  ;;  %v1900_v36 = vld [vmem:[#allocation2 + $0xcb0] sm:$0xff]  ;;  %v1915_v27 = vld [vmem:[#allocation2 + $0xd28] sm:$0xff]  ;;  %v1917_v28 = vld [vmem:[#allocation2 + $0xd38] sm:$0xff] }
 0xa9e   :  { %4436 = vmatpush1.bf16.msra.mxu0 %v4435_v40  ;;  %v1746_v40 = vld [vmem:[#allocation2 + $0xaa0] sm:$0xff] }
 0xa9f   :  { %4438 = vmatprep.subr.bf16.mxu0 %v4437_v41  ;;  %v1748_v41 = vld [vmem:[#allocation2 + $0xab0] sm:$0xff] }
 0xaa2   :  { %4440 = vmatpush1.bf16.msra.mxu0 %v4439_v1 }
 0xb13   :  { %v1385_v42 = vpop.xlane.xlu1 %1384 }
 0xb14   :  { %v1386_v43 = vmul.f32 0.0052083335, %v1385_v42  ;;  %v4449_v42 = vpack.c.bf16 %v1749_v39, %v1747_v37  ;;  %v1767_v37 = vld [vmem:[#allocation2 + $0xb48] sm:$0xff] }
 0xb15   :  { %v1903_v39 = vld [vmem:[#allocation2 + $0xcc8] sm:$0xff] }
 0xb16   :  { %v1387_v45 = vadd.f32 1e-05, %v1386_v43  ;;  %v4451_v43 = vpack.c.bf16 %v1748_v41, %v1746_v40  ;;  %v1905_v40 = vld [vmem:[#allocation2 + $0xcd8] sm:$0xff] }
 0xb18   :  { %4983 = vrsqrt.f32 %v1387_v45  ;;  %v1883_v45 = vld [vmem:[#allocation2 + $0xc28] sm:$0xff] }
 0xb22   :  { %v4984_v21 = vpop.eup %4983 }
 0xb23   :  { %v1390_v53 = vmul.f32 %v4984_v21, %v5263_v5  ;;  %v1389_v55 = vmul.f32 %v4984_v21, %v5260_v4  ;;  %v4441_v5 = vpack.c.bf16 %v1603_v3, %v1601_v2  ;;  %v1467_v4 = vld [vmem:[#allocation5 + $0x16] sm:$0x3]  ;;  %v1751_v21 = vld [vmem:[#allocation2 + $0xac8] sm:$0xff]  ;;  %v1757_v3 = vld [vmem:[#allocation2 + $0xaf8] sm:$0xff] }
 0xb24   :  { %v1472_v8 = vrot.slane %v1467_v4, %v5169_v31  ;;  %v1476_v9 = vrot.slane %v1467_v4, %v5171_v33  ;;  %v1755_v2 = vld [vmem:[#allocation2 + $0xae8] sm:$0xff] }
 0xb25   :  { %v1403_v57 = vmul.f32 %v1399_v49, %v1390_v53  ;;  %v1402_v58 = vmul.f32 %v1395_v50, %v1389_v55  ;;  %4442 = vmatprep.subr.bf16.mxu0 %v4441_v5  ;;  %v4497_v49 = vpack.c.bf16 %v1885_v47, %v1883_v45  ;;  %v1884_v50 = vld [vmem:[#allocation2 + $0xc30] sm:$0xff]  ;;  %v1753_v53 = vld [vmem:[#allocation2 + $0xad8] sm:$0xff]  ;;  %v1754_v5 = vld [vmem:[#allocation2 + $0xae0] sm:$0xff]  ;;  %v4457_v61 = vpack.c.bf16 %v1757_v3, %v1755_v2 }
 0xb26   :  { %4444 = vmatpush1.bf16.msra.mxu0 %v4443_v6  ;;  %v4453_v55 = vpack.c.bf16 %v1753_v53, %v1751_v21  ;;  %v1756_v6 = vld [vmem:[#allocation2 + $0xaf0] sm:$0xff]  ;;  %v1891_v4 = vld [vmem:[#allocation2 + $0xc68] sm:$0xff]  ;;  %v1766_v45 = vld [vmem:[#allocation2 + $0xb40] sm:$0xff] }
 0xb27   :  { %v1416_v59 = vadd.f32 %v1412_v54, %v1403_v57  ;;  %v1415_v60 = vadd.f32 %v1408_v56, %v1402_v58  ;;  %4494 = vmatprep.subr.bf16.mxu0 %v4493_v34  ;;  %v4499_v54 = vpack.c.bf16 %v1884_v50, %v1882_v48  ;;  %v1750_v56 = vld [vmem:[#allocation2 + $0xac0] sm:$0xff]  ;;  %v1752_v57 = vld [vmem:[#allocation2 + $0xad0] sm:$0xff]  ;;  %v1887_v58 = vld [vmem:[#allocation2 + $0xc48] sm:$0xff]  ;;  %v4517_v48 = vpack.c.bf16 %v1905_v40, %v1903_v39 }
 0xb28   :  { %v4455_v0 = vpack.c.bf16 %v1752_v57, %v1750_v56  ;;  %v1898_v34 = vld [vmem:[#allocation2 + $0xca0] sm:$0xff]  ;;  %v1768_v47 = vld [vmem:[#allocation2 + $0xb50] sm:$0xff]  ;;  %v1919_v39 = vld [vmem:[#allocation2 + $0xd48] sm:$0xff] }
 0xb29   :  { %3999 = vmatprep.mubr.msk.f32.mxu1 %vm110_vm0, %v1416_v59  ;;  %v1904_v50 = vld [vmem:[#allocation2 + $0xcd0] sm:$0xff]  ;;  %v4471_v21 = vpack.c.bf16 %v1768_v47, %v1766_v45  ;;  %v1770_v3 = vld [vmem:[#allocation2 + $0xb60] sm:$0xff]  ;;  %v1921_v40 = vld [vmem:[#allocation2 + $0xd58] sm:$0xff] }
 0xb2a   :  { %1547 = vmatmul.mubr.f32.vlgmr.msra.gmra.mrb[10].mxu1 %v1415_v60  ;;  %v1920_v45 = vld [vmem:[#allocation2 + $0xd50] sm:$0xff]  ;;  %v1787_v47 = vld [vmem:[#allocation2 + $0xbe8] sm:$0xff] }
 0xb2b   :  { %4448 = vmatpush1.bf16.msra.mxu1 %v4447_v32  ;;  %v1764_v32 = vld [vmem:[#allocation2 + $0xb30] sm:$0xff] }
 0xb2c   :  { %4450 = vmatprep.subr.bf16.mxu1 %v4449_v42  ;;  %v4467_v41 = vpack.c.bf16 %v1764_v32, %v1762_v46  ;;  %v4515_v42 = vpack.c.bf16 %v1900_v36, %v1898_v34  ;;  %v1916_v46 = vld [vmem:[#allocation2 + $0xd30] sm:$0xff]  ;;  %v1783_v32 = vld [vmem:[#allocation2 + $0xbc8] sm:$0xff]  ;;  %v1782_v36 = vld [vmem:[#allocation2 + $0xbc0] sm:$0xff] }
 0xb2f   :  { %4452 = vmatpush1.bf16.msra.mxu1 %v4451_v43 }
 0xb30   :  { %4454 = vmatprep.subr.bf16.mxu1 %v4453_v55 }
 0xb33   :  { %4456 = vmatpush1.bf16.msra.mxu1 %v4455_v0  ;;  %v1771_v0 = vld [vmem:[#allocation2 + $0xb68] sm:$0xff] }
 0xb34   :  { %4458 = vmatprep.subr.bf16.mxu1 %v4457_v61  ;;  %v1909_v61 = vld [vmem:[#allocation2 + $0xcf8] sm:$0xff] }
 0xbfd   :  { %v1548_v63 = vpop.f32.mrb[10].mxu1 }
 0xbfe   :  { %v1549_v10 = vadd.f32 %v1548_v63, %v1472_v8  ;;  %v1550_v11 = vpop.f32.mrb[11].mxu1  ;;  %v1893_v8 = vld [vmem:[#allocation2 + $0xc78] sm:$0xff]  ;;  %v1890_v63 = vld [vmem:[#allocation2 + $0xc60] sm:$0xff] }
 0xbff   :  { %v1551_v12 = vadd.f32 %v1550_v11, %v1476_v9  ;;  %v4505_v9 = vpack.c.bf16 %v1893_v8, %v1891_v4  ;;  %v1759_v11 = vld [vmem:[#allocation2 + $0xb08] sm:$0xff] }
 0xc00   :  { %v1553_v14 = vmax.f32 %v1549_v10, 0.0  ;;  %v1892_v10 = vld [vmem:[#allocation2 + $0xc70] sm:$0xff] }
 0xc01   :  { %v1554_v13 = vmax.f32 %v1551_v12, 0.0  ;;  %v1761_v12 = vld [vmem:[#allocation2 + $0xb18] sm:$0xff] }
 0xc03   :  { %4000 = vmatprep.mubr.msk.f32.mxu0 %vm110_vm0, %v1554_v13  ;;  %v4459_v13 = vpack.c.bf16 %v1756_v6, %v1754_v5  ;;  %v1772_v5 = vld [vmem:[#allocation2 + $0xb70] sm:$0xff] }
 0xc04   :  { %1685 = vmatmul.mubr.f32.vlgmr.msra.gmra.mrb[12].mxu0 %v1553_v14  ;;  %v1895_v14 = vld [vmem:[#allocation2 + $0xc88] sm:$0xff]  ;;  %v1908_v6 = vld [vmem:[#allocation2 + $0xcf0] sm:$0xff] }
 0xc05   :  { %4496 = vmatpush1.bf16.msra.mxu0 %v4495_v38  ;;  %4460 = vmatpush1.bf16.msra.mxu1 %v4459_v13  ;;  %v1769_v38 = vld [vmem:[#allocation2 + $0xb58] sm:$0xff]  ;;  %v1911_v13 = vld [vmem:[#allocation2 + $0xd08] sm:$0xff] }
 0xc06   :  { %4498 = vmatprep.subr.bf16.mxu0 %v4497_v49  ;;  %v4469_v43 = vpack.c.bf16 %v1769_v38, %v1767_v37  ;;  %v1902_v49 = vld [vmem:[#allocation2 + $0xcc0] sm:$0xff]  ;;  %v1784_v37 = vld [vmem:[#allocation2 + $0xbd0] sm:$0xff] }
 0xc07   :  { %v4519_v53 = vpack.c.bf16 %v1904_v50, %v1902_v49  ;;  %v1786_v50 = vld [vmem:[#allocation2 + $0xbe0] sm:$0xff] }
 0xc09   :  { %4500 = vmatpush1.bf16.msra.mxu0 %v4499_v54 }
 0xcd7   :  { %v1686_v18 = vpop.f32.mrb[12].mxu0 }
 0xcd8   :  { %v1687_v7 = vadd.f32 %v1686_v18, %v1610_v16  ;;  %v1688_v19 = vpop.f32.mrb[13].mxu0  ;;  %v4507_v16 = vpack.c.bf16 %v1892_v10, %v1890_v63  ;;  %v1758_v18 = vld [vmem:[#allocation2 + $0xb00] sm:$0xff]  ;;  %v1777_v63 = vld [vmem:[#allocation2 + $0xb98] sm:$0xff] }
 0xcd9   :  { %v1689_v20 = vadd.f32 %v1688_v19, %v1614_v17  ;;  %v4461_v17 = vpack.c.bf16 %v1761_v12, %v1759_v11  ;;  %v1894_v19 = vld [vmem:[#allocation2 + $0xc80] sm:$0xff]  ;;  %v1776_v12 = vld [vmem:[#allocation2 + $0xb90] sm:$0xff] }
 0xcda   :  { %v5284_v23 = vadd.f32 %v1687_v7, %v1415_v60  ;;  %v1886_v60 = vld [vmem:[#allocation2 + $0xc40] sm:$0xff]  ;;  %v1760_v7 = vld [vmem:[#allocation2 + $0xb10] sm:$0xff] }
 0xcdb   :  { %v5282_v22 = vadd.f32 %v1689_v20, %v1416_v59  ;;  %v1889_v59 = vld [vmem:[#allocation2 + $0xc58] sm:$0xff]  ;;  %v4503_v52 = vpack.c.bf16 %v1888_v62, %v1886_v60  ;;  %v4509_v20 = vpack.c.bf16 %v1897_v15, %v1895_v14  ;;  %v4463_v29 = vpack.c.bf16 %v1760_v7, %v1758_v18  ;;  %4462 = vmatprep.subr.bf16.mxu1 %v4461_v17  ;;  %v1774_v11 = vld [vmem:[#allocation2 + $0xb80] sm:$0xff]  ;;  %v1912_v17 = vld [vmem:[#allocation2 + $0xd10] sm:$0xff] }
 0xcdc   :  { %v4501_v1 = vpack.c.bf16 %v1889_v59, %v1887_v58  ;;  %v4479_v14 = vpack.c.bf16 %v1776_v12, %v1774_v11  ;;  %v1913_v15 = vld [vmem:[#allocation2 + $0xd18] sm:$0xff]  ;;  %v2011_v12 = vld [vmem:[#allocation2 + $0xd80] sm:$0xff] }
 0xcdd   :  { %v1697_v24 = vsel %vm110_vm0, %v5282_v22, 0.0  ;;  %4464 = vmatpush1.bf16.msra.mxu1 %v4463_v29  ;;  %v4525_v18 = vpack.c.bf16 %v1913_v15, %v1911_v13  ;;  %v2013_v13 = vld [vmem:[#allocation2 + $0xd90] sm:$0xff] }
 0xcde   :  { %v1698_v25 = vadd.f32 %v1697_v24, %v5284_v23  ;;  %4502 = vmatprep.subr.bf16.mxu0 %v4501_v1  ;;  %v1896_v24 = vld [vmem:[#allocation2 + $0xc90] sm:$0xff]  ;;  %v1773_v1 = vld [vmem:[#allocation2 + $0xb78] sm:$0xff] }
 0xcdf   :  { %4504 = vmatpush1.bf16.msra.mxu0 %v4503_v52  ;;  %v4511_v44 = vpack.c.bf16 %v1896_v24, %v1894_v19  ;;  %v4473_v2 = vpack.c.bf16 %v1773_v1, %v1771_v0  ;;  %v4475_v52 = vpack.c.bf16 %v1772_v5, %v1770_v3  ;;  %v1779_v19 = vld [vmem:[#allocation2 + $0xba8] sm:$0xff]  ;;  %v1778_v24 = vld [vmem:[#allocation2 + $0xba0] sm:$0xff] }
 0xce0   :  { %1699 = vadd.xlane.f32.xlu1 %v1698_v25  ;;  %4506 = vmatprep.subr.bf16.mxu0 %v4505_v9  ;;  %v1763_v25 = vld [vmem:[#allocation2 + $0xb28] sm:$0xff] }
 0xce1   :  { %v4465_v30 = vpack.c.bf16 %v1765_v26, %v1763_v25  ;;  %v1775_v9 = vld [vmem:[#allocation2 + $0xb88] sm:$0xff]  ;;  %v1780_v26 = vld [vmem:[#allocation2 + $0xbb0] sm:$0xff] }
 0xce2   :  { %v4477_v10 = vpack.c.bf16 %v1777_v63, %v1775_v9  ;;  %v4483_v29 = vpack.c.bf16 %v1780_v26, %v1778_v24  ;;  %v2012_v1 = vld [vmem:[#allocation2 + $0xd88] sm:$0xff]  ;;  %v2015_v24 = vld [vmem:[#allocation2 + $0xda0] sm:$0xff] }
 0xce3   :  { %4508 = vmatpush1.bf16.msra.mxu0 %v4507_v16  ;;  %4466 = vmatprep.subr.bf16.mxu1 %v4465_v30  ;;  %v1910_v16 = vld [vmem:[#allocation2 + $0xd00] sm:$0xff] }
 0xce4   :  { %4510 = vmatprep.subr.bf16.mxu0 %v4509_v20  ;;  %4468 = vmatpush1.bf16.msra.mxu1 %v4467_v41  ;;  %v4527_v7 = vpack.c.bf16 %v1912_v17, %v1910_v16  ;;  %v1781_v20 = vld [vmem:[#allocation2 + $0xbb8] sm:$0xff]  ;;  %v1914_v30 = vld [vmem:[#allocation2 + $0xd20] sm:$0xff]  ;;  %v2016_v16 = vld [vmem:[#allocation2 + $0xda8] sm:$0xff] }
 0xce5   :  { %4470 = vmatprep.subr.bf16.mxu1 %v4469_v43  ;;  %v4481_v25 = vpack.c.bf16 %v1781_v20, %v1779_v19  ;;  %v4531_v34 = vpack.c.bf16 %v1916_v46, %v1914_v30  ;;  %v1918_v41 = vld [vmem:[#allocation2 + $0xd40] sm:$0xff]  ;;  %v4533_v43 = vpack.c.bf16 %v1921_v40, %v1919_v39  ;;  %v2018_v17 = vld [vmem:[#allocation2 + $0xdb8] sm:$0xff]  ;;  %v4543_v19 = vpack.c.bf16 %v2013_v13, %v2011_v12 }
 0xce6   :  { %v4545_v20 = vpack.c.bf16 %v2018_v17, %v2016_v16  ;;  %v2026_v30 = vld [vmem:[#allocation2 + $0xdf8] sm:$0xff]  ;;  %v2027_v40 = vld [vmem:[#allocation2 + $0xe00] sm:$0xff]  ;;  %v2053_v16 = vld [vmem:[#allocation2 + $0xed0] sm:$0xff] }
 0xce7   :  { %4512 = vmatpush1.bf16.msra.mxu0 %v4511_v44  ;;  %v4529_v44 = vpack.c.bf16 %v1917_v28, %v1915_v27  ;;  %v2019_v28 = vld [vmem:[#allocation2 + $0xdc0] sm:$0xff]  ;;  %v2054_v12 = vld [vmem:[#allocation2 + $0xed8] sm:$0xff]  ;;  %v2056_v17 = vld [vmem:[#allocation2 + $0xee8] sm:$0xff] }
 0xce8   :  { %4514 = vmatprep.subr.bf16.mxu0 %v4513_v35  ;;  %4472 = vmatpush1.bf16.msra.mxu1 %v4471_v21  ;;  %v1785_v35 = vld [vmem:[#allocation2 + $0xbd8] sm:$0xff]  ;;  %v1788_v21 = vld [vmem:[#allocation2 + $0xbf0] sm:$0xff] }
 0xce9   :  { %4474 = vmatprep.subr.bf16.mxu1 %v4473_v2  ;;  %v4485_v38 = vpack.c.bf16 %v1785_v35, %v1783_v32  ;;  %v2014_v2 = vld [vmem:[#allocation2 + $0xd98] sm:$0xff]  ;;  %v2025_v35 = vld [vmem:[#allocation2 + $0xdf0] sm:$0xff] }
 0xcea   :  { %v4541_v3 = vpack.c.bf16 %v2014_v2, %v2012_v1  ;;  %v2039_v1 = vld [vmem:[#allocation2 + $0xe60] sm:$0xff]  ;;  %v2041_v2 = vld [vmem:[#allocation2 + $0xe70] sm:$0xff] }
 0xceb   :  { %4516 = vmatpush1.bf16.msra.mxu0 %v4515_v42  ;;  %v4487_v42 = vpack.c.bf16 %v1784_v37, %v1782_v36  ;;  %v2028_v36 = vld [vmem:[#allocation2 + $0xe08] sm:$0xff]  ;;  %v2030_v37 = vld [vmem:[#allocation2 + $0xe18] sm:$0xff] }
 0xcec   :  { %4518 = vmatprep.subr.bf16.mxu0 %v4517_v48  ;;  %4476 = vmatpush1.bf16.msra.mxu1 %v4475_v52  ;;  %v1789_v48 = vld [vmem:[#allocation2 + $0xbf8] sm:$0xff]  ;;  %v4557_v39 = vpack.c.bf16 %v2030_v37, %v2028_v36 }
 0xced   :  { %4478 = vmatprep.subr.bf16.mxu1 %v4477_v10  ;;  %v4489_v49 = vpack.c.bf16 %v1789_v48, %v1787_v47  ;;  %v2031_v48 = vld [vmem:[#allocation2 + $0xe20] sm:$0xff] }
 0xcef   :  { %4520 = vmatpush1.bf16.msra.mxu0 %v4519_v53  ;;  %v1923_v53 = vld [vmem:[#allocation2 + $0xd68] sm:$0xff] }
 0xcf0   :  { %4480 = vmatpush1.bf16.msra.mxu1 %v4479_v14 }
 0xcf1   :  { %4482 = vmatprep.subr.bf16.mxu1 %v4481_v25  ;;  %v2022_v25 = vld [vmem:[#allocation2 + $0xdd8] sm:$0xff] }
 0xcf4   :  { %4484 = vmatpush1.bf16.msra.mxu1 %v4483_v29  ;;  %v2021_v29 = vld [vmem:[#allocation2 + $0xdd0] sm:$0xff] }
 0xcf5   :  { %4486 = vmatprep.subr.bf16.mxu1 %v4485_v38  ;;  %v4551_v46 = vpack.c.bf16 %v2021_v29, %v2019_v28 }
 0xcf8   :  { %4488 = vmatpush1.bf16.msra.mxu1 %v4487_v42  ;;  %v2032_v42 = vld [vmem:[#allocation2 + $0xe28] sm:$0xff] }
 0xcf9   :  { %4490 = vmatprep.subr.bf16.mxu1 %v4489_v49  ;;  %v2033_v49 = vld [vmem:[#allocation2 + $0xe30] sm:$0xff] }
 0xd6d   :  { %v1700_v54 = vpop.xlane.xlu1 %1699 }
 0xd6e   :  { %v1701_v55 = vmul.f32 0.0052083335, %v1700_v54  ;;  %v4535_v54 = vpack.c.bf16 %v1920_v45, %v1918_v41  ;;  %v2029_v41 = vld [vmem:[#allocation2 + $0xe10] sm:$0xff] }
 0xd6f   :  { %v4559_v45 = vpack.c.bf16 %v2029_v41, %v2027_v40 }
 0xd70   :  { %v5290_v56 = vsub.f32 %v5284_v23, %v1701_v55  ;;  %v5293_v57 = vsub.f32 %v5282_v22, %v1701_v55  ;;  %v1907_v23 = vld [vmem:[#allocation2 + $0xce8] sm:$0xff]  ;;  %v1906_v22 = vld [vmem:[#allocation2 + $0xce0] sm:$0xff]  ;;  %v1925_v55 = vld [vmem:[#allocation2 + $0xd78] sm:$0xff] }
 0xd71   :  { %v4521_v4 = vpack.c.bf16 %v1909_v61, %v1907_v23  ;;  %v4523_v8 = vpack.c.bf16 %v1908_v6, %v1906_v22  ;;  %v1694_v61 = vld [vmem:[#allocation5 + $0x1a] sm:$0x3]  ;;  %v1696_v22 = vld [vmem:[#allocation5 + $0x1c] sm:$0x3] }
 0xd72   :  { %v1704_v58 = vmul.f32 %v5290_v56, %v5290_v56  ;;  %v1705_v59 = vmul.f32 %v5293_v57, %v5293_v57  ;;  %v1723_v6 = vrot.slane %v1694_v61, %v5171_v33  ;;  %v1736_v63 = vrot.slane %v1696_v22, %v5171_v33 }
 0xd73   :  { %4522 = vmatprep.subr.bf16.mxu0 %v4521_v4  ;;  %v1719_v4 = vrot.slane %v1694_v61, %v5169_v31  ;;  %v1732_v11 = vrot.slane %v1696_v22, %v5169_v31  ;;  %v2043_v61 = vld [vmem:[#allocation2 + $0xe80] sm:$0xff]  ;;  %v2045_v22 = vld [vmem:[#allocation2 + $0xe90] sm:$0xff] }
 0xd74   :  { %v1706_v60 = vsel %vm110_vm0, %v1705_v59, 0.0  ;;  %4524 = vmatpush1.bf16.msra.mxu0 %v4523_v8  ;;  %v1922_v59 = vld [vmem:[#allocation2 + $0xd60] sm:$0xff] }
 0xd75   :  { %v1707_v62 = vadd.f32 %v1706_v60, %v1704_v58  ;;  %4526 = vmatprep.subr.bf16.mxu0 %v4525_v18  ;;  %v4537_v58 = vpack.c.bf16 %v1925_v55, %v1923_v53  ;;  %v1924_v60 = vld [vmem:[#allocation2 + $0xd70] sm:$0xff]  ;;  %v4563_v53 = vpack.c.bf16 %v2033_v49, %v2031_v48  ;;  %v2035_v55 = vld [vmem:[#allocation2 + $0xe40] sm:$0xff] }
 0xd76   :  { %v4539_v0 = vpack.c.bf16 %v1924_v60, %v1922_v59  ;;  %v2040_v59 = vld [vmem:[#allocation2 + $0xe68] sm:$0xff]  ;;  %v2042_v60 = vld [vmem:[#allocation2 + $0xe78] sm:$0xff] }
 0xd77   :  { %1708 = vadd.xlane.f32.xlu1 %v1707_v62  ;;  %v4491_v62 = vpack.c.bf16 %v1788_v21, %v1786_v50  ;;  %v2036_v50 = vld [vmem:[#allocation2 + $0xe48] sm:$0xff]  ;;  %v2038_v21 = vld [vmem:[#allocation2 + $0xe58] sm:$0xff] }
 0xd78   :  { %4528 = vmatpush1.bf16.msra.mxu0 %v4527_v7 }
 0xd79   :  { %4530 = vmatprep.subr.bf16.mxu0 %v4529_v44  ;;  %4492 = vmatpush1.bf16.msra.mxu1 %v4491_v62  ;;  %v2024_v44 = vld [vmem:[#allocation2 + $0xde8] sm:$0xff] }
 0xd7a   :  { %4542 = vmatprep.subr.bf16.mxu1 %v4541_v3  ;;  %v4553_v32 = vpack.c.bf16 %v2026_v30, %v2024_v44  ;;  %v2044_v3 = vld [vmem:[#allocation2 + $0xe88] sm:$0xff] }
 0xd7c   :  { %4532 = vmatpush1.bf16.msra.mxu0 %v4531_v34  ;;  %v2023_v34 = vld [vmem:[#allocation2 + $0xde0] sm:$0xff] }
 0xd7d   :  { %4534 = vmatprep.subr.bf16.mxu0 %v4533_v43  ;;  %v4555_v38 = vpack.c.bf16 %v2025_v35, %v2023_v34  ;;  %v2034_v43 = vld [vmem:[#allocation2 + $0xe38] sm:$0xff] }
 0xd7e   :  { %v4561_v47 = vpack.c.bf16 %v2034_v43, %v2032_v42 }
 0xd80   :  { %4536 = vmatpush1.bf16.msra.mxu0 %v4535_v54  ;;  %v4565_v54 = vpack.c.bf16 %v2038_v21, %v2036_v50 }
 0xd81   :  { %4538 = vmatprep.subr.bf16.mxu0 %v4537_v58  ;;  %v2037_v58 = vld [vmem:[#allocation2 + $0xe50] sm:$0xff] }
 0xd82   :  { %v4567_v62 = vpack.c.bf16 %v2037_v58, %v2035_v55 }
 0xd84   :  { %4540 = vmatpush1.bf16.msra.mxu0 %v4539_v0  ;;  %v4569_v0 = vpack.c.bf16 %v2042_v60, %v2040_v59 }
 0xd85   :  { %4079 = vmatprep.subr.mxu0 %v5101_v51 }
 0xe04   :  { %v1709_v5 = vpop.xlane.xlu1 %1708 }
 0xe05   :  { %v1710_v23 = vmul.f32 0.0052083335, %v1709_v5  ;;  %v2046_v5 = vld [vmem:[#allocation2 + $0xe98] sm:$0xff] }
 0xe07   :  { %v1711_v52 = vadd.f32 1e-05, %v1710_v23  ;;  %v4571_v23 = vpack.c.bf16 %v2041_v2, %v2039_v1 }
 0xe09   :  { %4985 = vrsqrt.f32 %v1711_v52  ;;  %v4573_v52 = vpack.c.bf16 %v2046_v5, %v2044_v3 }
 0xe13   :  { %v4986_v8 = vpop.eup %4985 }
 0xe14   :  { %v1714_v9 = vmul.f32 %v4986_v8, %v5293_v57  ;;  %v1713_v10 = vmul.f32 %v4986_v8, %v5290_v56  ;;  %v2017_v57 = vld [vmem:[#allocation2 + $0xdb0] sm:$0xff]  ;;  %v2020_v56 = vld [vmem:[#allocation2 + $0xdc8] sm:$0xff]  ;;  %v4575_v8 = vpack.c.bf16 %v2045_v22, %v2043_v61 }
 0xe15   :  { %v4547_v26 = vpack.c.bf16 %v2017_v57, %v2015_v24  ;;  %v4549_v27 = vpack.c.bf16 %v2022_v25, %v2020_v56  ;;  %v2055_v57 = vld [vmem:[#allocation2 + $0xee0] sm:$0xff]  ;;  %v2057_v56 = vld [vmem:[#allocation2 + $0xef0] sm:$0xff] }
 0xe16   :  { %v1727_v14 = vmul.f32 %v1723_v6, %v1714_v9  ;;  %v1726_v15 = vmul.f32 %v1719_v4, %v1713_v10  ;;  %v2048_v6 = vld [vmem:[#allocation2 + $0xea8] sm:$0xff]  ;;  %v2050_v4 = vld [vmem:[#allocation2 + $0xeb8] sm:$0xff]  ;;  %v2049_v10 = vld [vmem:[#allocation2 + $0xeb0] sm:$0xff]  ;;  %v4587_v25 = vpack.c.bf16 %v2057_v56, %v2055_v57 }
 0xe17   :  { %v4577_v9 = vpack.c.bf16 %v2050_v4, %v2048_v6  ;;  %v2171_v57 = vld [vmem:[#allocation2 + $0xfd8] sm:$0xff] }
 0xe18   :  { %v5307_v18 = vadd.f32 %v1736_v63, %v1727_v14  ;;  %v5309_v7 = vadd.f32 %v1732_v11, %v1726_v15  ;;  %v2047_v63 = vld [vmem:[#allocation2 + $0xea0] sm:$0xff]  ;;  %v2052_v11 = vld [vmem:[#allocation2 + $0xec8] sm:$0xff] }
 0xe19   :  { %v4579_v13 = vpack.c.bf16 %v2049_v10, %v2047_v63  ;;  %v4581_v14 = vpack.c.bf16 %v2054_v12, %v2052_v11  ;;  %v2051_v15 = vld [vmem:[#allocation2 + $0xec0] sm:$0xff]  ;;  %v2161_v63 = vld [vmem:[#allocation2 + $0xf88] sm:$0xff]  ;;  %v2163_v10 = vld [vmem:[#allocation2 + $0xf98] sm:$0xff] }
 0xe1a   :  { %4001 = vmatprep.mubr.msk.f32.mxu1 %vm110_vm0, %v5307_v18  ;;  %4002 = vmatprep.mubr.msk.f32.mxu0 %vm110_vm0, %v5307_v18  ;;  %v2160_v11 = vld [vmem:[#allocation2 + $0xf80] sm:$0xff]  ;;  %v4589_v12 = vpack.c.bf16 %v2163_v10, %v2161_v63 }
 0xe1b   :  { %1871 = vmatmul.mubr.f32.vlgmr.msra.gmra.mrb[12].mxu1 %v5309_v7  ;;  %2004 = vmatmul.mubr.f32.vlgmr.msra.gmra.mrb[14].mxu0 %v5309_v7 }
 0xe1c   :  { %4544 = vmatpush1.bf16.msra.mxu1 %v4543_v19  ;;  %4003 = vmatprep.mubr.msk.f32.mxu1 %vm110_vm0, %v5307_v18  ;;  %v2058_v19 = vld [vmem:[#allocation2 + $0xef8] sm:$0xff] }
 0xe1d   :  { %4546 = vmatprep.subr.bf16.mxu1 %v4545_v20  ;;  %4081 = vmatprep.mubr.msk.f32.mxu0 %vm5102_vm1, %v5101_v51  ;;  %v4583_v20 = vpack.c.bf16 %v2053_v16, %v2051_v15  ;;  %v4585_v24 = vpack.c.bf16 %v2058_v19, %v2056_v17  ;;  %v2167_v15 = vld [vmem:[#allocation2 + $0xfb8] sm:$0xff]  ;;  %v2164_v19 = vld [vmem:[#allocation2 + $0xfa0] sm:$0xff] }
 0xe20   :  { %4548 = vmatpush1.bf16.msra.mxu1 %v4547_v26  ;;  %v5325_v26 = vld [vmem:[#allocation5 + $0x1e] sm:$0x3] }
 0xe21   :  { %4550 = vmatprep.subr.bf16.mxu1 %v4549_v27  ;;  %v1927_v27 = vld [vmem:[#allocation5 + $0x20] sm:$0x3]  ;;  %v1796_v28 = vrot.slane %v5325_v26, %v5169_v31 }
 0xe22   :  { %v1932_v29 = vrot.slane %v1927_v27, %v5169_v31  ;;  %v1936_v44 = vrot.slane %v1927_v27, %v5171_v33  ;;  %v2168_v27 = vld [vmem:[#allocation2 + $0xfc0] sm:$0xff] }
 0xe24   :  { %4552 = vmatpush1.bf16.msra.mxu1 %v4551_v46 }
 0xe25   :  { %4554 = vmatprep.subr.bf16.mxu1 %v4553_v32 }
 0xe28   :  { %4556 = vmatpush1.bf16.msra.mxu1 %v4555_v38 }
 0xe29   :  { %4558 = vmatprep.subr.bf16.mxu1 %v4557_v39  ;;  %v2060_v39 = vld [vmem:[#allocation5 + $0x22] sm:$0x3] }
 0xe2a   :  { %v2065_v40 = vrot.slane %v2060_v39, %v5169_v31  ;;  %v2069_v41 = vrot.slane %v2060_v39, %v5171_v33  ;;  %v1800_v39 = vrot.slane %v5325_v26, %v5171_v33  ;;  %v2145_v26 = vld [vmem:[#allocation2 + $0xf08] sm:$0xff] }
 0xe2c   :  { %4560 = vmatpush1.bf16.msra.mxu1 %v4559_v45 }
 0xe2d   :  { %4562 = vmatprep.subr.bf16.mxu1 %v4561_v47 }
 0xe30   :  { %4564 = vmatpush1.bf16.msra.mxu1 %v4563_v53 }
 0xe31   :  { %4566 = vmatprep.subr.bf16.mxu1 %v4565_v54 }
 0xe34   :  { %4568 = vmatpush1.bf16.msra.mxu1 %v4567_v62 }
 0xe35   :  { %4570 = vmatprep.subr.bf16.mxu1 %v4569_v0 }
 0xe38   :  { %4572 = vmatpush1.bf16.msra.mxu1 %v4571_v23 }
 0xe39   :  { %4574 = vmatprep.subr.bf16.mxu1 %v4573_v52 }
 0xe3c   :  { %4576 = vmatpush1.bf16.msra.mxu1 %v4575_v8 }
 0xe3d   :  { %4578 = vmatprep.subr.bf16.mxu1 %v4577_v9 }
 0xe40   :  { %4580 = vmatpush1.bf16.msra.mxu1 %v4579_v13  ;;  %v2162_v13 = vld [vmem:[#allocation2 + $0xf90] sm:$0xff] }
 0xe41   :  { %4582 = vmatprep.subr.bf16.mxu1 %v4581_v14  ;;  %v2165_v14 = vld [vmem:[#allocation2 + $0xfa8] sm:$0xff]  ;;  %v4591_v16 = vpack.c.bf16 %v2162_v13, %v2160_v11 }
 0xe42   :  { %v4593_v17 = vpack.c.bf16 %v2167_v15, %v2165_v14  ;;  %v2177_v15 = vld [vmem:[#allocation2 + $0x1008] sm:$0xff] }
 0xe44   :  { %4584 = vmatpush1.bf16.msra.mxu1 %v4583_v20  ;;  %v2166_v20 = vld [vmem:[#allocation2 + $0xfb0] sm:$0xff] }
 0xe45   :  { %4586 = vmatprep.subr.bf16.mxu1 %v4585_v24  ;;  %v2169_v24 = vld [vmem:[#allocation2 + $0xfc8] sm:$0xff]  ;;  %v4595_v56 = vpack.c.bf16 %v2166_v20, %v2164_v19  ;;  %v2178_v20 = vld [vmem:[#allocation2 + $0x1010] sm:$0xff] }
 0xe48   :  { %4588 = vmatpush1.bf16.msra.mxu1 %v4587_v25  ;;  %v4597_v25 = vpack.c.bf16 %v2171_v57, %v2169_v24  ;;  %v2181_v24 = vld [vmem:[#allocation2 + $0x1028] sm:$0xff]  ;;  %v2183_v57 = vld [vmem:[#allocation2 + $0x1038] sm:$0xff] }
 0xe49   :  { %4094 = vmatprep.subr.mxu1 %v5101_v51 }
 0xe4b   :  { %2137 = vmatmul.mubr.f32.vlgmr.msra.gmra.mrb[14].mxu1 %v5309_v7 }
 0xe4c   :  { %4096 = vmatprep.mubr.msk.f32.mxu1 %vm5102_vm1, %v5101_v51 }
 0xeee   :  { %v1872_v30 = vpop.f32.mrb[12].mxu1  ;;  %v2005_v46 = vpop.f32.mrb[14].mxu0 }
 0xeef   :  { %v1873_v32 = vadd.f32 %v1872_v30, %v1796_v28  ;;  %v2006_v34 = vadd.f32 %v2005_v46, %v1932_v29  ;;  %v5331_v35 = vpop.f32.mrb[13].mxu1  ;;  %v2007_v36 = vpop.f32.mrb[15].mxu0  ;;  %v2170_v28 = vld [vmem:[#allocation2 + $0xfd0] sm:$0xff]  ;;  %v2173_v29 = vld [vmem:[#allocation2 + $0xfe8] sm:$0xff] }
 0xef0   :  { %v5333_v37 = vadd.f32 %v2007_v36, %v1936_v44  ;;  %v2175_v44 = vld [vmem:[#allocation2 + $0xff8] sm:$0xff]  ;;  %v4599_v30 = vpack.c.bf16 %v2170_v28, %v2168_v27  ;;  %v2182_v27 = vld [vmem:[#allocation2 + $0x1030] sm:$0xff] }
 0xef1   :  { %v2192_v38 = vmul.f32 0.125, %v1873_v32  ;;  %4080 = vmatpush3.xpose.msk.msra.mxu0 %vm110_vm0, %v2006_v34  ;;  %v4601_v46 = vpack.c.bf16 %v2175_v44, %v2173_v29  ;;  %v2172_v32 = vld [vmem:[#allocation2 + $0xfe0] sm:$0xff]  ;;  %v2187_v28 = vld [vmem:[#allocation2 + $0x1058] sm:$0xff] }
 0xef2   :  { %4084 = vmatprep.subr.mxu0 %v5101_v51 }
 0xef4   :  { %4082 = vmatmul.mubr.msk.f32.vlgmr.msra.gmra.mrb[16].mxu0 %vm110_vm0, %v2192_v38 }
 0xef5   :  { %4086 = vmatprep.mubr.msk.f32.mxu0 %vm5102_vm1, %v5101_v51 }
 0xf1e   :  { %v2138_v42 = vpop.f32.mrb[14].mxu1 }
 0xf1f   :  { %v2139_v43 = vadd.f32 %v2138_v42, %v2065_v40  ;;  %v2140_v45 = vpop.f32.mrb[15].mxu1 }
 0xf20   :  { %v5342_v47 = vadd.f32 %v2140_v45, %v2069_v41  ;;  %v1875_v41 = vadd.f32 %v5331_v35, %v1800_v39  ;;  %v2147_v35 = vld [vmem:[#allocation2 + $0xf18] sm:$0xff]  ;;  %v2188_v39 = vld [vmem:[#allocation2 + $0x1060] sm:$0xff] }
 0xf21   :  { %4085 = vmatpush3.msra.mxu0 %v2139_v43  ;;  %v4605_v45 = vpack.c.bf16 %v2147_v35, %v2145_v26 }
 0xf22   :  { %4089 = vmatprep.subr.mxu0 %v5101_v51 }
 0xfc7   :  { %v2265_v48 = vpop.f32.mrb[16].mxu0 }
 0xfc8   :  { %v4083_v49 = vpop.f32.mrb[17].mxu0  ;;  %v2269_v50 = vsel %vm715_vm2, %v2265_v48, -inf }
 0xfc9   :  { %2270 = vmax.xlane.f32.xlu1 %v2269_v50  ;;  %v2146_v49 = vld [vmem:[#allocation2 + $0xf10] sm:$0xff]  ;;  %v2151_v50 = vld [vmem:[#allocation2 + $0xf38] sm:$0xff] }
 0xfda   :  { %2355 = vrot.lane.b32.xlu1 %v2006_v34, %s5103_s0  ;;  %v2174_v34 = vld [vmem:[#allocation2 + $0xff0] sm:$0xff] }
 0xfdb   :  { %v4603_v36 = vpack.c.bf16 %v2174_v34, %v2172_v32  ;;  %v2189_v32 = vld [vmem:[#allocation2 + $0x1068] sm:$0xff]  ;;  %v2191_v34 = vld [vmem:[#allocation2 + $0x1078] sm:$0xff] }
0x1056   :  { %v2271_v21 = vpop.xlane.xlu1 %2270 }
0x1057   :  { %v2272_v53 = vsub.f32 %v2265_v48, %v2271_v21  ;;  %v2144_v48 = vld [vmem:[#allocation2 + $0xf00] sm:$0xff] }
0x1058   :  { %v4607_v21 = vpack.c.bf16 %v2146_v49, %v2144_v48  ;;  %v2905_v48 = vld [vmem:[#allocation5 + $0x24] sm:$0x3] }
0x1059   :  { %v2273_v54 = vmul.f32 1.442695, %v2272_v53  ;;  %v2910_v49 = vrot.slane %v2905_v48, %v5169_v31 }
0x105a   :  { %v2356_v0 = vpop.permute.xlu1 %2355 }
0x105b   :  { %4987 = vpow2.f32 %v2273_v54  ;;  %v2148_v54 = vld [vmem:[#allocation2 + $0xf20] sm:$0xff] }
0x1065   :  { %v4988_v55 = vpop.eup %4987 }
0x1066   :  { %v2275_v58 = vsel %vm715_vm2, %v4988_v55, 0.0 }
0x1067   :  { %2276 = vadd.xlane.f32.xlu0 %v2275_v58 }
0x107d   :  { %2353 = vrot.lane.b32.xlu0 %v2192_v38, %s5103_s0 }
0x10f4   :  { %v2277_v59 = vpop.xlane.xlu0 %2276 }
0x10f5   :  { %4989 = vrcp.f32 %v2277_v59  ;;  %v2153_v59 = vld [vmem:[#allocation2 + $0xf48] sm:$0xff] }
0x10f8   :  { %v2354_v1 = vpop.permute.xlu0 %2353 }
0x10ff   :  { %v4990_v60 = vpop.eup %4989 }
0x1100   :  { %v2279_v62 = vmul.f32 %v4990_v60, %v4988_v55  ;;  %v2150_v55 = vld [vmem:[#allocation2 + $0xf30] sm:$0xff]  ;;  %v2155_v60 = vld [vmem:[#allocation2 + $0xf58] sm:$0xff] }
0x1102   :  { %4087 = vmatmul.mubr.msk.f32.vlgmr.msra.gmra.mrb[18].mxu0 %vm715_vm2, %v2279_v62 }
0x1103   :  { %4090 = vmatpush3.xpose.msk.msra.mxu0 %vm110_vm0, %v2356_v0  ;;  %4091 = vmatprep.mubr.msk.f32.mxu0 %vm5102_vm1, %v5101_v51  ;;  %v4613_v0 = vpack.c.bf16 %v2155_v60, %v2153_v59 }
0x1104   :  { %4590 = vmatprep.subr.bf16.mxu0 %v4589_v12 }
0x1106   :  { %4092 = vmatmul.mubr.msk.f32.vlgmr.msra.gmra.mrb[20].mxu0 %vm110_vm0, %v2354_v1  ;;  %v2152_v1 = vld [vmem:[#allocation2 + $0xf40] sm:$0xff] }
0x1107   :  { %2586 = vmatprep.mubr.f32.mxu0 %v5101_v51  ;;  %4592 = vmatpush1.bf16.msra.mxu0 %v4591_v16  ;;  %v2179_v16 = vld [vmem:[#allocation2 + $0x1018] sm:$0xff] }
0x1108   :  { %4594 = vmatprep.subr.bf16.mxu0 %v4593_v17  ;;  %v2176_v17 = vld [vmem:[#allocation2 + $0x1000] sm:$0xff]  ;;  %v4621_v19 = vpack.c.bf16 %v2179_v16, %v2177_v15  ;;  %v2984_v15 = vld [vmem:[#allocation2 + $0x10f0] sm:$0xff]  ;;  %v2987_v16 = vld [vmem:[#allocation2 + $0x1108] sm:$0xff] }
0x110b   :  { %4596 = vmatpush1.bf16.msra.mxu0 %v4595_v56  ;;  %v4623_v56 = vpack.c.bf16 %v2178_v20, %v2176_v17  ;;  %v2989_v17 = vld [vmem:[#allocation2 + $0x1118] sm:$0xff] }
0x110c   :  { %4598 = vmatprep.subr.bf16.mxu0 %v4597_v25  ;;  %v4625_v25 = vpack.c.bf16 %v2183_v57, %v2181_v24  ;;  %v4653_v20 = vpack.c.bf16 %v2989_v17, %v2987_v16  ;;  %v2986_v24 = vld [vmem:[#allocation2 + $0x1100] sm:$0xff]  ;;  %v2988_v57 = vld [vmem:[#allocation2 + $0x1110] sm:$0xff]  ;;  %v3113_v16 = vld [vmem:[#allocation2 + $0x1228] sm:$0xff] }
0x110d   :  { %v3115_v17 = vld [vmem:[#allocation2 + $0x1238] sm:$0xff] }
0x110f   :  { %4600 = vmatpush1.bf16.msra.mxu0 %v4599_v30  ;;  %v2184_v30 = vld [vmem:[#allocation2 + $0x1040] sm:$0xff] }
0x1110   :  { %4602 = vmatprep.subr.bf16.mxu0 %v4601_v46  ;;  %v2186_v46 = vld [vmem:[#allocation2 + $0x1050] sm:$0xff] }
0x1113   :  { %4604 = vmatpush1.bf16.msra.mxu0 %v4603_v36  ;;  %v4631_v36 = vpack.c.bf16 %v2186_v46, %v2184_v30 }
0x1114   :  { %4606 = vmatprep.subr.bf16.mxu0 %v4605_v45 }
0x11d5   :  { %v5355_v2 = vpop.f32.mrb[18].mxu0 }
0x11d6   :  { %v4088_v3 = vpop.f32.mrb[19].mxu0 }
0x11d7   :  { %v2154_v3 = vld [vmem:[#allocation2 + $0xf50] sm:$0xff] }
0x11d9   :  { %v2427_v5 = vpop.f32.mrb[20].mxu0 }
0x11da   :  { %v4093_v23 = vpop.f32.mrb[21].mxu0  ;;  %v2431_v52 = vsel %vm715_vm2, %v2427_v5, -inf }
0x11db   :  { %2432 = vmax.xlane.f32.xlu1 %v2431_v52  ;;  %v2157_v23 = vld [vmem:[#allocation2 + $0xf68] sm:$0xff]  ;;  %v2159_v52 = vld [vmem:[#allocation2 + $0xf78] sm:$0xff] }
0x11ec   :  { %2443 = vrot.lane.b32.xlu1 %v2139_v43, %s5103_s0  ;;  %v2667_v43 = vmul.f32 0.125, %v1875_v41 }
0x1268   :  { %v2433_v61 = vpop.xlane.xlu1 %2432 }
0x1269   :  { %v2434_v22 = vsub.f32 %v2427_v5, %v2433_v61 }
0x126b   :  { %v2435_v6 = vmul.f32 1.442695, %v2434_v22 }
0x126c   :  { %v2444_v4 = vpop.permute.xlu1 %2443 }
0x126d   :  { %4991 = vpow2.f32 %v2435_v6  ;;  %4095 = vmatpush3.msra.mxu1 %v2444_v4  ;;  %v4615_v6 = vpack.c.bf16 %v2154_v3, %v2152_v1  ;;  %v4617_v4 = vpack.c.bf16 %v2159_v52, %v2157_v23  ;;  %v2972_v3 = vld [vmem:[#allocation2 + $0x1090] sm:$0xff]  ;;  %v2977_v23 = vld [vmem:[#allocation2 + $0x10b8] sm:$0xff] }
0x126e   :  { %4099 = vmatprep.subr.mxu1 %v5101_v51 }
0x1277   :  { %v4992_v8 = vpop.eup %4991 }
0x1278   :  { %v2437_v9 = vsel %vm715_vm2, %v4992_v8, 0.0 }
0x1279   :  { %2438 = vadd.xlane.f32.xlu0 %v2437_v9  ;;  %v2158_v9 = vld [vmem:[#allocation2 + $0xf70] sm:$0xff] }
0x1306   :  { %v2439_v38 = vpop.xlane.xlu0 %2438 }
0x1307   :  { %4993 = vrcp.f32 %v2439_v38  ;;  %v4633_v38 = vpack.c.bf16 %v2191_v34, %v2189_v32  ;;  %v2994_v32 = vld [vmem:[#allocation2 + $0x1140] sm:$0xff]  ;;  %v2996_v34 = vld [vmem:[#allocation2 + $0x1150] sm:$0xff] }
0x1311   :  { %v4994_v40 = vpop.eup %4993 }
0x1312   :  { %v2441_v42 = vmul.f32 %v4994_v40, %v4992_v8  ;;  %v2156_v8 = vld [vmem:[#allocation2 + $0xf60] sm:$0xff]  ;;  %v2190_v40 = vld [vmem:[#allocation2 + $0x1070] sm:$0xff] }
0x1313   :  { %v4619_v63 = vpack.c.bf16 %v2158_v9, %v2156_v8  ;;  %v4635_v41 = vpack.c.bf16 %v2190_v40, %v2188_v39  ;;  %v2978_v9 = vld [vmem:[#allocation2 + $0x10c0] sm:$0xff] }
0x1314   :  { %4097 = vmatmul.mubr.msk.f32.vlgmr.msra.gmra.mrb[16].mxu1 %vm715_vm2, %v2441_v42 }
0x1315   :  { %4100 = vmatpush3.xpose.msk.msra.mxu1 %vm110_vm0, %v5333_v37  ;;  %4101 = vmatprep.mubr.msk.f32.mxu1 %vm5102_vm1, %v5101_v51  ;;  %v2149_v37 = vld [vmem:[#allocation2 + $0xf28] sm:$0xff] }
0x1316   :  { %4104 = vmatprep.subr.mxu1 %v5101_v51  ;;  %v4609_v53 = vpack.c.bf16 %v2151_v50, %v2149_v37  ;;  %v2914_v37 = vrot.slane %v2905_v48, %v5171_v33  ;;  %v3001_v48 = vld [vmem:[#allocation2 + $0x1178] sm:$0xff] }
0x1318   :  { %4102 = vmatmul.mubr.msk.f32.vlgmr.msra.gmra.mrb[18].mxu1 %vm110_vm0, %v2667_v43 }
0x1319   :  { %4105 = vmatpush3.msra.mxu1 %v5342_v47  ;;  %4106 = vmatprep.mubr.msk.f32.mxu1 %vm5102_vm1, %v5101_v51  ;;  %v4611_v47 = vpack.c.bf16 %v2150_v55, %v2148_v54 }
0x13e7   :  { %v2515_v58 = vpop.f32.mrb[16].mxu1 }
0x13e8   :  { %v4098_v62 = vpop.f32.mrb[17].mxu1  ;;  %4010 = vmatmul.mubr.msk.f32.vlgmr.msra.gmra.mrb[22].mxu0 %vm110_vm0, %v2515_v58 }
0x13e9   :  { %4608 = vmatpush1.bf16.msra.mxu0 %v4607_v21  ;;  %2660 = vmatprep.mubr.f32.mxu0 %v5101_v51  ;;  %v2971_v62 = vld [vmem:[#allocation2 + $0x1088] sm:$0xff] }
0x13ea   :  { %4610 = vmatprep.subr.bf16.mxu0 %v4609_v53 }
0x13eb   :  { %v2740_v5 = vpop.f32.mrb[18].mxu1 }
0x13ec   :  { %v4103_v61 = vpop.f32.mrb[19].mxu1  ;;  %v2744_v22 = vsel %vm715_vm2, %v2740_v5, -inf }
0x13ed   :  { %4612 = vmatpush1.bf16.msra.mxu0 %v4611_v47  ;;  %2745 = vmax.xlane.f32.xlu0 %v2744_v22  ;;  %v2973_v47 = vld [vmem:[#allocation2 + $0x1098] sm:$0xff]  ;;  %v2974_v22 = vld [vmem:[#allocation2 + $0x10a0] sm:$0xff] }
0x13ee   :  { %4614 = vmatprep.subr.bf16.mxu0 %v4613_v0  ;;  %v2970_v0 = vld [vmem:[#allocation2 + $0x1080] sm:$0xff]  ;;  %v4637_v1 = vpack.c.bf16 %v2973_v47, %v2971_v62  ;;  %v3009_v62 = vld [vmem:[#allocation2 + $0x11b8] sm:$0xff] }
0x13ef   :  { %v4639_v52 = vpack.c.bf16 %v2972_v3, %v2970_v0  ;;  %v3008_v3 = vld [vmem:[#allocation2 + $0x11b0] sm:$0xff] }
0x13f0   :  { %4638 = vmatprep.subr.bf16.mxu1 %v4637_v1  ;;  %v3006_v1 = vld [vmem:[#allocation2 + $0x11a0] sm:$0xff] }
0x13f1   :  { %4616 = vmatpush1.bf16.msra.mxu0 %v4615_v6  ;;  %v2976_v6 = vld [vmem:[#allocation2 + $0x10b0] sm:$0xff] }
0x13f2   :  { %4618 = vmatprep.subr.bf16.mxu0 %v4617_v4  ;;  %v2981_v4 = vld [vmem:[#allocation2 + $0x10d8] sm:$0xff] }
0x13f5   :  { %4620 = vmatpush1.bf16.msra.mxu0 %v4619_v63  ;;  %v2980_v63 = vld [vmem:[#allocation2 + $0x10d0] sm:$0xff] }
0x13f6   :  { %4622 = vmatprep.subr.bf16.mxu0 %v4621_v19 }
0x13f8   :  { %4011 = vmatmul.mubr.msk.f32.vlgmr.msra.gmra.mrb[22].mxu0 %vm110_vm0, %v5355_v2  ;;  %v2180_v2 = vld [vmem:[#allocation2 + $0x1020] sm:$0xff] }
0x13f9   :  { %2895 = vmatprep.mubr.f32.mxu0 %v5101_v51  ;;  %v2185_v51 = vld [vmem:[#allocation2 + $0x1048] sm:$0xff]  ;;  %4624 = vmatpush1.bf16.msra.mxu0 %v4623_v56  ;;  %v4627_v29 = vpack.c.bf16 %v2182_v27, %v2180_v2  ;;  %v4655_v2 = vpack.c.bf16 %v2988_v57, %v2986_v24  ;;  %v3112_v24 = vld [vmem:[#allocation2 + $0x1220] sm:$0xff]  ;;  %v3114_v57 = vld [vmem:[#allocation2 + $0x1230] sm:$0xff] }
0x13fa   :  { %4626 = vmatprep.subr.bf16.mxu0 %v4625_v25  ;;  %v4629_v44 = vpack.c.bf16 %v2187_v28, %v2185_v51  ;;  %v2991_v56 = vld [vmem:[#allocation2 + $0x1128] sm:$0xff]  ;;  %v2993_v25 = vld [vmem:[#allocation2 + $0x1138] sm:$0xff]  ;;  %v2990_v51 = vld [vmem:[#allocation2 + $0x1120] sm:$0xff] }
0x13fb   :  { %v4657_v27 = vpack.c.bf16 %v2993_v25, %v2991_v56  ;;  %v2992_v28 = vld [vmem:[#allocation2 + $0x1130] sm:$0xff]  ;;  %v3117_v56 = vld [vmem:[#allocation2 + $0x1248] sm:$0xff]  ;;  %v3119_v25 = vld [vmem:[#allocation2 + $0x1258] sm:$0xff] }
0x13fc   :  { %v4659_v30 = vpack.c.bf16 %v2992_v28, %v2990_v51  ;;  %v3116_v51 = vld [vmem:[#allocation2 + $0x1240] sm:$0xff]  ;;  %v3118_v28 = vld [vmem:[#allocation2 + $0x1250] sm:$0xff] }
0x13fd   :  { %4628 = vmatpush1.bf16.msra.mxu0 %v4627_v29  ;;  %v2995_v29 = vld [vmem:[#allocation2 + $0x1148] sm:$0xff] }
0x13fe   :  { %4630 = vmatprep.subr.bf16.mxu0 %v4629_v44  ;;  %v2997_v44 = vld [vmem:[#allocation2 + $0x1158] sm:$0xff] }
0x13ff   :  { %v4661_v46 = vpack.c.bf16 %v2997_v44, %v2995_v29  ;;  %v3121_v29 = vld [vmem:[#allocation2 + $0x1268] sm:$0xff]  ;;  %v3123_v44 = vld [vmem:[#allocation2 + $0x1278] sm:$0xff] }
0x1401   :  { %4632 = vmatpush1.bf16.msra.mxu0 %v4631_v36  ;;  %v4663_v36 = vpack.c.bf16 %v2996_v34, %v2994_v32  ;;  %v3120_v32 = vld [vmem:[#allocation2 + $0x1260] sm:$0xff]  ;;  %v3122_v34 = vld [vmem:[#allocation2 + $0x1270] sm:$0xff] }
0x1402   :  { %4634 = vmatprep.subr.bf16.mxu0 %v4633_v38 }
0x1405   :  { %4636 = vmatpush1.bf16.msra.mxu0 %v4635_v41 }
0x147a   :  { %v2746_v10 = vpop.xlane.xlu0 %2745 }
0x147b   :  { %v2747_v11 = vsub.f32 %v2740_v5, %v2746_v10  ;;  %v2975_v5 = vld [vmem:[#allocation2 + $0x10a8] sm:$0xff] }
0x147c   :  { %v4641_v61 = vpack.c.bf16 %v2977_v23, %v2975_v5  ;;  %v2983_v10 = vld [vmem:[#allocation2 + $0x10e8] sm:$0xff]  ;;  %v3013_v23 = vld [vmem:[#allocation2 + $0x11d8] sm:$0xff] }
0x147d   :  { %v2748_v12 = vmul.f32 1.442695, %v2747_v11  ;;  %v2985_v11 = vld [vmem:[#allocation2 + $0x10f8] sm:$0xff]  ;;  %v3011_v5 = vld [vmem:[#allocation2 + $0x11c8] sm:$0xff] }
0x147f   :  { %4995 = vpow2.f32 %v2748_v12  ;;  %v4647_v12 = vpack.c.bf16 %v2980_v63, %v2978_v9  ;;  %v3014_v9 = vld [vmem:[#allocation2 + $0x11e0] sm:$0xff]  ;;  %v3016_v63 = vld [vmem:[#allocation2 + $0x11f0] sm:$0xff] }
0x1489   :  { %v4996_v13 = vpop.eup %4995 }
0x148a   :  { %v2750_v14 = vsel %vm715_vm2, %v4996_v13, 0.0 }
0x148b   :  { %2751 = vadd.xlane.f32.xlu0 %v2750_v14  ;;  %v2982_v14 = vld [vmem:[#allocation2 + $0x10e0] sm:$0xff] }
0x148c   :  { %v4651_v19 = vpack.c.bf16 %v2984_v15, %v2982_v14  ;;  %v3110_v15 = vld [vmem:[#allocation2 + $0x1210] sm:$0xff] }
0x1518   :  { %v2752_v42 = vpop.xlane.xlu0 %2751 }
0x1519   :  { %4997 = vrcp.f32 %v2752_v42 }
0x1523   :  { %v4998_v43 = vpop.eup %4997 }
0x1524   :  { %v2754_v26 = vmul.f32 %v4998_v43, %v4996_v13  ;;  %v4649_v13 = vpack.c.bf16 %v2985_v11, %v2983_v10  ;;  %v4683_v10 = vpack.c.bf16 %v3016_v63, %v3014_v9  ;;  %v3109_v11 = vld [vmem:[#allocation2 + $0x1208] sm:$0xff]  ;;  %v3144_v9 = vld [vmem:[#allocation2 + $0x1320] sm:$0xff]  ;;  %v3146_v63 = vld [vmem:[#allocation2 + $0x1330] sm:$0xff] }
0x1526   :  { %4107 = vmatmul.mubr.msk.f32.vlgmr.msra.gmra.mrb[20].mxu1 %vm715_vm2, %v2754_v26 }
0x1527   :  { %4640 = vmatpush1.bf16.msra.mxu1 %v4639_v52  ;;  %v4675_v52 = vpack.c.bf16 %v3008_v3, %v3006_v1  ;;  %v3136_v1 = vld [vmem:[#allocation2 + $0x12e0] sm:$0xff]  ;;  %v3138_v3 = vld [vmem:[#allocation2 + $0x12f0] sm:$0xff] }
0x1528   :  { %4642 = vmatprep.subr.bf16.mxu1 %v4641_v61  ;;  %v4677_v61 = vpack.c.bf16 %v3013_v23, %v3011_v5  ;;  %v3141_v5 = vld [vmem:[#allocation2 + $0x1308] sm:$0xff]  ;;  %v3143_v23 = vld [vmem:[#allocation2 + $0x1318] sm:$0xff] }
0x15f9   :  { %v2824_v35 = vpop.f32.mrb[20].mxu1 }
0x15fa   :  { %v4108_v45 = vpop.f32.mrb[21].mxu1  ;;  %4015 = vmatmul.mubr.msk.f32.vlgmr.msra.gmra.mrb[22].mxu0 %vm110_vm0, %v2824_v35 }
0x15fb   :  { %v2999_v45 = vld [vmem:[#allocation2 + $0x1168] sm:$0xff] }
0x16cd   :  { %v2897_v50 = vpop.f32.mrb[22].mxu0 }
0x16ce   :  { %v2917_v21 = vadd.f32 %v2910_v49, %v2897_v50  ;;  %v2899_v53 = vpop.f32.mrb[23].mxu0  ;;  %v4665_v49 = vpack.c.bf16 %v3001_v48, %v2999_v45  ;;  %v3000_v50 = vld [vmem:[#allocation2 + $0x1170] sm:$0xff]  ;;  %v3131_v45 = vld [vmem:[#allocation2 + $0x12b8] sm:$0xff] }
0x16cf   :  { %v2918_v54 = vadd.f32 %v2914_v37, %v2899_v53  ;;  %v2998_v37 = vld [vmem:[#allocation2 + $0x1160] sm:$0xff]  ;;  %v3003_v53 = vld [vmem:[#allocation2 + $0x1188] sm:$0xff] }
0x16d0   :  { %v2919_v58 = vadd.f32 %v2917_v21, %v5309_v7  ;;  %v4643_v7 = vpack.c.bf16 %v2976_v6, %v2974_v22  ;;  %v4667_v21 = vpack.c.bf16 %v3000_v50, %v2998_v37  ;;  %v3010_v22 = vld [vmem:[#allocation2 + $0x11c0] sm:$0xff]  ;;  %v3012_v6 = vld [vmem:[#allocation2 + $0x11d0] sm:$0xff] }
0x16d1   :  { %v5386_v55 = vadd.f32 %v2918_v54, %v5307_v18  ;;  %v2979_v18 = vld [vmem:[#allocation2 + $0x10c8] sm:$0xff]  ;;  %v3005_v54 = vld [vmem:[#allocation2 + $0x1198] sm:$0xff]  ;;  %v3128_v37 = vld [vmem:[#allocation2 + $0x12a0] sm:$0xff] }
0x16d2   :  { %v4645_v8 = vpack.c.bf16 %v2981_v4, %v2979_v18  ;;  %4644 = vmatpush1.bf16.msra.mxu1 %v4643_v7  ;;  %v3015_v18 = vld [vmem:[#allocation2 + $0x11e8] sm:$0xff]  ;;  %v3017_v4 = vld [vmem:[#allocation2 + $0x11f8] sm:$0xff]  ;;  %v4679_v7 = vpack.c.bf16 %v3012_v6, %v3010_v22  ;;  %v3130_v50 = vld [vmem:[#allocation2 + $0x12b0] sm:$0xff] }
0x16d3   :  { %v2925_v59 = vsel %vm110_vm0, %v5386_v55, 0.0  ;;  %v3140_v22 = vld [vmem:[#allocation2 + $0x1300] sm:$0xff]  ;;  %v3142_v6 = vld [vmem:[#allocation2 + $0x1310] sm:$0xff] }
0x16d4   :  { %v2926_v60 = vadd.f32 %v2925_v59, %v2919_v58  ;;  %4646 = vmatprep.subr.bf16.mxu1 %v4645_v8  ;;  %v3004_v59 = vld [vmem:[#allocation2 + $0x1190] sm:$0xff]  ;;  %v4681_v8 = vpack.c.bf16 %v3017_v4, %v3015_v18  ;;  %v3145_v18 = vld [vmem:[#allocation2 + $0x1328] sm:$0xff]  ;;  %v3147_v4 = vld [vmem:[#allocation2 + $0x1338] sm:$0xff] }
0x16d6   :  { %2927 = vadd.xlane.f32.xlu0 %v2926_v60  ;;  %4648 = vmatpush1.bf16.msra.mxu1 %v4647_v12  ;;  %v3007_v60 = vld [vmem:[#allocation2 + $0x11a8] sm:$0xff]  ;;  %v3111_v12 = vld [vmem:[#allocation2 + $0x1218] sm:$0xff] }
0x16d7   :  { %4650 = vmatprep.subr.bf16.mxu1 %v4649_v13  ;;  %v4673_v0 = vpack.c.bf16 %v3009_v62, %v3007_v60  ;;  %v3108_v13 = vld [vmem:[#allocation2 + $0x1200] sm:$0xff]  ;;  %v4685_v14 = vpack.c.bf16 %v3111_v12, %v3109_v11  ;;  %v3137_v60 = vld [vmem:[#allocation2 + $0x12e8] sm:$0xff]  ;;  %v3139_v62 = vld [vmem:[#allocation2 + $0x12f8] sm:$0xff]  ;;  %v4723_v12 = vpack.c.bf16 %v3146_v63, %v3144_v9 }
0x16d8   :  { %v3151_v11 = vld [vmem:[#allocation2 + $0x1358] sm:$0xff]  ;;  %v3299_v9 = vld [vmem:[#allocation2 + $0x13a8] sm:$0xff] }
0x16d9   :  { %4686 = vmatprep.subr.bf16.mxu0 %v4685_v14 }
0x16da   :  { %4652 = vmatpush1.bf16.msra.mxu1 %v4651_v19  ;;  %v4687_v19 = vpack.c.bf16 %v3110_v15, %v3108_v13 }
0x16db   :  { %4654 = vmatprep.subr.bf16.mxu1 %v4653_v20  ;;  %v4689_v20 = vpack.c.bf16 %v3115_v17, %v3113_v16  ;;  %v2922_v17 = vld [vmem:[#allocation5 + $0x26] sm:$0x3] }
0x16dc   :  { %4688 = vmatpush1.bf16.msra.mxu0 %v4687_v19  ;;  %v2924_v19 = vld [vmem:[#allocation5 + $0x28] sm:$0x3] }
0x16dd   :  { %4690 = vmatprep.subr.bf16.mxu0 %v4689_v20  ;;  %v2951_v20 = vrot.slane %v2922_v17, %v5171_v33 }
0x16de   :  { %4656 = vmatpush1.bf16.msra.mxu1 %v4655_v2  ;;  %v4691_v2 = vpack.c.bf16 %v3114_v57, %v3112_v24  ;;  %v2947_v24 = vrot.slane %v2922_v17, %v5169_v31  ;;  %v3436_v17 = vld [vmem:[#allocation2 + $0x1520] sm:$0xff] }
0x16df   :  { %4658 = vmatprep.subr.bf16.mxu1 %v4657_v27  ;;  %v4693_v27 = vpack.c.bf16 %v3119_v25, %v3117_v56  ;;  %v2964_v25 = vrot.slane %v2924_v19, %v5171_v33 }
0x16e0   :  { %4692 = vmatpush1.bf16.msra.mxu0 %v4691_v2 }
0x16e1   :  { %4694 = vmatprep.subr.bf16.mxu0 %v4693_v27  ;;  %v2960_v27 = vrot.slane %v2924_v19, %v5169_v31 }
0x16e2   :  { %4660 = vmatpush1.bf16.msra.mxu1 %v4659_v30  ;;  %v4695_v30 = vpack.c.bf16 %v3118_v28, %v3116_v51 }
0x16e3   :  { %4662 = vmatprep.subr.bf16.mxu1 %v4661_v46  ;;  %v4697_v46 = vpack.c.bf16 %v3123_v44, %v3121_v29 }
0x16e4   :  { %4696 = vmatpush1.bf16.msra.mxu0 %v4695_v30  ;;  %v3148_v30 = vld [vmem:[#allocation2 + $0x1340] sm:$0xff] }
0x16e5   :  { %4698 = vmatprep.subr.bf16.mxu0 %v4697_v46  ;;  %v3150_v46 = vld [vmem:[#allocation2 + $0x1350] sm:$0xff] }
0x16e6   :  { %4664 = vmatpush1.bf16.msra.mxu1 %v4663_v36  ;;  %v3125_v36 = vld [vmem:[#allocation2 + $0x1288] sm:$0xff] }
0x16e7   :  { %4666 = vmatprep.subr.bf16.mxu1 %v4665_v49 }
0x16ea   :  { %4668 = vmatpush1.bf16.msra.mxu1 %v4667_v21  ;;  %v3133_v21 = vld [vmem:[#allocation2 + $0x12c8] sm:$0xff] }
0x1763   :  { %v2928_v38 = vpop.xlane.xlu0 %2927 }
0x1764   :  { %v2929_v39 = vmul.f32 0.0052083335, %v2928_v38  ;;  %v3127_v38 = vld [vmem:[#allocation2 + $0x1298] sm:$0xff] }
0x1766   :  { %v5391_v40 = vsub.f32 %v2919_v58, %v2929_v39  ;;  %v5394_v41 = vsub.f32 %v5386_v55, %v2929_v39  ;;  %v3002_v55 = vld [vmem:[#allocation2 + $0x1180] sm:$0xff]  ;;  %v4669_v58 = vpack.c.bf16 %v3005_v54, %v3003_v53  ;;  %v4699_v39 = vpack.c.bf16 %v3122_v34, %v3120_v32  ;;  %v3135_v53 = vld [vmem:[#allocation2 + $0x12d8] sm:$0xff]  ;;  %v3153_v34 = vld [vmem:[#allocation2 + $0x1368] sm:$0xff] }
0x1767   :  { %v4671_v47 = vpack.c.bf16 %v3004_v59, %v3002_v55  ;;  %v4707_v54 = vpack.c.bf16 %v3130_v50, %v3128_v37  ;;  %v4709_v55 = vpack.c.bf16 %v3135_v53, %v3133_v21  ;;  %v3134_v59 = vld [vmem:[#allocation2 + $0x12d0] sm:$0xff]  ;;  %v4727_v32 = vpack.c.bf16 %v3150_v46, %v3148_v30  ;;  %v3157_v21 = vld [vmem:[#allocation5 + $0x2c] sm:$0x3] }
0x1768   :  { %v2932_v42 = vmul.f32 %v5391_v40, %v5391_v40  ;;  %v2933_v43 = vmul.f32 %v5394_v41, %v5394_v41  ;;  %4670 = vmatprep.subr.bf16.mxu1 %v4669_v58  ;;  %4700 = vmatpush1.bf16.msra.mxu0 %v4699_v39  ;;  %v3132_v58 = vld [vmem:[#allocation2 + $0x12c0] sm:$0xff]  ;;  %v3154_v39 = vld [vmem:[#allocation2 + $0x1370] sm:$0xff]  ;;  %v3162_v53 = vrot.slane %v3157_v21, %v5169_v31 }
0x1769   :  { %4672 = vmatpush1.bf16.msra.mxu1 %v4671_v47  ;;  %v4711_v47 = vpack.c.bf16 %v3134_v59, %v3132_v58  ;;  %v3442_v30 = vld [vmem:[#allocation2 + $0x1550] sm:$0xff] }
0x176a   :  { %v2934_v26 = vsel %vm110_vm0, %v2933_v43, 0.0  ;;  %4674 = vmatprep.subr.bf16.mxu1 %v4673_v0  ;;  %v3124_v43 = vld [vmem:[#allocation2 + $0x1280] sm:$0xff]  ;;  %v4713_v0 = vpack.c.bf16 %v3139_v62, %v3137_v60 }
0x176b   :  { %v2935_v35 = vadd.f32 %v2934_v26, %v2932_v42  ;;  %v4701_v42 = vpack.c.bf16 %v3127_v38, %v3125_v36  ;;  %v3126_v26 = vld [vmem:[#allocation2 + $0x1290] sm:$0xff]  ;;  %v3155_v36 = vld [vmem:[#allocation2 + $0x1378] sm:$0xff]  ;;  %v3152_v38 = vld [vmem:[#allocation2 + $0x1360] sm:$0xff] }
0x176c   :  { %v4703_v48 = vpack.c.bf16 %v3126_v26, %v3124_v43 }
0x176d   :  { %2936 = vadd.xlane.f32.xlu0 %v2935_v35  ;;  %4676 = vmatpush1.bf16.msra.mxu1 %v4675_v52  ;;  %v3129_v35 = vld [vmem:[#allocation2 + $0x12a8] sm:$0xff]  ;;  %v4715_v52 = vpack.c.bf16 %v3138_v3, %v3136_v1 }
0x176e   :  { %4678 = vmatprep.subr.bf16.mxu1 %v4677_v61  ;;  %4702 = vmatprep.subr.bf16.mxu0 %v4701_v42  ;;  %v4705_v49 = vpack.c.bf16 %v3131_v45, %v3129_v35  ;;  %v4717_v61 = vpack.c.bf16 %v3143_v23, %v3141_v5  ;;  %v4731_v42 = vpack.c.bf16 %v3154_v39, %v3152_v38  ;;  %v3295_v3 = vld [vmem:[#allocation2 + $0x1388] sm:$0xff]  ;;  %v3297_v5 = vld [vmem:[#allocation2 + $0x1398] sm:$0xff] }
0x176f   :  { %4704 = vmatpush1.bf16.msra.mxu0 %v4703_v48  ;;  %v3433_v23 = vld [vmem:[#allocation2 + $0x1508] sm:$0xff]  ;;  %v3447_v39 = vld [vmem:[#allocation2 + $0x1578] sm:$0xff] }
0x1770   :  { %4706 = vmatprep.subr.bf16.mxu0 %v4705_v49 }
0x1771   :  { %4680 = vmatpush1.bf16.msra.mxu1 %v4679_v7  ;;  %v4719_v7 = vpack.c.bf16 %v3142_v6, %v3140_v22  ;;  %v3294_v22 = vld [vmem:[#allocation2 + $0x1380] sm:$0xff]  ;;  %v3296_v6 = vld [vmem:[#allocation2 + $0x1390] sm:$0xff] }
0x1772   :  { %4682 = vmatprep.subr.bf16.mxu1 %v4681_v8  ;;  %v4721_v8 = vpack.c.bf16 %v3147_v4, %v3145_v18  ;;  %v4735_v4 = vpack.c.bf16 %v3296_v6, %v3294_v22  ;;  %v3314_v22 = vld [vmem:[#allocation2 + $0x1420] sm:$0xff]  ;;  %v3316_v6 = vld [vmem:[#allocation2 + $0x1430] sm:$0xff] }
0x1773   :  { %4708 = vmatpush1.bf16.msra.mxu0 %v4707_v54  ;;  %v3166_v54 = vrot.slane %v3157_v21, %v5171_v33 }
0x1774   :  { %4710 = vmatprep.subr.bf16.mxu0 %v4709_v55 }
0x1775   :  { %4684 = vmatpush1.bf16.msra.mxu1 %v4683_v10  ;;  %v3149_v10 = vld [vmem:[#allocation2 + $0x1348] sm:$0xff] }
0x1776   :  { %v4725_v13 = vpack.c.bf16 %v3151_v11, %v3149_v10  ;;  %v3301_v10 = vld [vmem:[#allocation2 + $0x13b8] sm:$0xff]  ;;  %v3437_v11 = vld [vmem:[#allocation2 + $0x1528] sm:$0xff] }
0x1777   :  { %4712 = vmatpush1.bf16.msra.mxu0 %v4711_v47 }
0x1778   :  { %4714 = vmatprep.subr.bf16.mxu0 %v4713_v0 }
0x177b   :  { %4716 = vmatpush1.bf16.msra.mxu0 %v4715_v52  ;;  %v4733_v52 = vpack.c.bf16 %v3297_v5, %v3295_v3  ;;  %v3453_v3 = vld [vmem:[#allocation2 + $0x15a8] sm:$0xff]  ;;  %v3455_v5 = vld [vmem:[#allocation2 + $0x15b8] sm:$0xff] }
0x177c   :  { %4718 = vmatprep.subr.bf16.mxu0 %v4717_v61  ;;  %v3435_v61 = vld [vmem:[#allocation2 + $0x1518] sm:$0xff] }
0x177d   :  { %v4781_v18 = vpack.c.bf16 %v3435_v61, %v3433_v23  ;;  %4734 = vmatprep.subr.bf16.mxu1 %v4733_v52 }
0x177f   :  { %4720 = vmatpush1.bf16.msra.mxu0 %v4719_v7  ;;  %v3432_v7 = vld [vmem:[#allocation2 + $0x1500] sm:$0xff] }
0x1780   :  { %4722 = vmatprep.subr.bf16.mxu0 %v4721_v8  ;;  %v3434_v8 = vld [vmem:[#allocation2 + $0x1510] sm:$0xff] }
0x1781   :  { %v4783_v63 = vpack.c.bf16 %v3434_v8, %v3432_v7  ;;  %v3454_v7 = vld [vmem:[#allocation2 + $0x15b0] sm:$0xff]  ;;  %v3319_v8 = vld [vmem:[#allocation2 + $0x1448] sm:$0xff] }
0x1783   :  { %4724 = vmatpush1.bf16.msra.mxu0 %v4723_v12  ;;  %v3439_v12 = vld [vmem:[#allocation2 + $0x1538] sm:$0xff] }
0x1784   :  { %4726 = vmatprep.subr.bf16.mxu0 %v4725_v13  ;;  %v4737_v13 = vpack.c.bf16 %v3301_v10, %v3299_v9  ;;  %v3321_v9 = vld [vmem:[#allocation2 + $0x1458] sm:$0xff] }
0x1785   :  { %v3459_v10 = vld [vmem:[#allocation2 + $0x15d8] sm:$0xff] }
0x1787   :  { %4728 = vmatpush1.bf16.msra.mxu0 %v4727_v32  ;;  %v3307_v32 = vld [vmem:[#allocation2 + $0x13e8] sm:$0xff] }
0x17fa   :  { %v2937_v14 = vpop.xlane.xlu0 %2936 }
0x17fb   :  { %v2938_v15 = vmul.f32 0.0052083335, %v2937_v14  ;;  %v4785_v14 = vpack.c.bf16 %v3439_v12, %v3437_v11  ;;  %v4755_v11 = vpack.c.bf16 %v3316_v6, %v3314_v22  ;;  %v3335_v22 = vld [vmem:[#allocation2 + $0x14c8] sm:$0xff]  ;;  %v3337_v6 = vld [vmem:[#allocation2 + $0x14d8] sm:$0xff] }
0x17fd   :  { %v2939_v16 = vadd.f32 1e-05, %v2938_v15  ;;  %v3298_v15 = vld [vmem:[#allocation2 + $0x13a0] sm:$0xff] }
0x17ff   :  { %4999 = vrsqrt.f32 %v2939_v16  ;;  %v3300_v16 = vld [vmem:[#allocation2 + $0x13b0] sm:$0xff] }
0x1800   :  { %v4739_v19 = vpack.c.bf16 %v3300_v16, %v3298_v15  ;;  %v3320_v15 = vld [vmem:[#allocation2 + $0x1450] sm:$0xff] }
0x1809   :  { %v5000_v57 = vpop.eup %4999 }
0x180a   :  { %v2942_v56 = vmul.f32 %v5000_v57, %v5394_v41  ;;  %v2941_v2 = vmul.f32 %v5000_v57, %v5391_v40  ;;  %v4729_v41 = vpack.c.bf16 %v3155_v36, %v3153_v34  ;;  %v3019_v40 = vld [vmem:[#allocation5 + $0x2a] sm:$0x3]  ;;  %v3305_v57 = vld [vmem:[#allocation2 + $0x13d8] sm:$0xff] }
0x180b   :  { %v3024_v43 = vrot.slane %v3019_v40, %v5169_v31  ;;  %v3028_v26 = vrot.slane %v3019_v40, %v5171_v33  ;;  %v3309_v34 = vld [vmem:[#allocation2 + $0x13f8] sm:$0xff]  ;;  %v3445_v36 = vld [vmem:[#allocation2 + $0x1568] sm:$0xff]  ;;  %v3308_v40 = vld [vmem:[#allocation2 + $0x13f0] sm:$0xff] }
0x180c   :  { %v2955_v51 = vmul.f32 %v2951_v20, %v2942_v56  ;;  %v2954_v28 = vmul.f32 %v2947_v24, %v2941_v2  ;;  %4730 = vmatprep.subr.bf16.mxu0 %v4729_v41  ;;  %v3438_v20 = vld [vmem:[#allocation2 + $0x1530] sm:$0xff]  ;;  %v3303_v24 = vld [vmem:[#allocation2 + $0x13c8] sm:$0xff]  ;;  %v4745_v38 = vpack.c.bf16 %v3309_v34, %v3307_v32  ;;  %v3463_v34 = vld [vmem:[#allocation2 + $0x15f8] sm:$0xff] }
0x180d   :  { %4732 = vmatpush1.bf16.msra.mxu0 %v4731_v42  ;;  %v4787_v56 = vpack.c.bf16 %v3438_v20, %v3436_v17  ;;  %v3441_v2 = vld [vmem:[#allocation2 + $0x1548] sm:$0xff]  ;;  %v3306_v42 = vld [vmem:[#allocation2 + $0x13e0] sm:$0xff] }
0x180e   :  { %v2968_v29 = vadd.f32 %v2964_v25, %v2955_v51  ;;  %v2967_v44 = vadd.f32 %v2960_v27, %v2954_v28  ;;  %4782 = vmatprep.subr.bf16.mxu0 %v4781_v18  ;;  %v4741_v25 = vpack.c.bf16 %v3305_v57, %v3303_v24  ;;  %v3443_v27 = vld [vmem:[#allocation2 + $0x1558] sm:$0xff]  ;;  %v3302_v51 = vld [vmem:[#allocation2 + $0x13c0] sm:$0xff] }
0x180f   :  { %v4789_v28 = vpack.c.bf16 %v3443_v27, %v3441_v2  ;;  %v3452_v18 = vld [vmem:[#allocation2 + $0x15a0] sm:$0xff] }
0x1810   :  { %4016 = vmatprep.mubr.msk.f32.mxu1 %vm110_vm0, %v2968_v29  ;;  %v4803_v12 = vpack.c.bf16 %v3454_v7, %v3452_v18  ;;  %v3456_v17 = vld [vmem:[#allocation2 + $0x15c0] sm:$0xff]  ;;  %v3473_v7 = vld [vmem:[#allocation2 + $0x1648] sm:$0xff] }
0x1811   :  { %3099 = vmatmul.mubr.f32.vlgmr.msra.gmra.mrb[22].mxu1 %v2967_v44 }
0x1812   :  { %4736 = vmatpush1.bf16.msra.mxu1 %v4735_v4  ;;  %v4801_v4 = vpack.c.bf16 %v3455_v5, %v3453_v3  ;;  %v3330_v3 = vld [vmem:[#allocation2 + $0x14a0] sm:$0xff]  ;;  %v3332_v5 = vld [vmem:[#allocation2 + $0x14b0] sm:$0xff] }
0x1813   :  { %4738 = vmatprep.subr.bf16.mxu1 %v4737_v13  ;;  %v4757_v13 = vpack.c.bf16 %v3321_v9, %v3319_v8  ;;  %v3475_v8 = vld [vmem:[#allocation2 + $0x1658] sm:$0xff]  ;;  %v3334_v9 = vld [vmem:[#allocation2 + $0x14c0] sm:$0xff] }
0x1816   :  { %4740 = vmatpush1.bf16.msra.mxu1 %v4739_v19  ;;  %v3458_v19 = vld [vmem:[#allocation2 + $0x15d0] sm:$0xff] }
0x1817   :  { %4742 = vmatprep.subr.bf16.mxu1 %v4741_v25  ;;  %v4807_v24 = vpack.c.bf16 %v3458_v19, %v3456_v17 }
0x18e4   :  { %v3100_v35 = vpop.f32.mrb[22].mxu1 }
0x18e5   :  { %v3101_v45 = vadd.f32 %v3100_v35, %v3024_v43  ;;  %v3102_v48 = vpop.f32.mrb[23].mxu1  ;;  %v4793_v43 = vpack.c.bf16 %v3447_v39, %v3445_v36  ;;  %v3446_v35 = vld [vmem:[#allocation2 + $0x1570] sm:$0xff] }
0x18e6   :  { %v3103_v49 = vadd.f32 %v3102_v48, %v3028_v26  ;;  %v3444_v26 = vld [vmem:[#allocation2 + $0x1560] sm:$0xff]  ;;  %v3313_v48 = vld [vmem:[#allocation2 + $0x1418] sm:$0xff]  ;;  %v3324_v36 = vld [vmem:[#allocation2 + $0x1470] sm:$0xff] }
0x18e7   :  { %v3105_v50 = vmax.f32 %v3101_v45, 0.0  ;;  %v3311_v45 = vld [vmem:[#allocation2 + $0x1408] sm:$0xff]  ;;  %v4795_v21 = vpack.c.bf16 %v3446_v35, %v3444_v26  ;;  %v3462_v39 = vld [vmem:[#allocation2 + $0x15f0] sm:$0xff] }
0x18e8   :  { %v3106_v37 = vmax.f32 %v3103_v49, 0.0  ;;  %v3449_v49 = vld [vmem:[#allocation2 + $0x1588] sm:$0xff] }
0x18e9   :  { %v3465_v26 = vld [vmem:[#allocation2 + $0x1608] sm:$0xff] }
0x18ea   :  { %4017 = vmatprep.mubr.msk.f32.mxu0 %vm110_vm0, %v3106_v37  ;;  %v3451_v37 = vld [vmem:[#allocation2 + $0x1598] sm:$0xff] }
0x18eb   :  { %3237 = vmatmul.mubr.f32.vlgmr.msra.gmra.mrb[24].mxu0 %v3105_v50  ;;  %v4747_v50 = vpack.c.bf16 %v3308_v40, %v3306_v42  ;;  %v3327_v40 = vld [vmem:[#allocation2 + $0x1488] sm:$0xff] }
0x18ec   :  { %4784 = vmatpush1.bf16.msra.mxu0 %v4783_v63  ;;  %v3457_v63 = vld [vmem:[#allocation2 + $0x15c8] sm:$0xff] }
0x18ed   :  { %4786 = vmatprep.subr.bf16.mxu0 %v4785_v14  ;;  %v3318_v14 = vld [vmem:[#allocation2 + $0x1440] sm:$0xff]  ;;  %v4805_v16 = vpack.c.bf16 %v3459_v10, %v3457_v63  ;;  %v4821_v63 = vpack.c.bf16 %v3475_v8, %v3473_v7  ;;  %v3336_v10 = vld [vmem:[#allocation2 + $0x14d0] sm:$0xff]  ;;  %v3597_v8 = vld [vmem:[%s5621_s3 + $0x88] sm:$0xff] }
0x18ee   :  { %v4759_v20 = vpack.c.bf16 %v3320_v15, %v3318_v14  ;;  %v3339_v14 = vld [vmem:[#allocation2 + $0x14e8] sm:$0xff]  ;;  %v3341_v15 = vld [vmem:[#allocation2 + $0x14f8] sm:$0xff]  ;;  %v3596_v7 = vld [vmem:[%s5621_s3 + $0x80] sm:$0xff] }
0x18ef   :  { %v4777_v19 = vpack.c.bf16 %v3341_v15, %v3339_v14  ;;  %v3602_v15 = vld [vmem:[%s5621_s3 + $0xb0] sm:$0xff] }
0x18f0   :  { %4788 = vmatpush1.bf16.msra.mxu0 %v4787_v56 }
0x18f1   :  { %4790 = vmatprep.subr.bf16.mxu0 %v4789_v28 }
0x19be   :  { %v3238_v55 = vpop.f32.mrb[24].mxu0 }
0x19bf   :  { %v3239_v58 = vadd.f32 %v3238_v55, %v3162_v53  ;;  %v3240_v59 = vpop.f32.mrb[25].mxu0  ;;  %v4749_v53 = vpack.c.bf16 %v3313_v48, %v3311_v45  ;;  %v3312_v55 = vld [vmem:[#allocation2 + $0x1410] sm:$0xff]  ;;  %v3467_v45 = vld [vmem:[#allocation2 + $0x1618] sm:$0xff]  ;;  %v3326_v48 = vld [vmem:[#allocation2 + $0x1480] sm:$0xff] }
0x19c0   :  { %v3241_v60 = vadd.f32 %v3240_v59, %v3166_v54  ;;  %v3310_v54 = vld [vmem:[#allocation2 + $0x1400] sm:$0xff]  ;;  %v4797_v59 = vpack.c.bf16 %v3451_v37, %v3449_v49  ;;  %v3328_v49 = vld [vmem:[#allocation2 + $0x1490] sm:$0xff]  ;;  %v4813_v37 = vpack.c.bf16 %v3467_v45, %v3465_v26  ;;  %v3581_v26 = vld [vmem:[%s5621_s3 + $0x8] sm:$0xff] }
0x19c1   :  { %v5415_v47 = vadd.f32 %v3239_v58, %v2967_v44  ;;  %v3440_v44 = vld [vmem:[#allocation2 + $0x1540] sm:$0xff]  ;;  %v4751_v23 = vpack.c.bf16 %v3312_v55, %v3310_v54  ;;  %v3331_v54 = vld [vmem:[#allocation2 + $0x14a8] sm:$0xff] }
0x19c2   :  { %v5413_v62 = vadd.f32 %v3241_v60, %v2968_v29  ;;  %v3304_v29 = vld [vmem:[#allocation2 + $0x13d0] sm:$0xff]  ;;  %v4791_v41 = vpack.c.bf16 %v3442_v30, %v3440_v44  ;;  %v3448_v58 = vld [vmem:[#allocation2 + $0x1580] sm:$0xff]  ;;  %v3323_v44 = vld [vmem:[#allocation2 + $0x1468] sm:$0xff] }
0x19c3   :  { %v4743_v46 = vpack.c.bf16 %v3304_v29, %v3302_v51  ;;  %v3450_v60 = vld [vmem:[#allocation2 + $0x1590] sm:$0xff]  ;;  %v3325_v30 = vld [vmem:[#allocation2 + $0x1478] sm:$0xff] }
0x19c4   :  { %v3249_v0 = vsel %vm110_vm0, %v5413_v62, 0.0  ;;  %4792 = vmatpush1.bf16.msra.mxu0 %v4791_v41  ;;  %v4799_v52 = vpack.c.bf16 %v3450_v60, %v3448_v58  ;;  %v4761_v32 = vpack.c.bf16 %v3325_v30, %v3323_v44  ;;  %v3333_v58 = vld [vmem:[#allocation2 + $0x14b8] sm:$0xff]  ;;  %v5104_v44 = vmov 0.0|0.0  }
0x19c5   :  { %v3250_v1 = vadd.f32 %v3249_v0, %v5415_v47  ;;  %4744 = vmatpush1.bf16.msra.mxu1 %v4743_v46  ;;  %4794 = vmatprep.subr.bf16.mxu0 %v4793_v43  ;;  %v3315_v0 = vld [vmem:[#allocation2 + $0x1428] sm:$0xff]  ;;  %v3329_v43 = vld [vmem:[#allocation2 + $0x1498] sm:$0xff] }
0x19c6   :  { %4746 = vmatprep.subr.bf16.mxu1 %v4745_v38  ;;  %v3461_v46 = vld [vmem:[#allocation2 + $0x15e8] sm:$0xff]  ;;  %v3460_v38 = vld [vmem:[#allocation2 + $0x15e0] sm:$0xff]  ;;  %v4765_v35 = vpack.c.bf16 %v3329_v43, %v3327_v40  ;;  %v3471_v60 = vld [vmem:[#allocation2 + $0x1638] sm:$0xff] }
0x19c7   :  { %3251 = vadd.xlane.f32.xlu0 %v3250_v1  ;;  %v3317_v1 = vld [vmem:[#allocation2 + $0x1438] sm:$0xff]  ;;  %v4809_v41 = vpack.c.bf16 %v3463_v34, %v3461_v46  ;;  %v4811_v42 = vpack.c.bf16 %v3462_v39, %v3460_v38  ;;  %v3246_v34 = vld [vmem:[#allocation5 + $0x2e] sm:$0x3]  ;;  %v3580_v43 = vld [vmem:[%s5621_s3] sm:$0xff] }
0x19c8   :  { %4796 = vmatpush1.bf16.msra.mxu0 %v4795_v21  ;;  %v4753_v61 = vpack.c.bf16 %v3317_v1, %v3315_v0  ;;  %v3464_v21 = vld [vmem:[#allocation2 + $0x1600] sm:$0xff]  ;;  %v4769_v0 = vpack.c.bf16 %v3333_v58, %v3331_v54  ;;  %v3587_v58 = vld [vmem:[%s5621_s3 + $0x38] sm:$0xff] }
0x19c9   :  { %4748 = vmatpush1.bf16.msra.mxu1 %v4747_v50  ;;  %4798 = vmatprep.subr.bf16.mxu0 %v4797_v59  ;;  %v4767_v50 = vpack.c.bf16 %v3328_v49, %v3326_v48  ;;  %v3469_v59 = vld [vmem:[#allocation2 + $0x1628] sm:$0xff] }
0x19ca   :  { %4750 = vmatprep.subr.bf16.mxu1 %v4749_v53  ;;  %v3466_v53 = vld [vmem:[#allocation2 + $0x1610] sm:$0xff]  ;;  %v4817_v1 = vpack.c.bf16 %v3471_v60, %v3469_v59  ;;  %v3588_v60 = vld [vmem:[%s5621_s3 + $0x40] sm:$0xff] }
0x19cb   :  { %v4815_v55 = vpack.c.bf16 %v3466_v53, %v3464_v21  ;;  %v3584_v21 = vld [vmem:[%s5621_s3 + $0x20] sm:$0xff]  ;;  %v3585_v53 = vld [vmem:[%s5621_s3 + $0x28] sm:$0xff] }
0x19cc   :  { %4800 = vmatpush1.bf16.msra.mxu0 %v4799_v52  ;;  %v4771_v52 = vpack.c.bf16 %v3332_v5, %v3330_v3  ;;  %v5473_v54 = vpack.c.bf16 %v3585_v53, %v3584_v21  ;;  %v3590_v3 = vld [vmem:[%s5621_s3 + $0x50] sm:$0xff]  ;;  %v3591_v5 = vld [vmem:[%s5621_s3 + $0x58] sm:$0xff]  ;;  %v3725_v21 = vld [vmem:[#allocation2 + $0x1680] sm:$0xff] }
0x19cd   :  { %4752 = vmatpush1.bf16.msra.mxu1 %v4751_v23  ;;  %4802 = vmatprep.subr.bf16.mxu0 %v4801_v4  ;;  %v3468_v23 = vld [vmem:[#allocation2 + $0x1620] sm:$0xff]  ;;  %v4773_v4 = vpack.c.bf16 %v3337_v6, %v3335_v22  ;;  %v3594_v6 = vld [vmem:[%s5621_s3 + $0x70] sm:$0xff] }
0x19ce   :  { %4754 = vmatprep.subr.bf16.mxu1 %v4753_v61  ;;  %v3470_v61 = vld [vmem:[#allocation2 + $0x1630] sm:$0xff] }
0x19cf   :  { %v4819_v18 = vpack.c.bf16 %v3470_v61, %v3468_v23  ;;  %v5504_v23 = vpack.c.bf16 %v3591_v5, %v3590_v3  ;;  %v3593_v61 = vld [vmem:[%s5621_s3 + $0x68] sm:$0xff]  ;;  %v3736_v5 = vld [vmem:[#allocation2 + $0x16d8] sm:$0xff] }
0x19d0   :  { %4804 = vmatpush1.bf16.msra.mxu0 %v4803_v12  ;;  %v3474_v12 = vld [vmem:[#allocation2 + $0x1650] sm:$0xff]  ;;  %v3734_v3 = vld [vmem:[#allocation2 + $0x16c8] sm:$0xff] }
0x19d1   :  { %4756 = vmatpush1.bf16.msra.mxu1 %v4755_v11  ;;  %4806 = vmatprep.subr.bf16.mxu0 %v4805_v16  ;;  %v3472_v11 = vld [vmem:[#allocation2 + $0x1640] sm:$0xff]  ;;  %v3477_v16 = vld [vmem:[#allocation2 + $0x1668] sm:$0xff] }
0x19d2   :  { %4758 = vmatprep.subr.bf16.mxu1 %v4757_v13  ;;  %v4775_v13 = vpack.c.bf16 %v3336_v10, %v3334_v9  ;;  %v4823_v17 = vpack.c.bf16 %v3474_v12, %v3472_v11  ;;  %v5534_v9 = vpack.c.bf16 %v3597_v8, %v3596_v7  ;;  %v3599_v10 = vld [vmem:[%s5621_s3 + $0x98] sm:$0xff]  ;;  %v3600_v12 = vld [vmem:[%s5621_s3 + $0xa0] sm:$0xff]  ;;  %v3739_v8 = vld [vmem:[#allocation2 + $0x16f0] sm:$0xff] }
0x19d3   :  { %v3737_v7 = vld [vmem:[#allocation2 + $0x16e0] sm:$0xff] }
0x19d4   :  { %4808 = vmatpush1.bf16.msra.mxu0 %v4807_v24  ;;  %v3338_v24 = vld [vmem:[#allocation2 + $0x14e0] sm:$0xff] }
0x19d5   :  { %4760 = vmatpush1.bf16.msra.mxu1 %v4759_v20  ;;  %4810 = vmatprep.subr.bf16.mxu0 %v4809_v41  ;;  %v3479_v20 = vld [vmem:[#allocation2 + $0x1678] sm:$0xff]  ;;  %v3271_v41 = vrot.slane %v3246_v34, %v5169_v31 }
0x19d6   :  { %4762 = vmatprep.subr.bf16.mxu1 %v4761_v32 }
0x19d8   :  { %4812 = vmatpush1.bf16.msra.mxu0 %v4811_v42 }
0x19d9   :  { %4814 = vmatprep.subr.bf16.mxu0 %v4813_v37  ;;  %v3583_v37 = vld [vmem:[%s5621_s3 + $0x18] sm:$0xff] }
0x19dc   :  { %4816 = vmatpush1.bf16.msra.mxu0 %v4815_v55  ;;  %v3586_v55 = vld [vmem:[%s5621_s3 + $0x30] sm:$0xff] }
0x19dd   :  { %4818 = vmatprep.subr.bf16.mxu0 %v4817_v1  ;;  %v5483_v59 = vpack.c.bf16 %v3587_v58, %v3586_v55  ;;  %v3730_v55 = vld [vmem:[#allocation2 + $0x16a8] sm:$0xff]  ;;  %v3732_v58 = vld [vmem:[#allocation2 + $0x16b8] sm:$0xff] }
0x19e0   :  { %4820 = vmatpush1.bf16.msra.mxu0 %v4819_v18  ;;  %v3595_v18 = vld [vmem:[%s5621_s3 + $0x78] sm:$0xff] }
0x19e1   :  { %4822 = vmatprep.subr.bf16.mxu0 %v4821_v63  ;;  %v3598_v63 = vld [vmem:[%s5621_s3 + $0x90] sm:$0xff] }
0x19e2   :  { %v5544_v11 = vpack.c.bf16 %v3599_v10, %v3598_v63  ;;  %v3744_v63 = vld [vmem:[#allocation2 + $0x1718] sm:$0xff]  ;;  %v4879_v10 = vpack.c.bf16 %v3739_v8, %v3737_v7  ;;  %v3761_v7 = vld [vmem:[#allocation2 + $0x17a0] sm:$0xff]  ;;  %v3763_v8 = vld [vmem:[#allocation2 + $0x17b0] sm:$0xff] }
0x19e4   :  { %4824 = vmatpush1.bf16.msra.mxu0 %v4823_v17 }
0x1a54   :  { %v3252_v57 = vpop.xlane.xlu0 %3251 }
0x1a55   :  { %v3253_v56 = vmul.f32 0.0052083335, %v3252_v57  ;;  %v3340_v57 = vld [vmem:[#allocation2 + $0x14f0] sm:$0xff] }
0x1a57   :  { %v5421_v25 = vsub.f32 %v5415_v47, %v3253_v56  ;;  %v5424_v2 = vsub.f32 %v5413_v62, %v3253_v56  ;;  %v3322_v47 = vld [vmem:[#allocation2 + $0x1460] sm:$0xff]  ;;  %v4825_v56 = vpack.c.bf16 %v3479_v20, %v3477_v16  ;;  %v3603_v16 = vld [vmem:[%s5621_s3 + $0xb8] sm:$0xff] }
0x1a58   :  { %v4763_v62 = vpack.c.bf16 %v3324_v36, %v3322_v47  ;;  %v3248_v47 = vld [vmem:[#allocation5 + $0x30] sm:$0x3]  ;;  %v3275_v36 = vrot.slane %v3246_v34, %v5171_v33  ;;  %v4863_v17 = vpack.c.bf16 %v3603_v16, %v3602_v15  ;;  %v3748_v15 = vld [vmem:[#allocation2 + $0x1738] sm:$0xff] }
0x1a59   :  { %v3256_v27 = vmul.f32 %v5421_v25, %v5421_v25  ;;  %v3257_v51 = vmul.f32 %v5424_v2, %v5424_v2  ;;  %4826 = vmatprep.subr.bf16.mxu0 %v4825_v56  ;;  %v3288_v39 = vrot.slane %v3248_v47, %v5171_v33  ;;  %v3284_v40 = vrot.slane %v3248_v47, %v5169_v31 }
0x1a5a   :  { %4764 = vmatpush1.bf16.msra.mxu1 %v4763_v62 }
0x1a5b   :  { %v3258_v28 = vsel %vm110_vm0, %v3257_v51, 0.0  ;;  %4766 = vmatprep.subr.bf16.mxu1 %v4765_v35  ;;  %v3478_v51 = vld [vmem:[#allocation2 + $0x1670] sm:$0xff] }
0x1a5c   :  { %v3259_v29 = vadd.f32 %v3258_v28, %v3256_v27  ;;  %v3476_v27 = vld [vmem:[#allocation2 + $0x1660] sm:$0xff]  ;;  %v4779_v28 = vpack.c.bf16 %v3340_v57, %v3338_v24 }
0x1a5e   :  { %3260 = vadd.xlane.f32.xlu1 %v3259_v29  ;;  %4768 = vmatpush1.bf16.msra.mxu1 %v4767_v50  ;;  %v4827_v29 = vpack.c.bf16 %v3478_v51, %v3476_v27 }
0x1a5f   :  { %4770 = vmatprep.subr.bf16.mxu1 %v4769_v0  ;;  %v3589_v0 = vld [vmem:[%s5621_s3 + $0x48] sm:$0xff] }
0x1a60   :  { %4828 = vmatpush1.bf16.msra.mxu0 %v4827_v29  ;;  %v5494_v1 = vpack.c.bf16 %v3589_v0, %v3588_v60  ;;  %v4869_v60 = vpack.c.bf16 %v3732_v58, %v3730_v55  ;;  %v3729_v0 = vld [vmem:[#allocation2 + $0x16a0] sm:$0xff] }
0x1a62   :  { %4772 = vmatpush1.bf16.msra.mxu1 %v4771_v52  ;;  %v3592_v52 = vld [vmem:[%s5621_s3 + $0x60] sm:$0xff] }
0x1a63   :  { %4774 = vmatprep.subr.bf16.mxu1 %v4773_v4  ;;  %v5514_v22 = vpack.c.bf16 %v3593_v61, %v3592_v52  ;;  %v5524_v4 = vpack.c.bf16 %v3595_v18, %v3594_v6  ;;  %v3733_v52 = vld [vmem:[#allocation2 + $0x16c0] sm:$0xff]  ;;  %v3735_v61 = vld [vmem:[#allocation2 + $0x16d0] sm:$0xff]  ;;  %v3740_v6 = vld [vmem:[#allocation2 + $0x16f8] sm:$0xff] }
0x1a64   :  { %v4875_v18 = vpack.c.bf16 %v3735_v61, %v3733_v52  ;;  %v3757_v52 = vld [vmem:[#allocation2 + $0x1780] sm:$0xff]  ;;  %v3759_v61 = vld [vmem:[#allocation2 + $0x1790] sm:$0xff] }
0x1a66   :  { %4776 = vmatpush1.bf16.msra.mxu1 %v4775_v13  ;;  %v3601_v13 = vld [vmem:[%s5621_s3 + $0xa8] sm:$0xff] }
0x1a67   :  { %4778 = vmatprep.subr.bf16.mxu1 %v4777_v19  ;;  %v4860_v14 = vpack.c.bf16 %v3601_v13, %v3600_v12  ;;  %v3481_v19 = vld [vmem:[#allocation5 + $0x4] sm:$0x3]  ;;  %v3743_v13 = vld [vmem:[#allocation2 + $0x1710] sm:$0xff] }
0x1a68   :  { %v3486_v20 = vrot.slane %v3481_v19, %v5169_v31  ;;  %v3490_v24 = vrot.slane %v3481_v19, %v5171_v33  ;;  %v3741_v12 = vld [vmem:[#allocation2 + $0x1700] sm:$0xff] }
0x1a69   :  { %v4883_v16 = vpack.c.bf16 %v3743_v13, %v3741_v12  ;;  %v3745_v19 = vld [vmem:[#allocation2 + $0x1720] sm:$0xff]  ;;  %v3767_v13 = vld [vmem:[#allocation2 + $0x17d0] sm:$0xff] }
0x1a6a   :  { %4780 = vmatpush1.bf16.msra.mxu1 %v4779_v28  ;;  %v3765_v12 = vld [vmem:[#allocation2 + $0x17c0] sm:$0xff] }
0x1a6b   :  { %4829 = vmatprep.subr.bf16.mxu1 %v5104_v44 }
0x1aeb   :  { %v3261_v30 = vpop.xlane.xlu1 %3260 }
0x1aec   :  { %v3262_v46 = vmul.f32 0.0052083335, %v3261_v30 }
0x1aee   :  { %v3263_v32 = vadd.f32 1e-05, %v3262_v46 }
0x1af0   :  { %5001 = vrsqrt.f32 %v3263_v32  ;;  %v3343_v32 = vld [vmem:[#allocation5 + $0x2] sm:$0x3] }
0x1af1   :  { %v3348_v34 = vrot.slane %v3343_v32, %v5169_v31  ;;  %v3352_v47 = vrot.slane %v3343_v32, %v5171_v33 }
0x1afa   :  { %v5002_v62 = vpop.eup %5001 }
0x1afb   :  { %v3266_v38 = vmul.f32 %v5002_v62, %v5424_v2  ;;  %v3265_v42 = vmul.f32 %v5002_v62, %v5421_v25  ;;  %v5448_v2 = vpack.c.bf16 %v3581_v26, %v3580_v43  ;;  %v3582_v25 = vld [vmem:[%s5621_s3 + $0x10] sm:$0xff]  ;;  %s5106_s3 = smov 127  }
0x1afc   :  { %v5463_v50 = vpack.c.bf16 %v3583_v37, %v3582_v25  ;;  %v3726_v37 = vld [vmem:[#allocation2 + $0x1688] sm:$0xff] }
0x1afd   :  { %v3279_v35 = vmul.f32 %v3275_v36, %v3266_v38  ;;  %v3278_v45 = vmul.f32 %v3271_v41, %v3265_v42 }
0x1aff   :  { %v5444_v48 = vadd.f32 %v3288_v39, %v3279_v35  ;;  %v5446_v49 = vadd.f32 %v3284_v40, %v3278_v45 }
0x1b01   :  { %4018 = vmatprep.mubr.msk.f32.mxu1 %vm110_vm0, %v5444_v48  ;;  %4019 = vmatprep.mubr.msk.f32.mxu0 %vm110_vm0, %v5444_v48 }
0x1b02   :  { %3423 = vmatmul.mubr.f32.vlgmr.msra.gmra.mrb[24].mxu1 %v5446_v49  ;;  %3558 = vmatmul.mubr.f32.vlgmr.msra.gmra.mrb[26].mxu0 %v5446_v49 }
0x1b03   :  { %4831 = vmatpush1.bf16.msra.mxu1 %v5448_v2 }
0x1b04   :  { %4832 = vmatprep.subr.bf16.mxu1 %v5104_v44 }
0x1b07   :  { %4834 = vmatpush1.bf16.msra.mxu1 %v5463_v50 }
0x1b08   :  { %4835 = vmatprep.subr.bf16.mxu1 %v5104_v44 }
0x1b0b   :  { %4837 = vmatpush1.bf16.msra.mxu1 %v5473_v54 }
0x1b0c   :  { %4838 = vmatprep.subr.bf16.mxu1 %v5104_v44 }
0x1b0f   :  { %4840 = vmatpush1.bf16.msra.mxu1 %v5483_v59 }
0x1b10   :  { %4841 = vmatprep.subr.bf16.mxu1 %v5104_v44 }
0x1b13   :  { %4843 = vmatpush1.bf16.msra.mxu1 %v5494_v1 }
0x1b14   :  { %4844 = vmatprep.subr.bf16.mxu1 %v5104_v44 }
0x1b17   :  { %4846 = vmatpush1.bf16.msra.mxu1 %v5504_v23 }
0x1b18   :  { %4847 = vmatprep.subr.bf16.mxu1 %v5104_v44 }
0x1b1b   :  { %4849 = vmatpush1.bf16.msra.mxu1 %v5514_v22 }
0x1b1c   :  { %4850 = vmatprep.subr.bf16.mxu1 %v5104_v44 }
0x1b1f   :  { %4852 = vmatpush1.bf16.msra.mxu1 %v5524_v4 }
0x1b20   :  { %4853 = vmatprep.subr.bf16.mxu1 %v5104_v44 }
0x1b23   :  { %4855 = vmatpush1.bf16.msra.mxu1 %v5534_v9 }
0x1b24   :  { %4856 = vmatprep.subr.bf16.mxu1 %v5104_v44 }
0x1b27   :  { %4858 = vmatpush1.bf16.msra.mxu1 %v5544_v11 }
0x1b28   :  { %4859 = vmatprep.subr.bf16.mxu1 %v5104_v44 }
0x1b2b   :  { %4861 = vmatpush1.bf16.msra.mxu1 %v4860_v14 }
0x1b2c   :  { %4862 = vmatprep.subr.bf16.mxu1 %v5104_v44 }
0x1b2f   :  { %4864 = vmatpush1.bf16.msra.mxu1 %v4863_v17 }
0x1b30   :  { %4913 = vmatprep.subr.bf16.mxu1 %v5104_v44 }
0x1bd5   :  { %v3424_v57 = vpop.f32.mrb[24].mxu1  ;;  %v3559_v56 = vpop.f32.mrb[26].mxu0 }
0x1bd6   :  { %v3560_v27 = vadd.f32 %v3559_v56, %v3486_v20  ;;  %v3426_v51 = vpop.f32.mrb[25].mxu1  ;;  %v3561_v28 = vpop.f32.mrb[27].mxu0  ;;  %v3425_v36 = vadd.f32 %v3424_v57, %v3348_v34  ;;  %v3747_v20 = vld [vmem:[#allocation2 + $0x1730] sm:$0xff]  ;;  %v3752_v57 = vld [vmem:[#allocation2 + $0x1758] sm:$0xff]  ;;  %v3753_v34 = vld [vmem:[#allocation2 + $0x1760] sm:$0xff] }
0x1bd7   :  { %v3562_v29 = vadd.f32 %v3561_v28, %v3490_v24  ;;  %v3427_v41 = vadd.f32 %v3426_v51, %v3352_v47  ;;  %v3750_v24 = vld [vmem:[#allocation2 + $0x1748] sm:$0xff]  ;;  %v4887_v56 = vpack.c.bf16 %v3747_v20, %v3745_v19  ;;  %v3749_v51 = vld [vmem:[#allocation2 + $0x1740] sm:$0xff]  ;;  %v3751_v28 = vld [vmem:[#allocation2 + $0x1750] sm:$0xff] }
0x1bd8   :  { %v4020_v30 = vmul.f32 -1.442695, %v3560_v27  ;;  %v4889_v27 = vpack.c.bf16 %v3752_v57, %v3750_v24  ;;  %v3755_v47 = vld [vmem:[#allocation2 + $0x1770] sm:$0xff]  ;;  %v3769_v19 = vld [vmem:[#allocation2 + $0x17e0] sm:$0xff] }
0x1bd9   :  { %v4021_v46 = vmul.f32 -1.442695, %v3562_v29  ;;  %v3754_v29 = vld [vmem:[#allocation2 + $0x1768] sm:$0xff]  ;;  %v3771_v20 = vld [vmem:[#allocation2 + $0x17f0] sm:$0xff] }
0x1bda   :  { %5003 = vpow2.f32 %v4020_v30  ;;  %v3756_v30 = vld [vmem:[#allocation2 + $0x1778] sm:$0xff]  ;;  %v4911_v24 = vpack.c.bf16 %v3771_v20, %v3769_v19 }
0x1bdb   :  { %5005 = vpow2.f32 %v4021_v46  ;;  %v4891_v46 = vpack.c.bf16 %v3751_v28, %v3749_v51  ;;  %v4893_v32 = vpack.c.bf16 %v3756_v30, %v3754_v29 }
0x1bdc   :  { %5007 = vtanh.f32 %v3425_v36  ;;  %v4895_v36 = vpack.c.bf16 %v3755_v47, %v3753_v34 }
0x1bdd   :  { %5009 = vtanh.f32 %v3427_v41  ;;  %v5588_v41 = vld [vmem:[#allocation5 + $0x8] sm:$0x3] }
0x1be4   :  { %v5004_v62 = vpop.eup %5003 }
0x1be5   :  { %v5006_v38 = vpop.eup %5005  ;;  %v3570_v39 = vadd.f32 1.0, %v5004_v62  ;;  %v3681_v62 = vrot.slane %v5588_v41, %v5169_v31 }
0x1be6   :  { %v3571_v42 = vadd.f32 1.0, %v5006_v38  ;;  %v5008_v40 = vpop.eup %5007 }
0x1be7   :  { %5011 = vrcp.f32 %v3570_v39  ;;  %v5010_v43 = vpop.eup %5009 }
0x1be8   :  { %5013 = vrcp.f32 %v3571_v42 }
0x1bf1   :  { %v5012_v26 = vpop.eup %5011 }
0x1bf2   :  { %v5014_v35 = vpop.eup %5013  ;;  %v3578_v45 = vmul.f32 %v5012_v26, %v5008_v40 }
0x1bf3   :  { %v3579_v25 = vmul.f32 %v5014_v35, %v5010_v43 }
0x1bf5   :  { %4022 = vmatprep.mubr.msk.f32.mxu1 %vm110_vm0, %v3579_v25 }
0x1bf6   :  { %3672 = vmatmul.mubr.f32.vlgmr.msra.gmra.mrb[26].mxu1 %v3578_v45 }
0x1bf7   :  { %4915 = vmatpush1.bf16.msra.mxu1 %v5448_v2  ;;  %v5105_v2 = vmov 0  }
0x1bf8   :  { %4916 = vmatprep.subr.bf16.mxu1 %v5104_v44  ;;  %4970 = vset.pattern.permute.xlu0 %v5105_v2 }
0x1bfb   :  { %4918 = vmatpush1.bf16.msra.mxu1 %v5463_v50  ;;  %v3728_v50 = vld [vmem:[#allocation2 + $0x1698] sm:$0xff] }
0x1bfc   :  { %4919 = vmatprep.subr.bf16.mxu1 %v5104_v44  ;;  %v4865_v53 = vpack.c.bf16 %v3728_v50, %v3726_v37 }
0x1bfe   :  { %4866 = vmatprep.subr.bf16.mxu0 %v4865_v53 }
0x1bff   :  { %4921 = vmatpush1.bf16.msra.mxu1 %v5473_v54  ;;  %v3727_v54 = vld [vmem:[#allocation2 + $0x1690] sm:$0xff] }
0x1c00   :  { %4922 = vmatprep.subr.bf16.mxu1 %v5104_v44 }
0x1c03   :  { %4924 = vmatpush1.bf16.msra.mxu1 %v5483_v59  ;;  %v4867_v59 = vpack.c.bf16 %v3727_v54, %v3725_v21 }
0x1c04   :  { %4925 = vmatprep.subr.bf16.mxu1 %v5104_v44 }
0x1c05   :  { %4868 = vmatpush1.bf16.msra.mxu0 %v4867_v59 }
0x1c06   :  { %4870 = vmatprep.subr.bf16.mxu0 %v4869_v60 }
0x1c07   :  { %4927 = vmatpush1.bf16.msra.mxu1 %v5494_v1  ;;  %v3731_v1 = vld [vmem:[#allocation2 + $0x16b0] sm:$0xff] }
0x1c08   :  { %4928 = vmatprep.subr.bf16.mxu1 %v5104_v44 }
0x1c0b   :  { %4930 = vmatpush1.bf16.msra.mxu1 %v5504_v23  ;;  %v4871_v23 = vpack.c.bf16 %v3731_v1, %v3729_v0 }
0x1c0c   :  { %4931 = vmatprep.subr.bf16.mxu1 %v5104_v44 }
0x1c0d   :  { %4872 = vmatpush1.bf16.msra.mxu0 %v4871_v23  ;;  %v3760_v23 = vld [vmem:[#allocation2 + $0x1798] sm:$0xff] }
0x1c0f   :  { %4933 = vmatpush1.bf16.msra.mxu1 %v5514_v22  ;;  %v3738_v22 = vld [vmem:[#allocation2 + $0x16e8] sm:$0xff] }
0x1c10   :  { %4934 = vmatprep.subr.bf16.mxu1 %v5104_v44 }
0x1c13   :  { %4936 = vmatpush1.bf16.msra.mxu1 %v5524_v4  ;;  %v4877_v4 = vpack.c.bf16 %v3740_v6, %v3738_v22  ;;  %v4899_v22 = vpack.c.bf16 %v3759_v61, %v3757_v52  ;;  %v3762_v6 = vld [vmem:[#allocation2 + $0x17a8] sm:$0xff] }
0x1c14   :  { %4937 = vmatprep.subr.bf16.mxu1 %v5104_v44 }
0x1c17   :  { %4939 = vmatpush1.bf16.msra.mxu1 %v5534_v9  ;;  %v3742_v9 = vld [vmem:[#allocation2 + $0x1708] sm:$0xff] }
0x1c18   :  { %4940 = vmatprep.subr.bf16.mxu1 %v5104_v44 }
0x1c1b   :  { %4942 = vmatpush1.bf16.msra.mxu1 %v5544_v11  ;;  %v4881_v11 = vpack.c.bf16 %v3744_v63, %v3742_v9  ;;  %v4903_v9 = vpack.c.bf16 %v3763_v8, %v3761_v7  ;;  %v3766_v63 = vld [vmem:[#allocation2 + $0x17c8] sm:$0xff] }
0x1c1c   :  { %4943 = vmatprep.subr.bf16.mxu1 %v5104_v44 }
0x1c1f   :  { %4945 = vmatpush1.bf16.msra.mxu1 %v4860_v14  ;;  %v3746_v14 = vld [vmem:[#allocation2 + $0x1728] sm:$0xff] }
0x1c20   :  { %4946 = vmatprep.subr.bf16.mxu1 %v5104_v44  ;;  %v4873_v44 = vpack.c.bf16 %v3736_v5, %v3734_v3  ;;  %v3758_v5 = vld [vmem:[#allocation2 + $0x1788] sm:$0xff] }
0x1c22   :  { %4874 = vmatprep.subr.bf16.mxu0 %v4873_v44  ;;  %v4897_v44 = vpack.c.bf16 %v3760_v23, %v3758_v5 }
0x1c23   :  { %4948 = vmatpush1.bf16.msra.mxu1 %v4863_v17  ;;  %4876 = vmatpush1.bf16.msra.mxu0 %v4875_v18  ;;  %v4885_v17 = vpack.c.bf16 %v3748_v15, %v3746_v14  ;;  %v3764_v18 = vld [vmem:[#allocation2 + $0x17b8] sm:$0xff]  ;;  %v4907_v14 = vpack.c.bf16 %v3767_v13, %v3765_v12  ;;  %v3770_v15 = vld [vmem:[#allocation2 + $0x17e8] sm:$0xff] }
0x1c24   :  { %4878 = vmatprep.subr.bf16.mxu0 %v4877_v4  ;;  %v4901_v4 = vpack.c.bf16 %v3764_v18, %v3762_v6 }
0x1c27   :  { %4880 = vmatpush1.bf16.msra.mxu0 %v4879_v10  ;;  %v3768_v10 = vld [vmem:[#allocation2 + $0x17d8] sm:$0xff] }
0x1c28   :  { %4882 = vmatprep.subr.bf16.mxu0 %v4881_v11  ;;  %v4905_v11 = vpack.c.bf16 %v3768_v10, %v3766_v63 }
0x1c2b   :  { %4884 = vmatpush1.bf16.msra.mxu0 %v4883_v16  ;;  %v3772_v16 = vld [vmem:[#allocation2 + $0x17f8] sm:$0xff] }
0x1c2c   :  { %4886 = vmatprep.subr.bf16.mxu0 %v4885_v17  ;;  %v4909_v17 = vpack.c.bf16 %v3772_v16, %v3770_v15 }
0x1c2f   :  { %4888 = vmatpush1.bf16.msra.mxu0 %v4887_v56 }
0x1c30   :  { %4890 = vmatprep.subr.bf16.mxu0 %v4889_v27 }
0x1c33   :  { %4892 = vmatpush1.bf16.msra.mxu0 %v4891_v46 }
0x1c34   :  { %4894 = vmatprep.subr.bf16.mxu0 %v4893_v32 }
0x1c37   :  { %4896 = vmatpush1.bf16.msra.mxu0 %v4895_v36 }
0x1c38   :  { %4898 = vmatprep.subr.bf16.mxu0 %v4897_v44 }
0x1c3b   :  { %4900 = vmatpush1.bf16.msra.mxu0 %v4899_v22 }
0x1c3c   :  { %4902 = vmatprep.subr.bf16.mxu0 %v4901_v4 }
0x1c3f   :  { %4904 = vmatpush1.bf16.msra.mxu0 %v4903_v9 }
0x1c40   :  { %4906 = vmatprep.subr.bf16.mxu0 %v4905_v11 }
0x1c43   :  { %4908 = vmatpush1.bf16.msra.mxu0 %v4907_v14 }
0x1c44   :  { %4910 = vmatprep.subr.bf16.mxu0 %v4909_v17 }
0x1c47   :  { %4912 = vmatpush1.bf16.msra.mxu0 %v4911_v24 }
0x1cc9   :  { %v3673_v38 = vpop.f32.mrb[26].mxu1 }
0x1cca   :  { %v3683_v39 = vadd.f32 %v3681_v62, %v3673_v38  ;;  %v3675_v42 = vpop.f32.mrb[27].mxu1 }
0x1ccc   :  { %v3685_v40 = vsel %vm3684_vm3, %v3683_v39, -inf }
0x1ccd   :  { %v3686_v43 = vrot.slane %v3685_v40, 4 }
0x1ccf   :  { %v3687_v26 = vmax.f32 %v3685_v40, %v3686_v43 }
0x1cd1   :  { %v3688_v35 = vrot.slane %v3687_v26, 2 }
0x1cd3   :  { %v3689_v45 = vmax.f32 %v3687_v26, %v3688_v35 }
0x1cd5   :  { %v3690_v25 = vrot.slane %v3689_v45, 1 }
0x1cd7   :  { %v3691_v2 = vmax.f32 %v3689_v45, %v3690_v25 }
0x1cd9   :  { %v3692_v37 = vsub.f32 %v3683_v39, %v3691_v2 }
0x1cdb   :  { %v3693_v50 = vmul.f32 1.442695, %v3692_v37 }
0x1cdd   :  { %5015 = vpow2.f32 %v3693_v50 }
0x1ce7   :  { %v5016_v21 = vpop.eup %5015 }
0x1ce8   :  { %v3695_v53 = vsel %vm3684_vm3, %v5016_v21, 0.0 }
0x1ce9   :  { %v3696_v54 = vrot.slane %v3695_v53, 4 }
0x1ceb   :  { %v3697_v55 = vadd.f32 %v3696_v54, %v3695_v53 }
0x1ced   :  { %v3698_v58 = vrot.slane %v3697_v55, 2 }
0x1cef   :  { %v3699_v59 = vadd.f32 %v3698_v58, %v3697_v55 }
0x1cf1   :  { %v3700_v60 = vrot.slane %v3699_v59, 1 }
0x1cf3   :  { %v3701_v0 = vadd.f32 %v3700_v60, %v3699_v59 }
0x1cf5   :  { %5017 = vrcp.f32 %v3701_v0 }
0x1cff   :  { %v5018_v1 = vpop.eup %5017 }
0x1d00   :  { %v3703_v3 = vmul.f32 %v5018_v1, %v5016_v21 }
0x1d02   :  { %3706 = vperm.xlu0 %4970, %v3703_v3  }
0x1d81   :  { %v3707_v57 = vpop.permute.xlu0 %3706 }
0x1d82   :  { %v3709_v56 = vmul.f32 %v3707_v57, %v5446_v49  ;;  %v3710_v27 = vmul.f32 %v3707_v57, %v5444_v48  ;;  %v3774_v49 = vld [vmem:[#allocation5 + $0x6] sm:$0x3] }
0x1d83   :  { %v3779_v48 = vrot.slane %v3774_v49, %v5169_v31  ;;  %v3783_v40 = vrot.slane %v3774_v49, %v5171_v33 }
0x1d84   :  { %v3711_v51 = vrot.slane %v3709_v56, 4  ;;  %v3717_v28 = vsel %vm110_vm0, %v3710_v27, 0.0 }
0x1d85   :  { %v3718_v29 = vrot.slane %v3717_v28, 4 }
0x1d86   :  { %v3712_v30 = vadd.f32 %v3711_v51, %v3709_v56 }
0x1d87   :  { %v3719_v46 = vadd.f32 %v3718_v29, %v3717_v28 }
0x1d88   :  { %v3713_v32 = vrot.slane %v3712_v30, 2 }
0x1d89   :  { %v3720_v34 = vrot.slane %v3719_v46, 2 }
0x1d8a   :  { %v3714_v47 = vadd.f32 %v3713_v32, %v3712_v30 }
0x1d8b   :  { %v3721_v36 = vadd.f32 %v3720_v34, %v3719_v46 }
0x1d8c   :  { %v3715_v62 = vrot.slane %v3714_v47, 1 }
0x1d8d   :  { %v3722_v38 = vrot.slane %v3721_v36, 1 }
0x1d8e   :  { %v3716_v42 = vadd.f32 %v3715_v62, %v3714_v47 }
0x1d8f   :  { %v3723_v39 = vadd.f32 %v3722_v38, %v3721_v36 }
0x1d91   :  { %4023 = vmatprep.mubr.msk.f32.mxu0 %vm110_vm0, %v3723_v39 }
0x1d92   :  { %3854 = vmatmul.mubr.f32.vlgmr.msra.gmra.mrb[28].mxu0 %v3716_v42 }
0x1e65   :  { %v3855_v43 = vpop.f32.mrb[28].mxu0 }
0x1e66   :  { %v3856_v26 = vadd.f32 %v3855_v43, %v3779_v48  ;;  %v3857_v35 = vpop.f32.mrb[29].mxu0 }
0x1e67   :  { %v3858_v45 = vadd.f32 %v3857_v35, %v3783_v40 }
0x1e68   :  { %v3860_v2 = vmax.f32 %v3856_v26, 0.0 }
0x1e69   :  { %v3861_v25 = vmax.f32 %v3858_v45, 0.0 }
0x1e6b   :  { %4024 = vmatprep.mubr.msk.f32.mxu1 %vm110_vm0, %v3861_v25 }
0x1e6c   :  { %3930 = vmatmul.mubr.f32.vlgmr.msra.gmra.mrb[28].mxu1 %v3860_v2 }
0x1f3f   :  { %v3931_v37 = vpop.f32.mrb[28].mxu1 }
0x1f40   :  { %v3935_v50 = vadd.f32 %v3931_v37, %v5588_v41  ;;  %v3933_v21 = vpop.f32.mrb[29].mxu1 }
0x1f42   :  { %v3943_v53 = vsel %vm3942_vm4, %v3935_v50, -inf }
0x1f43   :  { %3944 = vmax.xlane.f32.xlu1 %v3943_v53 }
0x1fd0   :  { %v3945_v54 = vpop.xlane.xlu1 %3944 }
0x1fd1   :  { %v3946_v31 = vsub.f32 %v3935_v50, %v3945_v54 }
0x1fd3   :  { %v3947_v55 = vmul.f32 1.442695, %v3946_v31 }
0x1fd5   :  { %5019 = vpow2.f32 %v3947_v55 }
0x1fdf   :  { %v5020_v33 = vpop.eup %5019 }
0x1fe0   :  { %3950 = vrot.lane.b32.xlu1 %v5020_v33, %s5106_s3 }
0x2052   :  { %v3951_v58 = vpop.permute.xlu1 %3950 }
0x2053   :  { %v3953_v59 = vsel %vm3940_vm5, %v3951_v58, 0.0 }
0x2054   :  { %3954 = vadd.xlane.f32.xlu0 %v3953_v59 }
0x20e1   :  { %v3955_v60 = vpop.xlane.xlu0 %3954 }
0x20e2   :  { %5021 = vrcp.f32 %v3955_v60 }
0x20ec   :  { %v5022_v0 = vpop.eup %5021 }
0x20ed   :  { %v3957_v1 = vmul.f32 %v5022_v0, %v5020_v33 }
0x20ef   :  { %3959 = vrot.lane.b32.xlu1 %v3957_v1, %s5106_s3 }
0x20f3   :  { %3937 = vrot.lane.b32.xlu1 %v3935_v50, %s5106_s3 }
0x2161   :  { %v3960_v41 = vpop.permute.xlu1 %3959 }
0x2162   :  { %3962 = vst.msk [vmem:[#allocation7] sm:$0x1] %vm3940_vm5, %v3960_v41 }
0x2163   :  { %5078 = shalt.err (!%p5075_p6)
}
0x2164   :  { %s5079_s22 = scalar_lea.hbm %s5623_s5, 16 }
0x2165   :  { %p5080_p7 = scmp.ne.s32.totalorder %s5623_s5, %s5079_s22  ;;  %p5083_p8 = scmp.lt.u32.totalorder %s5079_s22, %s5623_s5 }
0x2167   :  { %p5085_p9 = pnand %p5083_p8, %p5080_p7 }
0x2169   :  { %5088 = shalt.err (!%p5085_p9)
}
0x216a   :  { %3974 = dma.vmem_to_hbm [thread:$0]  %s3972_s18, 16, %s5623_s5, [#allocation4]   ;;  %v3938_v3 = vpop.permute.xlu1 %3937 }
0x216b   :  { %3941 = vst.msk [vmem:[%s5622_s4] sm:$0x1] %vm3940_vm5, %v3938_v3 }
0x216c   :  { %5093 = dma.done.wait [#allocation4], 16  }
0x216d   :  { %5094 = vsyncadd [#allocation4], 4294967280 }
0x216e   :  { %3980 = vsyncpa [#allocation3], 1 }
0x216f   :  { %3981 = vsyncpa [#allocation6], 1 }
0x2170   :  { %3982 = vsyncpa [#allocation4], 1 }

</bundles_post_ra>
